<compile_context>
chip_gen: v7x
topology: tpu7x:2x2x1
jax: 0.10.0
libtpu: 0.0.40
codegen_flags: <defaults>
</compile_context>

<pallas_src>
import functools

import jax
import jax.numpy as jnp
from jax.experimental import pallas as pl
from jax.experimental.pallas import tpu as pltpu

OMEGA = 0.95          # haze weight hard-coded in the reference forward()
DARK_RADIUS = 7       # DehazeFilter(r=7) default
GUIDED_RADIUS = 60    # GuidedFilter(60, 0.0001) hard-coded in forward()
GUIDED_EPS = 1e-4


# ---------------------------------------------------------------------------
# helpers used inside the kernel bodies (operate on traced jnp values)
# ---------------------------------------------------------------------------

def _sliding_min(m, window, axis):
    """Min over `window` consecutive elements along `axis` (log-depth doubling).
    Input length L along `axis` -> output length L - window + 1."""
    covered = 1
    while covered < window:
        step = min(covered, window - covered)
        if axis == 0:
            m = jnp.minimum(m[: m.shape[0] - step, :], m[step:, :])
        else:
            m = jnp.minimum(m[:, : m.shape[1] - step], m[:, step:])
        covered += step
    return m


def _min_filter(dc, r):
    """(2r+1)x(2r+1) min filter, window clipped at the image border
    (== MaxPool2d(2r+1, stride=1, padding=r) of -x, negated; pad = +inf)."""
    h, w = dc.shape
    pad_rows = jnp.full((r, w), jnp.inf, jnp.float32)
    m = jnp.concatenate([pad_rows, dc, pad_rows], axis=0)     # (h + 2r, w)
    m = _sliding_min(m, 2 * r + 1, axis=0)                    # (h, w)
    pad_cols = jnp.full((h, r), jnp.inf, jnp.float32)
    m = jnp.concatenate([pad_cols, m, pad_cols], axis=1)      # (h, w + 2r)
    return _sliding_min(m, 2 * r + 1, axis=1)                 # (h, w)


def _band_matrix(n, r):
    """B[i, j] = 1 if |i - j| <= r else 0.  B_H @ M @ B_W is exactly the
    border-clipped box sum used by GuidedFilter.box_sum (cumsum variant)."""
    i = jax.lax.broadcasted_iota(jnp.int32, (n, n), 0)
    j = jax.lax.broadcasted_iota(jnp.int32, (n, n), 1)
    d = i - j
    return ((d <= r) & (d >= -r)).astype(jnp.float32)


# ---------------------------------------------------------------------------
# kernel 1: dark channel of the hazy image
# ---------------------------------------------------------------------------

def _dark_channel_kernel(x_ref, dc_ref, *, radius):
    dc = jnp.minimum(jnp.minimum(x_ref[0], x_ref[1]), x_ref[2])
    dc_ref[...] = _min_filter(dc, radius)


# ---------------------------------------------------------------------------
# kernel 2: fused transmission estimate + guided filter + dehaze transform
# ---------------------------------------------------------------------------

def _dehaze_kernel(a_ref, x_ref, dc_ref, y_ref, *, guided_radius, guided_eps,
                   omega):
    A = a_ref[0]                                     # scalar atmospheric light
    c0, c1, c2 = x_ref[0], x_ref[1], x_ref[2]
    H, W = c0.shape

    # t = 1 - omega * dark_channel(x / A).  Since a_r == a_g == a_b == A > 0,
    # the channel-min and the border-clipped min filter both commute exactly
    # with division by A, so dark_channel(x / A) == dark_channel(x) / A and we
    # reuse the dark channel computed by kernel 1 (saves a 15x15 min filter).
    t = 1.0 - omega * (dc_ref[...] / A)              # same for all 3 channels

    # GuidedFilter(guided_radius, guided_eps) with guide i = x, p = t.
    # Clipped box sums as band-matrix matmuls -> MXU work, no padding copies.
    band_h = _band_matrix(H, guided_radius)
    band_w = _band_matrix(W, guided_radius)

    def box(m):
        mw = jnp.dot(m, band_w, preferred_element_type=jnp.float32)
        return jnp.dot(band_h, mw, preferred_element_type=jnp.float32)

    inv_n = 1.0 / box(jnp.ones((H, W), jnp.float32))  # per-pixel window count
    mean_p = box(t) * inv_n                           # identical for every ch.

    for c, xc in enumerate((c0, c1, c2)):
        mean_i = box(xc) * inv_n
        mean_pi = box(t * xc) * inv_n
        mean_ii = box(xc * xc) * inv_n
        cov_ip = mean_pi - mean_p * mean_i
        cov_ii = mean_ii - mean_i * mean_i
        a = cov_ip / (cov_ii + guided_eps)
        b = mean_p - a * mean_i
        q = jnp.clip(a * xc + b, 0.0, 1.0)           # q.clamp_(0, 1)
        rt = jnp.maximum(q, 0.1)                     # refined_t.clamp_(min=.1)
        y_ref[c] = jnp.clip((xc - A) / rt + A, 0.0, 1.0)


# ---------------------------------------------------------------------------
# wrapper
# ---------------------------------------------------------------------------

@functools.partial(jax.jit, static_argnames=("dark_radius",))
def dehaze_filter(x, *, dark_radius=DARK_RADIUS):
    """Forward pass of DehazeFilter. x: (1, 3, H, W) float32, values in [0,1]."""
    b, c, H, W = x.shape
    assert b == 1 and c == 3, "reference module operates on a single RGB image"
    assert 2 * GUIDED_RADIUS + 1 <= H and 2 * GUIDED_RADIUS + 1 <= W
    xi = x[0].astype(jnp.float32)                    # (3, H, W)

    vmem = pl.BlockSpec(memory_space=pltpu.MemorySpace.VMEM)
    smem = pl.BlockSpec(memory_space=pltpu.MemorySpace.SMEM)

    # --- dark channel of the hazy image (Pallas) ---------------------------
    dc = pl.pallas_call(
        functools.partial(_dark_channel_kernel, radius=dark_radius),
        out_shape=jax.ShapeDtypeStruct((H, W), jnp.float32),
        in_specs=[vmem],
        out_specs=vmem,
    )(xi)

    # --- atmospheric light (scalar glue) -----------------------------------
    # TODO(synk): the global descending sort / top-k threshold has no clean
    # Pallas equivalent; this tiny scalar stage stays in XLA.
    index = (H * W) // 1000
    thres = jax.lax.top_k(dc.reshape(-1), index + 1)[0][index]
    mask = dc >= thres
    cnt = jnp.sum(mask.astype(jnp.float32))
    a0 = jnp.sum(jnp.where(mask, xi[0], 0.0)) / cnt
    a1 = jnp.sum(jnp.where(mask, xi[1], 0.0)) / cnt
    a2 = jnp.sum(jnp.where(mask, xi[2], 0.0)) / cnt
    avg = 0.299 * a0 + 0.587 * a1 + 0.114 * a2       # a_r == a_g == a_b == avg

    # --- fused transmission + guided filter + dehaze (Pallas) --------------
    y = pl.pallas_call(
        functools.partial(_dehaze_kernel, guided_radius=GUIDED_RADIUS,
                          guided_eps=GUIDED_EPS, omega=OMEGA),
        out_shape=jax.ShapeDtypeStruct((3, H, W), jnp.float32),
        in_specs=[smem, vmem, vmem],
        out_specs=vmem,
    )(jnp.reshape(avg, (1,)), xi, dc)

    return y[None].astype(x.dtype)


if __name__ == "__main__":
    key = jax.random.PRNGKey(0)
    # Single hazy RGB image in [0, 1]. H = W = 128 is the smallest natural
    # size: the reference GuidedFilter(60) box_sum requires 2*60+1 <= H, W.
    x = jax.random.uniform(key, (1, 3, 128, 128), dtype=jnp.float32)
    y = dehaze_filter(x)
    jax.block_until_ready(y)
    assert y.shape == (1, 3, 128, 128) and y.dtype == jnp.float32
    assert bool(jnp.all(jnp.isfinite(y)))
    assert bool(jnp.all((y >= 0.0) & (y <= 1.0)))
    print("KERNEL_OK")
</pallas_src>

<mosaic_0001>
module attributes {stable_mosaic.version = 11 : i64} {
  func.func @_dark_channel_kernel(%arg0: memref<3x128x128xf32, #tpu.memory_space<vmem>>, %arg1: memref<128x128xf32, #tpu.memory_space<vmem>>) attributes {dimension_semantics = [], scalar_prefetch = 0 : i64, scratch_operands = 0 : i64, tpu.core_type = #tpu.core_type<tc>} {
    %c0 = arith.constant 0 : index
    %c0_0 = arith.constant 0 : index
    %c0_1 = arith.constant 0 : index
    %0 = vector.load %arg0[%c0, %c0_0, %c0_1] : memref<3x128x128xf32, #tpu.memory_space<vmem>>, vector<1x128x128xf32>
    %1 = vector.shape_cast %0 : vector<1x128x128xf32> to vector<128x128xf32>
    %c1 = arith.constant 1 : index
    %c0_2 = arith.constant 0 : index
    %c0_3 = arith.constant 0 : index
    %2 = vector.load %arg0[%c1, %c0_2, %c0_3] : memref<3x128x128xf32, #tpu.memory_space<vmem>>, vector<1x128x128xf32>
    %3 = vector.shape_cast %2 : vector<1x128x128xf32> to vector<128x128xf32>
    %4 = arith.minimumf %1, %3 : vector<128x128xf32>
    %c2 = arith.constant 2 : index
    %c0_4 = arith.constant 0 : index
    %c0_5 = arith.constant 0 : index
    %5 = vector.load %arg0[%c2, %c0_4, %c0_5] : memref<3x128x128xf32, #tpu.memory_space<vmem>>, vector<1x128x128xf32>
    %6 = vector.shape_cast %5 : vector<1x128x128xf32> to vector<128x128xf32>
    %7 = arith.minimumf %4, %6 : vector<128x128xf32>
    %cst = arith.constant 0x7F800000 : f32
    %8 = vector.broadcast %cst : f32 to vector<7x128xf32>
    %9 = tpu.concatenate %8, %7, %8 in 0 : vector<7x128xf32>, vector<128x128xf32>, vector<7x128xf32> -> vector<142x128xf32>
    %10 = vector.extract_strided_slice %9 {offsets = [0, 0], sizes = [141, 128], strides = [1, 1]} : vector<142x128xf32> to vector<141x128xf32>
    %11 = vector.extract_strided_slice %9 {offsets = [1, 0], sizes = [141, 128], strides = [1, 1]} : vector<142x128xf32> to vector<141x128xf32>
    %12 = arith.minimumf %10, %11 : vector<141x128xf32>
    %13 = vector.extract_strided_slice %12 {offsets = [0, 0], sizes = [139, 128], strides = [1, 1]} : vector<141x128xf32> to vector<139x128xf32>
    %14 = vector.extract_strided_slice %12 {offsets = [2, 0], sizes = [139, 128], strides = [1, 1]} : vector<141x128xf32> to vector<139x128xf32>
    %15 = arith.minimumf %13, %14 : vector<139x128xf32>
    %16 = vector.extract_strided_slice %15 {offsets = [0, 0], sizes = [135, 128], strides = [1, 1]} : vector<139x128xf32> to vector<135x128xf32>
    %17 = vector.extract_strided_slice %15 {offsets = [4, 0], sizes = [135, 128], strides = [1, 1]} : vector<139x128xf32> to vector<135x128xf32>
    %18 = arith.minimumf %16, %17 : vector<135x128xf32>
    %19 = vector.extract_strided_slice %18 {offsets = [0, 0], sizes = [128, 128], strides = [1, 1]} : vector<135x128xf32> to vector<128x128xf32>
    %20 = vector.extract_strided_slice %18 {offsets = [7, 0], sizes = [128, 128], strides = [1, 1]} : vector<135x128xf32> to vector<128x128xf32>
    %21 = arith.minimumf %19, %20 : vector<128x128xf32>
    %cst_6 = arith.constant 0x7F800000 : f32
    %22 = vector.broadcast %cst_6 : f32 to vector<128x7xf32>
    %23 = tpu.concatenate %22, %21, %22 in 1 : vector<128x7xf32>, vector<128x128xf32>, vector<128x7xf32> -> vector<128x142xf32>
    %24 = vector.extract_strided_slice %23 {offsets = [0, 0], sizes = [128, 141], strides = [1, 1]} : vector<128x142xf32> to vector<128x141xf32>
    %25 = vector.extract_strided_slice %23 {offsets = [0, 1], sizes = [128, 141], strides = [1, 1]} : vector<128x142xf32> to vector<128x141xf32>
    %26 = arith.minimumf %24, %25 : vector<128x141xf32>
    %27 = vector.extract_strided_slice %26 {offsets = [0, 0], sizes = [128, 139], strides = [1, 1]} : vector<128x141xf32> to vector<128x139xf32>
    %28 = vector.extract_strided_slice %26 {offsets = [0, 2], sizes = [128, 139], strides = [1, 1]} : vector<128x141xf32> to vector<128x139xf32>
    %29 = arith.minimumf %27, %28 : vector<128x139xf32>
    %30 = vector.extract_strided_slice %29 {offsets = [0, 0], sizes = [128, 135], strides = [1, 1]} : vector<128x139xf32> to vector<128x135xf32>
    %31 = vector.extract_strided_slice %29 {offsets = [0, 4], sizes = [128, 135], strides = [1, 1]} : vector<128x139xf32> to vector<128x135xf32>
    %32 = arith.minimumf %30, %31 : vector<128x135xf32>
    %33 = vector.extract_strided_slice %32 {offsets = [0, 0], sizes = [128, 128], strides = [1, 1]} : vector<128x135xf32> to vector<128x128xf32>
    %34 = vector.extract_strided_slice %32 {offsets = [0, 7], sizes = [128, 128], strides = [1, 1]} : vector<128x135xf32> to vector<128x128xf32>
    %35 = arith.minimumf %33, %34 : vector<128x128xf32>
    %c0_7 = arith.constant 0 : index
    %c0_8 = arith.constant 0 : index
    %36 = vector.load %arg1[%c0_7, %c0_8] : memref<128x128xf32, #tpu.memory_space<vmem>>, vector<128x128xf32>
    tpu.vector_store %arg1[%c0_7, %c0_8], %35 {strides = array<i32>} : memref<128x128xf32, #tpu.memory_space<vmem>>, vector<128x128xf32>,
    return
  }
}

module attributes {stable_mosaic.version = 11 : i64} {
  func.func @_dehaze_kernel(%arg0: memref<1xf32, #tpu.memory_space<smem>>, %arg1: memref<3x128x128xf32, #tpu.memory_space<vmem>>, %arg2: memref<128x128xf32, #tpu.memory_space<vmem>>, %arg3: memref<3x128x128xf32, #tpu.memory_space<vmem>>) attributes {dimension_semantics = [], scalar_prefetch = 0 : i64, scratch_operands = 0 : i64, tpu.core_type = #tpu.core_type<tc>} {
    %c0 = arith.constant 0 : index
    %0 = memref.load %arg0[%c0] : memref<1xf32, #tpu.memory_space<smem>>
    %c0_0 = arith.constant 0 : index
    %c0_1 = arith.constant 0 : index
    %c0_2 = arith.constant 0 : index
    %1 = vector.load %arg1[%c0_0, %c0_1, %c0_2] : memref<3x128x128xf32, #tpu.memory_space<vmem>>, vector<1x128x128xf32>
    %2 = vector.shape_cast %1 : vector<1x128x128xf32> to vector<128x128xf32>
    %c1 = arith.constant 1 : index
    %c0_3 = arith.constant 0 : index
    %c0_4 = arith.constant 0 : index
    %3 = vector.load %arg1[%c1, %c0_3, %c0_4] : memref<3x128x128xf32, #tpu.memory_space<vmem>>, vector<1x128x128xf32>
    %4 = vector.shape_cast %3 : vector<1x128x128xf32> to vector<128x128xf32>
    %c2 = arith.constant 2 : index
    %c0_5 = arith.constant 0 : index
    %c0_6 = arith.constant 0 : index
    %5 = vector.load %arg1[%c2, %c0_5, %c0_6] : memref<3x128x128xf32, #tpu.memory_space<vmem>>, vector<1x128x128xf32>
    %6 = vector.shape_cast %5 : vector<1x128x128xf32> to vector<128x128xf32>
    %c0_7 = arith.constant 0 : index
    %c0_8 = arith.constant 0 : index
    %7 = vector.load %arg2[%c0_7, %c0_8] : memref<128x128xf32, #tpu.memory_space<vmem>>, vector<128x128xf32>
    %8 = vector.broadcast %0 : f32 to vector<128x128xf32>
    %9 = arith.divf %7, %8 : vector<128x128xf32>
    %cst = arith.constant 0.949999988 : f32
    %10 = vector.broadcast %cst : f32 to vector<128x128xf32>
    %11 = arith.mulf %10, %9 : vector<128x128xf32>
    %cst_9 = arith.constant 1.000000e+00 : f32
    %12 = vector.broadcast %cst_9 : f32 to vector<128x128xf32>
    %13 = arith.subf %12, %11 : vector<128x128xf32>
    %14 = tpu.iota {dimensions = array<i32: 0>} : vector<128x128xi32>
    %15 = tpu.iota {dimensions = array<i32: 1>} : vector<128x128xi32>
    %16 = arith.subi %14, %15 : vector<128x128xi32>
    %c60_i32 = arith.constant 60 : i32
    %17 = vector.broadcast %c60_i32 : i32 to vector<128x128xi32>
    %18 = arith.cmpi sle, %16, %17 : vector<128x128xi32>
    %c-60_i32 = arith.constant -60 : i32
    %19 = vector.broadcast %c-60_i32 : i32 to vector<128x128xi32>
    %20 = arith.cmpi sge, %16, %19 : vector<128x128xi32>
    %21 = arith.andi %18, %20 : vector<128x128xi1>
    %22 = arith.extui %21 : vector<128x128xi1> to vector<128x128xi32>
    %23 = arith.sitofp %22 : vector<128x128xi32> to vector<128x128xf32>
    %24 = tpu.iota {dimensions = array<i32: 0>} : vector<128x128xi32>
    %25 = tpu.iota {dimensions = array<i32: 1>} : vector<128x128xi32>
    %26 = arith.subi %24, %25 : vector<128x128xi32>
    %c60_i32_10 = arith.constant 60 : i32
    %27 = vector.broadcast %c60_i32_10 : i32 to vector<128x128xi32>
    %28 = arith.cmpi sle, %26, %27 : vector<128x128xi32>
    %c-60_i32_11 = arith.constant -60 : i32
    %29 = vector.broadcast %c-60_i32_11 : i32 to vector<128x128xi32>
    %30 = arith.cmpi sge, %26, %29 : vector<128x128xi32>
    %31 = arith.andi %28, %30 : vector<128x128xi1>
    %32 = arith.extui %31 : vector<128x128xi1> to vector<128x128xi32>
    %33 = arith.sitofp %32 : vector<128x128xi32> to vector<128x128xf32>
    %cst_12 = arith.constant 1.000000e+00 : f32
    %34 = vector.broadcast %cst_12 : f32 to vector<128x128xf32>
    %cst_13 = arith.constant dense<0.000000e+00> : vector<128x128xf32>
    %35 = tpu.matmul %34, %33, %cst_13 {dimension_numbers = #tpu.dot_dimension_numbers<[1], [0], [0], [1], [0, 0, 1, 1], [], []>} : vector<128x128xf32>, vector<128x128xf32>, vector<128x128xf32> -> vector<128x128xf32>
    %cst_14 = arith.constant dense<0.000000e+00> : vector<128x128xf32>
    %36 = tpu.matmul %23, %35, %cst_14 {dimension_numbers = #tpu.dot_dimension_numbers<[1], [0], [0], [1], [0, 0, 1, 1], [], []>} : vector<128x128xf32>, vector<128x128xf32>, vector<128x128xf32> -> vector<128x128xf32>
    %cst_15 = arith.constant 1.000000e+00 : f32
    %37 = vector.broadcast %cst_15 : f32 to vector<128x128xf32>
    %38 = arith.divf %37, %36 : vector<128x128xf32>
    %cst_16 = arith.constant dense<0.000000e+00> : vector<128x128xf32>
    %39 = tpu.matmul %13, %33, %cst_16 {dimension_numbers = #tpu.dot_dimension_numbers<[1], [0], [0], [1], [0, 0, 1, 1], [], []>} : vector<128x128xf32>, vector<128x128xf32>, vector<128x128xf32> -> vector<128x128xf32>
    %cst_17 = arith.constant dense<0.000000e+00> : vector<128x128xf32>
    %40 = tpu.matmul %23, %39, %cst_17 {dimension_numbers = #tpu.dot_dimension_numbers<[1], [0], [0], [1], [0, 0, 1, 1], [], []>} : vector<128x128xf32>, vector<128x128xf32>, vector<128x128xf32> -> vector<128x128xf32>
    %41 = arith.mulf %40, %38 : vector<128x128xf32>
    %cst_18 = arith.constant dense<0.000000e+00> : vector<128x128xf32>
    %42 = tpu.matmul %2, %33, %cst_18 {dimension_numbers = #tpu.dot_dimension_numbers<[1], [0], [0], [1], [0, 0, 1, 1], [], []>} : vector<128x128xf32>, vector<128x128xf32>, vector<128x128xf32> -> vector<128x128xf32>
    %cst_19 = arith.constant dense<0.000000e+00> : vector<128x128xf32>
    %43 = tpu.matmul %23, %42, %cst_19 {dimension_numbers = #tpu.dot_dimension_numbers<[1], [0], [0], [1], [0, 0, 1, 1], [], []>} : vector<128x128xf32>, vector<128x128xf32>, vector<128x128xf32> -> vector<128x128xf32>
    %44 = arith.mulf %43, %38 : vector<128x128xf32>
    %45 = arith.mulf %13, %2 : vector<128x128xf32>
    %cst_20 = arith.constant dense<0.000000e+00> : vector<128x128xf32>
    %46 = tpu.matmul %45, %33, %cst_20 {dimension_numbers = #tpu.dot_dimension_numbers<[1], [0], [0], [1], [0, 0, 1, 1], [], []>} : vector<128x128xf32>, vector<128x128xf32>, vector<128x128xf32> -> vector<128x128xf32>
    %cst_21 = arith.constant dense<0.000000e+00> : vector<128x128xf32>
    %47 = tpu.matmul %23, %46, %cst_21 {dimension_numbers = #tpu.dot_dimension_numbers<[1], [0], [0], [1], [0, 0, 1, 1], [], []>} : vector<128x128xf32>, vector<128x128xf32>, vector<128x128xf32> -> vector<128x128xf32>
    %48 = arith.mulf %47, %38 : vector<128x128xf32>
    %49 = arith.mulf %2, %2 : vector<128x128xf32>
    %cst_22 = arith.constant dense<0.000000e+00> : vector<128x128xf32>
    %50 = tpu.matmul %49, %33, %cst_22 {dimension_numbers = #tpu.dot_dimension_numbers<[1], [0], [0], [1], [0, 0, 1, 1], [], []>} : vector<128x128xf32>, vector<128x128xf32>, vector<128x128xf32> -> vector<128x128xf32>
    %cst_23 = arith.constant dense<0.000000e+00> : vector<128x128xf32>
    %51 = tpu.matmul %23, %50, %cst_23 {dimension_numbers = #tpu.dot_dimension_numbers<[1], [0], [0], [1], [0, 0, 1, 1], [], []>} : vector<128x128xf32>, vector<128x128xf32>, vector<128x128xf32> -> vector<128x128xf32>
    %52 = arith.mulf %51, %38 : vector<128x128xf32>
    %53 = arith.mulf %41, %44 : vector<128x128xf32>
    %54 = arith.subf %48, %53 : vector<128x128xf32>
    %55 = arith.mulf %44, %44 : vector<128x128xf32>
    %56 = arith.subf %52, %55 : vector<128x128xf32>
    %cst_24 = arith.constant 9.99999974E-5 : f32
    %57 = vector.broadcast %cst_24 : f32 to vector<128x128xf32>
    %58 = arith.addf %56, %57 : vector<128x128xf32>
    %59 = arith.divf %54, %58 : vector<128x128xf32>
    %60 = arith.mulf %59, %44 : vector<128x128xf32>
    %61 = arith.subf %41, %60 : vector<128x128xf32>
    %62 = arith.mulf %59, %2 : vector<128x128xf32>
    %63 = arith.addf %62, %61 : vector<128x128xf32>
    %cst_25 = arith.constant 0.000000e+00 : f32
    %cst_26 = arith.constant 1.000000e+00 : f32
    %64 = vector.broadcast %cst_25 : f32 to vector<128x128xf32>
    %65 = arith.maximumf %64, %63 : vector<128x128xf32>
    %66 = vector.broadcast %cst_26 : f32 to vector<128x128xf32>
    %67 = arith.minimumf %66, %65 : vector<128x128xf32>
    %cst_27 = arith.constant 1.000000e-01 : f32
    %68 = vector.broadcast %cst_27 : f32 to vector<128x128xf32>
    %69 = arith.maximumf %67, %68 : vector<128x128xf32>
    %70 = vector.broadcast %0 : f32 to vector<128x128xf32>
    %71 = arith.subf %2, %70 : vector<128x128xf32>
    %72 = arith.divf %71, %69 : vector<128x128xf32>
    %73 = vector.broadcast %0 : f32 to vector<128x128xf32>
    %74 = arith.addf %72, %73 : vector<128x128xf32>
    %cst_28 = arith.constant 0.000000e+00 : f32
    %cst_29 = arith.constant 1.000000e+00 : f32
    %75 = vector.broadcast %cst_28 : f32 to vector<128x128xf32>
    %76 = arith.maximumf %75, %74 : vector<128x128xf32>
    %77 = vector.broadcast %cst_29 : f32 to vector<128x128xf32>
    %78 = arith.minimumf %77, %76 : vector<128x128xf32>
    %c0_30 = arith.constant 0 : index
    %c0_31 = arith.constant 0 : index
    %c0_32 = arith.constant 0 : index
    %79 = vector.load %arg3[%c0_30, %c0_31, %c0_32] : memref<3x128x128xf32, #tpu.memory_space<vmem>>, vector<1x128x128xf32>
    %80 = vector.shape_cast %79 : vector<1x128x128xf32> to vector<128x128xf32>
    %81 = vector.shape_cast %78 : vector<128x128xf32> to vector<1x128x128xf32>
    tpu.vector_store %arg3[%c0_30, %c0_31, %c0_32], %81 {strides = array<i32>} : memref<3x128x128xf32, #tpu.memory_space<vmem>>, vector<1x128x128xf32>,
    %cst_33 = arith.constant dense<0.000000e+00> : vector<128x128xf32>
    %82 = tpu.matmul %4, %33, %cst_33 {dimension_numbers = #tpu.dot_dimension_numbers<[1], [0], [0], [1], [0, 0, 1, 1], [], []>} : vector<128x128xf32>, vector<128x128xf32>, vector<128x128xf32> -> vector<128x128xf32>
    %cst_34 = arith.constant dense<0.000000e+00> : vector<128x128xf32>
    %83 = tpu.matmul %23, %82, %cst_34 {dimension_numbers = #tpu.dot_dimension_numbers<[1], [0], [0], [1], [0, 0, 1, 1], [], []>} : vector<128x128xf32>, vector<128x128xf32>, vector<128x128xf32> -> vector<128x128xf32>
    %84 = arith.mulf %83, %38 : vector<128x128xf32>
    %85 = arith.mulf %13, %4 : vector<128x128xf32>
    %cst_35 = arith.constant dense<0.000000e+00> : vector<128x128xf32>
    %86 = tpu.matmul %85, %33, %cst_35 {dimension_numbers = #tpu.dot_dimension_numbers<[1], [0], [0], [1], [0, 0, 1, 1], [], []>} : vector<128x128xf32>, vector<128x128xf32>, vector<128x128xf32> -> vector<128x128xf32>
    %cst_36 = arith.constant dense<0.000000e+00> : vector<128x128xf32>
    %87 = tpu.matmul %23, %86, %cst_36 {dimension_numbers = #tpu.dot_dimension_numbers<[1], [0], [0], [1], [0, 0, 1, 1], [], []>} : vector<128x128xf32>, vector<128x128xf32>, vector<128x128xf32> -> vector<128x128xf32>
    %88 = arith.mulf %87, %38 : vector<128x128xf32>
    %89 = arith.mulf %4, %4 : vector<128x128xf32>
    %cst_37 = arith.constant dense<0.000000e+00> : vector<128x128xf32>
    %90 = tpu.matmul %89, %33, %cst_37 {dimension_numbers = #tpu.dot_dimension_numbers<[1], [0], [0], [1], [0, 0, 1, 1], [], []>} : vector<128x128xf32>, vector<128x128xf32>, vector<128x128xf32> -> vector<128x128xf32>
    %cst_38 = arith.constant dense<0.000000e+00> : vector<128x128xf32>
    %91 = tpu.matmul %23, %90, %cst_38 {dimension_numbers = #tpu.dot_dimension_numbers<[1], [0], [0], [1], [0, 0, 1, 1], [], []>} : vector<128x128xf32>, vector<128x128xf32>, vector<128x128xf32> -> vector<128x128xf32>
    %92 = arith.mulf %91, %38 : vector<128x128xf32>
    %93 = arith.mulf %41, %84 : vector<128x128xf32>
    %94 = arith.subf %88, %93 : vector<128x128xf32>
    %95 = arith.mulf %84, %84 : vector<128x128xf32>
    %96 = arith.subf %92, %95 : vector<128x128xf32>
    %cst_39 = arith.constant 9.99999974E-5 : f32
    %97 = vector.broadcast %cst_39 : f32 to vector<128x128xf32>
    %98 = arith.addf %96, %97 : vector<128x128xf32>
    %99 = arith.divf %94, %98 : vector<128x128xf32>
    %100 = arith.mulf %99, %84 : vector<128x128xf32>
    %101 = arith.subf %41, %100 : vector<128x128xf32>
    %102 = arith.mulf %99, %4 : vector<128x128xf32>
    %103 = arith.addf %102, %101 : vector<128x128xf32>
    %cst_40 = arith.constant 0.000000e+00 : f32
    %cst_41 = arith.constant 1.000000e+00 : f32
    %104 = vector.broadcast %cst_40 : f32 to vector<128x128xf32>
    %105 = arith.maximumf %104, %103 : vector<128x128xf32>
    %106 = vector.broadcast %cst_41 : f32 to vector<128x128xf32>
    %107 = arith.minimumf %106, %105 : vector<128x128xf32>
    %cst_42 = arith.constant 1.000000e-01 : f32
    %108 = vector.broadcast %cst_42 : f32 to vector<128x128xf32>
    %109 = arith.maximumf %107, %108 : vector<128x128xf32>
    %110 = vector.broadcast %0 : f32 to vector<128x128xf32>
    %111 = arith.subf %4, %110 : vector<128x128xf32>
    %112 = arith.divf %111, %109 : vector<128x128xf32>
    %113 = vector.broadcast %0 : f32 to vector<128x128xf32>
    %114 = arith.addf %112, %113 : vector<128x128xf32>
    %cst_43 = arith.constant 0.000000e+00 : f32
    %cst_44 = arith.constant 1.000000e+00 : f32
    %115 = vector.broadcast %cst_43 : f32 to vector<128x128xf32>
    %116 = arith.maximumf %115, %114 : vector<128x128xf32>
    %117 = vector.broadcast %cst_44 : f32 to vector<128x128xf32>
    %118 = arith.minimumf %117, %116 : vector<128x128xf32>
    %c1_45 = arith.constant 1 : index
    %c0_46 = arith.constant 0 : index
    %c0_47 = arith.constant 0 : index
    %119 = vector.load %arg3[%c1_45, %c0_46, %c0_47] : memref<3x128x128xf32, #tpu.memory_space<vmem>>, vector<1x128x128xf32>
    %120 = vector.shape_cast %119 : vector<1x128x128xf32> to vector<128x128xf32>
    %121 = vector.shape_cast %118 : vector<128x128xf32> to vector<1x128x128xf32>
    tpu.vector_store %arg3[%c1_45, %c0_46, %c0_47], %121 {strides = array<i32>} : memref<3x128x128xf32, #tpu.memory_space<vmem>>, vector<1x128x128xf32>,
    %cst_48 = arith.constant dense<0.000000e+00> : vector<128x128xf32>
    %122 = tpu.matmul %6, %33, %cst_48 {dimension_numbers = #tpu.dot_dimension_numbers<[1], [0], [0], [1], [0, 0, 1, 1], [], []>} : vector<128x128xf32>, vector<128x128xf32>, vector<128x128xf32> -> vector<128x128xf32>
    %cst_49 = arith.constant dense<0.000000e+00> : vector<128x128xf32>
    %123 = tpu.matmul %23, %122, %cst_49 {dimension_numbers = #tpu.dot_dimension_numbers<[1], [0], [0], [1], [0, 0, 1, 1], [], []>} : vector<128x128xf32>, vector<128x128xf32>, vector<128x128xf32> -> vector<128x128xf32>
    %124 = arith.mulf %123, %38 : vector<128x128xf32>
    %125 = arith.mulf %13, %6 : vector<128x128xf32>
    %cst_50 = arith.constant dense<0.000000e+00> : vector<128x128xf32>
    %126 = tpu.matmul %125, %33, %cst_50 {dimension_numbers = #tpu.dot_dimension_numbers<[1], [0], [0], [1], [0, 0, 1, 1], [], []>} : vector<128x128xf32>, vector<128x128xf32>, vector<128x128xf32> -> vector<128x128xf32>
    %cst_51 = arith.constant dense<0.000000e+00> : vector<128x128xf32>
    %127 = tpu.matmul %23, %126, %cst_51 {dimension_numbers = #tpu.dot_dimension_numbers<[1], [0], [0], [1], [0, 0, 1, 1], [], []>} : vector<128x128xf32>, vector<128x128xf32>, vector<128x128xf32> -> vector<128x128xf32>
    %128 = arith.mulf %127, %38 : vector<128x128xf32>
    %129 = arith.mulf %6, %6 : vector<128x128xf32>
    %cst_52 = arith.constant dense<0.000000e+00> : vector<128x128xf32>
    %130 = tpu.matmul %129, %33, %cst_52 {dimension_numbers = #tpu.dot_dimension_numbers<[1], [0], [0], [1], [0, 0, 1, 1], [], []>} : vector<128x128xf32>, vector<128x128xf32>, vector<128x128xf32> -> vector<128x128xf32>
    %cst_53 = arith.constant dense<0.000000e+00> : vector<128x128xf32>
    %131 = tpu.matmul %23, %130, %cst_53 {dimension_numbers = #tpu.dot_dimension_numbers<[1], [0], [0], [1], [0, 0, 1, 1], [], []>} : vector<128x128xf32>, vector<128x128xf32>, vector<128x128xf32> -> vector<128x128xf32>
    %132 = arith.mulf %131, %38 : vector<128x128xf32>
    %133 = arith.mulf %41, %124 : vector<128x128xf32>
    %134 = arith.subf %128, %133 : vector<128x128xf32>
    %135 = arith.mulf %124, %124 : vector<128x128xf32>
    %136 = arith.subf %132, %135 : vector<128x128xf32>
    %cst_54 = arith.constant 9.99999974E-5 : f32
    %137 = vector.broadcast %cst_54 : f32 to vector<128x128xf32>
    %138 = arith.addf %136, %137 : vector<128x128xf32>
    %139 = arith.divf %134, %138 : vector<128x128xf32>
    %140 = arith.mulf %139, %124 : vector<128x128xf32>
    %141 = arith.subf %41, %140 : vector<128x128xf32>
    %142 = arith.mulf %139, %6 : vector<128x128xf32>
    %143 = arith.addf %142, %141 : vector<128x128xf32>
    %cst_55 = arith.constant 0.000000e+00 : f32
    %cst_56 = arith.constant 1.000000e+00 : f32
    %144 = vector.broadcast %cst_55 : f32 to vector<128x128xf32>
    %145 = arith.maximumf %144, %143 : vector<128x128xf32>
    %146 = vector.broadcast %cst_56 : f32 to vector<128x128xf32>
    %147 = arith.minimumf %146, %145 : vector<128x128xf32>
    %cst_57 = arith.constant 1.000000e-01 : f32
    %148 = vector.broadcast %cst_57 : f32 to vector<128x128xf32>
    %149 = arith.maximumf %147, %148 : vector<128x128xf32>
    %150 = vector.broadcast %0 : f32 to vector<128x128xf32>
    %151 = arith.subf %6, %150 : vector<128x128xf32>
    %152 = arith.divf %151, %149 : vector<128x128xf32>
    %153 = vector.broadcast %0 : f32 to vector<128x128xf32>
    %154 = arith.addf %152, %153 : vector<128x128xf32>
    %cst_58 = arith.constant 0.000000e+00 : f32
    %cst_59 = arith.constant 1.000000e+00 : f32
    %155 = vector.broadcast %cst_58 : f32 to vector<128x128xf32>
    %156 = arith.maximumf %155, %154 : vector<128x128xf32>
    %157 = vector.broadcast %cst_59 : f32 to vector<128x128xf32>
    %158 = arith.minimumf %157, %156 : vector<128x128xf32>
    %c2_60 = arith.constant 2 : index
    %c0_61 = arith.constant 0 : index
    %c0_62 = arith.constant 0 : index
    %159 = vector.load %arg3[%c2_60, %c0_61, %c0_62] : memref<3x128x128xf32, #tpu.memory_space<vmem>>, vector<1x128x128xf32>
    %160 = vector.shape_cast %159 : vector<1x128x128xf32> to vector<128x128xf32>
    %161 = vector.shape_cast %158 : vector<128x128xf32> to vector<1x128x128xf32>
    tpu.vector_store %arg3[%c2_60, %c0_61, %c0_62], %161 {strides = array<i32>} : memref<3x128x128xf32, #tpu.memory_space<vmem>>, vector<1x128x128xf32>,
    return
  }
}

</mosaic_0001>

<bundles_post_ra>
// kernel: dehaze_filter.2
= control target key start
LH: loop header
LB: loop body
LE: loop exit
PB: predicated region body
PF: predicated region fallthrough
CT: control target
= control target key end

     0   :  { %6 = vsyncpa [#allocation3], 0  ;;  %s1331_s6 = smov [#allocation2]   ;;  %s2187_s0 = inlined_call_operand.hbm [shape: f32[3,128,128], index: 0, kind: input, shape index: {}]   ;;  %s2188_s1 = inlined_call_operand.vmem [shape: f32[128,128], index: 1, kind: output, shape index: {}]  }
   0x1   :  { %s12_s7 = sshll.u32 %s1331_s6, 4  ;;  %s1307_s10 = scalar_lea.hbm %s2187_s0, 6144  ;;  %s13_s7 = int_to_ptr.vmem [resolvable:$true] %s12_s7 }
   0x2   :  { %p1308_p0 = scmp.ne.s32.totalorder %s2187_s0, %s1307_s10  ;;  %p1311_p1 = scmp.lt.u32.totalorder %s1307_s10, %s2187_s0 }
   0x4   :  { %p1313_p2 = pnand %p1311_p1, %p1308_p0 }
   0x6   :  { %1316 = shalt.err (!%p1313_p2)
}
   0x7   :  { %s1317_s15 = scalar_lea.vmem %s13_s7, 6144  ;;  %p1322_p4 = scmp.lt.s32.totalorder %s13_s7, %s13_s7 }
   0x8   :  { %p1318_p3 = scmp.ne.s32.totalorder %s13_s7, %s1317_s15  ;;  %p1323_p5 = scmp.lt.s32.totalorder %s1317_s15, %s1317_s15 }
   0xa   :  { %p1324_p6 = por %p1323_p5, %p1322_p4 }
   0xc   :  { %p1325_p7 = pnand %p1324_p6, %p1318_p3 }
   0xe   :  { %1328 = shalt.err (!%p1325_p7)
}
   0xf   :  { %s1332_s16 = smov 128   ;;  %s1333_s17 = smov 8  }
  0x10   :  { %18 = dma.hbm_to_vmem [thread:$0]  %s2187_s0, 6144, %s13_s7, [#allocation3], %s1332_s16, %s1332_s16, %s1333_s17  }
  0x11   :  { %1329 = dma.done.wait [#allocation3], 6144  }
  0x12   :  { %1330 = vsyncadd [#allocation3], 4294961152  ;;  %v22_v0 = vld [vmem:[#allocation2] sm:$0xff]  ;;  %v23_v1 = vld [vmem:[#allocation2 + $0x8] sm:$0xff]  ;;  %vm120_vm0 = vcmask 1046528   ;;  %vm261_vm1 = vcmask 1045504  }
  0x13   :  { %v24_v2 = vld [vmem:[#allocation2 + $0x10] sm:$0xff]  ;;  %v25_v3 = vld [vmem:[#allocation2 + $0x18] sm:$0xff]  ;;  %v26_v4 = vld [vmem:[#allocation2 + $0x20] sm:$0xff]  ;;  %v1334_v32 = vmov inf   ;;  %vm351_vm2 = vcmask 1043456   ;;  %vm438_vm3 = vcmask 1040384  }
  0x14   :  { %v39_v5 = vld [vmem:[#allocation2 + $0x80] sm:$0xff]  ;;  %v40_v6 = vld [vmem:[#allocation2 + $0x88] sm:$0xff]  ;;  %v41_v7 = vld [vmem:[#allocation2 + $0x90] sm:$0xff]  ;;  %v1362_v33 = vrot.slane %v1334_v32, 1  ;;  %s1335_s0 = smov 7   ;;  %vm568_vm4 = vcmask 56320  }
  0x15   :  { %v42_v8 = vld [vmem:[#allocation2 + $0x98] sm:$0xff]  ;;  %v55_v9 = vmin.f32 %v22_v0, %v39_v5  ;;  %v43_v10 = vld [vmem:[#allocation2 + $0xa0] sm:$0xff]  ;;  %v56_v11 = vmin.f32 %v23_v1, %v40_v6  ;;  %v57_v12 = vmin.f32 %v24_v2, %v41_v7  ;;  %v73_v15 = vld [vmem:[#allocation2 + $0x108] sm:$0xff]  ;;  %s1336_s20 = smov 127   ;;  %vm697_vm5 = vcmask 1039360   ;;  %s1337_s21 = smov 126  }
  0x16   :  { %v58_v13 = vmin.f32 %v25_v3, %v42_v8  ;;  %v72_v14 = vld [vmem:[#allocation2 + $0x100] sm:$0xff]  ;;  %v59_v16 = vmin.f32 %v26_v4, %v43_v10  ;;  %v74_v17 = vld [vmem:[#allocation2 + $0x110] sm:$0xff]  ;;  %v75_v18 = vld [vmem:[#allocation2 + $0x118] sm:$0xff]  ;;  %vm874_vm6 = vcmask 1031168   ;;  %s1338_s22 = smov 124   ;;  %vm1051_vm7 = vcmask 1014784  }
  0x17   :  { %v76_v19 = vld [vmem:[#allocation2 + $0x120] sm:$0xff]  ;;  %v88_v20 = vmin.f32 %v55_v9, %v72_v14  ;;  %v89_v21 = vmin.f32 %v56_v11, %v73_v15  ;;  %v90_v22 = vmin.f32 %v57_v12, %v74_v17  ;;  %v27_v24 = vld [vmem:[#allocation2 + $0x28] sm:$0xff]  ;;  %v28_v30 = vld [vmem:[#allocation2 + $0x30] sm:$0xff]  ;;  %s1339_s23 = smov 121   ;;  %vm1228_vm8 = vcmask 990208  }
  0x18   :  { %v91_v23 = vmin.f32 %v58_v13, %v75_v18  ;;  %v44_v25 = vld [vmem:[#allocation2 + $0xa8] sm:$0xff]  ;;  %v92_v27 = vmin.f32 %v59_v16, %v76_v19  ;;  %v45_v31 = vld [vmem:[#allocation2 + $0xb0] sm:$0xff]  ;;  %v29_v38 = vld [vmem:[#allocation2 + $0x38] sm:$0xff] }
  0x19   :  { %v77_v26 = vld [vmem:[#allocation2 + $0x128] sm:$0xff]  ;;  %v121_v28 = vrot.slane %v88_v20, 1  ;;  %v60_v29 = vmin.f32 %v27_v24, %v44_v25  ;;  %v122_v34 = vrot.slane %v89_v21, 1  ;;  %v124_v35 = vrot.slane %v90_v22, 1  ;;  %v46_v39 = vld [vmem:[#allocation2 + $0xb8] sm:$0xff]  ;;  %v78_v43 = vld [vmem:[#allocation2 + $0x130] sm:$0xff] }
  0x1a   :  { %v126_v36 = vrot.slane %v91_v23, 1  ;;  %v61_v37 = vmin.f32 %v28_v30, %v45_v31  ;;  %v128_v40 = vrot.slane %v92_v27, 1  ;;  %v62_v44 = vmin.f32 %v29_v38, %v46_v39  ;;  %v79_v45 = vld [vmem:[#allocation2 + $0x138] sm:$0xff]  ;;  %v30_v50 = vld [vmem:[#allocation2 + $0x40] sm:$0xff]  ;;  %v31_v25 = vld [vmem:[#allocation2 + $0x48] sm:$0xff] }
  0x1b   :  { %v169_v41 = vsel %vm120_vm0, inf, %v121_v28  ;;  %v93_v42 = vmin.f32 %v60_v29, %v77_v26  ;;  %v123_v46 = vsel %vm120_vm0, %v121_v28, %v122_v34  ;;  %v125_v47 = vsel %vm120_vm0, %v122_v34, %v124_v35  ;;  %v47_v51 = vld [vmem:[#allocation2 + $0xc0] sm:$0xff]  ;;  %v48_v26 = vld [vmem:[#allocation2 + $0xc8] sm:$0xff] }
  0x1c   :  { %v127_v48 = vsel %vm120_vm0, %v124_v35, %v126_v36  ;;  %v174_v49 = vrot.slane %v169_v41, 1  ;;  %v129_v52 = vsel %vm120_vm0, %v126_v36, %v128_v40  ;;  %v175_v53 = vrot.slane %v123_v46, 1  ;;  %v80_v4 = vld [vmem:[#allocation2 + $0x140] sm:$0xff] }
  0x1d   :  { %v177_v54 = vrot.slane %v125_v47, 1  ;;  %v179_v55 = vrot.slane %v127_v48, 1  ;;  %v181_v56 = vrot.slane %v129_v52, 1  ;;  %v130_v57 = vrot.slane %v93_v42, 1 }
  0x1e   :  { %v94_v58 = vmin.f32 %v61_v37, %v78_v43  ;;  %v95_v59 = vmin.f32 %v62_v44, %v79_v45  ;;  %v176_v60 = vsel %vm120_vm0, %v174_v49, %v175_v53  ;;  %v63_v63 = vmin.f32 %v30_v50, %v47_v51 }
  0x1f   :  { %v178_v61 = vsel %vm120_vm0, %v175_v53, %v177_v54  ;;  %v180_v62 = vsel %vm120_vm0, %v177_v54, %v179_v55  ;;  %v182_v0 = vsel %vm120_vm0, %v179_v55, %v181_v56  ;;  %v227_v1 = vmin.f32 %v169_v41, %v176_v60  ;;  %v32_v53 = vld [vmem:[#allocation2 + $0x50] sm:$0xff] }
  0x20   :  { %v228_v2 = vmin.f32 %v123_v46, %v178_v61  ;;  %v229_v3 = vmin.f32 %v125_v47, %v180_v62  ;;  %v230_v5 = vmin.f32 %v127_v48, %v182_v0  ;;  %v131_v6 = vsel %vm120_vm0, %v128_v40, %v130_v57  ;;  %v81_v40 = vld [vmem:[#allocation2 + $0x148] sm:$0xff]  ;;  %v49_v54 = vld [vmem:[#allocation2 + $0xd0] sm:$0xff] }
  0x21   :  { %v132_v7 = vrot.slane %v94_v58, 1  ;;  %v134_v8 = vrot.slane %v95_v59, 1  ;;  %v262_v9 = vrot.slane %v227_v1, 2  ;;  %v183_v12 = vrot.slane %v131_v6, 1 }
  0x22   :  { %v263_v10 = vrot.slane %v228_v2, 2  ;;  %v265_v11 = vrot.slane %v229_v3, 2  ;;  %v267_v13 = vrot.slane %v230_v5, 2  ;;  %v96_v16 = vmin.f32 %v63_v63, %v80_v4 }
  0x23   :  { %v133_v14 = vsel %vm120_vm0, %v130_v57, %v132_v7  ;;  %v135_v15 = vsel %vm120_vm0, %v132_v7, %v134_v8  ;;  %v184_v19 = vsel %vm120_vm0, %v181_v56, %v183_v12  ;;  %v64_v39 = vmin.f32 %v31_v25, %v48_v26 }
  0x24   :  { %v264_v17 = vsel %vm261_vm1, %v262_v9, %v263_v10  ;;  %v266_v18 = vsel %vm261_vm1, %v263_v10, %v265_v11  ;;  %v185_v20 = vrot.slane %v133_v14, 1  ;;  %v268_v21 = vsel %vm261_vm1, %v265_v11, %v267_v13  ;;  %v50_v9 = vld [vmem:[#allocation2 + $0xd8] sm:$0xff] }
  0x25   :  { %v315_v22 = vmin.f32 %v227_v1, %v264_v17  ;;  %v316_v23 = vmin.f32 %v228_v2, %v266_v18  ;;  %v231_v24 = vmin.f32 %v129_v52, %v184_v19  ;;  %v317_v27 = vmin.f32 %v229_v3, %v268_v21  ;;  %v82_v3 = vld [vmem:[#allocation2 + $0x150] sm:$0xff]  ;;  %v83_v18 = vld [vmem:[#allocation2 + $0x158] sm:$0xff] }
  0x26   :  { %v186_v28 = vsel %vm120_vm0, %v183_v12, %v185_v20  ;;  %v187_v29 = vrot.slane %v135_v15, 1  ;;  %v136_v30 = vrot.slane %v96_v16, 1  ;;  %v97_v52 = vmin.f32 %v64_v39, %v81_v40  ;;  %v84_v39 = vld [vmem:[#allocation2 + $0x160] sm:$0xff] }
  0x27   :  { %v352_v31 = vrot.slane %v315_v22, 4  ;;  %v353_v32 = vrot.slane %v316_v23, 4  ;;  %v269_v34 = vrot.slane %v231_v24, 2  ;;  %v232_v35 = vmin.f32 %v131_v6, %v186_v28 }
  0x28   :  { %v355_v36 = vrot.slane %v317_v27, 4  ;;  %v188_v37 = vsel %vm120_vm0, %v185_v20, %v187_v29  ;;  %v137_v38 = vsel %vm120_vm0, %v134_v8, %v136_v30  ;;  %v138_v62 = vrot.slane %v97_v52, 1  ;;  %v33_v8 = vld [vmem:[#allocation2 + $0x58] sm:$0xff] }
  0x29   :  { %v354_v41 = vsel %vm351_vm2, %v352_v31, %v353_v32  ;;  %v270_v42 = vsel %vm261_vm1, %v267_v13, %v269_v34  ;;  %v271_v43 = vrot.slane %v232_v35, 2  ;;  %v233_v44 = vmin.f32 %v133_v14, %v188_v37 }
  0x2a   :  { %v356_v45 = vsel %vm351_vm2, %v353_v32, %v355_v36  ;;  %v404_v46 = vmin.f32 %v315_v22, %v354_v41  ;;  %v318_v47 = vmin.f32 %v230_v5, %v270_v42  ;;  %v189_v48 = vrot.slane %v137_v38, 1 }
  0x2b   :  { %v405_v49 = vmin.f32 %v316_v23, %v356_v45  ;;  %v272_v50 = vsel %vm261_vm1, %v269_v34, %v271_v43  ;;  %v273_v51 = vrot.slane %v233_v44, 2  ;;  %v65_v2 = vmin.f32 %v32_v53, %v49_v54  ;;  %v34_v23 = vld [vmem:[#allocation2 + $0x60] sm:$0xff] }
  0x2c   :  { %v439_v55 = vrot.slane %v404_v46, 7  ;;  %v357_v56 = vrot.slane %v318_v47, 4  ;;  %v319_v57 = vmin.f32 %v231_v24, %v272_v50  ;;  %v190_v58 = vsel %vm120_vm0, %v187_v29, %v189_v48  ;;  %v51_v24 = vld [vmem:[#allocation2 + $0xe0] sm:$0xff]  ;;  %v53_v50 = vld [vmem:[#allocation2 + $0xf0] sm:$0xff] }
  0x2d   :  { %v440_v59 = vrot.slane %v405_v49, 7  ;;  %v274_v60 = vsel %vm261_vm1, %v271_v43, %v273_v51  ;;  %v234_v61 = vmin.f32 %v135_v15, %v190_v58  ;;  %v139_v7 = vsel %vm120_vm0, %v136_v30, %v138_v62 }
  0x2e   :  { %v358_v63 = vsel %vm351_vm2, %v355_v36, %v357_v56  ;;  %v359_v0 = vrot.slane %v319_v57, 4  ;;  %v320_v1 = vmin.f32 %v232_v35, %v274_v60  ;;  %v191_v13 = vrot.slane %v139_v7, 1 }
  0x2f   :  { %v441_v4 = vsel %vm438_vm3, %v439_v55, %v440_v59  ;;  %v406_v5 = vmin.f32 %v317_v27, %v358_v63  ;;  %v275_v6 = vrot.slane %v234_v61, 2  ;;  %v98_v17 = vmin.f32 %v65_v2, %v82_v3  ;;  %v85_v55 = vld [vmem:[#allocation2 + $0x168] sm:$0xff]  ;;  %v86_v3 = vld [vmem:[#allocation2 + $0x170] sm:$0xff] }
  0x30   :  { %v488_v10 = vmin.f32 %v404_v46, %v441_v4  ;;  %v360_v11 = vsel %vm351_vm2, %v357_v56, %v359_v0  ;;  %v361_v12 = vrot.slane %v320_v1, 4  ;;  %v192_v21 = vsel %vm120_vm0, %v189_v48, %v191_v13  ;;  %v37_v56 = vld [vmem:[#allocation2 + $0x78] sm:$0xff] }
  0x31   :  { %v442_v14 = vrot.slane %v406_v5, 7  ;;  %v407_v15 = vmin.f32 %v318_v47, %v360_v11  ;;  %v276_v16 = vsel %vm261_vm1, %v273_v51, %v275_v6  ;;  %v66_v22 = vmin.f32 %v33_v8, %v50_v9  ;;  %v87_v8 = vld [vmem:[#allocation2 + $0x178] sm:$0xff] }
  0x32   :  { %520 = vrot.lane.b32.xlu0 %v488_v10, %s1335_s0  ;;  %v362_v19 = vsel %vm351_vm2, %v359_v0, %v361_v12  ;;  %v321_v20 = vmin.f32 %v233_v44, %v276_v16  ;;  %v235_v28 = vmin.f32 %v137_v38, %v192_v21  ;;  %v140_v31 = vrot.slane %v98_v17, 1  ;;  %v35_v44 = vld [vmem:[#allocation2 + $0x68] sm:$0xff] }
  0x33   :  { %v443_v25 = vsel %vm438_vm3, %v440_v59, %v442_v14  ;;  %v444_v26 = vrot.slane %v407_v15, 7  ;;  %v408_v27 = vmin.f32 %v319_v57, %v362_v19  ;;  %v99_v32 = vmin.f32 %v66_v22, %v83_v18  ;;  %v52_v38 = vld [vmem:[#allocation2 + $0xe8] sm:$0xff]  ;;  %v54_v57 = vld [vmem:[#allocation2 + $0xf8] sm:$0xff] }
  0x34   :  { %v489_v29 = vmin.f32 %v405_v49, %v443_v25  ;;  %v363_v30 = vrot.slane %v321_v20, 4  ;;  %v277_v36 = vrot.slane %v235_v28, 2  ;;  %v67_v37 = vmin.f32 %v34_v23, %v51_v24  ;;  %v36_v49 = vld [vmem:[#allocation2 + $0x70] sm:$0xff] }
  0x35   :  { %v445_v34 = vsel %vm438_vm3, %v442_v14, %v444_v26  ;;  %v446_v35 = vrot.slane %v408_v27, 7  ;;  %v141_v42 = vsel %vm120_vm0, %v138_v62, %v140_v31  ;;  %v142_v43 = vrot.slane %v99_v32, 1 }
  0x36   :  { %522 = vrot.lane.b32.xlu0 %v489_v29, %s1335_s0  ;;  %v490_v40 = vmin.f32 %v406_v5, %v445_v34  ;;  %v364_v41 = vsel %vm351_vm2, %v361_v12, %v363_v30  ;;  %v278_v47 = vsel %vm261_vm1, %v275_v6, %v277_v36  ;;  %v193_v48 = vrot.slane %v141_v42, 1 }
  0x37   :  { %v447_v45 = vsel %vm438_vm3, %v444_v26, %v446_v35  ;;  %v409_v46 = vmin.f32 %v320_v1, %v364_v41  ;;  %v322_v52 = vmin.f32 %v234_v61, %v278_v47  ;;  %v143_v53 = vsel %vm120_vm0, %v140_v31, %v142_v43 }
  0x38   :  { %524 = vrot.lane.b32.xlu1 %v490_v40, %s1335_s0  ;;  %v491_v51 = vmin.f32 %v407_v15, %v447_v45  ;;  %v100_v54 = vmin.f32 %v67_v37, %v84_v39  ;;  %v194_v59 = vsel %vm120_vm0, %v191_v13, %v193_v48  ;;  %v195_v60 = vrot.slane %v143_v53, 1 }
  0x39   :  { %v448_v58 = vrot.slane %v409_v46, 7  ;;  %v68_v62 = vmin.f32 %v35_v44, %v52_v38  ;;  %v365_v63 = vrot.slane %v322_v52, 4  ;;  %v236_v0 = vmin.f32 %v139_v7, %v194_v59 }
  0x3a   :  { %v144_v1 = vrot.slane %v100_v54, 1  ;;  %v69_v2 = vmin.f32 %v36_v49, %v53_v50  ;;  %v196_v61 = vsel %vm120_vm0, %v193_v48, %v195_v60  ;;  %v70_v6 = vmin.f32 %v37_v56, %v54_v57 }
  0x3b   :  { %v449_v4 = vsel %vm438_vm3, %v446_v35, %v448_v58  ;;  %v101_v5 = vmin.f32 %v68_v62, %v85_v55  ;;  %v366_v10 = vsel %vm351_vm2, %v363_v30, %v365_v63  ;;  %v279_v11 = vrot.slane %v236_v0, 2 }
  0x3c   :  { %526 = vrot.lane.b32.xlu1 %v491_v51, %s1335_s0  ;;  %v492_v9 = vmin.f32 %v408_v27, %v449_v4  ;;  %v237_v12 = vmin.f32 %v141_v42, %v196_v61  ;;  %v410_v13 = vmin.f32 %v321_v20, %v366_v10  ;;  %v145_v7 = vsel %vm120_vm0, %v142_v43, %v144_v1 }
  0x3d   :  { %v146_v14 = vrot.slane %v101_v5, 1  ;;  %v102_v15 = vmin.f32 %v69_v2, %v86_v3  ;;  %v280_v16 = vsel %vm261_vm1, %v277_v36, %v279_v11  ;;  %v197_v18 = vrot.slane %v145_v7, 1 }
  0x3e   :  { %528 = vrot.lane.b32.xlu0 %v492_v9, %s1335_s0  ;;  %v281_v17 = vrot.slane %v237_v12, 2  ;;  %v103_v19 = vmin.f32 %v70_v6, %v87_v8  ;;  %v450_v21 = vrot.slane %v410_v13, 7  ;;  %v323_v22 = vmin.f32 %v235_v28, %v280_v16 }
  0x3f   :  { %v147_v23 = vsel %vm120_vm0, %v144_v1, %v146_v14  ;;  %v148_v24 = vrot.slane %v102_v15, 1  ;;  %v198_v20 = vsel %vm120_vm0, %v195_v60, %v197_v18  ;;  %v295_v16 = vrot.slane %v1362_v33, 2 }
  0x40   :  { %v282_v25 = vsel %vm261_vm1, %v279_v11, %v281_v17  ;;  %v199_v26 = vrot.slane %v147_v23, 1  ;;  %v150_v27 = vrot.slane %v103_v19, 1  ;;  %v451_v29 = vsel %vm438_vm3, %v448_v58, %v450_v21 }
  0x41   :  { %v367_v30 = vrot.slane %v323_v22, 4  ;;  %v324_v31 = vmin.f32 %v236_v0, %v282_v25  ;;  %v238_v32 = vmin.f32 %v143_v53, %v198_v20  ;;  %v493_v34 = vmin.f32 %v409_v46, %v451_v29 }
  0x42   :  { %v200_v35 = vsel %vm120_vm0, %v197_v18, %v199_v26  ;;  %v149_v36 = vsel %vm120_vm0, %v146_v14, %v148_v24  ;;  %v151_v28 = vsel %vm120_vm0, %v148_v24, %v150_v27  ;;  %v170_v38 = vsel %vm120_vm0, %v150_v27, inf }
  0x43   :  { %v368_v37 = vsel %vm351_vm2, %v365_v63, %v367_v30  ;;  %v369_v39 = vrot.slane %v324_v31, 4  ;;  %v283_v40 = vrot.slane %v238_v32, 2  ;;  %v239_v41 = vmin.f32 %v145_v7, %v200_v35  ;;  %530 = vrot.lane.b32.xlu1 %v493_v34, %s1335_s0 }
  0x44   :  { %v411_v42 = vmin.f32 %v322_v52, %v368_v37  ;;  %v201_v43 = vrot.slane %v149_v36, 1  ;;  %v203_v44 = vrot.slane %v151_v28, 1  ;;  %v205_v48 = vrot.slane %v170_v38, 1 }
  0x45   :  { %v370_v45 = vsel %vm351_vm2, %v367_v30, %v369_v39  ;;  %v284_v46 = vsel %vm261_vm1, %v281_v17, %v283_v40  ;;  %v285_v47 = vrot.slane %v239_v41, 2  ;;  %v332_v25 = vmin.f32 %v1362_v33, %v295_v16 }
  0x46   :  { %v452_v49 = vrot.slane %v411_v42, 7  ;;  %v412_v50 = vmin.f32 %v323_v22, %v370_v45  ;;  %v325_v51 = vmin.f32 %v237_v12, %v284_v46  ;;  %v202_v53 = vsel %vm120_vm0, %v199_v26, %v201_v43 }
  0x47   :  { %v286_v54 = vsel %vm261_vm1, %v283_v40, %v285_v47  ;;  %v240_v55 = vmin.f32 %v147_v23, %v202_v53  ;;  %v204_v52 = vsel %vm120_vm0, %v201_v43, %v203_v44  ;;  %v206_v56 = vsel %vm120_vm0, %v203_v44, %v205_v48 }
  0x48   :  { %v453_v57 = vsel %vm438_vm3, %v450_v21, %v452_v49  ;;  %v454_v58 = vrot.slane %v412_v50, 7  ;;  %v371_v59 = vrot.slane %v325_v51, 4  ;;  %v326_v60 = vmin.f32 %v238_v32, %v286_v54 }
  0x49   :  { %v494_v62 = vmin.f32 %v410_v13, %v453_v57  ;;  %v287_v63 = vrot.slane %v240_v55, 2  ;;  %v241_v0 = vmin.f32 %v149_v36, %v204_v52  ;;  %v242_v1 = vmin.f32 %v151_v28, %v206_v56 }
  0x4a   :  { %v455_v2 = vsel %vm438_vm3, %v452_v49, %v454_v58  ;;  %v372_v3 = vsel %vm351_vm2, %v369_v39, %v371_v59  ;;  %v373_v4 = vrot.slane %v326_v60, 4  ;;  %v208_v61 = vsel %vm120_vm0, %v205_v48, %v1362_v33 }
  0x4b   :  { %532 = vrot.lane.b32.xlu0 %v494_v62, %s1335_s0  ;;  %v495_v5 = vmin.f32 %v411_v42, %v455_v2  ;;  %v413_v6 = vmin.f32 %v324_v31, %v372_v3  ;;  %v288_v8 = vsel %vm261_vm1, %v285_v47, %v287_v63  ;;  %v289_v9 = vrot.slane %v241_v0, 2 }
  0x4c   :  { %v374_v10 = vsel %vm351_vm2, %v371_v59, %v373_v4  ;;  %v327_v11 = vmin.f32 %v239_v41, %v288_v8  ;;  %v291_v12 = vrot.slane %v242_v1, 2  ;;  %v243_v13 = vmin.f32 %v170_v38, %v208_v61 }
  0x4d   :  { %534 = vrot.lane.b32.xlu1 %v495_v5, %s1335_s0  ;;  %v456_v7 = vrot.slane %v413_v6, 7  ;;  %v414_v14 = vmin.f32 %v325_v51, %v374_v10  ;;  %v290_v15 = vsel %vm261_vm1, %v287_v63, %v289_v9  ;;  %v385_v45 = vrot.slane %v332_v25, 4 }
  0x4e   :  { %v375_v17 = vrot.slane %v327_v11, 4  ;;  %v328_v18 = vmin.f32 %v240_v55, %v290_v15  ;;  %v292_v19 = vsel %vm261_vm1, %v289_v9, %v291_v12  ;;  %v293_v21 = vrot.slane %v243_v13, 2 }
  0x4f   :  { %v457_v22 = vsel %vm438_vm3, %v454_v58, %v456_v7  ;;  %v458_v23 = vrot.slane %v414_v14, 7  ;;  %v329_v24 = vmin.f32 %v241_v0, %v292_v19 }
  0x50   :  { %v496_v20 = vmin.f32 %v412_v50, %v457_v22  ;;  %v376_v26 = vsel %vm351_vm2, %v373_v4, %v375_v17  ;;  %v377_v27 = vrot.slane %v328_v18, 4  ;;  %v294_v29 = vsel %vm261_vm1, %v291_v12, %v293_v21 }
  0x51   :  { %v459_v30 = vsel %vm438_vm3, %v456_v7, %v458_v23  ;;  %v415_v31 = vmin.f32 %v326_v60, %v376_v26  ;;  %v379_v32 = vrot.slane %v329_v24, 4  ;;  %v330_v34 = vmin.f32 %v242_v1, %v294_v29 }
  0x52   :  { %536 = vrot.lane.b32.xlu0 %v496_v20, %s1335_s0  ;;  %v497_v35 = vmin.f32 %v413_v6, %v459_v30  ;;  %v378_v36 = vsel %vm351_vm2, %v375_v17, %v377_v27  ;;  %v296_v28 = vsel %vm261_vm1, %v293_v21, %v295_v16 }
  0x53   :  { %v460_v37 = vrot.slane %v415_v31, 7  ;;  %v416_v33 = vmin.f32 %v327_v11, %v378_v36  ;;  %v380_v39 = vsel %vm351_vm2, %v377_v27, %v379_v32  ;;  %v381_v40 = vrot.slane %v330_v34, 4 }
  0x54   :  { %538 = vrot.lane.b32.xlu1 %v497_v35, %s1335_s0  ;;  %v417_v41 = vmin.f32 %v328_v18, %v380_v39  ;;  %v331_v42 = vmin.f32 %v243_v13, %v296_v28 }
  0x55   :  { %v461_v43 = vsel %vm438_vm3, %v458_v23, %v460_v37  ;;  %v462_v44 = vrot.slane %v416_v33, 7  ;;  %v382_v38 = vsel %vm351_vm2, %v379_v32, %v381_v40 }
  0x56   :  { %v498_v46 = vmin.f32 %v414_v14, %v461_v43  ;;  %v464_v47 = vrot.slane %v417_v41, 7  ;;  %v418_v48 = vmin.f32 %v329_v24, %v382_v38  ;;  %v383_v49 = vrot.slane %v331_v42, 4 }
  0x57   :  { %v463_v50 = vsel %vm438_vm3, %v460_v37, %v462_v44 }
  0x58   :  { %540 = vrot.lane.b32.xlu0 %v498_v46, %s1335_s0  ;;  %v499_v51 = vmin.f32 %v415_v31, %v463_v50  ;;  %v465_v53 = vsel %vm438_vm3, %v462_v44, %v464_v47  ;;  %v466_v54 = vrot.slane %v418_v48, 7  ;;  %v384_v55 = vsel %vm351_vm2, %v381_v40, %v383_v49 }
  0x59   :  { %v500_v52 = vmin.f32 %v416_v33, %v465_v53  ;;  %v419_v56 = vmin.f32 %v330_v34, %v384_v55  ;;  %v386_v57 = vsel %vm351_vm2, %v383_v49, %v385_v45 }
  0x5a   :  { %542 = vrot.lane.b32.xlu1 %v499_v51, %s1335_s0  ;;  %v467_v58 = vsel %vm438_vm3, %v464_v47, %v466_v54  ;;  %v420_v59 = vmin.f32 %v331_v42, %v386_v57 }
  0x5b   :  { %v501_v60 = vmin.f32 %v417_v41, %v467_v58  ;;  %v468_v62 = vrot.slane %v419_v56, 7 }
  0x5c   :  { %544 = vrot.lane.b32.xlu0 %v500_v52, %s1335_s0  ;;  %v470_v63 = vrot.slane %v420_v59, 7 }
  0x5d   :  { %v469_v0 = vsel %vm438_vm3, %v466_v54, %v468_v62 }
  0x5e   :  { %546 = vrot.lane.b32.xlu1 %v501_v60, %s1335_s0  ;;  %v502_v1 = vmin.f32 %v418_v48, %v469_v0  ;;  %v471_v2 = vsel %vm438_vm3, %v468_v62, %v470_v63 }
  0x5f   :  { %v503_v3 = vmin.f32 %v419_v56, %v471_v2 }
  0x60   :  { %548 = vrot.lane.b32.xlu0 %v502_v1, %s1335_s0 }
  0x62   :  { %550 = vrot.lane.b32.xlu1 %v503_v3, %s1335_s0 }
  0xa4   :  { %v521_v4 = vpop.permute.xlu0 %520 }
  0xa5   :  { %v1468_v61 = vsel %vm568_vm4, %v521_v4, inf  ;;  %v1471_v5 = vsel %vm568_vm4, inf, %v521_v4 }
  0xa6   :  { %635 = vrot.lane.b32.xlu1 %v1468_v61, %s1336_s20  ;;  %633 = vrot.lane.b32.xlu0 %v1471_v5, %s1336_s20 }
  0xa8   :  { %v523_v6 = vpop.permute.xlu0 %522 }
  0xa9   :  { %v1478_v8 = vsel %vm568_vm4, %v523_v6, inf  ;;  %v1481_v9 = vsel %vm568_vm4, inf, %v523_v6 }
  0xaa   :  { %639 = vrot.lane.b32.xlu1 %v1478_v8, %s1336_s20  ;;  %637 = vrot.lane.b32.xlu0 %v1481_v9, %s1336_s20  ;;  %v525_v10 = vpop.permute.xlu1 %524 }
  0xab   :  { %v1488_v11 = vsel %vm568_vm4, %v525_v10, inf  ;;  %v1491_v12 = vsel %vm568_vm4, inf, %v525_v10 }
  0xae   :  { %643 = vrot.lane.b32.xlu1 %v1488_v11, %s1336_s20  ;;  %641 = vrot.lane.b32.xlu0 %v1491_v12, %s1336_s20  ;;  %v527_v13 = vpop.permute.xlu1 %526 }
  0xaf   :  { %v1498_v7 = vsel %vm568_vm4, %v527_v13, inf  ;;  %v1501_v14 = vsel %vm568_vm4, inf, %v527_v13 }
  0xb0   :  { %v529_v15 = vpop.permute.xlu0 %528 }
  0xb1   :  { %v1508_v16 = vsel %vm568_vm4, %v529_v15, inf  ;;  %v1511_v17 = vsel %vm568_vm4, inf, %v529_v15 }
  0xb2   :  { %647 = vrot.lane.b32.xlu1 %v1498_v7, %s1336_s20  ;;  %645 = vrot.lane.b32.xlu0 %v1501_v14, %s1336_s20 }
  0xb5   :  { %v531_v18 = vpop.permute.xlu1 %530 }
  0xb6   :  { %651 = vrot.lane.b32.xlu1 %v1508_v16, %s1336_s20  ;;  %649 = vrot.lane.b32.xlu0 %v1511_v17, %s1336_s20  ;;  %v1518_v19 = vsel %vm568_vm4, %v531_v18, inf  ;;  %v1521_v21 = vsel %vm568_vm4, inf, %v531_v18 }
  0xba   :  { %655 = vrot.lane.b32.xlu1 %v1518_v19, %s1336_s20  ;;  %653 = vrot.lane.b32.xlu0 %v1521_v21, %s1336_s20 }
  0xbd   :  { %v533_v22 = vpop.permute.xlu0 %532 }
  0xbe   :  { %v1528_v23 = vsel %vm568_vm4, %v533_v22, inf  ;;  %v1531_v24 = vsel %vm568_vm4, inf, %v533_v22 }
  0xbf   :  { %659 = vrot.lane.b32.xlu1 %v1528_v23, %s1336_s20  ;;  %657 = vrot.lane.b32.xlu0 %v1531_v24, %s1336_s20  ;;  %v535_v25 = vpop.permute.xlu1 %534 }
  0xc0   :  { %v1538_v20 = vsel %vm568_vm4, %v535_v25, inf  ;;  %v1541_v26 = vsel %vm568_vm4, inf, %v535_v25 }
  0xc3   :  { %663 = vrot.lane.b32.xlu1 %v1538_v20, %s1336_s20  ;;  %661 = vrot.lane.b32.xlu0 %v1541_v26, %s1336_s20 }
  0xc4   :  { %v537_v27 = vpop.permute.xlu0 %536 }
  0xc5   :  { %v1548_v29 = vsel %vm568_vm4, %v537_v27, inf  ;;  %v1551_v30 = vsel %vm568_vm4, inf, %v537_v27 }
  0xc6   :  { %v539_v31 = vpop.permute.xlu1 %538 }
  0xc7   :  { %667 = vrot.lane.b32.xlu1 %v1548_v29, %s1336_s20  ;;  %665 = vrot.lane.b32.xlu0 %v1551_v30, %s1336_s20  ;;  %v1558_v32 = vsel %vm568_vm4, %v539_v31, inf  ;;  %v1561_v34 = vsel %vm568_vm4, inf, %v539_v31 }
  0xca   :  { %v541_v35 = vpop.permute.xlu0 %540 }
  0xcb   :  { %671 = vrot.lane.b32.xlu1 %v1558_v32, %s1336_s20  ;;  %669 = vrot.lane.b32.xlu0 %v1561_v34, %s1336_s20  ;;  %v1568_v36 = vsel %vm568_vm4, %v541_v35, inf  ;;  %v1571_v28 = vsel %vm568_vm4, inf, %v541_v35 }
  0xcc   :  { %v543_v37 = vpop.permute.xlu1 %542 }
  0xcd   :  { %v1578_v33 = vsel %vm568_vm4, %v543_v37, inf  ;;  %v1581_v39 = vsel %vm568_vm4, inf, %v543_v37 }
  0xce   :  { %v545_v40 = vpop.permute.xlu0 %544 }
  0xcf   :  { %675 = vrot.lane.b32.xlu1 %v1568_v36, %s1336_s20  ;;  %673 = vrot.lane.b32.xlu0 %v1571_v28, %s1336_s20  ;;  %v1588_v41 = vsel %vm568_vm4, %v545_v40, inf  ;;  %v1591_v42 = vsel %vm568_vm4, inf, %v545_v40 }
  0xd0   :  { %v547_v43 = vpop.permute.xlu1 %546 }
  0xd1   :  { %v1598_v44 = vsel %vm568_vm4, %v547_v43, inf  ;;  %v1601_v38 = vsel %vm568_vm4, inf, %v547_v43 }
  0xd2   :  { %v549_v45 = vpop.permute.xlu0 %548 }
  0xd3   :  { %679 = vrot.lane.b32.xlu1 %v1578_v33, %s1336_s20  ;;  %677 = vrot.lane.b32.xlu0 %v1581_v39, %s1336_s20  ;;  %v1608_v46 = vsel %vm568_vm4, %v549_v45, inf  ;;  %v1611_v47 = vsel %vm568_vm4, inf, %v549_v45 }
  0xd4   :  { %v551_v48 = vpop.permute.xlu1 %550 }
  0xd5   :  { %v1618_v49 = vsel %vm568_vm4, %v551_v48, inf  ;;  %v1621_v50 = vsel %vm568_vm4, inf, %v551_v48 }
  0xd7   :  { %683 = vrot.lane.b32.xlu1 %v1588_v41, %s1336_s20  ;;  %681 = vrot.lane.b32.xlu0 %v1591_v42, %s1336_s20 }
  0xdb   :  { %687 = vrot.lane.b32.xlu1 %v1598_v44, %s1336_s20  ;;  %685 = vrot.lane.b32.xlu0 %v1601_v38, %s1336_s20 }
  0xdf   :  { %691 = vrot.lane.b32.xlu1 %v1608_v46, %s1336_s20  ;;  %689 = vrot.lane.b32.xlu0 %v1611_v47, %s1336_s20 }
  0xe3   :  { %695 = vrot.lane.b32.xlu1 %v1618_v49, %s1336_s20  ;;  %693 = vrot.lane.b32.xlu0 %v1621_v50, %s1336_s20 }
 0x118   :  { %v636_v51 = vpop.permute.xlu1 %635  ;;  %v634_v53 = vpop.permute.xlu0 %633 }
 0x119   :  { %v1628_v54 = vmin.f32 %v1468_v61, %v636_v51  ;;  %v698_v55 = vsel %vm697_vm5, %v634_v53, %v636_v51 }
 0x11a   :  { %v1632_v52 = vmin.f32 %v1471_v5, %v698_v55 }
 0x11b   :  { %812 = vrot.lane.b32.xlu1 %v1628_v54, %s1337_s21 }
 0x11c   :  { %v640_v56 = vpop.permute.xlu1 %639  ;;  %810 = vrot.lane.b32.xlu0 %v1632_v52, %s1337_s21  ;;  %v638_v57 = vpop.permute.xlu0 %637 }
 0x11d   :  { %v1639_v58 = vmin.f32 %v1478_v8, %v640_v56  ;;  %v699_v59 = vsel %vm697_vm5, %v638_v57, %v640_v56 }
 0x11e   :  { %v1643_v60 = vmin.f32 %v1481_v9, %v699_v59 }
 0x11f   :  { %816 = vrot.lane.b32.xlu1 %v1639_v58, %s1337_s21 }
 0x120   :  { %v644_v62 = vpop.permute.xlu1 %643  ;;  %814 = vrot.lane.b32.xlu0 %v1643_v60, %s1337_s21  ;;  %v642_v63 = vpop.permute.xlu0 %641 }
 0x121   :  { %v1650_v0 = vmin.f32 %v1488_v11, %v644_v62  ;;  %v700_v1 = vsel %vm697_vm5, %v642_v63, %v644_v62 }
 0x122   :  { %v1654_v2 = vmin.f32 %v1491_v12, %v700_v1 }
 0x123   :  { %820 = vrot.lane.b32.xlu1 %v1650_v0, %s1337_s21 }
 0x124   :  { %v648_v3 = vpop.permute.xlu1 %647  ;;  %818 = vrot.lane.b32.xlu0 %v1654_v2, %s1337_s21  ;;  %v646_v4 = vpop.permute.xlu0 %645 }
 0x125   :  { %v1661_v61 = vmin.f32 %v1498_v7, %v648_v3  ;;  %v701_v5 = vsel %vm697_vm5, %v646_v4, %v648_v3 }
 0x126   :  { %v1665_v6 = vmin.f32 %v1501_v14, %v701_v5 }
 0x127   :  { %824 = vrot.lane.b32.xlu1 %v1661_v61, %s1337_s21 }
 0x128   :  { %v652_v8 = vpop.permute.xlu1 %651  ;;  %822 = vrot.lane.b32.xlu0 %v1665_v6, %s1337_s21  ;;  %v650_v9 = vpop.permute.xlu0 %649 }
 0x129   :  { %v1672_v10 = vmin.f32 %v1508_v16, %v652_v8  ;;  %v702_v11 = vsel %vm697_vm5, %v650_v9, %v652_v8 }
 0x12a   :  { %v1676_v12 = vmin.f32 %v1511_v17, %v702_v11 }
 0x12b   :  { %828 = vrot.lane.b32.xlu1 %v1672_v10, %s1337_s21 }
 0x12c   :  { %v656_v13 = vpop.permute.xlu1 %655  ;;  %826 = vrot.lane.b32.xlu0 %v1676_v12, %s1337_s21  ;;  %v654_v7 = vpop.permute.xlu0 %653 }
 0x12d   :  { %v1683_v14 = vmin.f32 %v1518_v19, %v656_v13  ;;  %v703_v15 = vsel %vm697_vm5, %v654_v7, %v656_v13 }
 0x12e   :  { %v1687_v16 = vmin.f32 %v1521_v21, %v703_v15 }
 0x12f   :  { %832 = vrot.lane.b32.xlu1 %v1683_v14, %s1337_s21 }
 0x130   :  { %830 = vrot.lane.b32.xlu0 %v1687_v16, %s1337_s21 }
 0x131   :  { %v660_v17 = vpop.permute.xlu1 %659  ;;  %v658_v18 = vpop.permute.xlu0 %657 }
 0x132   :  { %v1694_v22 = vmin.f32 %v1528_v23, %v660_v17  ;;  %v704_v25 = vsel %vm697_vm5, %v658_v18, %v660_v17 }
 0x133   :  { %v1698_v19 = vmin.f32 %v1531_v24, %v704_v25 }
 0x134   :  { %836 = vrot.lane.b32.xlu1 %v1694_v22, %s1337_s21 }
 0x135   :  { %v664_v21 = vpop.permute.xlu1 %663  ;;  %834 = vrot.lane.b32.xlu0 %v1698_v19, %s1337_s21  ;;  %v662_v27 = vpop.permute.xlu0 %661 }
 0x136   :  { %v1705_v31 = vmin.f32 %v1538_v20, %v664_v21  ;;  %v705_v35 = vsel %vm697_vm5, %v662_v27, %v664_v21 }
 0x137   :  { %v1709_v23 = vmin.f32 %v1541_v26, %v705_v35 }
 0x138   :  { %840 = vrot.lane.b32.xlu1 %v1705_v31, %s1337_s21 }
 0x139   :  { %v668_v24 = vpop.permute.xlu1 %667  ;;  %838 = vrot.lane.b32.xlu0 %v1709_v23, %s1337_s21  ;;  %v666_v37 = vpop.permute.xlu0 %665 }
 0x13a   :  { %v1716_v40 = vmin.f32 %v1548_v29, %v668_v24  ;;  %v706_v43 = vsel %vm697_vm5, %v666_v37, %v668_v24 }
 0x13b   :  { %v1720_v20 = vmin.f32 %v1551_v30, %v706_v43 }
 0x13c   :  { %844 = vrot.lane.b32.xlu1 %v1716_v40, %s1337_s21 }
 0x13d   :  { %v672_v26 = vpop.permute.xlu1 %671  ;;  %842 = vrot.lane.b32.xlu0 %v1720_v20, %s1337_s21  ;;  %v670_v45 = vpop.permute.xlu0 %669 }
 0x13e   :  { %v1727_v48 = vmin.f32 %v1558_v32, %v672_v26  ;;  %v707_v51 = vsel %vm697_vm5, %v670_v45, %v672_v26 }
 0x13f   :  { %v1731_v29 = vmin.f32 %v1561_v34, %v707_v51 }
 0x140   :  { %848 = vrot.lane.b32.xlu1 %v1727_v48, %s1337_s21 }
 0x141   :  { %v676_v30 = vpop.permute.xlu1 %675  ;;  %846 = vrot.lane.b32.xlu0 %v1731_v29, %s1337_s21  ;;  %v674_v53 = vpop.permute.xlu0 %673 }
 0x142   :  { %v1738_v55 = vmin.f32 %v1568_v36, %v676_v30  ;;  %v708_v56 = vsel %vm697_vm5, %v674_v53, %v676_v30 }
 0x143   :  { %v1742_v32 = vmin.f32 %v1571_v28, %v708_v56 }
 0x144   :  { %852 = vrot.lane.b32.xlu1 %v1738_v55, %s1337_s21 }
 0x145   :  { %v680_v34 = vpop.permute.xlu1 %679  ;;  %850 = vrot.lane.b32.xlu0 %v1742_v32, %s1337_s21  ;;  %v678_v57 = vpop.permute.xlu0 %677 }
 0x146   :  { %v1749_v59 = vmin.f32 %v1578_v33, %v680_v34  ;;  %v709_v62 = vsel %vm697_vm5, %v678_v57, %v680_v34 }
 0x147   :  { %v1753_v36 = vmin.f32 %v1581_v39, %v709_v62 }
 0x148   :  { %856 = vrot.lane.b32.xlu1 %v1749_v59, %s1337_s21 }
 0x149   :  { %v684_v28 = vpop.permute.xlu1 %683  ;;  %854 = vrot.lane.b32.xlu0 %v1753_v36, %s1337_s21  ;;  %v682_v63 = vpop.permute.xlu0 %681 }
 0x14a   :  { %v1760_v1 = vmin.f32 %v1588_v41, %v684_v28  ;;  %v710_v3 = vsel %vm697_vm5, %v682_v63, %v684_v28 }
 0x14b   :  { %v1764_v33 = vmin.f32 %v1591_v42, %v710_v3 }
 0x14c   :  { %860 = vrot.lane.b32.xlu1 %v1760_v1, %s1337_s21 }
 0x14d   :  { %v688_v39 = vpop.permute.xlu1 %687  ;;  %858 = vrot.lane.b32.xlu0 %v1764_v33, %s1337_s21  ;;  %v686_v4 = vpop.permute.xlu0 %685 }
 0x14e   :  { %v1771_v5 = vmin.f32 %v1598_v44, %v688_v39  ;;  %v711_v8 = vsel %vm697_vm5, %v686_v4, %v688_v39 }
 0x14f   :  { %v1775_v41 = vmin.f32 %v1601_v38, %v711_v8 }
 0x150   :  { %864 = vrot.lane.b32.xlu1 %v1771_v5, %s1337_s21 }
 0x151   :  { %v692_v42 = vpop.permute.xlu1 %691  ;;  %862 = vrot.lane.b32.xlu0 %v1775_v41, %s1337_s21  ;;  %v690_v9 = vpop.permute.xlu0 %689 }
 0x152   :  { %v1782_v11 = vmin.f32 %v1608_v46, %v692_v42  ;;  %v712_v13 = vsel %vm697_vm5, %v690_v9, %v692_v42 }
 0x153   :  { %v1786_v44 = vmin.f32 %v1611_v47, %v712_v13 }
 0x154   :  { %868 = vrot.lane.b32.xlu1 %v1782_v11, %s1337_s21 }
 0x155   :  { %v696_v38 = vpop.permute.xlu1 %695  ;;  %866 = vrot.lane.b32.xlu0 %v1786_v44, %s1337_s21  ;;  %v694_v7 = vpop.permute.xlu0 %693 }
 0x156   :  { %v1793_v15 = vmin.f32 %v1618_v49, %v696_v38  ;;  %v713_v17 = vsel %vm697_vm5, %v694_v7, %v696_v38 }
 0x157   :  { %v1797_v46 = vmin.f32 %v1621_v50, %v713_v17 }
 0x158   :  { %872 = vrot.lane.b32.xlu1 %v1793_v15, %s1337_s21 }
 0x159   :  { %870 = vrot.lane.b32.xlu0 %v1797_v46, %s1337_s21 }
 0x18d   :  { %v813_v47 = vpop.permute.xlu1 %812 }
 0x18e   :  { %v1804_v18 = vmin.f32 %v1628_v54, %v813_v47  ;;  %v811_v25 = vpop.permute.xlu0 %810 }
 0x18f   :  { %v875_v49 = vsel %vm874_vm6, %v811_v25, %v813_v47 }
 0x190   :  { %v1808_v21 = vmin.f32 %v1632_v52, %v875_v49  ;;  %989 = vrot.lane.b32.xlu1 %v1804_v18, %s1338_s22 }
 0x191   :  { %v817_v50 = vpop.permute.xlu1 %816 }
 0x192   :  { %v1813_v27 = vmin.f32 %v1639_v58, %v817_v50  ;;  %987 = vrot.lane.b32.xlu0 %v1808_v21, %s1338_s22  ;;  %v815_v35 = vpop.permute.xlu0 %814 }
 0x193   :  { %v876_v54 = vsel %vm874_vm6, %v815_v35, %v817_v50 }
 0x194   :  { %v1819_v24 = vmin.f32 %v1643_v60, %v876_v54  ;;  %993 = vrot.lane.b32.xlu1 %v1813_v27, %s1338_s22 }
 0x195   :  { %v821_v52 = vpop.permute.xlu1 %820 }
 0x196   :  { %v1824_v37 = vmin.f32 %v1650_v0, %v821_v52  ;;  %991 = vrot.lane.b32.xlu0 %v1819_v24, %s1338_s22  ;;  %v819_v58 = vpop.permute.xlu0 %818 }
 0x197   :  { %v877_v43 = vsel %vm874_vm6, %v819_v58, %v821_v52 }
 0x198   :  { %v1830_v26 = vmin.f32 %v1654_v2, %v877_v43  ;;  %997 = vrot.lane.b32.xlu1 %v1824_v37, %s1338_s22 }
 0x199   :  { %v825_v60 = vpop.permute.xlu1 %824 }
 0x19a   :  { %v1835_v45 = vmin.f32 %v1661_v61, %v825_v60  ;;  %995 = vrot.lane.b32.xlu0 %v1830_v26, %s1338_s22  ;;  %v823_v0 = vpop.permute.xlu0 %822 }
 0x19b   :  { %v878_v51 = vsel %vm874_vm6, %v823_v0, %v825_v60 }
 0x19c   :  { %v1841_v30 = vmin.f32 %v1665_v6, %v878_v51  ;;  %1001 = vrot.lane.b32.xlu1 %v1835_v45, %s1338_s22 }
 0x19d   :  { %v829_v2 = vpop.permute.xlu1 %828 }
 0x19e   :  { %v1846_v53 = vmin.f32 %v1672_v10, %v829_v2  ;;  %999 = vrot.lane.b32.xlu0 %v1841_v30, %s1338_s22  ;;  %v827_v61 = vpop.permute.xlu0 %826 }
 0x19f   :  { %v879_v56 = vsel %vm874_vm6, %v827_v61, %v829_v2 }
 0x1a0   :  { %v1852_v34 = vmin.f32 %v1676_v12, %v879_v56  ;;  %1005 = vrot.lane.b32.xlu1 %v1846_v53, %s1338_s22 }
 0x1a1   :  { %v833_v6 = vpop.permute.xlu1 %832 }
 0x1a2   :  { %v1857_v57 = vmin.f32 %v1683_v14, %v833_v6  ;;  %1003 = vrot.lane.b32.xlu0 %v1852_v34, %s1338_s22  ;;  %v831_v10 = vpop.permute.xlu0 %830 }
 0x1a3   :  { %v880_v62 = vsel %vm874_vm6, %v831_v10, %v833_v6 }
 0x1a4   :  { %v1863_v28 = vmin.f32 %v1687_v16, %v880_v62  ;;  %1009 = vrot.lane.b32.xlu1 %v1857_v57, %s1338_s22 }
 0x1a6   :  { %v837_v12 = vpop.permute.xlu1 %836  ;;  %1007 = vrot.lane.b32.xlu0 %v1863_v28, %s1338_s22 }
 0x1a7   :  { %v1870_v63 = vmin.f32 %v1694_v22, %v837_v12  ;;  %v835_v14 = vpop.permute.xlu0 %834 }
 0x1a8   :  { %v881_v3 = vsel %vm874_vm6, %v835_v14, %v837_v12 }
 0x1a9   :  { %v1874_v39 = vmin.f32 %v1698_v19, %v881_v3  ;;  %1013 = vrot.lane.b32.xlu1 %v1870_v63, %s1338_s22 }
 0x1aa   :  { %v841_v16 = vpop.permute.xlu1 %840 }
 0x1ab   :  { %v1879_v4 = vmin.f32 %v1705_v31, %v841_v16  ;;  %1011 = vrot.lane.b32.xlu0 %v1874_v39, %s1338_s22  ;;  %v839_v8 = vpop.permute.xlu0 %838 }
 0x1ac   :  { %v882_v22 = vsel %vm874_vm6, %v839_v8, %v841_v16 }
 0x1ad   :  { %v1885_v42 = vmin.f32 %v1709_v23, %v882_v22  ;;  %1017 = vrot.lane.b32.xlu1 %v1879_v4, %s1338_s22 }
 0x1ae   :  { %v845_v19 = vpop.permute.xlu1 %844 }
 0x1af   :  { %v1890_v9 = vmin.f32 %v1716_v40, %v845_v19  ;;  %1015 = vrot.lane.b32.xlu0 %v1885_v42, %s1338_s22  ;;  %v843_v31 = vpop.permute.xlu0 %842 }
 0x1b0   :  { %v883_v13 = vsel %vm874_vm6, %v843_v31, %v845_v19 }
 0x1b1   :  { %v1896_v38 = vmin.f32 %v1720_v20, %v883_v13  ;;  %1021 = vrot.lane.b32.xlu1 %v1890_v9, %s1338_s22 }
 0x1b2   :  { %v849_v23 = vpop.permute.xlu1 %848 }
 0x1b3   :  { %v1901_v7 = vmin.f32 %v1727_v48, %v849_v23  ;;  %1019 = vrot.lane.b32.xlu0 %v1896_v38, %s1338_s22  ;;  %v847_v40 = vpop.permute.xlu0 %846 }
 0x1b4   :  { %v884_v17 = vsel %vm874_vm6, %v847_v40, %v849_v23 }
 0x1b5   :  { %v1907_v47 = vmin.f32 %v1731_v29, %v884_v17  ;;  %1025 = vrot.lane.b32.xlu1 %v1901_v7, %s1338_s22 }
 0x1b6   :  { %v853_v20 = vpop.permute.xlu1 %852 }
 0x1b7   :  { %v1912_v25 = vmin.f32 %v1738_v55, %v853_v20  ;;  %1023 = vrot.lane.b32.xlu0 %v1907_v47, %s1338_s22  ;;  %v851_v48 = vpop.permute.xlu0 %850 }
 0x1b8   :  { %v885_v49 = vsel %vm874_vm6, %v851_v48, %v853_v20 }
 0x1b9   :  { %v1918_v50 = vmin.f32 %v1742_v32, %v885_v49  ;;  %1029 = vrot.lane.b32.xlu1 %v1912_v25, %s1338_s22 }
 0x1ba   :  { %v857_v29 = vpop.permute.xlu1 %856 }
 0x1bb   :  { %v1923_v35 = vmin.f32 %v1749_v59, %v857_v29  ;;  %1027 = vrot.lane.b32.xlu0 %v1918_v50, %s1338_s22  ;;  %v855_v55 = vpop.permute.xlu0 %854 }
 0x1bc   :  { %v886_v54 = vsel %vm874_vm6, %v855_v55, %v857_v29 }
 0x1bd   :  { %v1929_v52 = vmin.f32 %v1753_v36, %v886_v54  ;;  %1033 = vrot.lane.b32.xlu1 %v1923_v35, %s1338_s22 }
 0x1be   :  { %v861_v32 = vpop.permute.xlu1 %860 }
 0x1bf   :  { %v1934_v58 = vmin.f32 %v1760_v1, %v861_v32  ;;  %1031 = vrot.lane.b32.xlu0 %v1929_v52, %s1338_s22  ;;  %v859_v59 = vpop.permute.xlu0 %858 }
 0x1c0   :  { %v887_v43 = vsel %vm874_vm6, %v859_v59, %v861_v32 }
 0x1c1   :  { %v1940_v60 = vmin.f32 %v1764_v33, %v887_v43  ;;  %1037 = vrot.lane.b32.xlu1 %v1934_v58, %s1338_s22 }
 0x1c2   :  { %v865_v36 = vpop.permute.xlu1 %864 }
 0x1c3   :  { %v1945_v0 = vmin.f32 %v1771_v5, %v865_v36  ;;  %1035 = vrot.lane.b32.xlu0 %v1940_v60, %s1338_s22  ;;  %v863_v1 = vpop.permute.xlu0 %862 }
 0x1c4   :  { %v888_v51 = vsel %vm874_vm6, %v863_v1, %v865_v36 }
 0x1c5   :  { %v1951_v2 = vmin.f32 %v1775_v41, %v888_v51  ;;  %1041 = vrot.lane.b32.xlu1 %v1945_v0, %s1338_s22 }
 0x1c6   :  { %v869_v33 = vpop.permute.xlu1 %868 }
 0x1c7   :  { %v1956_v61 = vmin.f32 %v1782_v11, %v869_v33  ;;  %1039 = vrot.lane.b32.xlu0 %v1951_v2, %s1338_s22  ;;  %v867_v5 = vpop.permute.xlu0 %866 }
 0x1c8   :  { %v889_v56 = vsel %vm874_vm6, %v867_v5, %v869_v33 }
 0x1c9   :  { %v1962_v6 = vmin.f32 %v1786_v44, %v889_v56  ;;  %1045 = vrot.lane.b32.xlu1 %v1956_v61, %s1338_s22 }
 0x1ca   :  { %v873_v41 = vpop.permute.xlu1 %872 }
 0x1cb   :  { %v1967_v10 = vmin.f32 %v1793_v15, %v873_v41  ;;  %1043 = vrot.lane.b32.xlu0 %v1962_v6, %s1338_s22  ;;  %v871_v11 = vpop.permute.xlu0 %870 }
 0x1cc   :  { %v890_v62 = vsel %vm874_vm6, %v871_v11, %v873_v41 }
 0x1cd   :  { %v1973_v12 = vmin.f32 %v1797_v46, %v890_v62  ;;  %1049 = vrot.lane.b32.xlu1 %v1967_v10, %s1338_s22 }
 0x1cf   :  { %1047 = vrot.lane.b32.xlu0 %v1973_v12, %s1338_s22 }
 0x202   :  { %v990_v44 = vpop.permute.xlu1 %989 }
 0x203   :  { %v1101_v15 = vmin.f32 %v1804_v18, %v990_v44 }
 0x204   :  { %v988_v14 = vpop.permute.xlu0 %987 }
 0x205   :  { %v1052_v3 = vsel %vm1051_vm7, %v988_v14, %v990_v44  ;;  %1166 = vrot.lane.b32.xlu1 %v1101_v15, %s1339_s23 }
 0x206   :  { %v1983_v16 = vmin.f32 %v1808_v21, %v1052_v3  ;;  %v994_v46 = vpop.permute.xlu1 %993 }
 0x207   :  { %v1103_v8 = vmin.f32 %v1813_v27, %v994_v46 }
 0x208   :  { %1164 = vrot.lane.b32.xlu0 %v1983_v16, %s1339_s23  ;;  %v992_v22 = vpop.permute.xlu0 %991 }
 0x209   :  { %v1053_v19 = vsel %vm1051_vm7, %v992_v22, %v994_v46  ;;  %1170 = vrot.lane.b32.xlu1 %v1103_v8, %s1339_s23 }
 0x20a   :  { %v1991_v18 = vmin.f32 %v1819_v24, %v1053_v19  ;;  %v998_v31 = vpop.permute.xlu1 %997 }
 0x20b   :  { %v1105_v13 = vmin.f32 %v1824_v37, %v998_v31 }
 0x20c   :  { %1168 = vrot.lane.b32.xlu0 %v1991_v18, %s1339_s23  ;;  %v996_v21 = vpop.permute.xlu0 %995 }
 0x20d   :  { %v1054_v27 = vsel %vm1051_vm7, %v996_v21, %v998_v31  ;;  %1174 = vrot.lane.b32.xlu1 %v1105_v13, %s1339_s23 }
 0x20e   :  { %v1999_v23 = vmin.f32 %v1830_v26, %v1054_v27  ;;  %v1002_v40 = vpop.permute.xlu1 %1001 }
 0x20f   :  { %v1107_v17 = vmin.f32 %v1835_v45, %v1002_v40 }
 0x210   :  { %1172 = vrot.lane.b32.xlu0 %v1999_v23, %s1339_s23  ;;  %v1000_v24 = vpop.permute.xlu0 %999 }
 0x211   :  { %v1055_v37 = vsel %vm1051_vm7, %v1000_v24, %v1002_v40  ;;  %1178 = vrot.lane.b32.xlu1 %v1107_v17, %s1339_s23 }
 0x212   :  { %v2007_v20 = vmin.f32 %v1841_v30, %v1055_v37  ;;  %v1006_v48 = vpop.permute.xlu1 %1005 }
 0x213   :  { %v1109_v49 = vmin.f32 %v1846_v53, %v1006_v48 }
 0x214   :  { %1176 = vrot.lane.b32.xlu0 %v2007_v20, %s1339_s23  ;;  %v1004_v26 = vpop.permute.xlu0 %1003 }
 0x215   :  { %v1056_v45 = vsel %vm1051_vm7, %v1004_v26, %v1006_v48  ;;  %1182 = vrot.lane.b32.xlu1 %v1109_v49, %s1339_s23 }
 0x216   :  { %v2015_v29 = vmin.f32 %v1852_v34, %v1056_v45  ;;  %v1010_v55 = vpop.permute.xlu1 %1009 }
 0x217   :  { %v1111_v54 = vmin.f32 %v1857_v57, %v1010_v55 }
 0x218   :  { %1180 = vrot.lane.b32.xlu0 %v2015_v29, %s1339_s23  ;;  %v1008_v30 = vpop.permute.xlu0 %1007 }
 0x219   :  { %v1057_v53 = vsel %vm1051_vm7, %v1008_v30, %v1010_v55  ;;  %1186 = vrot.lane.b32.xlu1 %v1111_v54, %s1339_s23 }
 0x21a   :  { %v2023_v32 = vmin.f32 %v1863_v28, %v1057_v53 }
 0x21b   :  { %v1014_v59 = vpop.permute.xlu1 %1013 }
 0x21c   :  { %v1113_v43 = vmin.f32 %v1870_v63, %v1014_v59  ;;  %1184 = vrot.lane.b32.xlu0 %v2023_v32, %s1339_s23 }
 0x21d   :  { %v1012_v34 = vpop.permute.xlu0 %1011 }
 0x21e   :  { %v1058_v57 = vsel %vm1051_vm7, %v1012_v34, %v1014_v59  ;;  %1190 = vrot.lane.b32.xlu1 %v1113_v43, %s1339_s23 }
 0x21f   :  { %v2031_v36 = vmin.f32 %v1874_v39, %v1058_v57  ;;  %v1018_v1 = vpop.permute.xlu1 %1017 }
 0x220   :  { %v1115_v51 = vmin.f32 %v1879_v4, %v1018_v1 }
 0x221   :  { %1188 = vrot.lane.b32.xlu0 %v2031_v36, %s1339_s23  ;;  %v1016_v28 = vpop.permute.xlu0 %1015 }
 0x222   :  { %v1059_v63 = vsel %vm1051_vm7, %v1016_v28, %v1018_v1  ;;  %1194 = vrot.lane.b32.xlu1 %v1115_v51, %s1339_s23 }
 0x223   :  { %v2039_v33 = vmin.f32 %v1885_v42, %v1059_v63  ;;  %v1022_v5 = vpop.permute.xlu1 %1021 }
 0x224   :  { %v1117_v56 = vmin.f32 %v1890_v9, %v1022_v5 }
 0x225   :  { %1192 = vrot.lane.b32.xlu0 %v2039_v33, %s1339_s23  ;;  %v1020_v39 = vpop.permute.xlu0 %1019 }
 0x226   :  { %v1060_v4 = vsel %vm1051_vm7, %v1020_v39, %v1022_v5  ;;  %1198 = vrot.lane.b32.xlu1 %v1117_v56, %s1339_s23 }
 0x227   :  { %v2047_v41 = vmin.f32 %v1896_v38, %v1060_v4  ;;  %v1026_v11 = vpop.permute.xlu1 %1025 }
 0x228   :  { %v1119_v62 = vmin.f32 %v1901_v7, %v1026_v11 }
 0x229   :  { %1196 = vrot.lane.b32.xlu0 %v2047_v41, %s1339_s23  ;;  %v1024_v42 = vpop.permute.xlu0 %1023 }
 0x22a   :  { %v1061_v9 = vsel %vm1051_vm7, %v1024_v42, %v1026_v11  ;;  %1202 = vrot.lane.b32.xlu1 %v1119_v62, %s1339_s23 }
 0x22b   :  { %v2055_v44 = vmin.f32 %v1907_v47, %v1061_v9  ;;  %v1030_v15 = vpop.permute.xlu1 %1029 }
 0x22c   :  { %v1121_v14 = vmin.f32 %v1912_v25, %v1030_v15 }
 0x22d   :  { %1200 = vrot.lane.b32.xlu0 %v2055_v44, %s1339_s23  ;;  %v1028_v38 = vpop.permute.xlu0 %1027 }
 0x22e   :  { %v1062_v7 = vsel %vm1051_vm7, %v1028_v38, %v1030_v15  ;;  %1206 = vrot.lane.b32.xlu1 %v1121_v14, %s1339_s23 }
 0x22f   :  { %v2063_v3 = vmin.f32 %v1918_v50, %v1062_v7  ;;  %v1034_v46 = vpop.permute.xlu1 %1033 }
 0x230   :  { %v1123_v8 = vmin.f32 %v1923_v35, %v1034_v46 }
 0x231   :  { %1204 = vrot.lane.b32.xlu0 %v2063_v3, %s1339_s23  ;;  %v1032_v47 = vpop.permute.xlu0 %1031 }
 0x232   :  { %v1063_v25 = vsel %vm1051_vm7, %v1032_v47, %v1034_v46  ;;  %1210 = vrot.lane.b32.xlu1 %v1123_v8, %s1339_s23 }
 0x233   :  { %v2071_v22 = vmin.f32 %v1929_v52, %v1063_v25  ;;  %v1038_v19 = vpop.permute.xlu1 %1037 }
 0x234   :  { %v1125_v31 = vmin.f32 %v1934_v58, %v1038_v19 }
 0x235   :  { %1208 = vrot.lane.b32.xlu0 %v2071_v22, %s1339_s23  ;;  %v1036_v50 = vpop.permute.xlu0 %1035 }
 0x236   :  { %v1064_v35 = vsel %vm1051_vm7, %v1036_v50, %v1038_v19  ;;  %1214 = vrot.lane.b32.xlu1 %v1125_v31, %s1339_s23 }
 0x237   :  { %v2079_v13 = vmin.f32 %v1940_v60, %v1064_v35  ;;  %v1042_v21 = vpop.permute.xlu1 %1041 }
 0x238   :  { %v1127_v27 = vmin.f32 %v1945_v0, %v1042_v21 }
 0x239   :  { %1212 = vrot.lane.b32.xlu0 %v2079_v13, %s1339_s23  ;;  %v1040_v52 = vpop.permute.xlu0 %1039 }
 0x23a   :  { %v1065_v58 = vsel %vm1051_vm7, %v1040_v52, %v1042_v21  ;;  %1218 = vrot.lane.b32.xlu1 %v1127_v27, %s1339_s23 }
 0x23b   :  { %v2087_v40 = vmin.f32 %v1951_v2, %v1065_v58  ;;  %v1046_v17 = vpop.permute.xlu1 %1045 }
 0x23c   :  { %v1129_v24 = vmin.f32 %v1956_v61, %v1046_v17 }
 0x23d   :  { %1216 = vrot.lane.b32.xlu0 %v2087_v40, %s1339_s23  ;;  %v1044_v60 = vpop.permute.xlu0 %1043 }
 0x23e   :  { %v1066_v0 = vsel %vm1051_vm7, %v1044_v60, %v1046_v17  ;;  %1222 = vrot.lane.b32.xlu1 %v1129_v24, %s1339_s23 }
 0x23f   :  { %v2095_v37 = vmin.f32 %v1962_v6, %v1066_v0  ;;  %v1050_v48 = vpop.permute.xlu1 %1049 }
 0x240   :  { %v1131_v49 = vmin.f32 %v1967_v10, %v1050_v48 }
 0x241   :  { %1220 = vrot.lane.b32.xlu0 %v2095_v37, %s1339_s23  ;;  %v1048_v2 = vpop.permute.xlu0 %1047 }
 0x242   :  { %v1067_v61 = vsel %vm1051_vm7, %v1048_v2, %v1050_v48  ;;  %1226 = vrot.lane.b32.xlu1 %v1131_v49, %s1339_s23 }
 0x243   :  { %v2103_v26 = vmin.f32 %v1973_v12, %v1067_v61 }
 0x245   :  { %1224 = vrot.lane.b32.xlu0 %v2103_v26, %s1339_s23 }
 0x277   :  { %v1167_v45 = vpop.permute.xlu1 %1166 }
 0x27a   :  { %v1165_v6 = vpop.permute.xlu0 %1164 }
 0x27b   :  { %v1229_v55 = vsel %vm1228_vm8, %v1165_v6, %v1167_v45  ;;  %v1171_v10 = vpop.permute.xlu1 %1170 }
 0x27c   :  { %v1261_v54 = vmin.f32 %v1983_v16, %v1229_v55 }
 0x27e   :  { %1277 = vst [vmem:[%s2188_s1] sm:$0xff] %v1261_v54  ;;  %v1169_v30 = vpop.permute.xlu0 %1168 }
 0x27f   :  { %v1230_v53 = vsel %vm1228_vm8, %v1169_v30, %v1171_v10  ;;  %v1175_v12 = vpop.permute.xlu1 %1174 }
 0x280   :  { %v1262_v59 = vmin.f32 %v1991_v18, %v1230_v53 }
 0x282   :  { %1278 = vst [vmem:[%s2188_s1 + $0x8] sm:$0xff] %v1262_v59  ;;  %v1173_v43 = vpop.permute.xlu0 %1172 }
 0x283   :  { %v1231_v34 = vsel %vm1228_vm8, %v1173_v43, %v1175_v12  ;;  %v1179_v57 = vpop.permute.xlu1 %1178 }
 0x284   :  { %v1263_v16 = vmin.f32 %v1999_v23, %v1231_v34 }
 0x286   :  { %1279 = vst [vmem:[%s2188_s1 + $0x10] sm:$0xff] %v1263_v16  ;;  %v1177_v1 = vpop.permute.xlu0 %1176 }
 0x287   :  { %v1232_v51 = vsel %vm1228_vm8, %v1177_v1, %v1179_v57  ;;  %v1183_v28 = vpop.permute.xlu1 %1182 }
 0x288   :  { %v1264_v18 = vmin.f32 %v2007_v20, %v1232_v51 }
 0x28a   :  { %1280 = vst [vmem:[%s2188_s1 + $0x18] sm:$0xff] %v1264_v18  ;;  %v1181_v63 = vpop.permute.xlu0 %1180 }
 0x28b   :  { %v1233_v5 = vsel %vm1228_vm8, %v1181_v63, %v1183_v28  ;;  %v1187_v56 = vpop.permute.xlu1 %1186 }
 0x28c   :  { %v1265_v23 = vmin.f32 %v2015_v29, %v1233_v5 }
 0x28e   :  { %1281 = vst [vmem:[%s2188_s1 + $0x20] sm:$0xff] %v1265_v23  ;;  %v1185_v39 = vpop.permute.xlu0 %1184 }
 0x28f   :  { %v1234_v4 = vsel %vm1228_vm8, %v1185_v39, %v1187_v56 }
 0x290   :  { %v1266_v11 = vmin.f32 %v2023_v32, %v1234_v4  ;;  %v1191_v20 = vpop.permute.xlu1 %1190 }
 0x292   :  { %1282 = vst [vmem:[%s2188_s1 + $0x28] sm:$0xff] %v1266_v11 }
 0x293   :  { %v1189_v62 = vpop.permute.xlu0 %1188 }
 0x294   :  { %v1235_v42 = vsel %vm1228_vm8, %v1189_v62, %v1191_v20  ;;  %v1195_v9 = vpop.permute.xlu1 %1194 }
 0x295   :  { %v1267_v29 = vmin.f32 %v2031_v36, %v1235_v42 }
 0x297   :  { %1283 = vst [vmem:[%s2188_s1 + $0x30] sm:$0xff] %v1267_v29  ;;  %v1193_v15 = vpop.permute.xlu0 %1192 }
 0x298   :  { %v1236_v14 = vsel %vm1228_vm8, %v1193_v15, %v1195_v9  ;;  %v1199_v38 = vpop.permute.xlu1 %1198 }
 0x299   :  { %v1268_v32 = vmin.f32 %v2039_v33, %v1236_v14 }
 0x29b   :  { %1284 = vst [vmem:[%s2188_s1 + $0x38] sm:$0xff] %v1268_v32  ;;  %v1197_v7 = vpop.permute.xlu0 %1196 }
 0x29c   :  { %v1237_v46 = vsel %vm1228_vm8, %v1197_v7, %v1199_v38  ;;  %v1203_v8 = vpop.permute.xlu1 %1202 }
 0x29d   :  { %v1269_v36 = vmin.f32 %v2047_v41, %v1237_v46 }
 0x29f   :  { %1285 = vst [vmem:[%s2188_s1 + $0x40] sm:$0xff] %v1269_v36  ;;  %v1201_v47 = vpop.permute.xlu0 %1200 }
 0x2a0   :  { %v1238_v25 = vsel %vm1228_vm8, %v1201_v47, %v1203_v8  ;;  %v1207_v19 = vpop.permute.xlu1 %1206 }
 0x2a1   :  { %v1270_v33 = vmin.f32 %v2055_v44, %v1238_v25 }
 0x2a3   :  { %1286 = vst [vmem:[%s2188_s1 + $0x48] sm:$0xff] %v1270_v33  ;;  %v1205_v31 = vpop.permute.xlu0 %1204 }
 0x2a4   :  { %v1239_v50 = vsel %vm1228_vm8, %v1205_v31, %v1207_v19  ;;  %v1211_v35 = vpop.permute.xlu1 %1210 }
 0x2a5   :  { %v1271_v41 = vmin.f32 %v2063_v3, %v1239_v50 }
 0x2a7   :  { %1287 = vst [vmem:[%s2188_s1 + $0x50] sm:$0xff] %v1271_v41  ;;  %v1209_v21 = vpop.permute.xlu0 %1208 }
 0x2a8   :  { %v1240_v27 = vsel %vm1228_vm8, %v1209_v21, %v1211_v35  ;;  %v1215_v52 = vpop.permute.xlu1 %1214 }
 0x2a9   :  { %v1272_v44 = vmin.f32 %v2071_v22, %v1240_v27 }
 0x2ab   :  { %1288 = vst [vmem:[%s2188_s1 + $0x58] sm:$0xff] %v1272_v44  ;;  %v1213_v58 = vpop.permute.xlu0 %1212 }
 0x2ac   :  { %v1241_v17 = vsel %vm1228_vm8, %v1213_v58, %v1215_v52  ;;  %v1219_v24 = vpop.permute.xlu1 %1218 }
 0x2ad   :  { %v1273_v3 = vmin.f32 %v2079_v13, %v1241_v17 }
 0x2af   :  { %1289 = vst [vmem:[%s2188_s1 + $0x60] sm:$0xff] %v1273_v3  ;;  %v1217_v60 = vpop.permute.xlu0 %1216 }
 0x2b0   :  { %v1242_v0 = vsel %vm1228_vm8, %v1217_v60, %v1219_v24  ;;  %v1223_v22 = vpop.permute.xlu1 %1222 }
 0x2b1   :  { %v1274_v48 = vmin.f32 %v2087_v40, %v1242_v0 }
 0x2b3   :  { %1290 = vst [vmem:[%s2188_s1 + $0x68] sm:$0xff] %v1274_v48  ;;  %v1221_v49 = vpop.permute.xlu0 %1220 }
 0x2b4   :  { %v1243_v2 = vsel %vm1228_vm8, %v1221_v49, %v1223_v22  ;;  %v1227_v13 = vpop.permute.xlu1 %1226 }
 0x2b5   :  { %v1275_v61 = vmin.f32 %v2095_v37, %v1243_v2 }
 0x2b7   :  { %1291 = vst [vmem:[%s2188_s1 + $0x70] sm:$0xff] %v1275_v61  ;;  %v1225_v45 = vpop.permute.xlu0 %1224 }
 0x2b8   :  { %v1244_v6 = vsel %vm1228_vm8, %v1225_v45, %v1227_v13 }
 0x2b9   :  { %v1276_v40 = vmin.f32 %v2103_v26, %v1244_v6 }
 0x2bb   :  { %1292 = vst [vmem:[%s2188_s1 + $0x78] sm:$0xff] %v1276_v40 }
 0x2bc   :  { %1297 = vsyncpa [#allocation3], 1 }

// kernel: dehaze_filter.3
= control target key start
LH: loop header
LB: loop body
LE: loop exit
PB: predicated region body
PF: predicated region fallthrough
CT: control target
= control target key end

     0   :  { %v133_v0 = vlaneseq  ;;  %v11858_v1 = vmov 1.0   ;;  %v12069_v13 = vmov 0  ;;  %v12073_v20 = vmov 0  ;;  %s11838_s0 = inlined_call_operand.<no memory space> [shape: f32[1], index: 0, kind: input, shape index: {}]   ;;  %s11839_s1 = inlined_call_operand.vmem [shape: f32[3,128,128], index: 1, kind: input, shape index: {}]   ;;  %s11840_s2 = inlined_call_operand.vmem [shape: f32[128,128], index: 2, kind: input, shape index: {}]   ;;  %s11841_s3 = inlined_call_operand.hbm [shape: f32[3,128,128], index: 3, kind: output, shape index: {}]  }
   0x1   :  { %5888 = vmatprep.mubr.f32.mxu0 %v11858_v1  ;;  %v12075_v21 = vmov 0  ;;  %v8096_v24 = vmov 1.0|1.0   ;;  %v12081_v26 = vmov 0  ;;  %v12083_v27 = vmov 0 }
   0x2   :  { %v134_v2 = vshrl.u32 %v133_v0, 7  ;;  %v8121_v3 = vand.u32 127, %v133_v0  ;;  %v12087_v32 = vmov 0  ;;  %v12089_v33 = vmov 0 }
   0x3   :  { %v12094_v39 = vmov 0  ;;  %v12097_v40 = vmov 0 }
   0x4   :  { %v135_v4 = vadd.s32 8, %v134_v2  ;;  %v152_v5 = vsub.s32 %v134_v2, %v8121_v3  ;;  %v136_v6 = vadd.s32 16, %v134_v2  ;;  %v137_v7 = vadd.s32 24, %v134_v2 }
   0x5   :  { %v138_v8 = vadd.s32 32, %v134_v2  ;;  %v139_v9 = vadd.s32 40, %v134_v2  ;;  %v140_v10 = vadd.s32 48, %v134_v2  ;;  %v141_v11 = vadd.s32 56, %v134_v2 }
   0x6   :  { %v153_v12 = vsub.s32 %v135_v4, %v8121_v3  ;;  %vm8125_vm0 = vcmp.ge.s32.totalorder %v152_v5, 4294967236  ;;  %v154_v14 = vsub.s32 %v136_v6, %v8121_v3  ;;  %v155_v15 = vsub.s32 %v137_v7, %v8121_v3 }
   0x7   :  { %v12070_v13 = vsel %vm8125_vm0, 4294967295, %v12069_v13  ;;  %v156_v16 = vsub.s32 %v138_v8, %v8121_v3  ;;  %v157_v17 = vsub.s32 %v139_v9, %v8121_v3  ;;  %v159_v18 = vsub.s32 %v141_v11, %v8121_v3  ;;  %5944 = vmatprep.mubr.msk.f32.mxu1 %vm8125_vm0, %v11858_v1 }
   0x8   :  { %vm8137_vm1 = vcmp.ge.s32.totalorder %v153_v12, 4294967236  ;;  %vm8141_vm2 = vcmp.ge.s32.totalorder %v154_v14, 4294967236  ;;  %vm8145_vm3 = vcmp.ge.s32.totalorder %v155_v15, 4294967236  ;;  %v142_v22 = vadd.s32 64, %v134_v2 }
   0x9   :  { %v12074_v20 = vsel %vm8141_vm2, 4294967295, %v12073_v20  ;;  %v12076_v21 = vsel %vm8145_vm3, 4294967295, %v12075_v21  ;;  %vm8153_vm4 = vmpackc.low %vm8137_vm1, %vm8125_vm0  ;;  %vm8168_vm6 = vcmp.ge.s32.totalorder %v156_v16, 4294967236  ;;  %vm8172_vm7 = vcmp.ge.s32.totalorder %v157_v17, 4294967236 }
   0xa   :  { %7089 = vmatprep.subr.msk.bf16.mxu0 %vm8153_vm4, %v8096_v24  ;;  %vm8164_vm5 = vmpackc.low %vm8145_vm3, %vm8141_vm2  ;;  %v12082_v26 = vsel %vm8168_vm6, 4294967295, %v12081_v26  ;;  %v12084_v27 = vsel %vm8172_vm7, 4294967295, %v12083_v27  ;;  %v158_v28 = vsub.s32 %v140_v10, %v8121_v3  ;;  %v143_v29 = vadd.s32 72, %v134_v2 }
   0xb   :  { %7091 = vmatpush3.bf16.msk.msra.mxu0 %vm8153_vm4, %v8096_v24  ;;  %vm175_vm8 = vcmp.le.s32.totalorder %v159_v18, 60  ;;  %vm191_vm9 = vcmp.ge.s32.totalorder %v159_v18, 4294967236  ;;  %v160_v30 = vsub.s32 %v142_v22, %v8121_v3  ;;  %vm8188_vm10 = vmpackc.low %vm8172_vm7, %vm8168_vm6  ;;  %v144_v35 = vadd.s32 80, %v134_v2 }
   0xc   :  { %7093 = vmatprep.subr.msk.bf16.mxu0 %vm8164_vm5, %v8096_v24  ;;  %vm8192_vm11 = vcmp.ge.s32.totalorder %v158_v28, 4294967236  ;;  %vm8196_vm12 = vmand %vm175_vm8, %vm191_vm9  ;;  %v161_v34 = vsub.s32 %v143_v29, %v8121_v3  ;;  %v145_v36 = vadd.s32 88, %v134_v2  ;;  %v146_v38 = vadd.s32 96, %v134_v2 }
   0xd   :  { %v12088_v32 = vsel %vm8192_vm11, 4294967295, %v12087_v32  ;;  %v12090_v33 = vsel %vm8196_vm12, 4294967295, %v12089_v33  ;;  %vm176_vm13 = vcmp.le.s32.totalorder %v160_v30, 60  ;;  %vm192_vm14 = vcmp.ge.s32.totalorder %v160_v30, 4294967236  ;;  %vm8211_vm15 = vmpackc.low %vm8196_vm12, %vm8192_vm11 }
   0xe   :  { %12091 = vst [vmem:[#allocation6_spill] sm:$0xff] %v12090_v33  ;;  %vm8215_vm8 = vcmp.le.s32.totalorder %v161_v34, 60  ;;  %vm8219_vm9 = vmand %vm176_vm13, %vm192_vm14  ;;  %v162_v41 = vsub.s32 %v144_v35, %v8121_v3  ;;  %v163_v42 = vsub.s32 %v145_v36, %v8121_v3  ;;  %v147_v43 = vadd.s32 104, %v134_v2 }
   0xf   :  { %7095 = vmatpush3.bf16.msk.msra.mxu0 %vm8164_vm5, %v8096_v24  ;;  %v12095_v39 = vsel %vm8215_vm8, 4294967295, %v12094_v39  ;;  %v12098_v40 = vsel %vm8219_vm9, 4294967295, %v12097_v40 }
  0x10   :  { %7097 = vmatprep.subr.msk.bf16.mxu0 %vm8188_vm10, %v8096_v24  ;;  %12096 = vst [vmem:[#allocation7_spill] sm:$0xff] %v12095_v39  ;;  %12099 = vst [vmem:[#allocation8_spill] sm:$0xff] %v12098_v40 }
  0x13   :  { %7099 = vmatpush3.bf16.msk.msra.mxu0 %vm8188_vm10, %v8096_v24 }
  0x14   :  { %7101 = vmatprep.subr.msk.bf16.mxu0 %vm8211_vm15, %v8096_v24 }
  0x15   :  { %9 = vsyncpa [#allocation4], 0  ;;  %v164_v45 = vsub.s32 %v146_v38, %v8121_v3  ;;  %v148_v46 = vadd.s32 112, %v134_v2  ;;  %vm8240_vm14 = vcmp.le.s32.totalorder %v162_v41, 60  ;;  %v12102_v47 = vmov 0  ;;  %v67_v62 = vld [vmem:[%s11840_s2] sm:$0xff] }
  0x16   :  { %vm8235_vm13 = vmpackc.low %vm8215_vm8, %vm8219_vm9  ;;  %v12103_v47 = vsel %vm8240_vm14, 4294967295, %v12102_v47  ;;  %vm8244_vm0 = vcmp.le.s32.totalorder %v163_v42, 60  ;;  %v12104_v48 = vmov 0  ;;  %v165_v49 = vsub.s32 %v147_v43, %v8121_v3  ;;  %v68_v0 = vld [vmem:[%s11840_s2 + $0x8] sm:$0xff]  ;;  %v70_v6 = vld [vmem:[%s11840_s2 + $0x18] sm:$0xff] }
  0x17   :  { %v12105_v48 = vsel %vm8244_vm0, 4294967295, %v12104_v48  ;;  %v149_v50 = vadd.s32 120, %v134_v2  ;;  %7103 = vmatpush3.bf16.msk.msra.mxu0 %vm8211_vm15, %v8096_v24  ;;  %vm8259_vm8 = vmpackc.low %vm8244_vm0, %vm8240_vm14  ;;  %vm8263_vm9 = vcmp.le.s32.totalorder %v164_v45, 60  ;;  %v12108_v52 = vmov 0  ;;  %v69_v2 = vld [vmem:[%s11840_s2 + $0x10] sm:$0xff]  ;;  %v71_v7 = vld [vmem:[%s11840_s2 + $0x20] sm:$0xff] }
  0x18   :  { %7105 = vmatprep.subr.msk.bf16.mxu0 %vm8235_vm13, %v8096_v24  ;;  %v12109_v52 = vsel %vm8263_vm9, 4294967295, %v12108_v52  ;;  %vm8267_vm12 = vcmp.le.s32.totalorder %v165_v49, 60  ;;  %v12111_v53 = vmov 0  ;;  %v166_v54 = vsub.s32 %v148_v46, %v8121_v3  ;;  %v72_v14 = vld [vmem:[%s11840_s2 + $0x28] sm:$0xff]  ;;  %v73_v15 = vld [vmem:[%s11840_s2 + $0x30] sm:$0xff]  ;;  %v74_v30 = vld [vmem:[%s11840_s2 + $0x38] sm:$0xff] }
  0x19   :  { %12110 = vst [vmem:[#allocation9_spill] sm:$0xff] %v12109_v52  ;;  %v12112_v53 = vsel %vm8267_vm12, 4294967295, %v12111_v53  ;;  %v167_v55 = vsub.s32 %v149_v50, %v8121_v3  ;;  %vm8283_vm0 = vmpackc.low %vm8267_vm12, %vm8263_vm9  ;;  %v12115_v57 = vmov 0  ;;  %v8329_v60 = vstv %s11838_s0  ;;  %v75_v34 = vld [vmem:[%s11840_s2 + $0x40] sm:$0xff]  ;;  %v76_v45 = vld [vmem:[%s11840_s2 + $0x48] sm:$0xff] }
  0x1a   :  { %vm8287_vm14 = vcmp.le.s32.totalorder %v166_v54, 60  ;;  %12121 = vst [vmem:[#allocation10_spill] sm:$0xff] %v8329_v60  ;;  %7797 = vrcp.f32 %v8329_v60  ;;  %v77_v46 = vld [vmem:[%s11840_s2 + $0x50] sm:$0xff]  ;;  %v10431_v58 = vld [vmem:[%s11839_s1 + $0x40] sm:$0xff] }
  0x1b   :  { %7107 = vmatpush3.bf16.msk.msra.mxu0 %vm8235_vm13, %v8096_v24  ;;  %v12116_v57 = vsel %vm8287_vm14, 4294967295, %v12115_v57  ;;  %vm8291_vm11 = vcmp.le.s32.totalorder %v167_v55, 60 }
  0x1c   :  { %7109 = vmatprep.subr.msk.bf16.mxu0 %vm8259_vm8, %v8096_v24  ;;  %vm8305_vm12 = vmpackc.low %vm8291_vm11, %vm8287_vm14 }
  0x1f   :  { %7111 = vmatpush3.bf16.msk.msra.mxu0 %vm8259_vm8, %v8096_v24 }
  0x20   :  { %7113 = vmatprep.subr.msk.bf16.mxu0 %vm8283_vm0, %v8096_v24 }
  0x23   :  { %7115 = vmatpush3.bf16.msk.msra.mxu0 %vm8283_vm0, %v8096_v24 }
  0x24   :  { %7117 = vmatprep.subr.msk.bf16.mxu0 %vm8305_vm12, %v8096_v24  ;;  %v8356_v61 = vpop.eup %7797 }
  0x25   :  { %v85_v63 = vmul.f32 %v8356_v61, %v67_v62  ;;  %v86_v3 = vmul.f32 %v8356_v61, %v68_v0  ;;  %v87_v5 = vmul.f32 %v8356_v61, %v69_v2  ;;  %v88_v9 = vmul.f32 %v8356_v61, %v70_v6  ;;  %v78_v0 = vld [vmem:[%s11840_s2 + $0x58] sm:$0xff]  ;;  %v79_v2 = vld [vmem:[%s11840_s2 + $0x60] sm:$0xff] }
  0x26   :  { %v89_v12 = vmul.f32 %v8356_v61, %v71_v7  ;;  %v90_v18 = vmul.f32 %v8356_v61, %v72_v14  ;;  %v91_v29 = vmul.f32 %v8356_v61, %v73_v15  ;;  %v92_v38 = vmul.f32 %v8356_v61, %v74_v30 }
  0x27   :  { %7119 = vmatpush3.bf16.msk.msra.mxu0 %vm8305_vm12, %v8096_v24  ;;  %v101_v4 = vmul.f32 0.95, %v85_v63  ;;  %v102_v8 = vmul.f32 0.95, %v86_v3  ;;  %v103_v11 = vmul.f32 0.95, %v87_v5  ;;  %v93_v43 = vmul.f32 %v8356_v61, %v75_v34 }
  0x28   :  { %7153 = vmatprep.subr.msk.bf16.mxu0 %vm8153_vm4, %v8096_v24  ;;  %v104_v17 = vmul.f32 0.95, %v88_v9  ;;  %v105_v28 = vmul.f32 0.95, %v89_v12  ;;  %v106_v36 = vmul.f32 0.95, %v90_v18  ;;  %v94_v54 = vmul.f32 %v8356_v61, %v76_v45 }
  0x29   :  { %v8401_v10 = vsub.f32 1.0, %v101_v4  ;;  %v8414_v16 = vsub.f32 1.0, %v102_v8  ;;  %v8421_v22 = vsub.f32 1.0, %v103_v11  ;;  %v107_v42 = vmul.f32 0.95, %v91_v29  ;;  %v80_v9 = vld [vmem:[%s11840_s2 + $0x68] sm:$0xff] }
  0x2a   :  { %5889 = vmatmul.mubr.f32.vlgmr.msra.gmra.mrb[0].mxu0 %v11858_v1  ;;  %v8434_v35 = vsub.f32 1.0, %v104_v17  ;;  %v8441_v41 = vsub.f32 1.0, %v105_v28  ;;  %v8454_v49 = vsub.f32 1.0, %v106_v36  ;;  %v108_v50 = vmul.f32 0.95, %v92_v38  ;;  %v81_v11 = vld [vmem:[%s11840_s2 + $0x70] sm:$0xff] }
  0x2b   :  { %7155 = vmatpush3.bf16.msk.msra.mxu0 %vm8153_vm4, %v8096_v24  ;;  %5891 = vmatprep.mubr.f32.mxu0 %v11858_v1  ;;  %v8461_v55 = vsub.f32 1.0, %v107_v42  ;;  %v109_v62 = vmul.f32 0.95, %v93_v43  ;;  %v95_v63 = vmul.f32 %v8356_v61, %v77_v46  ;;  %v110_v4 = vmul.f32 0.95, %v94_v54  ;;  %v82_v29 = vld [vmem:[%s11840_s2 + $0x78] sm:$0xff] }
  0x2c   :  { %7157 = vmatprep.subr.msk.bf16.mxu0 %vm8164_vm5, %v8096_v24  ;;  %v8474_v3 = vsub.f32 1.0, %v108_v50  ;;  %v96_v5 = vmul.f32 %v8356_v61, %v78_v0  ;;  %v97_v8 = vmul.f32 %v8356_v61, %v79_v2  ;;  %v98_v15 = vmul.f32 %v8356_v61, %v80_v9  ;;  %v8548_v50 = vld [vmem:[%s11839_s1] sm:$0xff]  ;;  %v8558_v54 = vld [vmem:[%s11839_s1 + $0x8] sm:$0xff]  ;;  %v8638_v9 = vld [vmem:[%s11839_s1 + $0x50] sm:$0xff] }
  0x2d   :  { %v8481_v6 = vsub.f32 1.0, %v109_v62  ;;  %v111_v7 = vmul.f32 0.95, %v95_v63  ;;  %v8494_v12 = vsub.f32 1.0, %v110_v4  ;;  %v99_v28 = vmul.f32 %v8356_v61, %v81_v11  ;;  %v8566_v62 = vld [vmem:[%s11839_s1 + $0x10] sm:$0xff]  ;;  %v8576_v63 = vld [vmem:[%s11839_s1 + $0x18] sm:$0xff] }
  0x2e   :  { %5892 = vmatmul.mubr.f32.gmra.mrb[2].mxu0 %v11858_v1  ;;  %v112_v14 = vmul.f32 0.95, %v96_v5  ;;  %v113_v18 = vmul.f32 0.95, %v97_v8  ;;  %v114_v34 = vmul.f32 0.95, %v98_v15  ;;  %v100_v36 = vmul.f32 %v8356_v61, %v82_v29 }
  0x2f   :  { %7159 = vmatpush3.bf16.msk.msra.mxu0 %vm8164_vm5, %v8096_v24  ;;  %5894 = vmatprep.mubr.f32.mxu0 %v11858_v1  ;;  %v8501_v17 = vsub.f32 1.0, %v111_v7  ;;  %v115_v42 = vmul.f32 0.95, %v99_v28  ;;  %v8584_v0 = vld [vmem:[%s11839_s1 + $0x20] sm:$0xff]  ;;  %v8594_v2 = vld [vmem:[%s11839_s1 + $0x28] sm:$0xff]  ;;  %v8602_v4 = vld [vmem:[%s11839_s1 + $0x30] sm:$0xff]  ;;  %v1182_v29 = vmul.f32 %v8401_v10, %v8548_v50 }
  0x30   :  { %7161 = vmatprep.subr.msk.bf16.mxu0 %vm8188_vm10, %v8096_v24  ;;  %v8511_v30 = vsub.f32 1.0, %v112_v14  ;;  %v8518_v38 = vsub.f32 1.0, %v113_v18  ;;  %v8524_v43 = vsub.f32 1.0, %v114_v34  ;;  %v116_v45 = vmul.f32 0.95, %v100_v36  ;;  %v8612_v5 = vld [vmem:[%s11839_s1 + $0x38] sm:$0xff] }
  0x31   :  { %v8530_v61 = vsub.f32 1.0, %v115_v42  ;;  %v8620_v7 = vld [vmem:[%s11839_s1 + $0x40] sm:$0xff]  ;;  %v8630_v8 = vld [vmem:[%s11839_s1 + $0x48] sm:$0xff]  ;;  %v8648_v11 = vld [vmem:[%s11839_s1 + $0x58] sm:$0xff]  ;;  %v1183_v34 = vmul.f32 %v8414_v16, %v8558_v54  ;;  %v1184_v36 = vmul.f32 %v8421_v22, %v8566_v62  ;;  %v1185_v42 = vmul.f32 %v8434_v35, %v8576_v63 }
  0x32   :  { %5895 = vmatmul.mubr.f32.gmra.mrb[4].mxu0 %v11858_v1  ;;  %12122 = vst [vmem:[#allocation11_spill] sm:$0xff] %v8511_v30  ;;  %12123 = vst [vmem:[#allocation12_spill] sm:$0xff] %v8518_v38  ;;  %v8536_v46 = vsub.f32 1.0, %v116_v45  ;;  %v8656_v14 = vld [vmem:[%s11839_s1 + $0x60] sm:$0xff]  ;;  %v8666_v15 = vld [vmem:[%s11839_s1 + $0x68] sm:$0xff]  ;;  %v1186_v45 = vmul.f32 %v8441_v41, %v8584_v0 }
  0x33   :  { %7163 = vmatpush3.bf16.msk.msra.mxu0 %vm8188_vm10, %v8096_v24  ;;  %5897 = vmatprep.mubr.f32.mxu0 %v11858_v1  ;;  %v8674_v18 = vld [vmem:[%s11839_s1 + $0x70] sm:$0xff]  ;;  %v8684_v28 = vld [vmem:[%s11839_s1 + $0x78] sm:$0xff] }
  0x34   :  { %7165 = vmatprep.subr.msk.bf16.mxu0 %vm8211_vm15, %v8096_v24 }
  0x36   :  { %5898 = vmatmul.mubr.f32.gmra.mrb[6].mxu0 %v11858_v1 }
  0x37   :  { %7167 = vmatpush3.bf16.msk.msra.mxu0 %vm8211_vm15, %v8096_v24  ;;  %5900 = vmatprep.mubr.f32.mxu0 %v11858_v1 }
  0x38   :  { %7169 = vmatprep.subr.msk.bf16.mxu0 %vm8235_vm13, %v8096_v24 }
  0x3a   :  { %5901 = vmatmul.mubr.f32.gmra.mrb[8].mxu0 %v11858_v1 }
  0x3b   :  { %7171 = vmatpush3.bf16.msk.msra.mxu0 %vm8235_vm13, %v8096_v24  ;;  %5903 = vmatprep.mubr.f32.mxu0 %v11858_v1 }
  0x3c   :  { %7173 = vmatprep.subr.msk.bf16.mxu0 %vm8259_vm8, %v8096_v24 }
  0x3e   :  { %5904 = vmatmul.mubr.f32.gmra.mrb[10].mxu0 %v11858_v1 }
  0x3f   :  { %7175 = vmatpush3.bf16.msk.msra.mxu0 %vm8259_vm8, %v8096_v24  ;;  %5906 = vmatprep.mubr.f32.mxu0 %v11858_v1 }
  0x40   :  { %7177 = vmatprep.subr.msk.bf16.mxu0 %vm8283_vm0, %v8096_v24 }
  0x42   :  { %5907 = vmatmul.mubr.f32.gmra.mrb[12].mxu0 %v11858_v1 }
  0x43   :  { %7179 = vmatpush3.bf16.msk.msra.mxu0 %vm8283_vm0, %v8096_v24  ;;  %5909 = vmatprep.mubr.f32.mxu0 %v11858_v1 }
  0x44   :  { %7181 = vmatprep.subr.msk.bf16.mxu0 %vm8305_vm12, %v8096_v24 }
  0x46   :  { %5910 = vmatmul.mubr.f32.gmra.mrb[14].mxu0 %v11858_v1 }
  0x47   :  { %7183 = vmatpush3.bf16.msk.msra.mxu0 %vm8305_vm12, %v8096_v24  ;;  %6000 = vmatprep.mubr.f32.mxu0 %v8401_v10 }
  0x48   :  { %7217 = vmatprep.subr.msk.bf16.mxu0 %vm8153_vm4, %v8096_v24 }
  0x4a   :  { %6001 = vmatmul.mubr.f32.vlgmr.msra.gmra.mrb[16].mxu0 %v8414_v16 }
  0x4b   :  { %7219 = vmatpush3.bf16.msk.msra.mxu0 %vm8153_vm4, %v8096_v24  ;;  %6003 = vmatprep.mubr.f32.mxu0 %v8421_v22 }
  0x4c   :  { %7221 = vmatprep.subr.msk.bf16.mxu0 %vm8164_vm5, %v8096_v24 }
  0x4e   :  { %6004 = vmatmul.mubr.f32.gmra.mrb[18].mxu0 %v8434_v35 }
  0x4f   :  { %7223 = vmatpush3.bf16.msk.msra.mxu0 %vm8164_vm5, %v8096_v24  ;;  %6006 = vmatprep.mubr.f32.mxu0 %v8441_v41 }
  0x50   :  { %7225 = vmatprep.subr.msk.bf16.mxu0 %vm8188_vm10, %v8096_v24 }
  0x52   :  { %6007 = vmatmul.mubr.f32.gmra.mrb[20].mxu0 %v8454_v49 }
  0x53   :  { %7227 = vmatpush3.bf16.msk.msra.mxu0 %vm8188_vm10, %v8096_v24  ;;  %6009 = vmatprep.mubr.f32.mxu0 %v8461_v55 }
  0x54   :  { %7229 = vmatprep.subr.msk.bf16.mxu0 %vm8211_vm15, %v8096_v24 }
  0x56   :  { %6010 = vmatmul.mubr.f32.gmra.mrb[22].mxu0 %v8474_v3 }
  0x57   :  { %7231 = vmatpush3.bf16.msk.msra.mxu0 %vm8211_vm15, %v8096_v24  ;;  %6012 = vmatprep.mubr.f32.mxu0 %v8481_v6 }
  0x58   :  { %7233 = vmatprep.subr.msk.bf16.mxu0 %vm8235_vm13, %v8096_v24 }
  0x5a   :  { %6013 = vmatmul.mubr.f32.gmra.mrb[24].mxu0 %v8494_v12 }
  0x5b   :  { %7235 = vmatpush3.bf16.msk.msra.mxu0 %vm8235_vm13, %v8096_v24  ;;  %6015 = vmatprep.mubr.f32.mxu0 %v8501_v17 }
  0x5c   :  { %7237 = vmatprep.subr.msk.bf16.mxu0 %vm8259_vm8, %v8096_v24 }
  0x5e   :  { %6016 = vmatmul.mubr.f32.gmra.mrb[26].mxu0 %v8511_v30 }
  0x5f   :  { %7239 = vmatpush3.bf16.msk.msra.mxu0 %vm8259_vm8, %v8096_v24  ;;  %6018 = vmatprep.mubr.f32.mxu0 %v8518_v38 }
  0x60   :  { %7241 = vmatprep.subr.msk.bf16.mxu0 %vm8283_vm0, %v8096_v24 }
  0x62   :  { %6019 = vmatmul.mubr.f32.gmra.mrb[28].mxu0 %v8524_v43 }
  0x63   :  { %7243 = vmatpush3.bf16.msk.msra.mxu0 %vm8283_vm0, %v8096_v24  ;;  %6021 = vmatprep.mubr.f32.mxu0 %v8530_v61 }
  0x64   :  { %7245 = vmatprep.subr.msk.bf16.mxu0 %vm8305_vm12, %v8096_v24 }
  0x66   :  { %6022 = vmatmul.mubr.f32.gmra.mrb[30].mxu0 %v8536_v46 }
  0x67   :  { %7247 = vmatpush3.bf16.msk.msra.mxu0 %vm8305_vm12, %v8096_v24  ;;  %6112 = vmatprep.mubr.f32.mxu0 %v8548_v50 }
  0x68   :  { %7281 = vmatprep.subr.msk.bf16.mxu0 %vm8153_vm4, %v8096_v24 }
  0x6a   :  { %6113 = vmatmul.mubr.f32.vlgmr.msra.gmra.mrb[32].mxu0 %v8558_v54 }
  0x6b   :  { %7283 = vmatpush3.bf16.msk.msra.mxu0 %vm8153_vm4, %v8096_v24  ;;  %6115 = vmatprep.mubr.f32.mxu0 %v8566_v62 }
  0x6c   :  { %7285 = vmatprep.subr.msk.bf16.mxu0 %vm8164_vm5, %v8096_v24 }
  0x6e   :  { %6116 = vmatmul.mubr.f32.gmra.mrb[34].mxu0 %v8576_v63 }
  0x6f   :  { %7287 = vmatpush3.bf16.msk.msra.mxu0 %vm8164_vm5, %v8096_v24  ;;  %6118 = vmatprep.mubr.f32.mxu0 %v8584_v0 }
  0x70   :  { %7289 = vmatprep.subr.msk.bf16.mxu0 %vm8188_vm10, %v8096_v24 }
  0x72   :  { %6119 = vmatmul.mubr.f32.gmra.mrb[36].mxu0 %v8594_v2 }
  0x73   :  { %7291 = vmatpush3.bf16.msk.msra.mxu0 %vm8188_vm10, %v8096_v24  ;;  %6121 = vmatprep.mubr.f32.mxu0 %v8602_v4 }
  0x74   :  { %7293 = vmatprep.subr.msk.bf16.mxu0 %vm8211_vm15, %v8096_v24 }
  0x76   :  { %6122 = vmatmul.mubr.f32.gmra.mrb[38].mxu0 %v8612_v5 }
  0x77   :  { %7295 = vmatpush3.bf16.msk.msra.mxu0 %vm8211_vm15, %v8096_v24  ;;  %6124 = vmatprep.mubr.f32.mxu0 %v8620_v7 }
  0x78   :  { %7297 = vmatprep.subr.msk.bf16.mxu0 %vm8235_vm13, %v8096_v24 }
  0x7a   :  { %6125 = vmatmul.mubr.f32.gmra.mrb[40].mxu0 %v8630_v8 }
  0x7b   :  { %7299 = vmatpush3.bf16.msk.msra.mxu0 %vm8235_vm13, %v8096_v24  ;;  %6127 = vmatprep.mubr.f32.mxu0 %v8638_v9 }
  0x7c   :  { %7301 = vmatprep.subr.msk.bf16.mxu0 %vm8259_vm8, %v8096_v24 }
  0x7e   :  { %6128 = vmatmul.mubr.f32.gmra.mrb[42].mxu0 %v8648_v11 }
  0x7f   :  { %7303 = vmatpush3.bf16.msk.msra.mxu0 %vm8259_vm8, %v8096_v24  ;;  %6130 = vmatprep.mubr.f32.mxu0 %v8656_v14 }
  0x80   :  { %7305 = vmatprep.subr.msk.bf16.mxu0 %vm8283_vm0, %v8096_v24 }
  0x82   :  { %6131 = vmatmul.mubr.f32.gmra.mrb[44].mxu0 %v8666_v15 }
  0x83   :  { %7307 = vmatpush3.bf16.msk.msra.mxu0 %vm8283_vm0, %v8096_v24  ;;  %6133 = vmatprep.mubr.f32.mxu0 %v8674_v18 }
  0x84   :  { %7309 = vmatprep.subr.msk.bf16.mxu0 %vm8305_vm12, %v8096_v24 }
  0x86   :  { %6134 = vmatmul.mubr.f32.gmra.mrb[46].mxu0 %v8684_v28 }
  0x87   :  { %7311 = vmatpush3.bf16.msk.msra.mxu0 %vm8305_vm12, %v8096_v24  ;;  %6224 = vmatprep.mubr.f32.mxu0 %v1182_v29  ;;  %v1187_v29 = vmul.f32 %v8454_v49, %v8594_v2 }
  0x88   :  { %7345 = vmatprep.subr.msk.bf16.mxu0 %vm8153_vm4, %v8096_v24 }
  0x8a   :  { %6225 = vmatmul.mubr.f32.vlgmr.msra.gmra.mrb[48].mxu0 %v1183_v34  ;;  %v1188_v34 = vmul.f32 %v8461_v55, %v8602_v4 }
  0x8b   :  { %7347 = vmatpush3.bf16.msk.msra.mxu0 %vm8153_vm4, %v8096_v24  ;;  %6227 = vmatprep.mubr.f32.mxu0 %v1184_v36  ;;  %v1189_v36 = vmul.f32 %v8474_v3, %v8612_v5 }
  0x8c   :  { %7349 = vmatprep.subr.msk.bf16.mxu0 %vm8164_vm5, %v8096_v24 }
  0x8e   :  { %6228 = vmatmul.mubr.f32.gmra.mrb[50].mxu0 %v1185_v42  ;;  %v1190_v42 = vmul.f32 %v8481_v6, %v8620_v7 }
  0x8f   :  { %7351 = vmatpush3.bf16.msk.msra.mxu0 %vm8164_vm5, %v8096_v24  ;;  %6230 = vmatprep.mubr.f32.mxu0 %v1186_v45  ;;  %v1191_v45 = vmul.f32 %v8494_v12, %v8630_v8 }
  0x90   :  { %7353 = vmatprep.subr.msk.bf16.mxu0 %vm8188_vm10, %v8096_v24 }
  0x92   :  { %6231 = vmatmul.mubr.f32.gmra.mrb[52].mxu0 %v1187_v29  ;;  %v1192_v29 = vmul.f32 %v8501_v17, %v8638_v9 }
  0x93   :  { %7355 = vmatpush3.bf16.msk.msra.mxu0 %vm8188_vm10, %v8096_v24  ;;  %6233 = vmatprep.mubr.f32.mxu0 %v1188_v34  ;;  %v1193_v34 = vmul.f32 %v8511_v30, %v8648_v11 }
  0x94   :  { %7357 = vmatprep.subr.msk.bf16.mxu0 %vm8211_vm15, %v8096_v24 }
  0x96   :  { %6234 = vmatmul.mubr.f32.gmra.mrb[54].mxu0 %v1189_v36  ;;  %v1194_v36 = vmul.f32 %v8518_v38, %v8656_v14 }
  0x97   :  { %7359 = vmatpush3.bf16.msk.msra.mxu0 %vm8211_vm15, %v8096_v24  ;;  %6236 = vmatprep.mubr.f32.mxu0 %v1190_v42  ;;  %v1195_v42 = vmul.f32 %v8524_v43, %v8666_v15 }
  0x98   :  { %7361 = vmatprep.subr.msk.bf16.mxu0 %vm8235_vm13, %v8096_v24 }
  0x9a   :  { %6237 = vmatmul.mubr.f32.gmra.mrb[56].mxu0 %v1191_v45  ;;  %v1196_v45 = vmul.f32 %v8530_v61, %v8674_v18 }
  0x9b   :  { %7363 = vmatpush3.bf16.msk.msra.mxu0 %vm8235_vm13, %v8096_v24  ;;  %6239 = vmatprep.mubr.f32.mxu0 %v1192_v29  ;;  %v1197_v29 = vmul.f32 %v8536_v46, %v8684_v28 }
  0x9c   :  { %7365 = vmatprep.subr.msk.bf16.mxu0 %vm8259_vm8, %v8096_v24 }
  0x9e   :  { %6240 = vmatmul.mubr.f32.gmra.mrb[58].mxu0 %v1193_v34  ;;  %v1504_v34 = vmul.f32 %v8548_v50, %v8548_v50  ;;  %v1507_v50 = vmul.f32 %v8576_v63, %v8576_v63  ;;  %v1510_v63 = vmul.f32 %v8602_v4, %v8602_v4  ;;  %v1513_v4 = vmul.f32 %v8630_v8, %v8630_v8 }
  0x9f   :  { %7367 = vmatpush3.bf16.msk.msra.mxu0 %vm8259_vm8, %v8096_v24  ;;  %6242 = vmatprep.mubr.f32.mxu0 %v1194_v36  ;;  %v1505_v36 = vmul.f32 %v8558_v54, %v8558_v54  ;;  %v1508_v54 = vmul.f32 %v8584_v0, %v8584_v0  ;;  %v1511_v0 = vmul.f32 %v8612_v5, %v8612_v5 }
  0xa0   :  { %7369 = vmatprep.subr.msk.bf16.mxu0 %vm8283_vm0, %v8096_v24  ;;  %v1514_v5 = vmul.f32 %v8638_v9, %v8638_v9  ;;  %v1516_v8 = vmul.f32 %v8656_v14, %v8656_v14  ;;  %v1517_v9 = vmul.f32 %v8666_v15, %v8666_v15  ;;  %v1519_v14 = vmul.f32 %v8684_v28, %v8684_v28  ;;  %v8853_v15 = vld [vmem:[%s11839_s1 + $0x80] sm:$0xff]  ;;  %v8870_v28 = vld [vmem:[%s11839_s1 + $0x90] sm:$0xff] }
  0xa2   :  { %6243 = vmatmul.mubr.f32.gmra.mrb[60].mxu0 %v1195_v42  ;;  %v1506_v42 = vmul.f32 %v8566_v62, %v8566_v62  ;;  %v1509_v62 = vmul.f32 %v8594_v2, %v8594_v2  ;;  %v1512_v2 = vmul.f32 %v8620_v7, %v8620_v7  ;;  %v1515_v7 = vmul.f32 %v8648_v11, %v8648_v11 }
  0xa3   :  { %7371 = vmatpush3.bf16.msk.msra.mxu0 %vm8283_vm0, %v8096_v24  ;;  %6245 = vmatprep.mubr.f32.mxu0 %v1196_v45  ;;  %v1518_v11 = vmul.f32 %v8674_v18, %v8674_v18  ;;  %v8862_v18 = vld [vmem:[%s11839_s1 + $0x88] sm:$0xff]  ;;  %v8880_v45 = vld [vmem:[%s11839_s1 + $0x98] sm:$0xff] }
  0xa4   :  { %7373 = vmatprep.subr.msk.bf16.mxu0 %vm8305_vm12, %v8096_v24 }
  0xa6   :  { %6246 = vmatmul.mubr.f32.gmra.mrb[62].mxu0 %v1197_v29  ;;  %v8888_v29 = vld [vmem:[%s11839_s1 + $0xa0] sm:$0xff] }
  0xa7   :  { %7375 = vmatpush3.bf16.msk.msra.mxu0 %vm8305_vm12, %v8096_v24  ;;  %6336 = vmatprep.mubr.f32.mxu0 %v1504_v34  ;;  %v8898_v34 = vld [vmem:[%s11839_s1 + $0xa8] sm:$0xff] }
  0xa8   :  { %7409 = vmatprep.subr.msk.bf16.mxu0 %vm8153_vm4, %v8096_v24 }
  0xaa   :  { %6337 = vmatmul.mubr.f32.vlgmr.msra.gmra.mrb[64].mxu0 %v1505_v36  ;;  %v8906_v36 = vld [vmem:[%s11839_s1 + $0xb0] sm:$0xff] }
  0xab   :  { %7411 = vmatpush3.bf16.msk.msra.mxu0 %vm8153_vm4, %v8096_v24  ;;  %6339 = vmatprep.mubr.f32.mxu0 %v1506_v42  ;;  %v8916_v42 = vld [vmem:[%s11839_s1 + $0xb8] sm:$0xff] }
  0xac   :  { %7413 = vmatprep.subr.msk.bf16.mxu0 %vm8164_vm5, %v8096_v24 }
  0xae   :  { %6340 = vmatmul.mubr.f32.gmra.mrb[66].mxu0 %v1507_v50  ;;  %v8924_v50 = vld [vmem:[%s11839_s1 + $0xc0] sm:$0xff] }
  0xaf   :  { %7415 = vmatpush3.bf16.msk.msra.mxu0 %vm8164_vm5, %v8096_v24  ;;  %6342 = vmatprep.mubr.f32.mxu0 %v1508_v54  ;;  %v8934_v54 = vld [vmem:[%s11839_s1 + $0xc8] sm:$0xff] }
  0xb0   :  { %7417 = vmatprep.subr.msk.bf16.mxu0 %vm8188_vm10, %v8096_v24 }
  0xb2   :  { %6343 = vmatmul.mubr.f32.gmra.mrb[68].mxu0 %v1509_v62  ;;  %v8942_v62 = vld [vmem:[%s11839_s1 + $0xd0] sm:$0xff] }
  0xb3   :  { %7419 = vmatpush3.bf16.msk.msra.mxu0 %vm8188_vm10, %v8096_v24  ;;  %6345 = vmatprep.mubr.f32.mxu0 %v1510_v63  ;;  %v8952_v63 = vld [vmem:[%s11839_s1 + $0xd8] sm:$0xff] }
  0xb4   :  { %7421 = vmatprep.subr.msk.bf16.mxu0 %vm8211_vm15, %v8096_v24 }
  0xb6   :  { %6346 = vmatmul.mubr.f32.gmra.mrb[70].mxu0 %v1511_v0  ;;  %v8960_v0 = vld [vmem:[%s11839_s1 + $0xe0] sm:$0xff] }
  0xb7   :  { %7423 = vmatpush3.bf16.msk.msra.mxu0 %vm8211_vm15, %v8096_v24  ;;  %6348 = vmatprep.mubr.f32.mxu0 %v1512_v2  ;;  %v8970_v2 = vld [vmem:[%s11839_s1 + $0xe8] sm:$0xff] }
  0xb8   :  { %7425 = vmatprep.subr.msk.bf16.mxu0 %vm8235_vm13, %v8096_v24 }
  0xba   :  { %6349 = vmatmul.mubr.f32.gmra.mrb[72].mxu0 %v1513_v4  ;;  %v8978_v4 = vld [vmem:[%s11839_s1 + $0xf0] sm:$0xff] }
  0xbb   :  { %7427 = vmatpush3.bf16.msk.msra.mxu0 %vm8235_vm13, %v8096_v24  ;;  %6351 = vmatprep.mubr.f32.mxu0 %v1514_v5  ;;  %v8988_v5 = vld [vmem:[%s11839_s1 + $0xf8] sm:$0xff] }
  0xbc   :  { %7429 = vmatprep.subr.msk.bf16.mxu0 %vm8259_vm8, %v8096_v24 }
  0xbe   :  { %6352 = vmatmul.mubr.f32.gmra.mrb[74].mxu0 %v1515_v7  ;;  %v2468_v7 = vmul.f32 %v8853_v15, %v8401_v10 }
  0xbf   :  { %7431 = vmatpush3.bf16.msk.msra.mxu0 %vm8259_vm8, %v8096_v24  ;;  %6354 = vmatprep.mubr.f32.mxu0 %v1516_v8  ;;  %v2469_v8 = vmul.f32 %v8862_v18, %v8414_v16 }
  0xc0   :  { %7433 = vmatprep.subr.msk.bf16.mxu0 %vm8283_vm0, %v8096_v24 }
  0xc2   :  { %6355 = vmatmul.mubr.f32.gmra.mrb[76].mxu0 %v1517_v9  ;;  %v2470_v9 = vmul.f32 %v8870_v28, %v8421_v22 }
  0xc3   :  { %7435 = vmatpush3.bf16.msk.msra.mxu0 %vm8283_vm0, %v8096_v24  ;;  %6357 = vmatprep.mubr.f32.mxu0 %v1518_v11  ;;  %v2471_v11 = vmul.f32 %v8880_v45, %v8434_v35 }
  0xc4   :  { %7437 = vmatprep.subr.msk.bf16.mxu0 %vm8305_vm12, %v8096_v24 }
  0xc6   :  { %6358 = vmatmul.mubr.f32.gmra.mrb[78].mxu0 %v1519_v14  ;;  %v2472_v14 = vmul.f32 %v8888_v29, %v8441_v41 }
  0xc7   :  { %7439 = vmatpush3.bf16.msk.msra.mxu0 %vm8305_vm12, %v8096_v24  ;;  %6448 = vmatprep.mubr.f32.mxu0 %v8853_v15 }
  0xc8   :  { %7473 = vmatprep.subr.msk.bf16.mxu0 %vm8153_vm4, %v8096_v24 }
  0xca   :  { %6449 = vmatmul.mubr.f32.vlgmr.msra.gmra.mrb[80].mxu0 %v8862_v18 }
  0xcb   :  { %7475 = vmatpush3.bf16.msk.msra.mxu0 %vm8153_vm4, %v8096_v24  ;;  %6451 = vmatprep.mubr.f32.mxu0 %v8870_v28 }
  0xcc   :  { %7477 = vmatprep.subr.msk.bf16.mxu0 %vm8164_vm5, %v8096_v24 }
  0xce   :  { %6452 = vmatmul.mubr.f32.gmra.mrb[82].mxu0 %v8880_v45 }
  0xcf   :  { %7479 = vmatpush3.bf16.msk.msra.mxu0 %vm8164_vm5, %v8096_v24  ;;  %6454 = vmatprep.mubr.f32.mxu0 %v8888_v29 }
  0xd0   :  { %7481 = vmatprep.subr.msk.bf16.mxu0 %vm8188_vm10, %v8096_v24 }
  0xd2   :  { %6455 = vmatmul.mubr.f32.gmra.mrb[84].mxu0 %v8898_v34 }
  0xd3   :  { %7483 = vmatpush3.bf16.msk.msra.mxu0 %vm8188_vm10, %v8096_v24  ;;  %6457 = vmatprep.mubr.f32.mxu0 %v8906_v36 }
  0xd4   :  { %7485 = vmatprep.subr.msk.bf16.mxu0 %vm8211_vm15, %v8096_v24 }
  0xd6   :  { %6458 = vmatmul.mubr.f32.gmra.mrb[86].mxu0 %v8916_v42 }
  0xd7   :  { %7487 = vmatpush3.bf16.msk.msra.mxu0 %vm8211_vm15, %v8096_v24  ;;  %6460 = vmatprep.mubr.f32.mxu0 %v8924_v50 }
  0xd8   :  { %7489 = vmatprep.subr.msk.bf16.mxu0 %vm8235_vm13, %v8096_v24 }
  0xda   :  { %6461 = vmatmul.mubr.f32.gmra.mrb[88].mxu0 %v8934_v54 }
  0xdb   :  { %7491 = vmatpush3.bf16.msk.msra.mxu0 %vm8235_vm13, %v8096_v24  ;;  %6463 = vmatprep.mubr.f32.mxu0 %v8942_v62 }
  0xdc   :  { %7493 = vmatprep.subr.msk.bf16.mxu0 %vm8259_vm8, %v8096_v24 }
  0xde   :  { %6464 = vmatmul.mubr.f32.gmra.mrb[90].mxu0 %v8952_v63 }
  0xdf   :  { %7495 = vmatpush3.bf16.msk.msra.mxu0 %vm8259_vm8, %v8096_v24  ;;  %6466 = vmatprep.mubr.f32.mxu0 %v8960_v0 }
  0xe0   :  { %7497 = vmatprep.subr.msk.bf16.mxu0 %vm8283_vm0, %v8096_v24 }
  0xe2   :  { %6467 = vmatmul.mubr.f32.gmra.mrb[92].mxu0 %v8970_v2 }
  0xe3   :  { %7499 = vmatpush3.bf16.msk.msra.mxu0 %vm8283_vm0, %v8096_v24  ;;  %6469 = vmatprep.mubr.f32.mxu0 %v8978_v4 }
  0xe4   :  { %7501 = vmatprep.subr.msk.bf16.mxu0 %vm8305_vm12, %v8096_v24 }
  0xe6   :  { %6470 = vmatmul.mubr.f32.gmra.mrb[94].mxu0 %v8988_v5 }
  0xe7   :  { %7503 = vmatpush3.bf16.msk.msra.mxu0 %vm8305_vm12, %v8096_v24  ;;  %6560 = vmatprep.mubr.f32.mxu0 %v2468_v7  ;;  %v2473_v7 = vmul.f32 %v8898_v34, %v8454_v49 }
  0xe8   :  { %7537 = vmatprep.subr.msk.bf16.mxu0 %vm8153_vm4, %v8096_v24 }
  0xea   :  { %6561 = vmatmul.mubr.f32.vlgmr.msra.gmra.mrb[96].mxu0 %v2469_v8  ;;  %v2474_v8 = vmul.f32 %v8906_v36, %v8461_v55 }
  0xeb   :  { %7539 = vmatpush3.bf16.msk.msra.mxu0 %vm8153_vm4, %v8096_v24  ;;  %6563 = vmatprep.mubr.f32.mxu0 %v2470_v9  ;;  %v2475_v9 = vmul.f32 %v8916_v42, %v8474_v3 }
  0xec   :  { %7541 = vmatprep.subr.msk.bf16.mxu0 %vm8164_vm5, %v8096_v24 }
  0xee   :  { %6564 = vmatmul.mubr.f32.gmra.mrb[98].mxu0 %v2471_v11  ;;  %v2476_v11 = vmul.f32 %v8924_v50, %v8481_v6 }
  0xef   :  { %7543 = vmatpush3.bf16.msk.msra.mxu0 %vm8164_vm5, %v8096_v24  ;;  %6566 = vmatprep.mubr.f32.mxu0 %v2472_v14  ;;  %v2477_v14 = vmul.f32 %v8934_v54, %v8494_v12 }
  0xf0   :  { %7545 = vmatprep.subr.msk.bf16.mxu0 %vm8188_vm10, %v8096_v24 }
  0xf2   :  { %6567 = vmatmul.mubr.f32.gmra.mrb[100].mxu0 %v2473_v7  ;;  %v2478_v7 = vmul.f32 %v8942_v62, %v8501_v17 }
  0xf3   :  { %7547 = vmatpush3.bf16.msk.msra.mxu0 %vm8188_vm10, %v8096_v24  ;;  %6569 = vmatprep.mubr.f32.mxu0 %v2474_v8  ;;  %v2479_v8 = vmul.f32 %v8952_v63, %v8511_v30 }
  0xf4   :  { %7549 = vmatprep.subr.msk.bf16.mxu0 %vm8211_vm15, %v8096_v24 }
  0xf6   :  { %6570 = vmatmul.mubr.f32.gmra.mrb[102].mxu0 %v2475_v9  ;;  %v2480_v9 = vmul.f32 %v8960_v0, %v8518_v38 }
  0xf7   :  { %7551 = vmatpush3.bf16.msk.msra.mxu0 %vm8211_vm15, %v8096_v24  ;;  %6572 = vmatprep.mubr.f32.mxu0 %v2476_v11 }
  0xf8   :  { %7553 = vmatprep.subr.msk.bf16.mxu0 %vm8235_vm13, %v8096_v24 }
  0xfa   :  { %6573 = vmatmul.mubr.f32.gmra.mrb[104].mxu0 %v2477_v14  ;;  %v2481_v14 = vmul.f32 %v8970_v2, %v8524_v43 }
  0xfb   :  { %7555 = vmatpush3.bf16.msk.msra.mxu0 %vm8235_vm13, %v8096_v24  ;;  %6575 = vmatprep.mubr.f32.mxu0 %v2478_v7  ;;  %v2482_v7 = vmul.f32 %v8978_v4, %v8530_v61 }
  0xfc   :  { %7557 = vmatprep.subr.msk.bf16.mxu0 %vm8259_vm8, %v8096_v24 }
  0xfd   :  { %v5890_v11 = vpop.f32.mrb[0].mxu0 }
  0xfe   :  { %v314_v1 = vpop.f32.mrb[1].mxu0  ;;  %6576 = vmatmul.mubr.f32.gmra.mrb[106].mxu0 %v2479_v8 }
  0xff   :  { %v7120_v60 = vpack.c.bf16 %v5890_v11, %v314_v1  ;;  %7559 = vmatpush3.bf16.msk.msra.mxu0 %vm8259_vm8, %v8096_v24  ;;  %6578 = vmatprep.mubr.f32.mxu0 %v2480_v9  ;;  %v2483_v1 = vmul.f32 %v8988_v5, %v8536_v46  ;;  %v2790_v9 = vmul.f32 %v8853_v15, %v8853_v15 }
 0x100   :  { %7561 = vmatprep.subr.msk.bf16.mxu0 %vm8283_vm0, %v8096_v24  ;;  %v2792_v15 = vmul.f32 %v8870_v28, %v8870_v28  ;;  %v2794_v28 = vmul.f32 %v8888_v29, %v8888_v29  ;;  %v2796_v29 = vmul.f32 %v8906_v36, %v8906_v36  ;;  %v2798_v36 = vmul.f32 %v8924_v50, %v8924_v50 }
 0x101   :  { %v5893_v38 = vpop.f32.mrb[2].mxu0  ;;  %7121 = vmatprep.subr.bf16.mxu1 %v7120_v60  ;;  %v2800_v50 = vmul.f32 %v8942_v62, %v8942_v62  ;;  %v2802_v62 = vmul.f32 %v8960_v0, %v8960_v0  ;;  %v2804_v0 = vmul.f32 %v8978_v4, %v8978_v4 }
 0x102   :  { %v324_v30 = vpop.f32.mrb[3].mxu0  ;;  %7123 = vmatpush3.bf16.msra.mxu1 %v7120_v60  ;;  %6579 = vmatmul.mubr.f32.gmra.mrb[108].mxu0 %v2481_v14 }
 0x103   :  { %v7124_v8 = vpack.c.bf16 %v5893_v38, %v324_v30  ;;  %7563 = vmatpush3.bf16.msk.msra.mxu0 %vm8283_vm0, %v8096_v24  ;;  %6581 = vmatprep.mubr.f32.mxu0 %v2482_v7  ;;  %v2791_v30 = vmul.f32 %v8862_v18, %v8862_v18  ;;  %v2793_v18 = vmul.f32 %v8880_v45, %v8880_v45 }
 0x104   :  { %7565 = vmatprep.subr.msk.bf16.mxu0 %vm8305_vm12, %v8096_v24  ;;  %v2795_v45 = vmul.f32 %v8898_v34, %v8898_v34  ;;  %v2797_v34 = vmul.f32 %v8916_v42, %v8916_v42  ;;  %v2799_v42 = vmul.f32 %v8934_v54, %v8934_v54  ;;  %v2801_v54 = vmul.f32 %v8952_v63, %v8952_v63 }
 0x105   :  { %v5896_v11 = vpop.f32.mrb[4].mxu0  ;;  %7125 = vmatprep.subr.bf16.mxu1 %v7124_v8  ;;  %v2803_v63 = vmul.f32 %v8970_v2, %v8970_v2 }
 0x106   :  { %v334_v60 = vpop.f32.mrb[5].mxu0  ;;  %7127 = vmatpush3.bf16.msra.mxu1 %v7124_v8  ;;  %6582 = vmatmul.mubr.f32.gmra.mrb[110].mxu0 %v2483_v1 }
 0x107   :  { %v7128_v38 = vpack.c.bf16 %v5896_v11, %v334_v60  ;;  %7567 = vmatpush3.bf16.msk.msra.mxu0 %vm8305_vm12, %v8096_v24  ;;  %6672 = vmatprep.mubr.f32.mxu0 %v2790_v9 }
 0x108   :  { %7601 = vmatprep.subr.msk.bf16.mxu0 %vm8153_vm4, %v8096_v24 }
 0x109   :  { %v5899_v14 = vpop.f32.mrb[6].mxu0  ;;  %7129 = vmatprep.subr.bf16.mxu1 %v7128_v38 }
 0x10a   :  { %v344_v7 = vpop.f32.mrb[7].mxu0  ;;  %7131 = vmatpush3.bf16.msra.mxu1 %v7128_v38  ;;  %6673 = vmatmul.mubr.f32.vlgmr.msra.gmra.mrb[112].mxu0 %v2791_v30 }
 0x10b   :  { %v7132_v1 = vpack.c.bf16 %v5899_v14, %v344_v7  ;;  %7603 = vmatpush3.bf16.msk.msra.mxu0 %vm8153_vm4, %v8096_v24  ;;  %6675 = vmatprep.mubr.f32.mxu0 %v2792_v15 }
 0x10c   :  { %7605 = vmatprep.subr.msk.bf16.mxu0 %vm8164_vm5, %v8096_v24 }
 0x10d   :  { %v5902_v8 = vpop.f32.mrb[8].mxu0  ;;  %7133 = vmatprep.subr.bf16.mxu1 %v7132_v1 }
 0x10e   :  { %v354_v9 = vpop.f32.mrb[9].mxu0  ;;  %7135 = vmatpush3.bf16.msra.mxu1 %v7132_v1  ;;  %6676 = vmatmul.mubr.f32.gmra.mrb[114].mxu0 %v2793_v18 }
 0x10f   :  { %v7136_v11 = vpack.c.bf16 %v5902_v8, %v354_v9  ;;  %7607 = vmatpush3.bf16.msk.msra.mxu0 %vm8164_vm5, %v8096_v24  ;;  %6678 = vmatprep.mubr.f32.mxu0 %v2794_v28 }
 0x110   :  { %7609 = vmatprep.subr.msk.bf16.mxu0 %vm8188_vm10, %v8096_v24 }
 0x111   :  { %v5905_v60 = vpop.f32.mrb[10].mxu0  ;;  %7137 = vmatprep.subr.bf16.mxu1 %v7136_v11 }
 0x112   :  { %v364_v30 = vpop.f32.mrb[11].mxu0  ;;  %7139 = vmatpush3.bf16.msra.mxu1 %v7136_v11  ;;  %6679 = vmatmul.mubr.f32.gmra.mrb[116].mxu0 %v2795_v45  ;;  %v12124_v11 = vmov 1.0  }
 0x113   :  { %v7140_v38 = vpack.c.bf16 %v5905_v60, %v364_v30  ;;  %7611 = vmatpush3.bf16.msk.msra.mxu0 %vm8188_vm10, %v8096_v24  ;;  %6681 = vmatprep.mubr.f32.mxu0 %v2796_v29  ;;  %v2805_v60 = vmul.f32 %v8988_v5, %v8988_v5  ;;  %v9166_v5 = vld [vmem:[%s11839_s1 + $0x100] sm:$0xff] }
 0x114   :  { %7613 = vmatprep.subr.msk.bf16.mxu0 %vm8211_vm15, %v8096_v24 }
 0x115   :  { %v5908_v15 = vpop.f32.mrb[12].mxu0  ;;  %7141 = vmatprep.subr.bf16.mxu1 %v7140_v38 }
 0x116   :  { %v374_v14 = vpop.f32.mrb[13].mxu0  ;;  %7143 = vmatpush3.bf16.msra.mxu1 %v7140_v38  ;;  %6682 = vmatmul.mubr.f32.gmra.mrb[118].mxu0 %v2797_v34 }
 0x117   :  { %v7144_v7 = vpack.c.bf16 %v5908_v15, %v374_v14  ;;  %7615 = vmatpush3.bf16.msk.msra.mxu0 %vm8211_vm15, %v8096_v24  ;;  %6684 = vmatprep.mubr.f32.mxu0 %v2798_v36  ;;  %v9177_v36 = vld [vmem:[%s11839_s1 + $0x108] sm:$0xff]  ;;  %v9189_v14 = vld [vmem:[%s11839_s1 + $0x110] sm:$0xff] }
 0x118   :  { %7617 = vmatprep.subr.msk.bf16.mxu0 %vm8235_vm13, %v8096_v24 }
 0x119   :  { %v5911_v18 = vpop.f32.mrb[14].mxu0  ;;  %7145 = vmatprep.subr.bf16.mxu1 %v7144_v7 }
 0x11a   :  { %v384_v1 = vpop.f32.mrb[15].mxu0  ;;  %7147 = vmatpush3.bf16.msra.mxu1 %v7144_v7  ;;  %6685 = vmatmul.mubr.f32.gmra.mrb[120].mxu0 %v2799_v42 }
 0x11b   :  { %v7148_v28 = vpack.c.bf16 %v5911_v18, %v384_v1  ;;  %7619 = vmatpush3.bf16.msk.msra.mxu0 %vm8235_vm13, %v8096_v24  ;;  %6687 = vmatprep.mubr.f32.mxu0 %v2800_v50  ;;  %v9201_v50 = vld [vmem:[%s11839_s1 + $0x118] sm:$0xff]  ;;  %v9213_v1 = vld [vmem:[%s11839_s1 + $0x120] sm:$0xff] }
 0x11c   :  { %7621 = vmatprep.subr.msk.bf16.mxu0 %vm8259_vm8, %v8096_v24 }
 0x11d   :  { %7149 = vmatprep.subr.bf16.mxu1 %v7148_v28  ;;  %v6002_v8 = vpop.f32.mrb[16].mxu0 }
 0x11e   :  { %7151 = vmatpush3.bf16.msra.mxu1 %v7148_v28  ;;  %v636_v9 = vpop.f32.mrb[17].mxu0  ;;  %6688 = vmatmul.mubr.f32.gmra.mrb[122].mxu0 %v2801_v54 }
 0x11f   :  { %v7184_v45 = vpack.c.bf16 %v6002_v8, %v636_v9  ;;  %7623 = vmatpush3.bf16.msk.msra.mxu0 %vm8259_vm8, %v8096_v24  ;;  %6690 = vmatprep.mubr.f32.mxu0 %v2802_v62  ;;  %v9225_v62 = vld [vmem:[%s11839_s1 + $0x128] sm:$0xff]  ;;  %v9237_v9 = vld [vmem:[%s11839_s1 + $0x130] sm:$0xff] }
 0x120   :  { %7625 = vmatprep.subr.msk.bf16.mxu0 %vm8283_vm0, %v8096_v24 }
 0x121   :  { %5945 = vmatmul.mubr.msk.f32.vlgmr.msra.gmra.mrb[0].mxu1 %vm8137_vm1, %v12124_v11  ;;  %v6005_v29 = vpop.f32.mrb[18].mxu0  ;;  %7185 = vmatprep.subr.bf16.mxu1 %v7184_v45 }
 0x122   :  { %v646_v2 = vpop.f32.mrb[19].mxu0  ;;  %7187 = vmatpush3.bf16.msra.mxu1 %v7184_v45  ;;  %6691 = vmatmul.mubr.f32.gmra.mrb[124].mxu0 %v2803_v63 }
 0x123   :  { %v7188_v30 = vpack.c.bf16 %v6005_v29, %v646_v2  ;;  %7627 = vmatpush3.bf16.msk.msra.mxu0 %vm8283_vm0, %v8096_v24  ;;  %5947 = vmatprep.mubr.msk.f32.mxu1 %vm8141_vm2, %v12124_v11  ;;  %v9261_v2 = vld [vmem:[%s11839_s1 + $0x140] sm:$0xff] }
 0x124   :  { %6693 = vmatprep.mubr.f32.mxu0 %v2804_v0  ;;  %7629 = vmatprep.subr.msk.bf16.mxu0 %vm8305_vm12, %v8096_v24  ;;  %v9249_v0 = vld [vmem:[%s11839_s1 + $0x138] sm:$0xff] }
 0x125   :  { %5948 = vmatmul.mubr.msk.f32.gmra.mrb[2].mxu1 %vm8145_vm3, %v12124_v11  ;;  %v6008_v4 = vpop.f32.mrb[20].mxu0  ;;  %7189 = vmatprep.subr.bf16.mxu1 %v7188_v30 }
 0x126   :  { %v656_v34 = vpop.f32.mrb[21].mxu0  ;;  %7191 = vmatpush3.bf16.msra.mxu1 %v7188_v30  ;;  %6694 = vmatmul.mubr.f32.gmra.mrb[126].mxu0 %v2805_v60 }
 0x127   :  { %v7192_v38 = vpack.c.bf16 %v6008_v4, %v656_v34  ;;  %7631 = vmatpush3.bf16.msk.msra.mxu0 %vm8305_vm12, %v8096_v24  ;;  %5950 = vmatprep.mubr.msk.f32.mxu1 %vm8168_vm6, %v12124_v11  ;;  %vm12125_vm6 = vnez %v12088_v32  ;;  %v9273_v4 = vld [vmem:[%s11839_s1 + $0x148] sm:$0xff] }
 0x128   :  { %6784 = vmatprep.mubr.f32.mxu0 %v9166_v5  ;;  %7665 = vmatprep.subr.msk.bf16.mxu0 %vm8153_vm4, %v8096_v24 }
 0x129   :  { %5951 = vmatmul.mubr.msk.f32.gmra.mrb[4].mxu1 %vm8172_vm7, %v12124_v11  ;;  %v6011_v15 = vpop.f32.mrb[22].mxu0  ;;  %7193 = vmatprep.subr.bf16.mxu1 %v7192_v38  ;;  %vm12126_vm7 = vnez %v12090_v33 }
 0x12a   :  { %v666_v42 = vpop.f32.mrb[23].mxu0  ;;  %7195 = vmatpush3.bf16.msra.mxu1 %v7192_v38  ;;  %6785 = vmatmul.mubr.f32.vlgmr.msra.gmra.mrb[128].mxu0 %v9177_v36  ;;  %v9285_v38 = vld [vmem:[%s11839_s1 + $0x150] sm:$0xff] }
 0x12b   :  { %v7196_v7 = vpack.c.bf16 %v6011_v15, %v666_v42  ;;  %7667 = vmatpush3.bf16.msk.msra.mxu0 %vm8153_vm4, %v8096_v24  ;;  %5953 = vmatprep.mubr.msk.f32.mxu1 %vm12125_vm6, %v12124_v11  ;;  %vm12127_vm6 = vnez %v12098_v40 }
 0x12c   :  { %6787 = vmatprep.mubr.f32.mxu0 %v9189_v14  ;;  %7669 = vmatprep.subr.msk.bf16.mxu0 %vm8164_vm5, %v8096_v24 }
 0x12d   :  { %5954 = vmatmul.mubr.msk.f32.gmra.mrb[6].mxu1 %vm12126_vm7, %v12124_v11  ;;  %v6014_v18 = vpop.f32.mrb[24].mxu0  ;;  %7197 = vmatprep.subr.bf16.mxu1 %v7196_v7  ;;  %vm12128_vm7 = vnez %v12095_v39 }
 0x12e   :  { %v676_v54 = vpop.f32.mrb[25].mxu0  ;;  %7199 = vmatpush3.bf16.msra.mxu1 %v7196_v7  ;;  %6788 = vmatmul.mubr.f32.gmra.mrb[130].mxu0 %v9201_v50  ;;  %v9297_v7 = vld [vmem:[%s11839_s1 + $0x158] sm:$0xff] }
 0x12f   :  { %v7200_v28 = vpack.c.bf16 %v6014_v18, %v676_v54  ;;  %7671 = vmatpush3.bf16.msk.msra.mxu0 %vm8164_vm5, %v8096_v24  ;;  %5956 = vmatprep.mubr.msk.f32.mxu1 %vm12127_vm6, %v12124_v11  ;;  %vm12129_vm6 = vnez %v12103_v47  ;;  %v9309_v54 = vld [vmem:[%s11839_s1 + $0x160] sm:$0xff] }
 0x130   :  { %6790 = vmatprep.mubr.f32.mxu0 %v9213_v1  ;;  %7673 = vmatprep.subr.msk.bf16.mxu0 %vm8188_vm10, %v8096_v24 }
 0x131   :  { %5957 = vmatmul.mubr.msk.f32.gmra.mrb[8].mxu1 %vm12128_vm7, %v12124_v11  ;;  %v6017_v8 = vpop.f32.mrb[26].mxu0  ;;  %7201 = vmatprep.subr.bf16.mxu1 %v7200_v28  ;;  %vm12130_vm7 = vnez %v12105_v48 }
 0x132   :  { %v686_v63 = vpop.f32.mrb[27].mxu0  ;;  %7203 = vmatpush3.bf16.msra.mxu1 %v7200_v28  ;;  %6791 = vmatmul.mubr.f32.gmra.mrb[132].mxu0 %v9225_v62 }
 0x133   :  { %v7204_v45 = vpack.c.bf16 %v6017_v8, %v686_v63  ;;  %7675 = vmatpush3.bf16.msk.msra.mxu0 %vm8188_vm10, %v8096_v24  ;;  %5959 = vmatprep.mubr.msk.f32.mxu1 %vm12129_vm6, %v12124_v11  ;;  %v9321_v63 = vld [vmem:[%s11839_s1 + $0x168] sm:$0xff] }
 0x134   :  { %6793 = vmatprep.mubr.f32.mxu0 %v9237_v9  ;;  %7677 = vmatprep.subr.msk.bf16.mxu0 %vm8211_vm15, %v8096_v24 }
 0x135   :  { %5960 = vmatmul.mubr.msk.f32.gmra.mrb[10].mxu1 %vm12130_vm7, %v12124_v11  ;;  %v6020_v29 = vpop.f32.mrb[28].mxu0  ;;  %7205 = vmatprep.subr.bf16.mxu1 %v7204_v45  ;;  %vm12131_vm7 = vnez %v12112_v53 }
 0x136   :  { %v696_v60 = vpop.f32.mrb[29].mxu0  ;;  %7207 = vmatpush3.bf16.msra.mxu1 %v7204_v45  ;;  %6794 = vmatmul.mubr.f32.gmra.mrb[134].mxu0 %v9249_v0 }
 0x137   :  { %v7208_v30 = vpack.c.bf16 %v6020_v29, %v696_v60  ;;  %7679 = vmatpush3.bf16.msk.msra.mxu0 %vm8211_vm15, %v8096_v24  ;;  %5962 = vmatprep.mubr.msk.f32.mxu1 %vm8263_vm9, %v12124_v11  ;;  %v9333_v29 = vld [vmem:[%s11839_s1 + $0x170] sm:$0xff] }
 0x138   :  { %6796 = vmatprep.mubr.f32.mxu0 %v9261_v2  ;;  %7681 = vmatprep.subr.msk.bf16.mxu0 %vm8235_vm13, %v8096_v24 }
 0x139   :  { %5963 = vmatmul.mubr.msk.f32.gmra.mrb[12].mxu1 %vm12131_vm7, %v12124_v11  ;;  %v6023_v34 = vpop.f32.mrb[30].mxu0  ;;  %7209 = vmatprep.subr.bf16.mxu1 %v7208_v30 }
 0x13a   :  { %v706_v15 = vpop.f32.mrb[31].mxu0  ;;  %7211 = vmatpush3.bf16.msra.mxu1 %v7208_v30  ;;  %6797 = vmatmul.mubr.f32.gmra.mrb[136].mxu0 %v9273_v4 }
 0x13b   :  { %v7212_v42 = vpack.c.bf16 %v6023_v34, %v706_v15  ;;  %7683 = vmatpush3.bf16.msk.msra.mxu0 %vm8235_vm13, %v8096_v24  ;;  %5965 = vmatprep.mubr.msk.f32.mxu1 %vm8287_vm14, %v12124_v11  ;;  %vm12132_vm14 = vnez %v12070_v13  ;;  %v9345_v34 = vld [vmem:[%s11839_s1 + $0x178] sm:$0xff]  ;;  %v3755_v15 = vmul.f32 %v9166_v5, %v8401_v10  ;;  %v3757_v10 = vmul.f32 %v9189_v14, %v8421_v22 }
 0x13c   :  { %6799 = vmatprep.mubr.f32.mxu0 %v9285_v38  ;;  %7685 = vmatprep.subr.msk.bf16.mxu0 %vm8259_vm8, %v8096_v24  ;;  %v3759_v22 = vmul.f32 %v9213_v1, %v8441_v41  ;;  %v3761_v41 = vmul.f32 %v9237_v9, %v8461_v55  ;;  %v3763_v55 = vmul.f32 %v9261_v2, %v8481_v6 }
 0x13d   :  { %5966 = vmatmul.mubr.msk.f32.gmra.mrb[14].mxu1 %vm8291_vm11, %v12124_v11  ;;  %7213 = vmatprep.subr.bf16.mxu1 %v7212_v42  ;;  %v6114_v18 = vpop.f32.mrb[32].mxu0  ;;  %v3765_v6 = vmul.f32 %v9285_v38, %v8501_v17  ;;  %v12142_v17 = vld [vmem:[#allocation12_spill] sm:$0xff] }
 0x13e   :  { %7215 = vmatpush3.bf16.msra.mxu1 %v7212_v42  ;;  %v942_v28 = vpop.f32.mrb[33].mxu0  ;;  %6800 = vmatmul.mubr.f32.gmra.mrb[138].mxu0 %v9297_v7 }
 0x13f   :  { %v7248_v8 = vpack.c.bf16 %v6114_v18, %v942_v28  ;;  %7687 = vmatpush3.bf16.msk.msra.mxu0 %vm8259_vm8, %v8096_v24  ;;  %6056 = vmatprep.mubr.msk.f32.mxu1 %vm12132_vm14, %v12124_v11  ;;  %v3756_v28 = vmul.f32 %v9177_v36, %v8414_v16 }
 0x140   :  { %6802 = vmatprep.mubr.f32.mxu0 %v9309_v54  ;;  %7689 = vmatprep.subr.msk.bf16.mxu0 %vm8283_vm0, %v8096_v24 }
 0x141   :  { %6057 = vmatmul.mubr.msk.f32.vlgmr.msra.gmra.mrb[16].mxu1 %vm8137_vm1, %v12124_v11  ;;  %v6117_v45 = vpop.f32.mrb[34].mxu0  ;;  %7249 = vmatprep.subr.bf16.mxu1 %v7248_v8 }
 0x142   :  { %v952_v60 = vpop.f32.mrb[35].mxu0  ;;  %7251 = vmatpush3.bf16.msra.mxu1 %v7248_v8  ;;  %6803 = vmatmul.mubr.f32.gmra.mrb[140].mxu0 %v9321_v63 }
 0x143   :  { %v7252_v30 = vpack.c.bf16 %v6117_v45, %v952_v60  ;;  %7691 = vmatpush3.bf16.msk.msra.mxu0 %vm8283_vm0, %v8096_v24  ;;  %6059 = vmatprep.mubr.msk.f32.mxu1 %vm8141_vm2, %v12124_v11  ;;  %vm12133_vm2 = vnez %v12082_v26  ;;  %v3758_v60 = vmul.f32 %v9201_v50, %v8434_v35 }
 0x144   :  { %6805 = vmatprep.mubr.f32.mxu0 %v9333_v29  ;;  %7693 = vmatprep.subr.msk.bf16.mxu0 %vm8305_vm12, %v8096_v24 }
 0x145   :  { %6060 = vmatmul.mubr.msk.f32.gmra.mrb[18].mxu1 %vm8145_vm3, %v12124_v11  ;;  %v6120_v42 = vpop.f32.mrb[36].mxu0  ;;  %7253 = vmatprep.subr.bf16.mxu1 %v7252_v30  ;;  %vm12134_vm3 = vnez %v12084_v27 }
 0x146   :  { %v962_v18 = vpop.f32.mrb[37].mxu0  ;;  %7255 = vmatpush3.bf16.msra.mxu1 %v7252_v30  ;;  %6806 = vmatmul.mubr.f32.gmra.mrb[142].mxu0 %v9345_v34 }
 0x147   :  { %v7256_v8 = vpack.c.bf16 %v6120_v42, %v962_v18  ;;  %7695 = vmatpush3.bf16.msk.msra.mxu0 %vm8305_vm12, %v8096_v24  ;;  %6062 = vmatprep.mubr.msk.f32.mxu1 %vm12133_vm2, %v12124_v11  ;;  %vm12135_vm2 = vnez %v12088_v32  ;;  %v3762_v18 = vmul.f32 %v9249_v0, %v8474_v3 }
 0x148   :  { %6896 = vmatprep.mubr.f32.mxu0 %v3755_v15  ;;  %7729 = vmatprep.subr.msk.bf16.mxu0 %vm8153_vm4, %v8096_v24  ;;  %v3760_v15 = vmul.f32 %v9225_v62, %v8454_v49 }
 0x149   :  { %6063 = vmatmul.mubr.msk.f32.gmra.mrb[20].mxu1 %vm12134_vm3, %v12124_v11  ;;  %v6123_v16 = vpop.f32.mrb[38].mxu0  ;;  %7257 = vmatprep.subr.bf16.mxu1 %v7256_v8  ;;  %vm12136_vm3 = vnez %v12090_v33 }
 0x14a   :  { %v972_v45 = vpop.f32.mrb[39].mxu0  ;;  %7259 = vmatpush3.bf16.msra.mxu1 %v7256_v8  ;;  %6897 = vmatmul.mubr.f32.vlgmr.msra.gmra.mrb[144].mxu0 %v3756_v28  ;;  %v3764_v8 = vmul.f32 %v9273_v4, %v8494_v12 }
 0x14b   :  { %v7260_v30 = vpack.c.bf16 %v6123_v16, %v972_v45  ;;  %7731 = vmatpush3.bf16.msk.msra.mxu0 %vm8153_vm4, %v8096_v24  ;;  %6065 = vmatprep.mubr.msk.f32.mxu1 %vm12135_vm2, %v12124_v11  ;;  %vm12137_vm4 = vnez %v12098_v40  ;;  %v12140_v16 = vld [vmem:[#allocation11_spill] sm:$0xff] }
 0x14c   :  { %6899 = vmatprep.mubr.f32.mxu0 %v3757_v10  ;;  %7733 = vmatprep.subr.msk.bf16.mxu0 %vm8164_vm5, %v8096_v24  ;;  %v3766_v45 = vmul.f32 %v9297_v7, %v12140_v16 }
 0x14d   :  { %6066 = vmatmul.mubr.msk.f32.gmra.mrb[22].mxu1 %vm12136_vm3, %v12124_v11  ;;  %v6126_v35 = vpop.f32.mrb[40].mxu0  ;;  %7261 = vmatprep.subr.bf16.mxu1 %v7260_v30  ;;  %vm12138_vm3 = vnez %v12095_v39 }
 0x14e   :  { %v982_v23 = vpop.f32.mrb[41].mxu0  ;;  %7263 = vmatpush3.bf16.msra.mxu1 %v7260_v30  ;;  %6900 = vmatmul.mubr.f32.gmra.mrb[146].mxu0 %v3758_v60  ;;  %v3767_v30 = vmul.f32 %v9309_v54, %v12142_v17 }
 0x14f   :  { %v7264_v42 = vpack.c.bf16 %v6126_v35, %v982_v23  ;;  %7735 = vmatpush3.bf16.msk.msra.mxu0 %vm8164_vm5, %v8096_v24  ;;  %6068 = vmatprep.mubr.msk.f32.mxu1 %vm12137_vm4, %v12124_v11  ;;  %vm12139_vm5 = vnez %v12105_v48  ;;  %v3768_v35 = vmul.f32 %v9321_v63, %v8524_v43 }
 0x150   :  { %6902 = vmatprep.mubr.f32.mxu0 %v3759_v22  ;;  %7737 = vmatprep.subr.msk.bf16.mxu0 %vm8188_vm10, %v8096_v24 }
 0x151   :  { %6069 = vmatmul.mubr.msk.f32.gmra.mrb[24].mxu1 %vm12138_vm3, %v12124_v11  ;;  %v6129_v49 = vpop.f32.mrb[42].mxu0  ;;  %7265 = vmatprep.subr.bf16.mxu1 %v7264_v42 }
 0x152   :  { %v992_v25 = vpop.f32.mrb[43].mxu0  ;;  %7267 = vmatpush3.bf16.msra.mxu1 %v7264_v42  ;;  %6903 = vmatmul.mubr.f32.gmra.mrb[148].mxu0 %v3760_v15  ;;  %v3769_v15 = vmul.f32 %v9333_v29, %v8530_v61  ;;  %v3770_v42 = vmul.f32 %v9345_v34, %v8536_v46  ;;  %v4077_v61 = vmul.f32 %v9166_v5, %v9166_v5 }
 0x153   :  { %v7268_v28 = vpack.c.bf16 %v6129_v49, %v992_v25  ;;  %7739 = vmatpush3.bf16.msk.msra.mxu0 %vm8188_vm10, %v8096_v24  ;;  %6071 = vmatprep.mubr.msk.f32.mxu1 %vm12129_vm6, %v12124_v11  ;;  %vm12141_vm10 = vnez %v12116_v57  ;;  %v4078_v49 = vmul.f32 %v9177_v36, %v9177_v36  ;;  %v4079_v5 = vmul.f32 %v9189_v14, %v9189_v14  ;;  %v10380_v57 = vld [vmem:[%s11839_s1 + $0x10] sm:$0xff] }
 0x154   :  { %6905 = vmatprep.mubr.f32.mxu0 %v3761_v41  ;;  %7741 = vmatprep.subr.msk.bf16.mxu0 %vm8211_vm15, %v8096_v24  ;;  %v4081_v14 = vmul.f32 %v9213_v1, %v9213_v1  ;;  %v4083_v1 = vmul.f32 %v9237_v9, %v9237_v9  ;;  %v4085_v9 = vmul.f32 %v9261_v2, %v9261_v2 }
 0x155   :  { %6072 = vmatmul.mubr.msk.f32.gmra.mrb[26].mxu1 %vm12139_vm5, %v12124_v11  ;;  %v6132_v3 = vpop.f32.mrb[44].mxu0  ;;  %7269 = vmatprep.subr.bf16.mxu1 %v7268_v28  ;;  %v4087_v2 = vmul.f32 %v9285_v38, %v9285_v38  ;;  %v4089_v38 = vmul.f32 %v9309_v54, %v9309_v54  ;;  %v4091_v54 = vmul.f32 %v9333_v29, %v9333_v29 }
 0x156   :  { %v1002_v31 = vpop.f32.mrb[45].mxu0  ;;  %7271 = vmatpush3.bf16.msra.mxu1 %v7268_v28  ;;  %6906 = vmatmul.mubr.f32.gmra.mrb[150].mxu0 %v3762_v18 }
 0x157   :  { %v7272_v10 = vpack.c.bf16 %v6132_v3, %v1002_v31  ;;  %7743 = vmatpush3.bf16.msk.msra.mxu0 %vm8211_vm15, %v8096_v24  ;;  %6074 = vmatprep.mubr.msk.f32.mxu1 %vm8263_vm9, %v12124_v11  ;;  %vm12143_vm15 = vnez %v12074_v20 }
 0x158   :  { %6908 = vmatprep.mubr.f32.mxu0 %v3763_v55  ;;  %7745 = vmatprep.subr.msk.bf16.mxu0 %vm8235_vm13, %v8096_v24 }
 0x159   :  { %6075 = vmatmul.mubr.msk.f32.gmra.mrb[28].mxu1 %vm12131_vm7, %v12124_v11  ;;  %v6135_v12 = vpop.f32.mrb[46].mxu0  ;;  %7273 = vmatprep.subr.bf16.mxu1 %v7272_v10 }
 0x15a   :  { %v1012_v37 = vpop.f32.mrb[47].mxu0  ;;  %7275 = vmatpush3.bf16.msra.mxu1 %v7272_v10  ;;  %6909 = vmatmul.mubr.f32.gmra.mrb[152].mxu0 %v3764_v8 }
 0x15b   :  { %v7276_v60 = vpack.c.bf16 %v6135_v12, %v1012_v37  ;;  %7747 = vmatpush3.bf16.msk.msra.mxu0 %vm8235_vm13, %v8096_v24  ;;  %6077 = vmatprep.mubr.msk.f32.mxu1 %vm12141_vm10, %v12124_v11  ;;  %vm12146_vm13 = vnez %v12084_v27 }
 0x15c   :  { %6911 = vmatprep.mubr.f32.mxu0 %v3765_v6  ;;  %7749 = vmatprep.subr.msk.bf16.mxu0 %vm8259_vm8, %v8096_v24 }
 0x15d   :  { %6078 = vmatmul.mubr.msk.f32.gmra.mrb[30].mxu1 %vm8291_vm11, %v12124_v11  ;;  %7277 = vmatprep.subr.bf16.mxu1 %v7276_v60  ;;  %v6226_v22 = vpop.f32.mrb[48].mxu0 }
 0x15e   :  { %7279 = vmatpush3.bf16.msra.mxu1 %v7276_v60  ;;  %v1264_v44 = vpop.f32.mrb[49].mxu0  ;;  %6912 = vmatmul.mubr.f32.gmra.mrb[154].mxu0 %v3766_v45 }
 0x15f   :  { %v7312_v23 = vpack.c.bf16 %v6226_v22, %v1264_v44  ;;  %7751 = vmatpush3.bf16.msk.msra.mxu0 %vm8259_vm8, %v8096_v24  ;;  %6168 = vmatprep.mubr.msk.f32.mxu1 %vm12132_vm14, %v12124_v11  ;;  %vm12144_vm8 = vnez %v12076_v21 }
 0x160   :  { %6914 = vmatprep.mubr.f32.mxu0 %v3767_v30  ;;  %7753 = vmatprep.subr.msk.bf16.mxu0 %vm8283_vm0, %v8096_v24 }
 0x161   :  { %6169 = vmatmul.mubr.msk.f32.vlgmr.msra.gmra.mrb[32].mxu1 %vm8137_vm1, %v12124_v11  ;;  %v6229_v43 = vpop.f32.mrb[50].mxu0  ;;  %7313 = vmatprep.subr.bf16.mxu1 %v7312_v23 }
 0x162   :  { %v1274_v51 = vpop.f32.mrb[51].mxu0  ;;  %7315 = vmatpush3.bf16.msra.mxu1 %v7312_v23  ;;  %6915 = vmatmul.mubr.f32.gmra.mrb[156].mxu0 %v3768_v35 }
 0x163   :  { %v7316_v41 = vpack.c.bf16 %v6229_v43, %v1274_v51  ;;  %7755 = vmatpush3.bf16.msk.msra.mxu0 %vm8283_vm0, %v8096_v24  ;;  %6171 = vmatprep.mubr.msk.f32.mxu1 %vm12143_vm15, %v12124_v11  ;;  %vm12145_vm0 = vnez %v12082_v26 }
 0x164   :  { %6917 = vmatprep.mubr.f32.mxu0 %v3769_v15  ;;  %7757 = vmatprep.subr.msk.bf16.mxu0 %vm8305_vm12, %v8096_v24 }
 0x165   :  { %6172 = vmatmul.mubr.msk.f32.gmra.mrb[34].mxu1 %vm12144_vm8, %v12124_v11  ;;  %v6232_v46 = vpop.f32.mrb[52].mxu0  ;;  %7317 = vmatprep.subr.bf16.mxu1 %v7316_v41 }
 0x166   :  { %v1284_v56 = vpop.f32.mrb[53].mxu0  ;;  %7319 = vmatpush3.bf16.msra.mxu1 %v7316_v41  ;;  %6918 = vmatmul.mubr.f32.gmra.mrb[158].mxu0 %v3770_v42 }
 0x167   :  { %v7320_v25 = vpack.c.bf16 %v6232_v46, %v1284_v56  ;;  %7759 = vmatpush3.bf16.msk.msra.mxu0 %vm8305_vm12, %v8096_v24  ;;  %6174 = vmatprep.mubr.msk.f32.mxu1 %vm12145_vm0, %v12124_v11  ;;  %v4080_v24 = vmul.f32 %v9201_v50, %v9201_v50  ;;  %vm12147_vm12 = vnez %v12090_v33  ;;  %v4082_v50 = vmul.f32 %v9225_v62, %v9225_v62 }
 0x168   :  { %7008 = vmatprep.mubr.f32.mxu0 %v4077_v61  ;;  %v4084_v62 = vmul.f32 %v9249_v0, %v9249_v0  ;;  %v4086_v0 = vmul.f32 %v9273_v4, %v9273_v4  ;;  %v4088_v4 = vmul.f32 %v9297_v7, %v9297_v7  ;;  %v4090_v7 = vmul.f32 %v9321_v63, %v9321_v63 }
 0x169   :  { %6175 = vmatmul.mubr.msk.f32.gmra.mrb[36].mxu1 %vm12146_vm13, %v12124_v11  ;;  %v6235_v18 = vpop.f32.mrb[54].mxu0  ;;  %7321 = vmatprep.subr.bf16.mxu1 %v7320_v25  ;;  %v4092_v63 = vmul.f32 %v9345_v34, %v9345_v34 }
 0x16a   :  { %v1294_v36 = vpop.f32.mrb[55].mxu0  ;;  %7323 = vmatpush3.bf16.msra.mxu1 %v7320_v25  ;;  %7009 = vmatmul.mubr.f32.vlgmr.msra.gmra.mrb[160].mxu0 %v4078_v49 }
 0x16b   :  { %v7324_v59 = vpack.c.bf16 %v6235_v18, %v1294_v36  ;;  %6177 = vmatprep.mubr.msk.f32.mxu1 %vm12135_vm2, %v12124_v11  ;;  %7011 = vmatprep.mubr.f32.mxu0 %v4079_v5 }
 0x16d   :  { %6178 = vmatmul.mubr.msk.f32.gmra.mrb[38].mxu1 %vm12147_vm12, %v12124_v11  ;;  %v6238_v28 = vpop.f32.mrb[56].mxu0  ;;  %7325 = vmatprep.subr.bf16.mxu1 %v7324_v59 }
 0x16e   :  { %v1304_v55 = vpop.f32.mrb[57].mxu0  ;;  %7327 = vmatpush3.bf16.msra.mxu1 %v7324_v59  ;;  %7012 = vmatmul.mubr.f32.gmra.mrb[162].mxu0 %v4080_v24 }
 0x16f   :  { %v7328_v3 = vpack.c.bf16 %v6238_v28, %v1304_v55  ;;  %6180 = vmatprep.mubr.msk.f32.mxu1 %vm12137_vm4, %v12124_v11  ;;  %7014 = vmatprep.mubr.f32.mxu0 %v4081_v14 }
 0x171   :  { %6181 = vmatmul.mubr.msk.f32.gmra.mrb[40].mxu1 %vm12138_vm3, %v12124_v11  ;;  %v6241_v31 = vpop.f32.mrb[58].mxu0  ;;  %7329 = vmatprep.subr.bf16.mxu1 %v7328_v3 }
 0x172   :  { %v1314_v8 = vpop.f32.mrb[59].mxu0  ;;  %7331 = vmatpush3.bf16.msra.mxu1 %v7328_v3  ;;  %7015 = vmatmul.mubr.f32.gmra.mrb[164].mxu0 %v4082_v50 }
 0x173   :  { %v7332_v10 = vpack.c.bf16 %v6241_v31, %v1314_v8  ;;  %6183 = vmatprep.mubr.msk.f32.mxu1 %vm12129_vm6, %v12124_v11  ;;  %7017 = vmatprep.mubr.f32.mxu0 %v4083_v1 }
 0x175   :  { %6184 = vmatmul.mubr.msk.f32.gmra.mrb[42].mxu1 %vm12139_vm5, %v12124_v11  ;;  %v6244_v6 = vpop.f32.mrb[60].mxu0  ;;  %7333 = vmatprep.subr.bf16.mxu1 %v7332_v10 }
 0x176   :  { %v1324_v12 = vpop.f32.mrb[61].mxu0  ;;  %7335 = vmatpush3.bf16.msra.mxu1 %v7332_v10  ;;  %7018 = vmatmul.mubr.f32.gmra.mrb[166].mxu0 %v4084_v62 }
 0x177   :  { %v7336_v37 = vpack.c.bf16 %v6244_v6, %v1324_v12  ;;  %6186 = vmatprep.mubr.msk.f32.mxu1 %vm8263_vm9, %v12124_v11  ;;  %7020 = vmatprep.mubr.f32.mxu0 %v4085_v9 }
 0x179   :  { %6187 = vmatmul.mubr.msk.f32.gmra.mrb[44].mxu1 %vm12131_vm7, %v12124_v11  ;;  %v6247_v16 = vpop.f32.mrb[62].mxu0  ;;  %7337 = vmatprep.subr.bf16.mxu1 %v7336_v37 }
 0x17a   :  { %v1334_v45 = vpop.f32.mrb[63].mxu0  ;;  %7339 = vmatpush3.bf16.msra.mxu1 %v7336_v37  ;;  %7021 = vmatmul.mubr.f32.gmra.mrb[168].mxu0 %v4086_v0 }
 0x17b   :  { %v7340_v60 = vpack.c.bf16 %v6247_v16, %v1334_v45  ;;  %6189 = vmatprep.mubr.msk.f32.mxu1 %vm12141_vm10, %v12124_v11  ;;  %7023 = vmatprep.mubr.f32.mxu0 %v4087_v2 }
 0x17d   :  { %6190 = vmatmul.mubr.msk.f32.gmra.mrb[46].mxu1 %vm8291_vm11, %v12124_v11  ;;  %7341 = vmatprep.subr.bf16.mxu1 %v7340_v60  ;;  %v6338_v17 = vpop.f32.mrb[64].mxu0 }
 0x17e   :  { %7343 = vmatpush3.bf16.msra.mxu1 %v7340_v60  ;;  %v1586_v30 = vpop.f32.mrb[65].mxu0  ;;  %7024 = vmatmul.mubr.f32.gmra.mrb[170].mxu0 %v4088_v4 }
 0x17f   :  { %v7376_v22 = vpack.c.bf16 %v6338_v17, %v1586_v30  ;;  %6280 = vmatprep.mubr.msk.f32.mxu1 %vm12132_vm14, %v12124_v11  ;;  %7026 = vmatprep.mubr.f32.mxu0 %v4089_v38 }
 0x181   :  { %6281 = vmatmul.mubr.msk.f32.vlgmr.msra.gmra.mrb[48].mxu1 %vm8137_vm1, %v12124_v11  ;;  %v6341_v44 = vpop.f32.mrb[66].mxu0  ;;  %7377 = vmatprep.subr.bf16.mxu1 %v7376_v22 }
 0x182   :  { %v1596_v35 = vpop.f32.mrb[67].mxu0  ;;  %7379 = vmatpush3.bf16.msra.mxu1 %v7376_v22  ;;  %7027 = vmatmul.mubr.f32.gmra.mrb[172].mxu0 %v4090_v7 }
 0x183   :  { %v7380_v23 = vpack.c.bf16 %v6341_v44, %v1596_v35  ;;  %6283 = vmatprep.mubr.msk.f32.mxu1 %vm12143_vm15, %v12124_v11  ;;  %7029 = vmatprep.mubr.f32.mxu0 %v4091_v54 }
 0x185   :  { %6284 = vmatmul.mubr.msk.f32.gmra.mrb[50].mxu1 %vm12144_vm8, %v12124_v11  ;;  %v6344_v29 = vpop.f32.mrb[68].mxu0  ;;  %7381 = vmatprep.subr.bf16.mxu1 %v7380_v23 }
 0x186   :  { %v1606_v15 = vpop.f32.mrb[69].mxu0  ;;  %7383 = vmatpush3.bf16.msra.mxu1 %v7380_v23  ;;  %7030 = vmatmul.mubr.f32.gmra.mrb[174].mxu0 %v4092_v63 }
 0x187   :  { %v7384_v43 = vpack.c.bf16 %v6344_v29, %v1606_v15  ;;  %6286 = vmatprep.mubr.msk.f32.mxu1 %vm12145_vm0, %v12124_v11 }
 0x189   :  { %6287 = vmatmul.mubr.msk.f32.gmra.mrb[52].mxu1 %vm12146_vm13, %v12124_v11  ;;  %v6347_v34 = vpop.f32.mrb[70].mxu0  ;;  %7385 = vmatprep.subr.bf16.mxu1 %v7384_v43 }
 0x18a   :  { %v1616_v51 = vpop.f32.mrb[71].mxu0  ;;  %7387 = vmatpush3.bf16.msra.mxu1 %v7384_v43  ;;  %6289 = vmatprep.mubr.msk.f32.mxu1 %vm12135_vm2, %v12124_v11 }
 0x18b   :  { %v7388_v42 = vpack.c.bf16 %v6347_v34, %v1616_v51 }
 0x18d   :  { %6290 = vmatmul.mubr.msk.f32.gmra.mrb[54].mxu1 %vm12147_vm12, %v12124_v11  ;;  %v6350_v41 = vpop.f32.mrb[72].mxu0  ;;  %7389 = vmatprep.subr.bf16.mxu1 %v7388_v42 }
 0x18e   :  { %v1626_v61 = vpop.f32.mrb[73].mxu0  ;;  %7391 = vmatpush3.bf16.msra.mxu1 %v7388_v42  ;;  %6292 = vmatprep.mubr.msk.f32.mxu1 %vm12137_vm4, %v12124_v11 }
 0x18f   :  { %v7392_v46 = vpack.c.bf16 %v6350_v41, %v1626_v61 }
 0x191   :  { %6293 = vmatmul.mubr.msk.f32.gmra.mrb[56].mxu1 %vm12138_vm3, %v12124_v11  ;;  %v6353_v56 = vpop.f32.mrb[74].mxu0  ;;  %7393 = vmatprep.subr.bf16.mxu1 %v7392_v46 }
 0x192   :  { %v1636_v49 = vpop.f32.mrb[75].mxu0  ;;  %7395 = vmatpush3.bf16.msra.mxu1 %v7392_v46  ;;  %6295 = vmatprep.mubr.msk.f32.mxu1 %vm12129_vm6, %v12124_v11 }
 0x193   :  { %v7396_v25 = vpack.c.bf16 %v6353_v56, %v1636_v49 }
 0x195   :  { %6296 = vmatmul.mubr.msk.f32.gmra.mrb[58].mxu1 %vm12139_vm5, %v12124_v11  ;;  %v6356_v5 = vpop.f32.mrb[76].mxu0  ;;  %7397 = vmatprep.subr.bf16.mxu1 %v7396_v25 }
 0x196   :  { %v1646_v18 = vpop.f32.mrb[77].mxu0  ;;  %7399 = vmatpush3.bf16.msra.mxu1 %v7396_v25  ;;  %6298 = vmatprep.mubr.msk.f32.mxu1 %vm8263_vm9, %v12124_v11 }
 0x197   :  { %v7400_v36 = vpack.c.bf16 %v6356_v5, %v1646_v18 }
 0x199   :  { %6299 = vmatmul.mubr.msk.f32.gmra.mrb[60].mxu1 %vm12131_vm7, %v12124_v11  ;;  %v6359_v24 = vpop.f32.mrb[78].mxu0  ;;  %7401 = vmatprep.subr.bf16.mxu1 %v7400_v36 }
 0x19a   :  { %v1656_v59 = vpop.f32.mrb[79].mxu0  ;;  %7403 = vmatpush3.bf16.msra.mxu1 %v7400_v36  ;;  %6301 = vmatprep.mubr.msk.f32.mxu1 %vm12141_vm10, %v12124_v11 }
 0x19b   :  { %v7404_v14 = vpack.c.bf16 %v6359_v24, %v1656_v59 }
 0x19d   :  { %6302 = vmatmul.mubr.msk.f32.gmra.mrb[62].mxu1 %vm8291_vm11, %v12124_v11  ;;  %7405 = vmatprep.subr.bf16.mxu1 %v7404_v14  ;;  %v6450_v28 = vpop.f32.mrb[80].mxu0 }
 0x19e   :  { %7407 = vmatpush3.bf16.msra.mxu1 %v7404_v14  ;;  %v2228_v55 = vpop.f32.mrb[81].mxu0  ;;  %6392 = vmatprep.mubr.msk.f32.mxu1 %vm12132_vm14, %v12124_v11 }
 0x19f   :  { %v7440_v50 = vpack.c.bf16 %v6450_v28, %v2228_v55 }
 0x1a1   :  { %6393 = vmatmul.mubr.msk.f32.vlgmr.msra.gmra.mrb[64].mxu1 %vm8137_vm1, %v12124_v11  ;;  %v6453_v3 = vpop.f32.mrb[82].mxu0  ;;  %7441 = vmatprep.subr.bf16.mxu1 %v7440_v50 }
 0x1a2   :  { %v2238_v1 = vpop.f32.mrb[83].mxu0  ;;  %7443 = vmatpush3.bf16.msra.mxu1 %v7440_v50  ;;  %6395 = vmatprep.mubr.msk.f32.mxu1 %vm12143_vm15, %v12124_v11 }
 0x1a3   :  { %v7444_v31 = vpack.c.bf16 %v6453_v3, %v2238_v1 }
 0x1a5   :  { %6396 = vmatmul.mubr.msk.f32.gmra.mrb[66].mxu1 %vm12144_vm8, %v12124_v11  ;;  %v6456_v8 = vpop.f32.mrb[84].mxu0  ;;  %7445 = vmatprep.subr.bf16.mxu1 %v7444_v31 }
 0x1a6   :  { %v2248_v62 = vpop.f32.mrb[85].mxu0  ;;  %7447 = vmatpush3.bf16.msra.mxu1 %v7444_v31  ;;  %6398 = vmatprep.mubr.msk.f32.mxu1 %vm12145_vm0, %v12124_v11 }
 0x1a7   :  { %v7448_v10 = vpack.c.bf16 %v6456_v8, %v2248_v62 }
 0x1a9   :  { %6399 = vmatmul.mubr.msk.f32.gmra.mrb[68].mxu1 %vm12146_vm13, %v12124_v11  ;;  %v6459_v9 = vpop.f32.mrb[86].mxu0  ;;  %7449 = vmatprep.subr.bf16.mxu1 %v7448_v10 }
 0x1aa   :  { %v2258_v6 = vpop.f32.mrb[87].mxu0  ;;  %7451 = vmatpush3.bf16.msra.mxu1 %v7448_v10  ;;  %6401 = vmatprep.mubr.msk.f32.mxu1 %vm12135_vm2, %v12124_v11 }
 0x1ab   :  { %v7452_v12 = vpack.c.bf16 %v6459_v9, %v2258_v6 }
 0x1ad   :  { %6402 = vmatmul.mubr.msk.f32.gmra.mrb[70].mxu1 %vm12147_vm12, %v12124_v11  ;;  %v6462_v0 = vpop.f32.mrb[88].mxu0  ;;  %7453 = vmatprep.subr.bf16.mxu1 %v7452_v12 }
 0x1ae   :  { %v2268_v37 = vpop.f32.mrb[89].mxu0  ;;  %7455 = vmatpush3.bf16.msra.mxu1 %v7452_v12  ;;  %6404 = vmatprep.mubr.msk.f32.mxu1 %vm12137_vm4, %v12124_v11 }
 0x1af   :  { %v7456_v2 = vpack.c.bf16 %v6462_v0, %v2268_v37 }
 0x1b1   :  { %6405 = vmatmul.mubr.msk.f32.gmra.mrb[72].mxu1 %vm12138_vm3, %v12124_v11  ;;  %v6465_v16 = vpop.f32.mrb[90].mxu0  ;;  %7457 = vmatprep.subr.bf16.mxu1 %v7456_v2 }
 0x1b2   :  { %v2278_v45 = vpop.f32.mrb[91].mxu0  ;;  %7459 = vmatpush3.bf16.msra.mxu1 %v7456_v2  ;;  %6407 = vmatprep.mubr.msk.f32.mxu1 %vm12129_vm6, %v12124_v11 }
 0x1b3   :  { %v7460_v4 = vpack.c.bf16 %v6465_v16, %v2278_v45 }
 0x1b5   :  { %6408 = vmatmul.mubr.msk.f32.gmra.mrb[74].mxu1 %vm12139_vm5, %v12124_v11  ;;  %v6468_v60 = vpop.f32.mrb[92].mxu0  ;;  %7461 = vmatprep.subr.bf16.mxu1 %v7460_v4 }
 0x1b6   :  { %v2288_v38 = vpop.f32.mrb[93].mxu0  ;;  %7463 = vmatpush3.bf16.msra.mxu1 %v7460_v4  ;;  %6410 = vmatprep.mubr.msk.f32.mxu1 %vm8263_vm9, %v12124_v11 }
 0x1b7   :  { %v7464_v17 = vpack.c.bf16 %v6468_v60, %v2288_v38 }
 0x1b9   :  { %6411 = vmatmul.mubr.msk.f32.gmra.mrb[76].mxu1 %vm12131_vm7, %v12124_v11  ;;  %v6471_v30 = vpop.f32.mrb[94].mxu0  ;;  %7465 = vmatprep.subr.bf16.mxu1 %v7464_v17 }
 0x1ba   :  { %v2298_v7 = vpop.f32.mrb[95].mxu0  ;;  %7467 = vmatpush3.bf16.msra.mxu1 %v7464_v17  ;;  %6413 = vmatprep.mubr.msk.f32.mxu1 %vm12141_vm10, %v12124_v11 }
 0x1bb   :  { %v7468_v22 = vpack.c.bf16 %v6471_v30, %v2298_v7 }
 0x1bd   :  { %6414 = vmatmul.mubr.msk.f32.gmra.mrb[78].mxu1 %vm8291_vm11, %v12124_v11  ;;  %7469 = vmatprep.subr.bf16.mxu1 %v7468_v22  ;;  %v6562_v54 = vpop.f32.mrb[96].mxu0 }
 0x1be   :  { %7471 = vmatpush3.bf16.msra.mxu1 %v7468_v22  ;;  %v2550_v44 = vpop.f32.mrb[97].mxu0  ;;  %6504 = vmatprep.mubr.msk.f32.mxu1 %vm12132_vm14, %v12124_v11 }
 0x1bf   :  { %v7504_v35 = vpack.c.bf16 %v6562_v54, %v2550_v44 }
 0x1c1   :  { %6505 = vmatmul.mubr.msk.f32.vlgmr.msra.gmra.mrb[80].mxu1 %vm8137_vm1, %v12124_v11  ;;  %v6565_v63 = vpop.f32.mrb[98].mxu0  ;;  %7505 = vmatprep.subr.bf16.mxu1 %v7504_v35 }
 0x1c2   :  { %v2560_v23 = vpop.f32.mrb[99].mxu0  ;;  %7507 = vmatpush3.bf16.msra.mxu1 %v7504_v35  ;;  %6507 = vmatprep.mubr.msk.f32.mxu1 %vm12143_vm15, %v12124_v11 }
 0x1c3   :  { %v7508_v29 = vpack.c.bf16 %v6565_v63, %v2560_v23 }
 0x1c5   :  { %6508 = vmatmul.mubr.msk.f32.gmra.mrb[82].mxu1 %vm12144_vm8, %v12124_v11  ;;  %v6568_v15 = vpop.f32.mrb[100].mxu0  ;;  %7509 = vmatprep.subr.bf16.mxu1 %v7508_v29 }
 0x1c6   :  { %v2570_v43 = vpop.f32.mrb[101].mxu0  ;;  %7511 = vmatpush3.bf16.msra.mxu1 %v7508_v29  ;;  %6510 = vmatprep.mubr.msk.f32.mxu1 %vm12145_vm0, %v12124_v11 }
 0x1c7   :  { %v7512_v34 = vpack.c.bf16 %v6568_v15, %v2570_v43 }
 0x1c9   :  { %6511 = vmatmul.mubr.msk.f32.gmra.mrb[84].mxu1 %vm12146_vm13, %v12124_v11  ;;  %v6571_v51 = vpop.f32.mrb[102].mxu0  ;;  %7513 = vmatprep.subr.bf16.mxu1 %v7512_v34 }
 0x1ca   :  { %v2580_v42 = vpop.f32.mrb[103].mxu0  ;;  %7515 = vmatpush3.bf16.msra.mxu1 %v7512_v34  ;;  %6513 = vmatprep.mubr.msk.f32.mxu1 %vm12135_vm2, %v12124_v11 }
 0x1cb   :  { %v7516_v41 = vpack.c.bf16 %v6571_v51, %v2580_v42 }
 0x1cd   :  { %6514 = vmatmul.mubr.msk.f32.gmra.mrb[86].mxu1 %vm12147_vm12, %v12124_v11  ;;  %v6574_v61 = vpop.f32.mrb[104].mxu0  ;;  %7517 = vmatprep.subr.bf16.mxu1 %v7516_v41 }
 0x1ce   :  { %v2590_v46 = vpop.f32.mrb[105].mxu0  ;;  %7519 = vmatpush3.bf16.msra.mxu1 %v7516_v41  ;;  %6516 = vmatprep.mubr.msk.f32.mxu1 %vm12137_vm4, %v12124_v11 }
 0x1cf   :  { %v7520_v56 = vpack.c.bf16 %v6574_v61, %v2590_v46 }
 0x1d1   :  { %6517 = vmatmul.mubr.msk.f32.gmra.mrb[88].mxu1 %vm12138_vm3, %v12124_v11  ;;  %v6577_v49 = vpop.f32.mrb[106].mxu0  ;;  %7521 = vmatprep.subr.bf16.mxu1 %v7520_v56 }
 0x1d2   :  { %v2600_v25 = vpop.f32.mrb[107].mxu0  ;;  %7523 = vmatpush3.bf16.msra.mxu1 %v7520_v56  ;;  %6519 = vmatprep.mubr.msk.f32.mxu1 %vm12129_vm6, %v12124_v11 }
 0x1d3   :  { %v7524_v5 = vpack.c.bf16 %v6577_v49, %v2600_v25 }
 0x1d5   :  { %6520 = vmatmul.mubr.msk.f32.gmra.mrb[90].mxu1 %vm12139_vm5, %v12124_v11  ;;  %v6580_v18 = vpop.f32.mrb[108].mxu0  ;;  %7525 = vmatprep.subr.bf16.mxu1 %v7524_v5 }
 0x1d6   :  { %v2610_v36 = vpop.f32.mrb[109].mxu0  ;;  %7527 = vmatpush3.bf16.msra.mxu1 %v7524_v5  ;;  %6522 = vmatprep.mubr.msk.f32.mxu1 %vm8263_vm9, %v12124_v11 }
 0x1d7   :  { %v7528_v24 = vpack.c.bf16 %v6580_v18, %v2610_v36 }
 0x1d9   :  { %6523 = vmatmul.mubr.msk.f32.gmra.mrb[92].mxu1 %vm12131_vm7, %v12124_v11  ;;  %v6583_v59 = vpop.f32.mrb[110].mxu0  ;;  %7529 = vmatprep.subr.bf16.mxu1 %v7528_v24 }
 0x1da   :  { %v2620_v14 = vpop.f32.mrb[111].mxu0  ;;  %7531 = vmatpush3.bf16.msra.mxu1 %v7528_v24  ;;  %6525 = vmatprep.mubr.msk.f32.mxu1 %vm12141_vm10, %v12124_v11 }
 0x1db   :  { %v7532_v28 = vpack.c.bf16 %v6583_v59, %v2620_v14 }
 0x1dd   :  { %6526 = vmatmul.mubr.msk.f32.gmra.mrb[94].mxu1 %vm8291_vm11, %v12124_v11  ;;  %7533 = vmatprep.subr.bf16.mxu1 %v7532_v28  ;;  %v6674_v55 = vpop.f32.mrb[112].mxu0 }
 0x1de   :  { %7535 = vmatpush3.bf16.msra.mxu1 %v7532_v28  ;;  %v2872_v50 = vpop.f32.mrb[113].mxu0  ;;  %6616 = vmatprep.mubr.msk.f32.mxu1 %vm12132_vm14, %v12124_v11 }
 0x1df   :  { %v7568_v3 = vpack.c.bf16 %v6674_v55, %v2872_v50 }
 0x1e1   :  { %6617 = vmatmul.mubr.msk.f32.vlgmr.msra.gmra.mrb[96].mxu1 %vm8137_vm1, %v12124_v11  ;;  %v6677_v1 = vpop.f32.mrb[114].mxu0  ;;  %7569 = vmatprep.subr.bf16.mxu1 %v7568_v3 }
 0x1e2   :  { %v2882_v31 = vpop.f32.mrb[115].mxu0  ;;  %7571 = vmatpush3.bf16.msra.mxu1 %v7568_v3  ;;  %6619 = vmatprep.mubr.msk.f32.mxu1 %vm12143_vm15, %v12124_v11 }
 0x1e3   :  { %v7572_v8 = vpack.c.bf16 %v6677_v1, %v2882_v31 }
 0x1e5   :  { %6620 = vmatmul.mubr.msk.f32.gmra.mrb[98].mxu1 %vm12144_vm8, %v12124_v11  ;;  %v6680_v62 = vpop.f32.mrb[116].mxu0  ;;  %7573 = vmatprep.subr.bf16.mxu1 %v7572_v8 }
 0x1e6   :  { %v2892_v10 = vpop.f32.mrb[117].mxu0  ;;  %7575 = vmatpush3.bf16.msra.mxu1 %v7572_v8  ;;  %6622 = vmatprep.mubr.msk.f32.mxu1 %vm12145_vm0, %v12124_v11 }
 0x1e7   :  { %v7576_v9 = vpack.c.bf16 %v6680_v62, %v2892_v10 }
 0x1e9   :  { %6623 = vmatmul.mubr.msk.f32.gmra.mrb[100].mxu1 %vm12146_vm13, %v12124_v11  ;;  %v6683_v6 = vpop.f32.mrb[118].mxu0  ;;  %7577 = vmatprep.subr.bf16.mxu1 %v7576_v9 }
 0x1ea   :  { %v2902_v12 = vpop.f32.mrb[119].mxu0  ;;  %7579 = vmatpush3.bf16.msra.mxu1 %v7576_v9  ;;  %6625 = vmatprep.mubr.msk.f32.mxu1 %vm12135_vm2, %v12124_v11 }
 0x1eb   :  { %v7580_v0 = vpack.c.bf16 %v6683_v6, %v2902_v12 }
 0x1ed   :  { %6626 = vmatmul.mubr.msk.f32.gmra.mrb[102].mxu1 %vm12147_vm12, %v12124_v11  ;;  %v6686_v37 = vpop.f32.mrb[120].mxu0  ;;  %7581 = vmatprep.subr.bf16.mxu1 %v7580_v0 }
 0x1ee   :  { %v2912_v2 = vpop.f32.mrb[121].mxu0  ;;  %7583 = vmatpush3.bf16.msra.mxu1 %v7580_v0  ;;  %6628 = vmatprep.mubr.msk.f32.mxu1 %vm12137_vm4, %v12124_v11 }
 0x1ef   :  { %v7584_v16 = vpack.c.bf16 %v6686_v37, %v2912_v2 }
 0x1f1   :  { %6629 = vmatmul.mubr.msk.f32.gmra.mrb[104].mxu1 %vm12138_vm3, %v12124_v11  ;;  %v6689_v45 = vpop.f32.mrb[122].mxu0  ;;  %7585 = vmatprep.subr.bf16.mxu1 %v7584_v16 }
 0x1f2   :  { %v2922_v4 = vpop.f32.mrb[123].mxu0  ;;  %7587 = vmatpush3.bf16.msra.mxu1 %v7584_v16  ;;  %6631 = vmatprep.mubr.msk.f32.mxu1 %vm12129_vm6, %v12124_v11 }
 0x1f3   :  { %v7588_v60 = vpack.c.bf16 %v6689_v45, %v2922_v4 }
 0x1f4   :  { %v9731_v38 = vpop.f32.mrb[0].mxu1 }
 0x1f5   :  { %v9733_v17 = vpop.f32.mrb[1].mxu1  ;;  %6632 = vmatmul.mubr.msk.f32.gmra.mrb[106].mxu1 %vm12139_vm5, %v12124_v11  ;;  %v6692_v30 = vpop.f32.mrb[124].mxu0  ;;  %7589 = vmatprep.subr.bf16.mxu1 %v7588_v60  ;;  %7799 = vrcp.f32 %v9731_v38 }
 0x1f6   :  { %v2932_v7 = vpop.f32.mrb[125].mxu0  ;;  %7591 = vmatpush3.bf16.msra.mxu1 %v7588_v60  ;;  %6634 = vmatprep.mubr.msk.f32.mxu1 %vm8263_vm9, %v12124_v11  ;;  %7801 = vrcp.f32 %v9733_v17 }
 0x1f7   :  { %v7592_v22 = vpack.c.bf16 %v6692_v30, %v2932_v7 }
 0x1f8   :  { %v9741_v54 = vpop.f32.mrb[2].mxu1 }
 0x1f9   :  { %v9743_v44 = vpop.f32.mrb[3].mxu1  ;;  %6635 = vmatmul.mubr.msk.f32.gmra.mrb[108].mxu1 %vm12131_vm7, %v12124_v11  ;;  %v6695_v35 = vpop.f32.mrb[126].mxu0  ;;  %7593 = vmatprep.subr.bf16.mxu1 %v7592_v22  ;;  %7803 = vrcp.f32 %v9741_v54 }
 0x1fa   :  { %v2942_v63 = vpop.f32.mrb[127].mxu0  ;;  %7595 = vmatpush3.bf16.msra.mxu1 %v7592_v22  ;;  %6637 = vmatprep.mubr.msk.f32.mxu1 %vm12141_vm10, %v12124_v11  ;;  %7805 = vrcp.f32 %v9743_v44 }
 0x1fb   :  { %v7596_v23 = vpack.c.bf16 %v6695_v35, %v2942_v63 }
 0x1fc   :  { %v9751_v29 = vpop.f32.mrb[4].mxu1 }
 0x1fd   :  { %v9753_v15 = vpop.f32.mrb[5].mxu1  ;;  %6638 = vmatmul.mubr.msk.f32.gmra.mrb[110].mxu1 %vm8291_vm11, %v12124_v11  ;;  %7597 = vmatprep.subr.bf16.mxu1 %v7596_v23  ;;  %v6786_v43 = vpop.f32.mrb[128].mxu0  ;;  %7807 = vrcp.f32 %v9751_v29 }
 0x1fe   :  { %7599 = vmatpush3.bf16.msra.mxu1 %v7596_v23  ;;  %v3515_v34 = vpop.f32.mrb[129].mxu0  ;;  %6728 = vmatprep.mubr.msk.f32.mxu1 %vm12132_vm14, %v12124_v11  ;;  %7809 = vrcp.f32 %v9753_v15 }
 0x1ff   :  { %v7632_v51 = vpack.c.bf16 %v6786_v43, %v3515_v34 }
 0x200   :  { %v9761_v42 = vpop.f32.mrb[6].mxu1 }
 0x201   :  { %v9763_v41 = vpop.f32.mrb[7].mxu1  ;;  %6729 = vmatmul.mubr.msk.f32.vlgmr.msra.gmra.mrb[112].mxu1 %vm8137_vm1, %v12124_v11  ;;  %v6789_v61 = vpop.f32.mrb[130].mxu0  ;;  %7633 = vmatprep.subr.bf16.mxu1 %v7632_v51  ;;  %7811 = vrcp.f32 %v9761_v42 }
 0x202   :  { %v3525_v46 = vpop.f32.mrb[131].mxu0  ;;  %7635 = vmatpush3.bf16.msra.mxu1 %v7632_v51  ;;  %6731 = vmatprep.mubr.msk.f32.mxu1 %vm12143_vm15, %v12124_v11  ;;  %7813 = vrcp.f32 %v9763_v41 }
 0x203   :  { %v7636_v56 = vpack.c.bf16 %v6789_v61, %v3525_v46 }
 0x204   :  { %v9771_v49 = vpop.f32.mrb[8].mxu1 }
 0x205   :  { %v9773_v25 = vpop.f32.mrb[9].mxu1  ;;  %6732 = vmatmul.mubr.msk.f32.gmra.mrb[114].mxu1 %vm12144_vm8, %v12124_v11  ;;  %v6792_v5 = vpop.f32.mrb[132].mxu0  ;;  %7637 = vmatprep.subr.bf16.mxu1 %v7636_v56  ;;  %7815 = vrcp.f32 %v9771_v49 }
 0x206   :  { %v3535_v18 = vpop.f32.mrb[133].mxu0  ;;  %7639 = vmatpush3.bf16.msra.mxu1 %v7636_v56  ;;  %6734 = vmatprep.mubr.msk.f32.mxu1 %vm12145_vm0, %v12124_v11  ;;  %7817 = vrcp.f32 %v9773_v25 }
 0x207   :  { %v7640_v36 = vpack.c.bf16 %v6792_v5, %v3535_v18 }
 0x208   :  { %v9781_v24 = vpop.f32.mrb[10].mxu1 }
 0x209   :  { %v9783_v59 = vpop.f32.mrb[11].mxu1  ;;  %6735 = vmatmul.mubr.msk.f32.gmra.mrb[116].mxu1 %vm12146_vm13, %v12124_v11  ;;  %v6795_v14 = vpop.f32.mrb[134].mxu0  ;;  %7641 = vmatprep.subr.bf16.mxu1 %v7640_v36  ;;  %7819 = vrcp.f32 %v9781_v24 }
 0x20a   :  { %v3545_v28 = vpop.f32.mrb[135].mxu0  ;;  %7643 = vmatpush3.bf16.msra.mxu1 %v7640_v36  ;;  %6737 = vmatprep.mubr.msk.f32.mxu1 %vm12135_vm2, %v12124_v11  ;;  %7821 = vrcp.f32 %v9783_v59 }
 0x20b   :  { %v7644_v55 = vpack.c.bf16 %v6795_v14, %v3545_v28 }
 0x20c   :  { %v9791_v50 = vpop.f32.mrb[12].mxu1 }
 0x20d   :  { %v9793_v3 = vpop.f32.mrb[13].mxu1  ;;  %6738 = vmatmul.mubr.msk.f32.gmra.mrb[118].mxu1 %vm12147_vm12, %v12124_v11  ;;  %v6798_v1 = vpop.f32.mrb[136].mxu0  ;;  %7645 = vmatprep.subr.bf16.mxu1 %v7644_v55  ;;  %7823 = vrcp.f32 %v9791_v50 }
 0x20e   :  { %v3555_v31 = vpop.f32.mrb[137].mxu0  ;;  %7647 = vmatpush3.bf16.msra.mxu1 %v7644_v55  ;;  %6740 = vmatprep.mubr.msk.f32.mxu1 %vm12137_vm4, %v12124_v11  ;;  %7825 = vrcp.f32 %v9793_v3 }
 0x20f   :  { %v7648_v8 = vpack.c.bf16 %v6798_v1, %v3555_v31 }
 0x210   :  { %v9801_v62 = vpop.f32.mrb[14].mxu1 }
 0x211   :  { %v9803_v10 = vpop.f32.mrb[15].mxu1  ;;  %6741 = vmatmul.mubr.msk.f32.gmra.mrb[120].mxu1 %vm12138_vm3, %v12124_v11  ;;  %v6801_v9 = vpop.f32.mrb[138].mxu0  ;;  %7649 = vmatprep.subr.bf16.mxu1 %v7648_v8  ;;  %7827 = vrcp.f32 %v9801_v62 }
 0x212   :  { %v3565_v6 = vpop.f32.mrb[139].mxu0  ;;  %7651 = vmatpush3.bf16.msra.mxu1 %v7648_v8  ;;  %6743 = vmatprep.mubr.msk.f32.mxu1 %vm12129_vm6, %v12124_v11  ;;  %7829 = vrcp.f32 %v9803_v10 }
 0x213   :  { %v7652_v12 = vpack.c.bf16 %v6801_v9, %v3565_v6 }
 0x214   :  { %v9811_v0 = vpop.f32.mrb[16].mxu1 }
 0x215   :  { %v9813_v37 = vpop.f32.mrb[17].mxu1  ;;  %6744 = vmatmul.mubr.msk.f32.gmra.mrb[122].mxu1 %vm12139_vm5, %v12124_v11  ;;  %v6804_v2 = vpop.f32.mrb[140].mxu0  ;;  %7653 = vmatprep.subr.bf16.mxu1 %v7652_v12 }
 0x216   :  { %v3575_v16 = vpop.f32.mrb[141].mxu0  ;;  %7655 = vmatpush3.bf16.msra.mxu1 %v7652_v12  ;;  %6746 = vmatprep.mubr.msk.f32.mxu1 %vm8263_vm9, %v12124_v11 }
 0x217   :  { %v7656_v45 = vpack.c.bf16 %v6804_v2, %v3575_v16 }
 0x218   :  { %v9821_v4 = vpop.f32.mrb[18].mxu1 }
 0x219   :  { %v9823_v60 = vpop.f32.mrb[19].mxu1  ;;  %6747 = vmatmul.mubr.msk.f32.gmra.mrb[124].mxu1 %vm12131_vm7, %v12124_v11  ;;  %v6807_v30 = vpop.f32.mrb[142].mxu0  ;;  %7657 = vmatprep.subr.bf16.mxu1 %v7656_v45 }
 0x21a   :  { %v3585_v7 = vpop.f32.mrb[143].mxu0  ;;  %7659 = vmatpush3.bf16.msra.mxu1 %v7656_v45  ;;  %6749 = vmatprep.mubr.msk.f32.mxu1 %vm12141_vm10, %v12124_v11 }
 0x21b   :  { %v7660_v22 = vpack.c.bf16 %v6807_v30, %v3585_v7 }
 0x21c   :  { %v9831_v35 = vpop.f32.mrb[20].mxu1 }
 0x21d   :  { %v9833_v63 = vpop.f32.mrb[21].mxu1  ;;  %6750 = vmatmul.mubr.msk.f32.gmra.mrb[126].mxu1 %vm8291_vm11, %v12124_v11  ;;  %7661 = vmatprep.subr.bf16.mxu1 %v7660_v22  ;;  %v6898_v23 = vpop.f32.mrb[144].mxu0 }
 0x21e   :  { %7663 = vmatpush3.bf16.msra.mxu1 %v7660_v22  ;;  %v3837_v43 = vpop.f32.mrb[145].mxu0  ;;  %6840 = vmatprep.mubr.msk.f32.mxu1 %vm12132_vm14, %v12124_v11 }
 0x21f   :  { %v7696_v34 = vpack.c.bf16 %v6898_v23, %v3837_v43 }
 0x220   :  { %v9841_v51 = vpop.f32.mrb[22].mxu1 }
 0x221   :  { %v9843_v61 = vpop.f32.mrb[23].mxu1  ;;  %6841 = vmatmul.mubr.msk.f32.vlgmr.msra.gmra.mrb[128].mxu1 %vm8137_vm1, %v12124_v11  ;;  %v6901_v46 = vpop.f32.mrb[146].mxu0  ;;  %7697 = vmatprep.subr.bf16.mxu1 %v7696_v34 }
 0x222   :  { %v3847_v56 = vpop.f32.mrb[147].mxu0  ;;  %7699 = vmatpush3.bf16.msra.mxu1 %v7696_v34  ;;  %6843 = vmatprep.mubr.msk.f32.mxu1 %vm12143_vm15, %v12124_v11 }
 0x223   :  { %v7700_v5 = vpack.c.bf16 %v6901_v46, %v3847_v56 }
 0x224   :  { %v9851_v18 = vpop.f32.mrb[24].mxu1 }
 0x225   :  { %v9853_v36 = vpop.f32.mrb[25].mxu1  ;;  %6844 = vmatmul.mubr.msk.f32.gmra.mrb[130].mxu1 %vm12144_vm8, %v12124_v11  ;;  %v6904_v14 = vpop.f32.mrb[148].mxu0  ;;  %7701 = vmatprep.subr.bf16.mxu1 %v7700_v5 }
 0x226   :  { %v3857_v28 = vpop.f32.mrb[149].mxu0  ;;  %7703 = vmatpush3.bf16.msra.mxu1 %v7700_v5  ;;  %6846 = vmatprep.mubr.msk.f32.mxu1 %vm12145_vm0, %v12124_v11 }
 0x227   :  { %v7704_v55 = vpack.c.bf16 %v6904_v14, %v3857_v28 }
 0x228   :  { %v9861_v1 = vpop.f32.mrb[26].mxu1 }
 0x229   :  { %v9863_v31 = vpop.f32.mrb[27].mxu1  ;;  %6847 = vmatmul.mubr.msk.f32.gmra.mrb[132].mxu1 %vm12146_vm13, %v12124_v11  ;;  %v6907_v8 = vpop.f32.mrb[150].mxu0  ;;  %7705 = vmatprep.subr.bf16.mxu1 %v7704_v55 }
 0x22a   :  { %v3867_v9 = vpop.f32.mrb[151].mxu0  ;;  %7707 = vmatpush3.bf16.msra.mxu1 %v7704_v55  ;;  %6849 = vmatprep.mubr.msk.f32.mxu1 %vm12135_vm2, %v12124_v11 }
 0x22b   :  { %v7708_v6 = vpack.c.bf16 %v6907_v8, %v3867_v9 }
 0x22c   :  { %v9871_v12 = vpop.f32.mrb[28].mxu1 }
 0x22d   :  { %v9873_v2 = vpop.f32.mrb[29].mxu1  ;;  %6850 = vmatmul.mubr.msk.f32.gmra.mrb[134].mxu1 %vm12147_vm12, %v12124_v11  ;;  %v6910_v16 = vpop.f32.mrb[152].mxu0  ;;  %7709 = vmatprep.subr.bf16.mxu1 %v7708_v6 }
 0x22e   :  { %v3877_v45 = vpop.f32.mrb[153].mxu0  ;;  %7711 = vmatpush3.bf16.msra.mxu1 %v7708_v6  ;;  %6852 = vmatprep.mubr.msk.f32.mxu1 %vm12137_vm4, %v12124_v11 }
 0x22f   :  { %v7712_v30 = vpack.c.bf16 %v6910_v16, %v3877_v45 }
 0x230   :  { %v9881_v7 = vpop.f32.mrb[30].mxu1 }
 0x231   :  { %12148 = vst [vmem:[#allocation11_spill] sm:$0xff] %v9881_v7  ;;  %v9883_v22 = vpop.f32.mrb[31].mxu1  ;;  %6853 = vmatmul.mubr.msk.f32.gmra.mrb[136].mxu1 %vm12138_vm3, %v12124_v11  ;;  %v6913_v23 = vpop.f32.mrb[154].mxu0  ;;  %7713 = vmatprep.subr.bf16.mxu1 %v7712_v30 }
 0x232   :  { %12149 = vst [vmem:[#allocation12_spill] sm:$0xff] %v9883_v22  ;;  %v3887_v43 = vpop.f32.mrb[155].mxu0  ;;  %7715 = vmatpush3.bf16.msra.mxu1 %v7712_v30  ;;  %6855 = vmatprep.mubr.msk.f32.mxu1 %vm12129_vm6, %v12124_v11 }
 0x233   :  { %v7716_v34 = vpack.c.bf16 %v6913_v23, %v3887_v43 }
 0x234   :  { %v9891_v46 = vpop.f32.mrb[32].mxu1 }
 0x235   :  { %v9893_v56 = vpop.f32.mrb[33].mxu1  ;;  %6856 = vmatmul.mubr.msk.f32.gmra.mrb[138].mxu1 %vm12139_vm5, %v12124_v11  ;;  %v6916_v5 = vpop.f32.mrb[156].mxu0  ;;  %7717 = vmatprep.subr.bf16.mxu1 %v7716_v34 }
 0x236   :  { %v3897_v14 = vpop.f32.mrb[157].mxu0  ;;  %7719 = vmatpush3.bf16.msra.mxu1 %v7716_v34  ;;  %6858 = vmatprep.mubr.msk.f32.mxu1 %vm8263_vm9, %v12124_v11 }
 0x237   :  { %v7720_v28 = vpack.c.bf16 %v6916_v5, %v3897_v14 }
 0x238   :  { %v9901_v55 = vpop.f32.mrb[34].mxu1 }
 0x239   :  { %v9903_v8 = vpop.f32.mrb[35].mxu1  ;;  %6859 = vmatmul.mubr.msk.f32.gmra.mrb[140].mxu1 %vm12131_vm7, %v12124_v11  ;;  %v6919_v9 = vpop.f32.mrb[158].mxu0  ;;  %7721 = vmatprep.subr.bf16.mxu1 %v7720_v28 }
 0x23a   :  { %v3907_v6 = vpop.f32.mrb[159].mxu0  ;;  %7723 = vmatpush3.bf16.msra.mxu1 %v7720_v28  ;;  %6861 = vmatprep.mubr.msk.f32.mxu1 %vm12141_vm10, %v12124_v11 }
 0x23b   :  { %v7724_v16 = vpack.c.bf16 %v6919_v9, %v3907_v6 }
 0x23c   :  { %v9911_v45 = vpop.f32.mrb[36].mxu1 }
 0x23d   :  { %v9913_v30 = vpop.f32.mrb[37].mxu1  ;;  %6862 = vmatmul.mubr.msk.f32.gmra.mrb[142].mxu1 %vm8291_vm11, %v12124_v11  ;;  %7725 = vmatprep.subr.bf16.mxu1 %v7724_v16  ;;  %v7010_v23 = vpop.f32.mrb[160].mxu0 }
 0x23e   :  { %7727 = vmatpush3.bf16.msra.mxu1 %v7724_v16  ;;  %v4159_v43 = vpop.f32.mrb[161].mxu0  ;;  %6952 = vmatprep.mubr.msk.f32.mxu1 %vm12132_vm14, %v12124_v11 }
 0x23f   :  { %v7760_v34 = vpack.c.bf16 %v7010_v23, %v4159_v43 }
 0x240   :  { %v9921_v5 = vpop.f32.mrb[38].mxu1 }
 0x241   :  { %v9923_v14 = vpop.f32.mrb[39].mxu1  ;;  %6953 = vmatmul.mubr.msk.f32.vlgmr.msra.gmra.mrb[144].mxu1 %vm8137_vm1, %v12124_v11  ;;  %v7013_v28 = vpop.f32.mrb[162].mxu0  ;;  %7761 = vmatprep.subr.bf16.mxu1 %v7760_v34 }
 0x242   :  { %v4169_v9 = vpop.f32.mrb[163].mxu0  ;;  %7763 = vmatpush3.bf16.msra.mxu1 %v7760_v34  ;;  %6955 = vmatprep.mubr.msk.f32.mxu1 %vm12143_vm15, %v12124_v11 }
 0x243   :  { %v7764_v6 = vpack.c.bf16 %v7013_v28, %v4169_v9 }
 0x244   :  { %v9931_v16 = vpop.f32.mrb[40].mxu1 }
 0x245   :  { %v9933_v23 = vpop.f32.mrb[41].mxu1  ;;  %6956 = vmatmul.mubr.msk.f32.gmra.mrb[146].mxu1 %vm12144_vm8, %v12124_v11  ;;  %v7016_v43 = vpop.f32.mrb[164].mxu0  ;;  %7765 = vmatprep.subr.bf16.mxu1 %v7764_v6 }
 0x246   :  { %v4179_v22 = vpop.f32.mrb[165].mxu0  ;;  %7767 = vmatpush3.bf16.msra.mxu1 %v7764_v6  ;;  %6958 = vmatprep.mubr.msk.f32.mxu1 %vm12145_vm0, %v12124_v11 }
 0x247   :  { %v7768_v34 = vpack.c.bf16 %v7016_v43, %v4179_v22 }
 0x248   :  { %v9943_v28 = vpop.f32.mrb[42].mxu1 }
 0x249   :  { %v9945_v9 = vpop.f32.mrb[43].mxu1  ;;  %6959 = vmatmul.mubr.msk.f32.gmra.mrb[148].mxu1 %vm12146_vm13, %v12124_v11  ;;  %v7019_v7 = vpop.f32.mrb[166].mxu0  ;;  %7769 = vmatprep.subr.bf16.mxu1 %v7768_v34 }
 0x24a   :  { %v4189_v38 = vpop.f32.mrb[167].mxu0  ;;  %7771 = vmatpush3.bf16.msra.mxu1 %v7768_v34  ;;  %6961 = vmatprep.mubr.msk.f32.mxu1 %vm12135_vm2, %v12124_v11 }
 0x24b   :  { %v7772_v17 = vpack.c.bf16 %v7019_v7, %v4189_v38  ;;  %v9967_v7 = vpop.eup %7799 }
 0x24c   :  { %v9955_v22 = vpop.f32.mrb[44].mxu1  ;;  %12150 = vst [vmem:[#allocation13_spill] sm:$0xff] %v9967_v7  ;;  %v9971_v38 = vpop.eup %7801  ;;  %v9975_v33 = vmul.f32 %v9967_v7, %v9891_v46  ;;  %v9993_v46 = vmul.f32 %v9967_v7, %v9811_v0 }
 0x24d   :  { %v9957_v6 = vpop.f32.mrb[45].mxu1  ;;  %6962 = vmatmul.mubr.msk.f32.gmra.mrb[150].mxu1 %vm12147_vm12, %v12124_v11  ;;  %v7022_v43 = vpop.f32.mrb[168].mxu0  ;;  %7773 = vmatprep.subr.bf16.mxu1 %v7772_v17  ;;  %12151 = vst [vmem:[#allocation14_spill] sm:$0xff] %v9971_v38  ;;  %v9985_v15 = vmul.f32 %v9971_v38, %v9893_v56  ;;  %v9999_v42 = vmul.f32 %v9971_v38, %v9813_v37 }
 0x24e   :  { %v4199_v54 = vpop.f32.mrb[169].mxu0  ;;  %7775 = vmatpush3.bf16.msra.mxu1 %v7772_v17  ;;  %6964 = vmatprep.mubr.msk.f32.mxu1 %vm12137_vm4, %v12124_v11  ;;  %12153 = vst [vmem:[#allocation16_spill] sm:$0xff] %v9993_v46  ;;  %v9995_v39 = vpop.eup %7803  ;;  %v10012_v0 = vmul.f32 %v9975_v33, %v9993_v46 }
 0x24f   :  { %v7776_v44 = vpack.c.bf16 %v7022_v43, %v4199_v54  ;;  %12152 = vst [vmem:[#allocation15_spill] sm:$0xff] %v9985_v15  ;;  %12154 = vst [vmem:[#allocation17_spill] sm:$0xff] %v9995_v39  ;;  %v10001_v40 = vpop.eup %7805  ;;  %v10035_v49 = vmul.f32 %v9995_v39, %v9821_v4 }
 0x250   :  { %v9969_v34 = vpop.f32.mrb[46].mxu1  ;;  %12155 = vst [vmem:[#allocation18_spill] sm:$0xff] %v9999_v42  ;;  %12156 = vst [vmem:[#allocation19_spill] sm:$0xff] %v10001_v40 }
 0x251   :  { %v9977_v29 = vpop.f32.mrb[47].mxu1  ;;  %6965 = vmatmul.mubr.msk.f32.gmra.mrb[152].mxu1 %vm12138_vm3, %v12124_v11  ;;  %v7025_v17 = vpop.f32.mrb[170].mxu0  ;;  %7777 = vmatprep.subr.bf16.mxu1 %v7776_v44  ;;  %12159 = vst [vmem:[#allocation22_spill] sm:$0xff] %v10035_v49 }
 0x252   :  { %v4209_v43 = vpop.f32.mrb[171].mxu0  ;;  %7779 = vmatpush3.bf16.msra.mxu1 %v7776_v44  ;;  %6967 = vmatprep.mubr.msk.f32.mxu1 %vm12129_vm6, %v12124_v11  ;;  %v10005_v44 = vmul.f32 %v9995_v39, %v9901_v55  ;;  %v10020_v55 = vmul.f32 %v10001_v40, %v9903_v8 }
 0x253   :  { %v7780_v54 = vpack.c.bf16 %v7025_v17, %v4209_v43 }
 0x254   :  { %v6282_v56 = vpop.f32.mrb[48].mxu1 }
 0x255   :  { %v10008_v41 = vmul.f32 %v9967_v7, %v6282_v56  ;;  %v1409_v17 = vpop.f32.mrb[49].mxu1  ;;  %6968 = vmatmul.mubr.msk.f32.gmra.mrb[154].mxu1 %vm12139_vm5, %v12124_v11  ;;  %v7028_v37 = vpop.f32.mrb[172].mxu0  ;;  %7781 = vmatprep.subr.bf16.mxu1 %v7780_v54  ;;  %v10027_v56 = vmul.f32 %v9985_v15, %v9999_v42  ;;  %v10043_v42 = vmul.f32 %v10001_v40, %v9823_v60 }
 0x256   :  { %v10023_v43 = vmul.f32 %v9971_v38, %v1409_v17  ;;  %v4219_v46 = vpop.f32.mrb[173].mxu0  ;;  %7783 = vmatpush3.bf16.msra.mxu1 %v7780_v54  ;;  %6970 = vmatprep.mubr.msk.f32.mxu1 %vm8263_vm9, %v12124_v11  ;;  %v10039_v38 = vpop.eup %7807 }
 0x257   :  { %12158 = vst [vmem:[#allocation21_spill] sm:$0xff] %v10027_v56  ;;  %v7784_v17 = vpack.c.bf16 %v7028_v37, %v4219_v46  ;;  %12160 = vst [vmem:[#allocation23_spill] sm:$0xff] %v10039_v38  ;;  %v10047_v15 = vpop.eup %7809  ;;  %v10051_v25 = vmul.f32 %v10039_v38, %v9911_v45  ;;  %v10058_v46 = vmul.f32 %v10005_v44, %v10035_v49 }
 0x258   :  { %12157 = vst [vmem:[#allocation20_spill] sm:$0xff] %v10023_v43  ;;  %12161 = vst [vmem:[#allocation24_spill] sm:$0xff] %v10043_v42  ;;  %v6285_v52 = vpop.f32.mrb[50].mxu1  ;;  %v10066_v45 = vmul.f32 %v10047_v15, %v9913_v30  ;;  %v10073_v54 = vmul.f32 %v10020_v55, %v10043_v42  ;;  %v10081_v24 = vmul.f32 %v10039_v38, %v9831_v35  ;;  %v10085_v49 = vpop.eup %7811 }
 0x259   :  { %12162 = vst [vmem:[#allocation25_spill] sm:$0xff] %v10047_v15  ;;  %v10054_v4 = vmul.f32 %v9995_v39, %v6285_v52  ;;  %v1419_v37 = vpop.f32.mrb[51].mxu1  ;;  %6971 = vmatmul.mubr.msk.f32.gmra.mrb[156].mxu1 %vm12131_vm7, %v12124_v11  ;;  %v7031_v60 = vpop.f32.mrb[174].mxu0  ;;  %7785 = vmatprep.subr.bf16.mxu1 %v7784_v17  ;;  %12164 = vst [vmem:[#allocation27_spill] sm:$0xff] %v10085_v49  ;;  %v10089_v42 = vmul.f32 %v10047_v15, %v9833_v63 }
 0x25a   :  { %v10069_v52 = vmul.f32 %v10001_v40, %v1419_v37  ;;  %v4229_v8 = vpop.f32.mrb[175].mxu0  ;;  %7787 = vmatpush3.bf16.msra.mxu1 %v7784_v17  ;;  %6973 = vmatprep.mubr.msk.f32.mxu1 %vm12141_vm10, %v12124_v11  ;;  %12163 = vst [vmem:[#allocation26_spill] sm:$0xff] %v10081_v24  ;;  %v10093_v43 = vpop.eup %7813  ;;  %v10097_v59 = vmul.f32 %v10085_v49, %v9921_v5 }
 0x25b   :  { %v7788_v37 = vpack.c.bf16 %v7031_v60, %v4229_v8  ;;  %12165 = vst [vmem:[#allocation28_spill] sm:$0xff] %v10089_v42  ;;  %12166 = vst [vmem:[#allocation29_spill] sm:$0xff] %v10093_v43  ;;  %v10104_v8 = vmul.f32 %v10051_v25, %v10081_v24  ;;  %v10112_v63 = vmul.f32 %v10093_v43, %v9923_v14 }
 0x25c   :  { %v6288_v56 = vpop.f32.mrb[52].mxu1  ;;  %v10127_v50 = vmul.f32 %v10085_v49, %v9841_v51  ;;  %v10135_v17 = vmul.f32 %v10093_v43, %v9843_v61 }
 0x25d   :  { %v10100_v35 = vmul.f32 %v10039_v38, %v6288_v56  ;;  %v1429_v60 = vpop.f32.mrb[53].mxu1  ;;  %6974 = vmatmul.mubr.msk.f32.gmra.mrb[158].mxu1 %vm8291_vm11, %v12124_v11  ;;  %7789 = vmatprep.subr.bf16.mxu1 %v7788_v37  ;;  %v10119_v56 = vmul.f32 %v10066_v45, %v10089_v42 }
 0x25e   :  { %v10115_v5 = vmul.f32 %v10047_v15, %v1429_v60  ;;  %7791 = vmatpush3.bf16.msra.mxu1 %v7788_v37  ;;  %7064 = vmatprep.mubr.msk.f32.mxu1 %vm12132_vm14, %v12124_v11  ;;  %12167 = vst [vmem:[#allocation30_spill] sm:$0xff] %v10127_v50  ;;  %v10131_v60 = vpop.eup %7815  ;;  %12169 = vst [vmem:[#allocation32_spill] sm:$0xff] %v10135_v17  ;;  %v10150_v14 = vmul.f32 %v10097_v59, %v10127_v50 }
 0x25f   :  { %12168 = vst [vmem:[#allocation31_spill] sm:$0xff] %v10131_v60  ;;  %v10139_v30 = vpop.eup %7817  ;;  %v10143_v3 = vmul.f32 %v10131_v60, %v9931_v16  ;;  %v10173_v19 = vmul.f32 %v10131_v60, %v9851_v18 }
 0x260   :  { %v6291_v13 = vpop.f32.mrb[54].mxu1  ;;  %12170 = vst [vmem:[#allocation33_spill] sm:$0xff] %v10139_v30  ;;  %v10158_v61 = vmul.f32 %v10139_v30, %v9933_v23  ;;  %v10177_v23 = vpop.eup %7819 }
 0x261   :  { %v10146_v51 = vmul.f32 %v10085_v49, %v6291_v13  ;;  %v1439_v42 = vpop.f32.mrb[55].mxu1  ;;  %7065 = vmatmul.mubr.msk.f32.vlgmr.msra.gmra.mrb[160].mxu1 %vm8137_vm1, %v12124_v11  ;;  %v10165_v13 = vmul.f32 %v10112_v63, %v10135_v17  ;;  %12172 = vst [vmem:[#allocation35_spill] sm:$0xff] %v10173_v19  ;;  %12173 = vst [vmem:[#allocation36_spill] sm:$0xff] %v10177_v23  ;;  %v10185_v17 = vpop.eup %7821  ;;  %v10189_v10 = vmul.f32 %v10177_v23, %v9943_v28 }
 0x262   :  { %v10161_v16 = vmul.f32 %v10093_v43, %v1439_v42  ;;  %7067 = vmatprep.mubr.msk.f32.mxu1 %vm12143_vm15, %v12124_v11  ;;  %v10181_v42 = vmul.f32 %v10139_v30, %v9853_v36  ;;  %v10196_v62 = vmul.f32 %v10143_v3, %v10173_v19  ;;  %v10203_v36 = vmul.f32 %v10185_v17, %v9945_v9  ;;  %v10221_v9 = vpop.eup %7823 }
 0x263   :  { %12171 = vst [vmem:[#allocation34_spill] sm:$0xff] %v10165_v13  ;;  %12179 = vst [vmem:[#allocation42_spill] sm:$0xff] %v10221_v9  ;;  %v10229_v13 = vpop.eup %7825  ;;  %v10233_v26 = vmul.f32 %v10221_v9, %v9955_v22 }
 0x264   :  { %12174 = vst [vmem:[#allocation37_spill] sm:$0xff] %v10181_v42  ;;  %v6294_v20 = vpop.f32.mrb[56].mxu1  ;;  %12175 = vst [vmem:[#allocation38_spill] sm:$0xff] %v10196_v62  ;;  %v10210_v28 = vmul.f32 %v10158_v61, %v10181_v42 }
 0x265   :  { %v10192_v18 = vmul.f32 %v10131_v60, %v6294_v20  ;;  %v1449_v50 = vpop.f32.mrb[57].mxu1  ;;  %7068 = vmatmul.mubr.msk.f32.gmra.mrb[162].mxu1 %vm12144_vm8, %v12124_v11  ;;  %12176 = vst [vmem:[#allocation39_spill] sm:$0xff] %v10203_v36  ;;  %v10217_v20 = vmul.f32 %v10177_v23, %v9861_v1  ;;  %12181 = vst [vmem:[#allocation44_spill] sm:$0xff] %v10229_v13 }
 0x266   :  { %v10206_v37 = vmul.f32 %v10139_v30, %v1449_v50  ;;  %12177 = vst [vmem:[#allocation40_spill] sm:$0xff] %v10210_v28  ;;  %7070 = vmatprep.mubr.msk.f32.mxu1 %vm12145_vm0, %v12124_v11  ;;  %v10225_v50 = vmul.f32 %v10185_v17, %v9863_v31  ;;  %12182 = vst [vmem:[#allocation45_spill] sm:$0xff] %v10233_v26  ;;  %v10247_v31 = vmul.f32 %v10229_v13, %v9957_v6  ;;  %v10265_v6 = vpop.eup %7827 }
 0x267   :  { %12178 = vst [vmem:[#allocation41_spill] sm:$0xff] %v10217_v20  ;;  %v10240_v21 = vmul.f32 %v10189_v10, %v10217_v20  ;;  %12189 = vst [vmem:[#allocation52_spill] sm:$0xff] %v10265_v6  ;;  %v10273_v28 = vpop.eup %7829  ;;  %v10277_v32 = vmul.f32 %v10265_v6, %v9969_v34 }
 0x268   :  { %12180 = vst [vmem:[#allocation43_spill] sm:$0xff] %v10225_v50  ;;  %v6297_v19 = vpop.f32.mrb[58].mxu1  ;;  %12185 = vst [vmem:[#allocation48_spill] sm:$0xff] %v10247_v31  ;;  %v10254_v22 = vmul.f32 %v10203_v36, %v10225_v50  ;;  %v10291_v50 = vmul.f32 %v10273_v28, %v9977_v29  ;;  %v12202_v29 = vld [vmem:[#allocation12_spill] sm:$0xff] }
 0x269   :  { %v10236_v1 = vmul.f32 %v10177_v23, %v6297_v19  ;;  %12184 = vst [vmem:[#allocation47_spill] sm:$0xff] %v10240_v21  ;;  %v1459_v62 = vpop.f32.mrb[59].mxu1  ;;  %7071 = vmatmul.mubr.msk.f32.gmra.mrb[164].mxu1 %vm12146_vm13, %v12124_v11  ;;  %v10261_v19 = vmul.f32 %v10221_v9, %v9871_v12  ;;  %12191 = vst [vmem:[#allocation54_spill] sm:$0xff] %v10273_v28 }
 0x26a   :  { %v10250_v42 = vmul.f32 %v10185_v17, %v1459_v62  ;;  %12187 = vst [vmem:[#allocation50_spill] sm:$0xff] %v10254_v22  ;;  %7073 = vmatprep.mubr.msk.f32.mxu1 %vm12135_vm2, %v12124_v11  ;;  %v10269_v62 = vmul.f32 %v10229_v13, %v9873_v2  ;;  %12192 = vst [vmem:[#allocation55_spill] sm:$0xff] %v10277_v32 }
 0x26b   :  { %12183 = vst [vmem:[#allocation46_spill] sm:$0xff] %v10236_v1  ;;  %12188 = vst [vmem:[#allocation51_spill] sm:$0xff] %v10261_v19  ;;  %v10284_v27 = vmul.f32 %v10233_v26, %v10261_v19  ;;  %v12200_v19 = vld [vmem:[#allocation11_spill] sm:$0xff] }
 0x26c   :  { %12186 = vst [vmem:[#allocation49_spill] sm:$0xff] %v10250_v42  ;;  %12190 = vst [vmem:[#allocation53_spill] sm:$0xff] %v10269_v62  ;;  %v6300_v20 = vpop.f32.mrb[60].mxu1  ;;  %v10298_v34 = vmul.f32 %v10247_v31, %v10269_v62  ;;  %v10305_v42 = vmul.f32 %v10265_v6, %v12200_v19 }
 0x26d   :  { %v10280_v12 = vmul.f32 %v10221_v9, %v6300_v20  ;;  %12194 = vst [vmem:[#allocation57_spill] sm:$0xff] %v10284_v27  ;;  %v1469_v21 = vpop.f32.mrb[61].mxu1  ;;  %7074 = vmatmul.mubr.msk.f32.gmra.mrb[166].mxu1 %vm12147_vm12, %v12124_v11  ;;  %12196 = vst [vmem:[#allocation6_spill] sm:$0xff] %v10291_v50  ;;  %v10311_v9 = vmul.f32 %v10273_v28, %v12202_v29 }
 0x26e   :  { %v10294_v22 = vmul.f32 %v10229_v13, %v1469_v21  ;;  %12198 = vst [vmem:[#allocation59_spill] sm:$0xff] %v10298_v34  ;;  %7076 = vmatprep.mubr.msk.f32.mxu1 %vm12137_vm4, %v12124_v11  ;;  %12201 = vst [vmem:[#allocation8_spill] sm:$0xff] %v10305_v42  ;;  %v10320_v20 = vmul.f32 %v10277_v32, %v10305_v42 }
 0x26f   :  { %12193 = vst [vmem:[#allocation56_spill] sm:$0xff] %v10280_v12  ;;  %12203 = vst [vmem:[#allocation11_spill] sm:$0xff] %v10311_v9  ;;  %v10330_v29 = vmul.f32 %v10291_v50, %v10311_v9  ;;  %v12209_v9 = vld [vmem:[#allocation14_spill] sm:$0xff] }
 0x270   :  { %12197 = vst [vmem:[#allocation58_spill] sm:$0xff] %v10294_v22  ;;  %v6303_v62 = vpop.f32.mrb[62].mxu1  ;;  %12205 = vst [vmem:[#allocation60_spill] sm:$0xff] %v10320_v20  ;;  %v12210_v22 = vld [vmem:[#allocation15_spill] sm:$0xff] }
 0x271   :  { %v10316_v13 = vmul.f32 %v10265_v6, %v6303_v62  ;;  %v1479_v19 = vpop.f32.mrb[63].mxu1  ;;  %7077 = vmatmul.mubr.msk.f32.gmra.mrb[168].mxu1 %vm12138_vm3, %v12124_v11  ;;  %12208 = vst [vmem:[#allocation61_spill] sm:$0xff] %v10330_v29  ;;  %v1858_v27 = vmul.f32 %v12210_v22, %v12210_v22  ;;  %v1860_v62 = vmul.f32 %v10020_v55, %v10020_v55 }
 0x272   :  { %v10326_v2 = vmul.f32 %v10273_v28, %v1479_v19  ;;  %7079 = vmatprep.mubr.msk.f32.mxu1 %vm12129_vm6, %v12124_v11  ;;  %v1859_v19 = vmul.f32 %v9975_v33, %v9975_v33 }
 0x273   :  { %12204 = vst [vmem:[#allocation12_spill] sm:$0xff] %v10316_v13  ;;  %v1861_v13 = vmul.f32 %v10005_v44, %v10005_v44 }
 0x274   :  { %12207 = vst [vmem:[#allocation7_spill] sm:$0xff] %v10326_v2  ;;  %v6394_v42 = vpop.f32.mrb[64].mxu1 }
 0x275   :  { %v1811_v1 = vmul.f32 %v9967_v7, %v6394_v42  ;;  %v1731_v34 = vpop.f32.mrb[65].mxu1  ;;  %7080 = vmatmul.mubr.msk.f32.gmra.mrb[170].mxu1 %vm12139_vm5, %v12124_v11  ;;  %v1867_v7 = vmul.f32 %v10143_v3, %v10143_v3 }
 0x276   :  { %v1810_v47 = vmul.f32 %v12209_v9, %v1731_v34  ;;  %7082 = vmatprep.mubr.msk.f32.mxu1 %vm8263_vm9, %v12124_v11 }
 0x277   :  { %v1875_v21 = vsub.f32 %v1811_v1, %v1859_v19  ;;  %v1863_v19 = vmul.f32 %v10051_v25, %v10051_v25 }
 0x278   :  { %v1874_v29 = vsub.f32 %v1810_v47, %v1858_v27  ;;  %v6397_v42 = vpop.f32.mrb[66].mxu1  ;;  %v10366_v27 = vld [vmem:[%s11839_s1] sm:$0xff]  ;;  %v10410_v47 = vld [vmem:[%s11839_s1 + $0x28] sm:$0xff] }
 0x279   :  { %v1891_v2 = vadd.f32 0.0001, %v1875_v21  ;;  %v1813_v20 = vmul.f32 %v9995_v39, %v6397_v42  ;;  %v1741_v48 = vpop.f32.mrb[67].mxu1  ;;  %7083 = vmatmul.mubr.msk.f32.gmra.mrb[172].mxu1 %vm12131_vm7, %v12124_v11  ;;  %v1865_v39 = vmul.f32 %v10097_v59, %v10097_v59 }
 0x27a   :  { %v1890_v34 = vadd.f32 0.0001, %v1874_v29  ;;  %v1812_v12 = vmul.f32 %v10001_v40, %v1741_v48  ;;  %7085 = vmatprep.mubr.msk.f32.mxu1 %vm12141_vm10, %v12124_v11  ;;  %v10373_v29 = vld [vmem:[%s11839_s1 + $0x8] sm:$0xff] }
 0x27b   :  { %7831 = vrcp.f32 %v1891_v2  ;;  %v1877_v53 = vsub.f32 %v1813_v20, %v1861_v13  ;;  %v10387_v13 = vld [vmem:[%s11839_s1 + $0x18] sm:$0xff] }
 0x27c   :  { %7833 = vrcp.f32 %v1890_v34  ;;  %v1876_v42 = vsub.f32 %v1812_v12, %v1860_v62  ;;  %v6400_v2 = vpop.f32.mrb[68].mxu1  ;;  %v10400_v12 = vld [vmem:[%s11839_s1 + $0x20] sm:$0xff]  ;;  %v10424_v34 = vld [vmem:[%s11839_s1 + $0x38] sm:$0xff] }
 0x27d   :  { %v1893_v48 = vadd.f32 0.0001, %v1877_v53  ;;  %v1815_v1 = vmul.f32 %v10039_v38, %v6400_v2  ;;  %v1751_v40 = vpop.f32.mrb[69].mxu1  ;;  %7086 = vmatmul.mubr.msk.f32.gmra.mrb[174].mxu1 %vm8291_vm11, %v12124_v11  ;;  %v1862_v2 = vmul.f32 %v10066_v45, %v10066_v45  ;;  %v10417_v11 = vld [vmem:[%s11839_s1 + $0x30] sm:$0xff] }
 0x27e   :  { %v1892_v62 = vadd.f32 0.0001, %v1876_v42  ;;  %v1814_v53 = vmul.f32 %v10047_v15, %v1751_v40 }
 0x27f   :  { %7835 = vrcp.f32 %v1893_v48  ;;  %v1879_v40 = vsub.f32 %v1815_v1, %v1863_v19  ;;  %v10438_v1 = vld [vmem:[%s11839_s1 + $0x48] sm:$0xff] }
 0x280   :  { %7837 = vrcp.f32 %v1892_v62  ;;  %v1878_v42 = vsub.f32 %v1814_v53, %v1862_v2  ;;  %v6403_v48 = vpop.f32.mrb[70].mxu1  ;;  %v10448_v62 = vld [vmem:[%s11839_s1 + $0x50] sm:$0xff] }
 0x281   :  { %v1895_v20 = vadd.f32 0.0001, %v1879_v40  ;;  %v1817_v38 = vmul.f32 %v10085_v49, %v6403_v48  ;;  %v1761_v9 = vpop.f32.mrb[71].mxu1  ;;  %12213 = vst [vmem:[#allocation15_spill] sm:$0xff] %v10448_v62  ;;  %v1864_v40 = vmul.f32 %v10112_v63, %v10112_v63  ;;  %v10458_v48 = vld [vmem:[%s11839_s1 + $0x58] sm:$0xff] }
 0x282   :  { %v1894_v2 = vadd.f32 0.0001, %v1878_v42  ;;  %v1816_v15 = vmul.f32 %v10093_v43, %v1761_v9  ;;  %12214 = vst [vmem:[#allocation9_spill] sm:$0xff] %v10458_v48  ;;  %v1866_v9 = vmul.f32 %v10158_v61, %v10158_v61  ;;  %v1869_v43 = vmul.f32 %v10189_v10, %v10189_v10 }
 0x283   :  { %7839 = vrcp.f32 %v1895_v20  ;;  %v1881_v49 = vsub.f32 %v1817_v38, %v1865_v39  ;;  %v10471_v39 = vmul.f32 %v10203_v36, %v10203_v36  ;;  %v10475_v38 = vmul.f32 %v10233_v26, %v10233_v26 }
 0x284   :  { %7841 = vrcp.f32 %v1894_v2  ;;  %v1880_v42 = vsub.f32 %v1816_v15, %v1864_v40  ;;  %v6406_v53 = vpop.f32.mrb[72].mxu1  ;;  %v12215_v20 = vsub.f32 %v10008_v41, %v10012_v0  ;;  %v10490_v26 = vmul.f32 %v10277_v32, %v10277_v32 }
 0x285   :  { %v7832_v62 = vpop.eup %7831  ;;  %v1897_v50 = vadd.f32 0.0001, %v1881_v49  ;;  %v1819_v28 = vmul.f32 %v10131_v60, %v6406_v53  ;;  %v1771_v6 = vpop.f32.mrb[73].mxu1  ;;  %v10483_v49 = vmul.f32 %v10247_v31, %v10247_v31  ;;  %v12216_v53 = vld [vmem:[#allocation20_spill] sm:$0xff]  ;;  %v12217_v60 = vld [vmem:[#allocation21_spill] sm:$0xff] }
 0x286   :  { %v7834_v15 = vpop.eup %7833  ;;  %v1909_v2 = vmul.f32 %v7832_v62, %v12215_v20  ;;  %v1896_v40 = vadd.f32 0.0001, %v1880_v42  ;;  %v1818_v19 = vmul.f32 %v10139_v30, %v1771_v6  ;;  %v12218_v36 = vsub.f32 %v12216_v53, %v12217_v60 }
 0x287   :  { %7843 = vrcp.f32 %v1897_v50  ;;  %v1883_v48 = vsub.f32 %v1819_v28, %v1867_v7  ;;  %v12219_v50 = vld [vmem:[#allocation16_spill] sm:$0xff] }
 0x288   :  { %v1907_v21 = vmul.f32 %v7834_v15, %v12218_v36  ;;  %v1939_v41 = vmul.f32 %v1909_v2, %v9975_v33  ;;  %v1971_v0 = vmul.f32 %v10373_v29, %v1909_v2  ;;  %7845 = vrcp.f32 %v1896_v40  ;;  %v6409_v62 = vpop.f32.mrb[74].mxu1 }
 0x289   :  { %v1882_v6 = vsub.f32 %v1818_v19, %v1866_v9  ;;  %v7836_v42 = vpop.eup %7835  ;;  %v1899_v60 = vadd.f32 0.0001, %v1883_v48  ;;  %v1821_v36 = vmul.f32 %v10177_v23, %v6409_v62  ;;  %v1781_v7 = vpop.f32.mrb[75].mxu1  ;;  %v12220_v33 = vsub.f32 %v10054_v4, %v10058_v46  ;;  %v12221_v9 = vld [vmem:[#allocation18_spill] sm:$0xff] }
 0x28a   :  { %v1938_v20 = vmul.f32 %v1907_v21, %v12210_v22  ;;  %v1970_v31 = vmul.f32 %v10366_v27, %v1907_v21  ;;  %v7838_v28 = vpop.eup %7837  ;;  %v1955_v15 = vsub.f32 %v12219_v50, %v1939_v41  ;;  %v10502_v19 = vmul.f32 %v10185_v17, %v1781_v7 }
 0x28b   :  { %v1913_v53 = vmul.f32 %v7836_v42, %v12220_v33  ;;  %v1898_v2 = vadd.f32 0.0001, %v1882_v6  ;;  %v12222_v22 = vsub.f32 %v10069_v52, %v10073_v54  ;;  %7847 = vrcp.f32 %v1899_v60 }
 0x28c   :  { %v1954_v40 = vsub.f32 %v12221_v9, %v1938_v20  ;;  %v1885_v48 = vsub.f32 %v1821_v36, %v1869_v43  ;;  %v1987_v62 = vadd.f32 %v1971_v0, %v1955_v15  ;;  %v10510_v4 = vpop.f32.mrb[76].mxu1  ;;  %v12223_v43 = vld [vmem:[#allocation22_spill] sm:$0xff]  ;;  %v1884_v36 = vsub.f32 %v10502_v19, %v10471_v39  ;;  %v12241_v39 = vld [vmem:[#allocation37_spill] sm:$0xff] }
 0x28d   :  { %v1911_v21 = vmul.f32 %v7838_v28, %v12222_v22  ;;  %v1941_v32 = vmul.f32 %v1913_v53, %v10005_v44  ;;  %v1973_v41 = vmul.f32 %v10387_v13, %v1913_v53  ;;  %7849 = vrcp.f32 %v1898_v2  ;;  %v7840_v46 = vpop.eup %7839  ;;  %v10514_v33 = vpop.f32.mrb[77].mxu1 }
 0x28e   :  { %v1986_v6 = vadd.f32 %v1970_v31, %v1954_v40  ;;  %v1901_v7 = vadd.f32 0.0001, %v1885_v48  ;;  %v7842_v54 = vpop.eup %7841  ;;  %v2003_v52 = vmax.f32 %v1987_v62, 0.0  ;;  %v12224_v44 = vsub.f32 %v10100_v35, %v10104_v8  ;;  %v12225_v31 = vld [vmem:[#allocation24_spill] sm:$0xff] }
 0x28f   :  { %v1940_v42 = vmul.f32 %v1911_v21, %v10020_v55  ;;  %v1972_v20 = vmul.f32 %v10380_v57, %v1911_v21  ;;  %v1957_v0 = vsub.f32 %v12223_v43, %v1941_v32  ;;  %v12226_v55 = vsub.f32 %v10115_v5, %v10119_v56 }
 0x290   :  { %v1917_v60 = vmul.f32 %v7840_v46, %v12224_v44  ;;  %v2002_v28 = vmax.f32 %v1986_v6, 0.0  ;;  %7851 = vrcp.f32 %v1901_v7  ;;  %v2019_v2 = vmin.f32 %v2003_v52, 1.0  ;;  %v10528_v21 = vpop.f32.mrb[78].mxu1 }
 0x291   :  { %v1956_v15 = vsub.f32 %v12225_v31, %v1940_v42  ;;  %v1915_v53 = vmul.f32 %v7842_v54, %v12226_v55  ;;  %v1989_v40 = vadd.f32 %v1973_v41, %v1957_v0  ;;  %v7844_v35 = vpop.eup %7843  ;;  %v10532_v6 = vpop.f32.mrb[79].mxu1  ;;  %v12228_v0 = vld [vmem:[#allocation28_spill] sm:$0xff] }
 0x292   :  { %v1943_v22 = vmul.f32 %v1917_v60, %v10051_v25  ;;  %v1975_v32 = vmul.f32 %v10410_v47, %v1917_v60  ;;  %v2018_v8 = vmin.f32 %v2002_v28, 1.0  ;;  %v7846_v5 = vpop.eup %7845  ;;  %v2035_v56 = vmax.f32 %v2019_v2, 0.1 }
 0x293   :  { %v1988_v48 = vadd.f32 %v1972_v20, %v1956_v15  ;;  %v1942_v62 = vmul.f32 %v1915_v53, %v10066_v45  ;;  %v1974_v46 = vmul.f32 %v10400_v12, %v1915_v53  ;;  %v2005_v42 = vmax.f32 %v1989_v40, 0.0  ;;  %v12229_v20 = vld [vmem:[#allocation34_spill] sm:$0xff] }
 0x294   :  { %v1959_v41 = vsub.f32 %v10081_v24, %v1943_v22  ;;  %v12227_v25 = vsub.f32 %v10146_v51, %v10150_v14  ;;  %v2034_v54 = vmax.f32 %v2018_v8, 0.1  ;;  %v12230_v45 = vsub.f32 %v10161_v16, %v12229_v20  ;;  %v10543_v53 = vpop.f32.mrb[80].mxu1  ;;  %v12231_v16 = vld [vmem:[#allocation30_spill] sm:$0xff] }
 0x295   :  { %v2004_v52 = vmax.f32 %v1988_v48, 0.0  ;;  %v1958_v44 = vsub.f32 %v12228_v0, %v1942_v62  ;;  %7853 = vrcp.f32 %v2035_v56  ;;  %v2021_v28 = vmin.f32 %v2005_v42, 1.0  ;;  %v7848_v2 = vpop.eup %7847  ;;  %v10546_v22 = vpop.f32.mrb[81].mxu1  ;;  %v12232_v42 = vld [vmem:[#allocation38_spill] sm:$0xff] }
 0x296   :  { %v1921_v7 = vmul.f32 %v7844_v35, %v12227_v25  ;;  %v1919_v60 = vmul.f32 %v7846_v5, %v12230_v45  ;;  %v1991_v15 = vadd.f32 %v1975_v32, %v1959_v41  ;;  %7855 = vrcp.f32 %v2034_v54  ;;  %v12234_v54 = vld [vmem:[#allocation32_spill] sm:$0xff] }
 0x297   :  { %v2020_v40 = vmin.f32 %v2004_v52, 1.0  ;;  %v1990_v14 = vadd.f32 %v1974_v46, %v1958_v44  ;;  %v7850_v35 = vpop.eup %7849  ;;  %v2037_v8 = vmax.f32 %v2021_v28, 0.1  ;;  %v12233_v41 = vsub.f32 %v10192_v18, %v12232_v42 }
 0x298   :  { %v1945_v55 = vmul.f32 %v1921_v7, %v10097_v59  ;;  %v1977_v51 = vmul.f32 %v10424_v34, %v1921_v7  ;;  %v2007_v48 = vmax.f32 %v1991_v15, 0.0  ;;  %v1944_v5 = vmul.f32 %v1919_v60, %v10112_v63  ;;  %v10555_v44 = vpop.f32.mrb[82].mxu1 }
 0x299   :  { %v2036_v32 = vmax.f32 %v2020_v40, 0.1  ;;  %v2006_v56 = vmax.f32 %v1990_v14, 0.0  ;;  %v1976_v59 = vmul.f32 %v10417_v11, %v1919_v60  ;;  %v1925_v25 = vmul.f32 %v7848_v2, %v12233_v41  ;;  %v10559_v15 = vpop.f32.mrb[83].mxu1  ;;  %v12235_v2 = vld [vmem:[#allocation40_spill] sm:$0xff] }
 0x29a   :  { %v1961_v62 = vsub.f32 %v12231_v16, %v1945_v55  ;;  %7857 = vrcp.f32 %v2037_v8  ;;  %v2023_v46 = vmin.f32 %v2007_v48, 1.0  ;;  %v1960_v52 = vsub.f32 %v12234_v54, %v1944_v5  ;;  %v7852_v20 = vpop.eup %7851  ;;  %v12237_v8 = vld [vmem:[#allocation35_spill] sm:$0xff] }
 0x29b   :  { %7859 = vrcp.f32 %v2036_v32  ;;  %v2022_v45 = vmin.f32 %v2006_v56, 1.0  ;;  %v1947_v63 = vmul.f32 %v1925_v25, %v10143_v3  ;;  %v1979_v28 = vmul.f32 %v10438_v1, %v1925_v25  ;;  %v12239_v5 = vld [vmem:[#allocation47_spill] sm:$0xff] }
 0x29c   :  { %v1993_v7 = vadd.f32 %v1977_v51, %v1961_v62  ;;  %v2039_v60 = vmax.f32 %v2023_v46, 0.1  ;;  %v1992_v18 = vadd.f32 %v1976_v59, %v1960_v52  ;;  %v12236_v40 = vsub.f32 %v10206_v37, %v12235_v2  ;;  %v12238_v62 = vld [vmem:[#allocation46_spill] sm:$0xff]  ;;  %v10572_v25 = vpop.f32.mrb[84].mxu1 }
 0x29d   :  { %v2038_v51 = vmax.f32 %v2022_v45, 0.1  ;;  %v1963_v48 = vsub.f32 %v12237_v8, %v1947_v63  ;;  %v12240_v32 = vsub.f32 %v12238_v62, %v12239_v5  ;;  %v1900_v3 = vadd.f32 0.0001, %v1884_v36  ;;  %v12242_v36 = vld [vmem:[#allocation9_spill] sm:$0xff] }
 0x29e   :  { %v2009_v55 = vmax.f32 %v1993_v7, 0.0  ;;  %v1923_v14 = vmul.f32 %v7850_v35, %v12236_v40  ;;  %7861 = vrcp.f32 %v2039_v60  ;;  %v2008_v41 = vmax.f32 %v1992_v18, 0.0  ;;  %v10576_v7 = vpop.f32.mrb[85].mxu1 }
 0x29f   :  { %v1929_v56 = vmul.f32 %v7852_v20, %v12240_v32  ;;  %7863 = vrcp.f32 %v2038_v51  ;;  %v1995_v37 = vadd.f32 %v1979_v28, %v1963_v48  ;;  %v7854_v52 = vpop.eup %7853  ;;  %v12245_v28 = vld [vmem:[#allocation41_spill] sm:$0xff] }
 0x2a0   :  { %v2025_v42 = vmin.f32 %v2009_v55, 1.0  ;;  %v1946_v59 = vmul.f32 %v1923_v14, %v10158_v61  ;;  %v1978_v35 = vmul.f32 %v10431_v58, %v1923_v14  ;;  %v2024_v45 = vmin.f32 %v2008_v41, 1.0  ;;  %v7856_v60 = vpop.eup %7855  ;;  %v12243_v61 = vld [vmem:[#allocation10_spill] sm:$0xff]  ;;  %v10587_v62 = vpop.f32.mrb[86].mxu1 }
 0x2a1   :  { %v1949_v46 = vmul.f32 %v1929_v56, %v10189_v10  ;;  %v1981_v63 = vmul.f32 %v12242_v36, %v1929_v56  ;;  %v12244_v55 = vsub.f32 %v10373_v29, %v12243_v61  ;;  %v2011_v2 = vmax.f32 %v1995_v37, 0.0  ;;  %v12247_v29 = vld [vmem:[#allocation42_spill] sm:$0xff]  ;;  %v10592_v41 = vpop.f32.mrb[87].mxu1  ;;  %v12248_v37 = vld [vmem:[#allocation44_spill] sm:$0xff] }
 0x2a2   :  { %v2041_v20 = vmax.f32 %v2025_v42, 0.1  ;;  %v1962_v19 = vsub.f32 %v12241_v39, %v1946_v59  ;;  %7865 = vrcp.f32 %v1900_v3  ;;  %v12246_v10 = vsub.f32 %v10366_v27, %v12243_v61 }
 0x2a3   :  { %v2069_v18 = vmul.f32 %v7854_v52, %v12244_v55  ;;  %v1965_v40 = vsub.f32 %v12245_v28, %v1949_v46  ;;  %v2040_v51 = vmax.f32 %v2024_v45, 0.1  ;;  %v2027_v32 = vmin.f32 %v2011_v2, 1.0 }
 0x2a4   :  { %v2067_v14 = vmul.f32 %v7856_v60, %v12246_v10  ;;  %7867 = vrcp.f32 %v2041_v20  ;;  %v1994_v48 = vadd.f32 %v1978_v35, %v1962_v19  ;;  %v1823_v42 = vmul.f32 %v12247_v29, %v10510_v4  ;;  %v7858_v59 = vpop.eup %7857 }
 0x2a5   :  { %v2099_v5 = vadd.f32 %v2069_v18, %v12243_v61  ;;  %v1997_v56 = vadd.f32 %v1981_v63, %v1965_v40  ;;  %7869 = vrcp.f32 %v2040_v51  ;;  %v1822_v46 = vmul.f32 %v12248_v37, %v10514_v33  ;;  %v7860_v35 = vpop.eup %7859  ;;  %v10604_v40 = vpop.f32.mrb[88].mxu1 }
 0x2a6   :  { %v2098_v3 = vadd.f32 %v2067_v14, %v12243_v61  ;;  %v2010_v27 = vmax.f32 %v1994_v48, 0.0  ;;  %v12249_v20 = vsub.f32 %v10387_v13, %v12243_v61  ;;  %v2043_v19 = vmax.f32 %v2027_v32, 0.1  ;;  %v10607_v51 = vpop.f32.mrb[89].mxu1 }
 0x2a7   :  { %v2115_v52 = vmax.f32 %v2099_v5, 0.0  ;;  %v2013_v63 = vmax.f32 %v1997_v56, 0.0  ;;  %v12250_v4 = vsub.f32 %v10380_v57, %v12243_v61  ;;  %v1887_v2 = vsub.f32 %v1823_v42, %v10475_v38 }
 0x2a8   :  { %v2073_v45 = vmul.f32 %v7858_v59, %v12249_v20  ;;  %v2114_v60 = vmax.f32 %v2098_v3, 0.0  ;;  %v2026_v18 = vmin.f32 %v2010_v27, 1.0  ;;  %7871 = vrcp.f32 %v2043_v19  ;;  %v7862_v13 = vpop.eup %7861 }
 0x2a9   :  { %v2071_v55 = vmul.f32 %v7860_v35, %v12250_v4  ;;  %v2131_v10 = vmin.f32 %v2115_v52, 1.0  ;;  %v2029_v14 = vmin.f32 %v2013_v63, 1.0  ;;  %v1903_v56 = vadd.f32 0.0001, %v1887_v2  ;;  %v7864_v57 = vpop.eup %7863  ;;  %v10619_v63 = vpop.f32.mrb[90].mxu1 }
 0x2aa   :  { %v2101_v33 = vadd.f32 %v2073_v45, %v12243_v61  ;;  %v2130_v48 = vmin.f32 %v2114_v60, 1.0  ;;  %v2042_v32 = vmax.f32 %v2026_v18, 0.1  ;;  %v12251_v38 = vsub.f32 %v10410_v47, %v12243_v61  ;;  %v12253_v45 = vld [vmem:[#allocation52_spill] sm:$0xff]  ;;  %v10622_v18 = vpop.f32.mrb[91].mxu1 }
 0x2ab   :  { %v2100_v5 = vadd.f32 %v2071_v55, %v12243_v61  ;;  %2147 = vst [vmem:[#allocation3 + $0x8] sm:$0xff] %v2131_v10  ;;  %v2045_v3 = vmax.f32 %v2029_v14, 0.1  ;;  %v1886_v27 = vsub.f32 %v1822_v46, %v10483_v49  ;;  %v12252_v52 = vsub.f32 %v10400_v12, %v12243_v61  ;;  %v12254_v12 = vld [vmem:[#allocation49_spill] sm:$0xff]  ;;  %v12255_v10 = vld [vmem:[#allocation50_spill] sm:$0xff] }
 0x2ac   :  { %v2117_v59 = vmax.f32 %v2101_v33, 0.0  ;;  %v2077_v42 = vmul.f32 %v7862_v13, %v12251_v38  ;;  %2146 = vst [vmem:[#allocation3] sm:$0xff] %v2130_v48  ;;  %7873 = vrcp.f32 %v2042_v32  ;;  %v1825_v19 = vmul.f32 %v12253_v45, %v10528_v21  ;;  %v7866_v60 = vpop.eup %7865 }
 0x2ad   :  { %v2116_v35 = vmax.f32 %v2100_v5, 0.0  ;;  %v2075_v20 = vmul.f32 %v7864_v57, %v12252_v52  ;;  %7875 = vrcp.f32 %v2045_v3  ;;  %v1902_v55 = vadd.f32 0.0001, %v1886_v27  ;;  %v12260_v27 = vld [vmem:[#allocation6_spill] sm:$0xff] }
 0x2ae   :  { %v2133_v4 = vmin.f32 %v2117_v59, 1.0  ;;  %v2103_v47 = vadd.f32 %v2077_v42, %v12243_v61  ;;  %v7868_v49 = vpop.eup %7867  ;;  %v12256_v33 = vsub.f32 %v12254_v12, %v12255_v10  ;;  %7877 = vrcp.f32 %v1903_v56  ;;  %v12258_v59 = vld [vmem:[#allocation39_spill] sm:$0xff]  ;;  %v12259_v42 = vld [vmem:[#allocation54_spill] sm:$0xff]  ;;  %v12279_v10 = vld [vmem:[#allocation57_spill] sm:$0xff] }
 0x2af   :  { %v2132_v46 = vmin.f32 %v2116_v35, 1.0  ;;  %v2102_v2 = vadd.f32 %v2075_v20, %v12243_v61  ;;  %v12257_v13 = vsub.f32 %v10424_v34, %v12243_v61  ;;  %7879 = vrcp.f32 %v1902_v55  ;;  %v7870_v32 = vpop.eup %7869  ;;  %v10637_v35 = vpop.f32.mrb[92].mxu1  ;;  %v10650_v12 = vld [vmem:[%s11839_s1 + $0x68] sm:$0xff] }
 0x2b0   :  { %v1927_v14 = vmul.f32 %v7866_v60, %v12256_v33  ;;  %2149 = vst [vmem:[#allocation3 + $0x18] sm:$0xff] %v2133_v4  ;;  %v2119_v21 = vmax.f32 %v2103_v47, 0.0  ;;  %v1889_v5 = vsub.f32 %v1825_v19, %v10490_v26  ;;  %v1824_v3 = vmul.f32 %v12259_v42, %v10532_v6  ;;  %v10643_v60 = vpop.f32.mrb[93].mxu1  ;;  %v12262_v47 = vld [vmem:[#allocation43_spill] sm:$0xff]  ;;  %12264 = vst [vmem:[#allocation20_spill] sm:$0xff] %v10650_v12 }
 0x2b1   :  { %v2081_v48 = vmul.f32 %v7868_v49, %v12257_v13  ;;  %2148 = vst [vmem:[#allocation3 + $0x10] sm:$0xff] %v2132_v46  ;;  %v2118_v57 = vmax.f32 %v2102_v2, 0.0  ;;  %v1872_v56 = vmul.f32 %v12260_v27, %v12260_v27  ;;  %v12261_v20 = vsub.f32 %v10417_v11, %v12243_v61  ;;  %v12263_v49 = vld [vmem:[#allocation15_spill] sm:$0xff] }
 0x2b2   :  { %v1948_v38 = vmul.f32 %v1927_v14, %v12258_v59  ;;  %v2135_v52 = vmin.f32 %v2119_v21, 1.0  ;;  %v1905_v19 = vadd.f32 0.0001, %v1889_v5  ;;  %v1980_v6 = vmul.f32 %v12263_v49, %v1927_v14  ;;  %v7872_v2 = vpop.eup %7871  ;;  %v12266_v5 = vld [vmem:[#allocation13_spill] sm:$0xff] }
 0x2b3   :  { %v2105_v34 = vadd.f32 %v2081_v48, %v12243_v61  ;;  %v2079_v26 = vmul.f32 %v7870_v32, %v12261_v20  ;;  %v2134_v4 = vmin.f32 %v2118_v57, 1.0  ;;  %v1888_v46 = vsub.f32 %v1824_v3, %v1872_v56  ;;  %v10662_v57 = vpop.f32.mrb[94].mxu1  ;;  %v12269_v3 = vld [vmem:[#allocation14_spill] sm:$0xff] }
 0x2b4   :  { %v1964_v55 = vsub.f32 %v12262_v47, %v1948_v38  ;;  %2151 = vst [vmem:[#allocation3 + $0x28] sm:$0xff] %v2135_v52  ;;  %7881 = vrcp.f32 %v1905_v19  ;;  %v12265_v21 = vsub.f32 %v10438_v1, %v12243_v61  ;;  %v10660_v32 = vmul.f32 %v12266_v5, %v10543_v53  ;;  %12268 = vst [vmem:[#allocation28_spill] sm:$0xff] %v10662_v57  ;;  %v12270_v52 = vld [vmem:[#allocation17_spill] sm:$0xff]  ;;  %v10672_v1 = vpop.f32.mrb[95].mxu1  ;;  %v12272_v53 = vld [vmem:[#allocation19_spill] sm:$0xff] }
 0x2b5   :  { %v2121_v11 = vmax.f32 %v2105_v34, 0.0  ;;  %v2104_v33 = vadd.f32 %v2079_v26, %v12243_v61  ;;  %2150 = vst [vmem:[#allocation3 + $0x20] sm:$0xff] %v2134_v4  ;;  %v1904_v48 = vadd.f32 0.0001, %v1888_v46  ;;  %v10666_v56 = vmul.f32 %v12269_v3, %v10546_v22  ;;  %12271 = vst [vmem:[#allocation34_spill] sm:$0xff] %v10672_v1  ;;  %v12284_v57 = vld [vmem:[#allocation59_spill] sm:$0xff] }
 0x2b6   :  { %v2085_v14 = vmul.f32 %v7872_v2, %v12265_v21  ;;  %v1996_v13 = vadd.f32 %v1980_v6, %v1964_v55  ;;  %12267 = vst [vmem:[#allocation21_spill] sm:$0xff] %v10660_v32  ;;  %v10670_v34 = vmul.f32 %v12270_v52, %v10555_v44  ;;  %v7874_v20 = vpop.eup %7873  ;;  %v10677_v4 = vmul.f32 %v12272_v53, %v10559_v15  ;;  %v12274_v44 = vld [vmem:[#allocation23_spill] sm:$0xff] }
 0x2b7   :  { %v2137_v59 = vmin.f32 %v2121_v11, 1.0  ;;  %v2120_v38 = vmax.f32 %v2104_v33, 0.0  ;;  %7883 = vrcp.f32 %v1904_v48  ;;  %v7876_v55 = vpop.eup %7875  ;;  %v12273_v22 = vsub.f32 %v10431_v58, %v12243_v61  ;;  %v12275_v11 = vld [vmem:[#allocation25_spill] sm:$0xff]  ;;  %v6618_v58 = vpop.f32.mrb[96].mxu1 }
 0x2b8   :  { %v2107_v26 = vadd.f32 %v2085_v14, %v12243_v61  ;;  %v2012_v19 = vmax.f32 %v1996_v13, 0.0  ;;  %v10684_v2 = vmul.f32 %v12274_v44, %v10572_v25  ;;  %v10688_v33 = vmul.f32 %v12275_v11, %v10576_v7  ;;  %v7878_v21 = vpop.eup %7877 }
 0x2b9   :  { %2153 = vst [vmem:[#allocation3 + $0x38] sm:$0xff] %v2137_v59  ;;  %v2136_v6 = vmin.f32 %v2120_v38, 1.0  ;;  %v2083_v46 = vmul.f32 %v7874_v20, %v12273_v22  ;;  %v12276_v15 = vsub.f32 %v12242_v36, %v12243_v61  ;;  %v12277_v59 = vld [vmem:[#allocation27_spill] sm:$0xff]  ;;  %v7880_v20 = vpop.eup %7879  ;;  %v12278_v22 = vld [vmem:[#allocation56_spill] sm:$0xff] }
 0x2ba   :  { %v2123_v14 = vmax.f32 %v2107_v26, 0.0  ;;  %v2028_v48 = vmin.f32 %v2012_v19, 1.0  ;;  %v10695_v38 = vmul.f32 %v12277_v59, %v10587_v62  ;;  %v12280_v7 = vsub.f32 %v12278_v22, %v12279_v10  ;;  %v12281_v26 = vld [vmem:[#allocation29_spill] sm:$0xff]  ;;  %v12282_v36 = vld [vmem:[#allocation31_spill] sm:$0xff] }
 0x2bb   :  { %v2089_v13 = vmul.f32 %v7876_v55, %v12276_v15  ;;  %2152 = vst [vmem:[#allocation3 + $0x30] sm:$0xff] %v2136_v6  ;;  %v2106_v25 = vadd.f32 %v2083_v46, %v12243_v61  ;;  %v10703_v1 = vmul.f32 %v12281_v26, %v10592_v41  ;;  %v10707_v19 = vmul.f32 %v12282_v36, %v10604_v40  ;;  %v2695_v55 = vpop.f32.mrb[97].mxu1  ;;  %v12283_v6 = vld [vmem:[#allocation58_spill] sm:$0xff]  ;;  %v12286_v10 = vld [vmem:[#allocation45_spill] sm:$0xff] }
 0x2bc   :  { %v1933_v42 = vmul.f32 %v7878_v21, %v12280_v7  ;;  %v2139_v62 = vmin.f32 %v2123_v14, 1.0  ;;  %v2044_v45 = vmax.f32 %v2028_v48, 0.1  ;;  %v12285_v46 = vsub.f32 %v12283_v6, %v12284_v57  ;;  %v12287_v48 = vld [vmem:[#allocation48_spill] sm:$0xff]  ;;  %v6621_v57 = vpop.f32.mrb[98].mxu1  ;;  %v12288_v7 = vld [vmem:[#allocation51_spill] sm:$0xff] }
 0x2bd   :  { %v2109_v15 = vadd.f32 %v2089_v13, %v12243_v61  ;;  %v2122_v28 = vmax.f32 %v2106_v25, 0.0  ;;  %v10716_v41 = vmul.f32 %v10139_v30, %v10607_v51  ;;  %v10720_v40 = vmul.f32 %v10177_v23, %v10619_v63  ;;  %v10728_v51 = vld [vmem:[%s11839_s1 + $0x60] sm:$0xff] }
 0x2be   :  { %v1931_v47 = vmul.f32 %v7880_v20, %v12285_v46  ;;  %v1951_v21 = vmul.f32 %v1933_v42, %v12286_v10  ;;  %2155 = vst [vmem:[#allocation3 + $0x48] sm:$0xff] %v2139_v62  ;;  %7885 = vrcp.f32 %v2044_v45  ;;  %v1983_v13 = vmul.f32 %v10650_v12, %v1933_v42  ;;  %v7882_v20 = vpop.eup %7881  ;;  %v2705_v45 = vpop.f32.mrb[99].mxu1  ;;  %v12291_v10 = vld [vmem:[#allocation12_spill] sm:$0xff] }
 0x2bf   :  { %v2125_v14 = vmax.f32 %v2109_v15, 0.0  ;;  %v2138_v25 = vmin.f32 %v2122_v28, 1.0  ;;  %v10733_v62 = vmul.f32 %v10185_v17, %v10622_v18  ;;  %v12290_v15 = vld [vmem:[#allocation53_spill] sm:$0xff]  ;;  %v10748_v18 = vmul.f32 %v12266_v5, %v6618_v58  ;;  %v6624_v58 = vpop.f32.mrb[100].mxu1  ;;  %v12302_v5 = vld [vmem:[#allocation8_spill] sm:$0xff] }
 0x2c0   :  { %v1950_v22 = vmul.f32 %v1931_v47, %v12287_v48  ;;  %v1967_v6 = vsub.f32 %v12288_v7, %v1951_v21  ;;  %v1982_v63 = vmul.f32 %v10728_v51, %v1931_v47  ;;  %v12292_v48 = vld [vmem:[#allocation60_spill] sm:$0xff]  ;;  %v10741_v21 = vmul.f32 %v12247_v29, %v10637_v35  ;;  %v10758_v35 = vld [vmem:[%s11839_s1 + $0x78] sm:$0xff] }
 0x2c1   :  { %12289 = vst [vmem:[#allocation38_spill] sm:$0xff] %v10733_v62  ;;  %v2141_v42 = vmin.f32 %v2125_v14, 1.0  ;;  %v12293_v28 = vsub.f32 %v12291_v10, %v12292_v48  ;;  %2154 = vst [vmem:[#allocation3 + $0x40] sm:$0xff] %v2138_v25  ;;  %v10745_v47 = vmul.f32 %v12248_v37, %v10643_v60  ;;  %v10752_v14 = vmul.f32 %v10660_v32, %v12219_v50  ;;  %v12298_v10 = vld [vmem:[#allocation55_spill] sm:$0xff] }
 0x2c2   :  { %v1966_v46 = vsub.f32 %v12290_v15, %v1950_v22  ;;  %12294 = vst [vmem:[#allocation40_spill] sm:$0xff] %v10741_v21  ;;  %v1999_v7 = vadd.f32 %v1983_v13, %v1967_v6  ;;  %12296 = vst [vmem:[#allocation47_spill] sm:$0xff] %v10748_v18  ;;  %v7884_v22 = vpop.eup %7883  ;;  %v10762_v13 = vmul.f32 %v12269_v3, %v2695_v55  ;;  %v12299_v6 = vld [vmem:[#allocation7_spill] sm:$0xff] }
 0x2c3   :  { %v1937_v12 = vmul.f32 %v7882_v20, %v12293_v28  ;;  %12295 = vst [vmem:[#allocation46_spill] sm:$0xff] %v10745_v47  ;;  %12297 = vst [vmem:[#allocation9_spill] sm:$0xff] %v10752_v14  ;;  %v12300_v28 = vld [vmem:[#allocation61_spill] sm:$0xff]  ;;  %v10775_v55 = vmul.f32 %v12270_v52, %v6621_v57  ;;  %v10798_v18 = vmul.f32 %v10677_v4, %v12225_v31 }
 0x2c4   :  { %2157 = vst [vmem:[#allocation3 + $0x58] sm:$0xff] %v2141_v42  ;;  %v1998_v20 = vadd.f32 %v1982_v63, %v1966_v46  ;;  %v2015_v25 = vmax.f32 %v1999_v7, 0.0  ;;  %v12301_v50 = vsub.f32 %v12299_v6, %v12300_v28  ;;  %v10771_v42 = vmul.f32 %v10666_v56, %v12221_v9  ;;  %v2715_v46 = vpop.f32.mrb[101].mxu1  ;;  %v12305_v9 = vld [vmem:[#allocation11_spill] sm:$0xff] }
 0x2c5   :  { %v1953_v48 = vmul.f32 %v1937_v12, %v12298_v10  ;;  %v1985_v60 = vmul.f32 %v10758_v35, %v1937_v12  ;;  %12303 = vst [vmem:[#allocation10_spill] sm:$0xff] %v10775_v55  ;;  %v10779_v7 = vmul.f32 %v10670_v34, %v12223_v43  ;;  %v10793_v43 = vmul.f32 %v12272_v53, %v2705_v45 }
 0x2c6   :  { %v1935_v32 = vmul.f32 %v7884_v22, %v12301_v50  ;;  %v2014_v10 = vmax.f32 %v1998_v20, 0.0  ;;  %v2031_v6 = vmin.f32 %v2015_v25, 1.0  ;;  %v10785_v22 = vld [vmem:[%s11839_s1 + $0x70] sm:$0xff]  ;;  %v6627_v25 = vpop.f32.mrb[102].mxu1  ;;  %v10805_v63 = vmul.f32 %v10684_v2, %v10081_v24 }
 0x2c7   :  { %v1969_v12 = vsub.f32 %v12302_v5, %v1953_v48  ;;  %12304 = vst [vmem:[#allocation49_spill] sm:$0xff] %v10779_v7  ;;  %v2725_v20 = vpop.f32.mrb[103].mxu1  ;;  %v10808_v45 = vmul.f32 %v12275_v11, %v2715_v46 }
 0x2c8   :  { %v1952_v50 = vmul.f32 %v1935_v32, %v12260_v27  ;;  %v1984_v28 = vmul.f32 %v10785_v22, %v1935_v32  ;;  %v2030_v48 = vmin.f32 %v2014_v10, 1.0  ;;  %v2047_v27 = vmax.f32 %v2031_v6, 0.1  ;;  %v7886_v10 = vpop.eup %7885  ;;  %v6630_v46 = vpop.f32.mrb[104].mxu1 }
 0x2c9   :  { %v2001_v57 = vadd.f32 %v1985_v60, %v1969_v12  ;;  %v10801_v32 = vmul.f32 %v12274_v44, %v6624_v58  ;;  %v12306_v6 = vsub.f32 %v12263_v49, %v12243_v61  ;;  %v10823_v49 = vmul.f32 %v12277_v59, %v6627_v25  ;;  %v12311_v58 = vld [vmem:[#allocation41_spill] sm:$0xff] }
 0x2ca   :  { %v1968_v14 = vsub.f32 %v12305_v9, %v1952_v50  ;;  %v2046_v60 = vmax.f32 %v2030_v48, 0.1  ;;  %7887 = vrcp.f32 %v2047_v27  ;;  %v10854_v25 = vmul.f32 %v10716_v41, %v12241_v39 }
 0x2cb   :  { %v2017_v12 = vmax.f32 %v2001_v57, 0.0  ;;  %v2087_v50 = vmul.f32 %v7886_v10, %v12306_v6  ;;  %v10819_v57 = vmul.f32 %v10688_v33, %v12228_v0  ;;  %v2062_v39 = vsub.f32 %v10728_v51, %v12243_v61  ;;  %v12320_v51 = vld [vmem:[#allocation51_spill] sm:$0xff] }
 0x2cc   :  { %v2000_v31 = vadd.f32 %v1984_v28, %v1968_v14  ;;  %7889 = vrcp.f32 %v2046_v60  ;;  %v10827_v14 = vmul.f32 %v10695_v38, %v12231_v16  ;;  %v2735_v28 = vpop.f32.mrb[105].mxu1  ;;  %v10832_v60 = vmul.f32 %v12281_v26, %v2725_v20  ;;  %12309 = vst [vmem:[#allocation6_spill] sm:$0xff] %v10854_v25  ;;  %v12322_v25 = vld [vmem:[#allocation20_spill] sm:$0xff] }
 0x2cd   :  { %v2033_v7 = vmin.f32 %v2017_v12, 1.0  ;;  %v2108_v24 = vadd.f32 %v2087_v50, %v12243_v61  ;;  %v10836_v12 = vmul.f32 %v10703_v1, %v12234_v54  ;;  %v10841_v50 = vmul.f32 %v12282_v36, %v6630_v46  ;;  %v6633_v48 = vpop.f32.mrb[106].mxu1 }
 0x2ce   :  { %v2016_v55 = vmax.f32 %v2000_v31, 0.0  ;;  %v10847_v20 = vmul.f32 %v10707_v19, %v12237_v8  ;;  %v10850_v10 = vmul.f32 %v10139_v30, %v2735_v28  ;;  %v10857_v46 = vmul.f32 %v10177_v23, %v6633_v48 }
 0x2cf   :  { %v2049_v27 = vmax.f32 %v2033_v7, 0.1  ;;  %v2124_v31 = vmax.f32 %v2108_v24, 0.0  ;;  %12307 = vst [vmem:[#allocation50_spill] sm:$0xff] %v10841_v50  ;;  %v10863_v8 = vmul.f32 %v10720_v40, %v12311_v58  ;;  %v12317_v50 = vld [vmem:[#allocation52_spill] sm:$0xff]  ;;  %v12323_v7 = vsub.f32 %v12322_v25, %v12243_v61  ;;  %v12324_v58 = vld [vmem:[#allocation34_spill] sm:$0xff] }
 0x2d0   :  { %v2032_v6 = vmin.f32 %v2016_v55, 1.0  ;;  %12308 = vst [vmem:[#allocation39_spill] sm:$0xff] %v10847_v20  ;;  %12310 = vst [vmem:[#allocation15_spill] sm:$0xff] %v10857_v46  ;;  %v12316_v20 = vld [vmem:[#allocation28_spill] sm:$0xff] }
 0x2d1   :  { %7891 = vrcp.f32 %v2049_v27  ;;  %v2140_v24 = vmin.f32 %v2124_v31, 1.0  ;;  %v2745_v27 = vpop.f32.mrb[107].mxu1  ;;  %12312 = vst [vmem:[#allocation56_spill] sm:$0xff] %v10863_v8  ;;  %v12314_v31 = vld [vmem:[#allocation43_spill] sm:$0xff] }
 0x2d2   :  { %v2048_v55 = vmax.f32 %v2032_v6, 0.1  ;;  %v10866_v28 = vmul.f32 %v10185_v17, %v2745_v27  ;;  %v10870_v6 = vmul.f32 %v10733_v62, %v12314_v31  ;;  %v6636_v27 = vpop.f32.mrb[108].mxu1  ;;  %v10882_v31 = vmul.f32 %v12317_v50, %v12316_v20 }
 0x2d3   :  { %2156 = vst [vmem:[#allocation3 + $0x50] sm:$0xff] %v2140_v24  ;;  %v10885_v16 = vmul.f32 %v12247_v29, %v6636_v27  ;;  %v10889_v24 = vmul.f32 %v10741_v21, %v12320_v51  ;;  %v10903_v27 = vmul.f32 %v10745_v47, %v12290_v15  ;;  %v2065_v51 = vsub.f32 %v10758_v35, %v12243_v61 }
 0x2d4   :  { %12313 = vst [vmem:[#allocation57_spill] sm:$0xff] %v10866_v28  ;;  %12315 = vst [vmem:[#allocation58_spill] sm:$0xff] %v10870_v6  ;;  %7893 = vrcp.f32 %v2048_v55  ;;  %v7888_v54 = vpop.eup %7887  ;;  %v2755_v55 = vpop.f32.mrb[109].mxu1  ;;  %v12325_v6 = vld [vmem:[#allocation54_spill] sm:$0xff]  ;;  %v10918_v15 = vmul.f32 %v10882_v31, %v12302_v5 }
 0x2d5   :  { %12318 = vst [vmem:[#allocation59_spill] sm:$0xff] %v10882_v31  ;;  %12319 = vst [vmem:[#allocation45_spill] sm:$0xff] %v10885_v16  ;;  %v2093_v8 = vmul.f32 %v7888_v54, %v12323_v7  ;;  %v10896_v28 = vmul.f32 %v12325_v6, %v12324_v58  ;;  %v10899_v20 = vmul.f32 %v12248_v37, %v2755_v55  ;;  %v6639_v25 = vpop.f32.mrb[110].mxu1 }
 0x2d6   :  { %12321 = vst [vmem:[#allocation48_spill] sm:$0xff] %v10889_v24  ;;  %v7890_v48 = vpop.eup %7889  ;;  %12328 = vst [vmem:[#allocation55_spill] sm:$0xff] %v10903_v27  ;;  %v10914_v55 = vmul.f32 %v12317_v50, %v6639_v25  ;;  %v2765_v35 = vpop.f32.mrb[111].mxu1  ;;  %v12334_v50 = vld [vmem:[#allocation21_spill] sm:$0xff] }
 0x2d7   :  { %12326 = vst [vmem:[#allocation12_spill] sm:$0xff] %v10896_v28  ;;  %12327 = vst [vmem:[#allocation60_spill] sm:$0xff] %v10899_v20  ;;  %v2091_v29 = vmul.f32 %v7890_v48, %v2062_v39  ;;  %v2111_v54 = vadd.f32 %v2093_v8, %v12243_v61  ;;  %v2064_v48 = vsub.f32 %v10785_v22, %v12243_v61  ;;  %v6730_v24 = vpop.f32.mrb[112].mxu1 }
 0x2d8   :  { %12329 = vst [vmem:[#allocation7_spill] sm:$0xff] %v10914_v55  ;;  %12330 = vst [vmem:[#allocation61_spill] sm:$0xff] %v10918_v15  ;;  %v10923_v8 = vmul.f32 %v12325_v6, %v2765_v35  ;;  %v10927_v58 = vmul.f32 %v10896_v28, %v12305_v9  ;;  %v12333_v35 = vld [vmem:[#allocation13_spill] sm:$0xff]  ;;  %v3145_v9 = vmul.f32 %v12334_v50, %v12334_v50  ;;  %v3017_v28 = vpop.f32.mrb[113].mxu1 }
 0x2d9   :  { %v2110_v7 = vadd.f32 %v2091_v29, %v12243_v61  ;;  %v2127_v46 = vmax.f32 %v2111_v54, 0.0  ;;  %v3097_v6 = vmul.f32 %v12333_v35, %v6730_v24  ;;  %v3151_v55 = vmul.f32 %v10695_v38, %v10695_v38 }
 0x2da   :  { %12331 = vst [vmem:[#allocation28_spill] sm:$0xff] %v10923_v8  ;;  %12332 = vst [vmem:[#allocation20_spill] sm:$0xff] %v10927_v58 }
 0x2db   :  { %v7892_v39 = vpop.eup %7891  ;;  %v2126_v29 = vmax.f32 %v2110_v7, 0.0  ;;  %v2143_v5 = vmin.f32 %v2127_v46, 1.0  ;;  %v3096_v7 = vmul.f32 %v12269_v3, %v3017_v28  ;;  %v3144_v46 = vmul.f32 %v10666_v56, %v10666_v56 }
 0x2dc   :  { %v2097_v25 = vmul.f32 %v7892_v39, %v2065_v51  ;;  %v3161_v20 = vsub.f32 %v3097_v6, %v3145_v9  ;;  %v10950_v9 = vld [vmem:[%s11839_s1 + $0x80] sm:$0xff] }
 0x2dd   :  { %v2142_v22 = vmin.f32 %v2126_v29, 1.0  ;;  %2159 = vst [vmem:[#allocation3 + $0x68] sm:$0xff] %v2143_v5  ;;  %v3160_v27 = vsub.f32 %v3096_v7, %v3144_v46  ;;  %v3147_v5 = vmul.f32 %v10670_v34, %v10670_v34  ;;  %v11012_v7 = vld [vmem:[%s11839_s1 + $0xc0] sm:$0xff] }
 0x2de   :  { %v7894_v16 = vpop.eup %7893  ;;  %v2113_v54 = vadd.f32 %v2097_v25, %v12243_v61  ;;  %v6733_v25 = vpop.f32.mrb[114].mxu1  ;;  %v3177_v24 = vadd.f32 0.0001, %v3161_v20  ;;  %v10957_v20 = vld [vmem:[%s11839_s1 + $0x88] sm:$0xff] }
 0x2df   :  { %v2095_v51 = vmul.f32 %v7894_v16, %v2064_v48  ;;  %2158 = vst [vmem:[#allocation3 + $0x60] sm:$0xff] %v2142_v22  ;;  %v3099_v8 = vmul.f32 %v12270_v52, %v6733_v25  ;;  %v3027_v16 = vpop.f32.mrb[115].mxu1  ;;  %v3176_v28 = vadd.f32 0.0001, %v3160_v27  ;;  %v3146_v22 = vmul.f32 %v10677_v4, %v10677_v4  ;;  %v10971_v25 = vld [vmem:[%s11839_s1 + $0x98] sm:$0xff] }
 0x2e0   :  { %v2129_v39 = vmax.f32 %v2113_v54, 0.0  ;;  %v3098_v15 = vmul.f32 %v12272_v53, %v3027_v16  ;;  %7895 = vrcp.f32 %v3177_v24 }
 0x2e1   :  { %v2112_v29 = vadd.f32 %v2095_v51, %v12243_v61  ;;  %v3163_v54 = vsub.f32 %v3099_v8, %v3147_v5  ;;  %v10964_v51 = vld [vmem:[%s11839_s1 + $0x90] sm:$0xff]  ;;  %7897 = vrcp.f32 %v3176_v28  ;;  %v3149_v5 = vmul.f32 %v10684_v2, %v10684_v2 }
 0x2e2   :  { %v2145_v58 = vmin.f32 %v2129_v39, 1.0  ;;  %v3162_v39 = vsub.f32 %v3098_v15, %v3146_v22  ;;  %v10981_v15 = vld [vmem:[%s11839_s1 + $0xa0] sm:$0xff] }
 0x2e3   :  { %v2128_v48 = vmax.f32 %v2112_v29, 0.0  ;;  %v6736_v29 = vpop.f32.mrb[116].mxu1  ;;  %v3179_v8 = vadd.f32 0.0001, %v3163_v54  ;;  %v3148_v54 = vmul.f32 %v10688_v33, %v10688_v33 }
 0x2e4   :  { %2161 = vst [vmem:[#allocation3 + $0x78] sm:$0xff] %v2145_v58  ;;  %v3101_v24 = vmul.f32 %v12274_v44, %v6736_v29  ;;  %v3037_v16 = vpop.f32.mrb[117].mxu1  ;;  %v3178_v28 = vadd.f32 0.0001, %v3162_v39  ;;  %v10991_v29 = vld [vmem:[%s11839_s1 + $0xa8] sm:$0xff]  ;;  %v10998_v58 = vld [vmem:[%s11839_s1 + $0xb0] sm:$0xff]  ;;  %v3153_v44 = vmul.f32 %v10707_v19, %v10707_v19 }
 0x2e5   :  { %v2144_v46 = vmin.f32 %v2128_v48, 1.0  ;;  %v3100_v22 = vmul.f32 %v12275_v11, %v3037_v16  ;;  %7899 = vrcp.f32 %v3179_v8  ;;  %v11005_v16 = vld [vmem:[%s11839_s1 + $0xb8] sm:$0xff]  ;;  %v6739_v8 = vpop.f32.mrb[118].mxu1 }
 0x2e6   :  { %v3165_v39 = vsub.f32 %v3101_v24, %v3149_v5  ;;  %7901 = vrcp.f32 %v3178_v28  ;;  %v11019_v24 = vld [vmem:[%s11839_s1 + $0xc8] sm:$0xff]  ;;  %v3103_v27 = vmul.f32 %v12277_v59, %v6739_v8  ;;  %v3047_v11 = vpop.f32.mrb[119].mxu1  ;;  %v11029_v28 = vld [vmem:[%s11839_s1 + $0xd0] sm:$0xff]  ;;  %v11039_v8 = vld [vmem:[%s11839_s1 + $0xd8] sm:$0xff] }
 0x2e7   :  { %2160 = vst [vmem:[#allocation3 + $0x70] sm:$0xff] %v2144_v46  ;;  %v3164_v46 = vsub.f32 %v3100_v22, %v3148_v54  ;;  %12335 = vst [vmem:[#allocation34_spill] sm:$0xff] %v11029_v28  ;;  %v3102_v6 = vmul.f32 %v12281_v26, %v3047_v11  ;;  %v6742_v22 = vpop.f32.mrb[120].mxu1  ;;  %v3152_v11 = vmul.f32 %v10716_v41, %v10716_v41 }
 0x2e8   :  { %v3181_v48 = vadd.f32 0.0001, %v3165_v39  ;;  %v3150_v39 = vmul.f32 %v10703_v1, %v10703_v1  ;;  %v3167_v59 = vsub.f32 %v3103_v27, %v3151_v55  ;;  %v3155_v26 = vmul.f32 %v10720_v40, %v10720_v40  ;;  %v3057_v35 = vpop.f32.mrb[121].mxu1 }
 0x2e9   :  { %v3180_v54 = vadd.f32 0.0001, %v3164_v46  ;;  %v3105_v3 = vmul.f32 %v12282_v36, %v6742_v22  ;;  %v11052_v55 = vmul.f32 %v10733_v62, %v10733_v62  ;;  %v11056_v27 = vmul.f32 %v10741_v21, %v10741_v21 }
 0x2ea   :  { %7903 = vrcp.f32 %v3181_v48  ;;  %v3166_v46 = vsub.f32 %v3102_v6, %v3150_v39  ;;  %v7896_v53 = vpop.eup %7895  ;;  %v3183_v52 = vadd.f32 0.0001, %v3167_v59  ;;  %v12336_v48 = vld [vmem:[#allocation47_spill] sm:$0xff]  ;;  %v3104_v37 = vmul.f32 %v10139_v30, %v3057_v35 }
 0x2eb   :  { %7905 = vrcp.f32 %v3180_v54  ;;  %v7898_v6 = vpop.eup %7897  ;;  %v12337_v54 = vld [vmem:[#allocation9_spill] sm:$0xff]  ;;  %v11064_v59 = vmul.f32 %v10745_v47, %v10745_v47  ;;  %v12339_v22 = vsub.f32 %v10762_v13, %v10771_v42  ;;  %v3169_v62 = vsub.f32 %v3105_v3, %v3153_v44  ;;  %v12340_v42 = vld [vmem:[#allocation16_spill] sm:$0xff] }
 0x2ec   :  { %v12338_v39 = vsub.f32 %v12336_v48, %v12337_v54  ;;  %v3182_v28 = vadd.f32 0.0001, %v3166_v46  ;;  %7907 = vrcp.f32 %v3183_v52  ;;  %v11071_v21 = vmul.f32 %v10882_v31, %v10882_v31  ;;  %v6745_v46 = vpop.f32.mrb[122].mxu1  ;;  %v12342_v31 = vld [vmem:[#allocation49_spill] sm:$0xff] }
 0x2ed   :  { %v3193_v36 = vmul.f32 %v7898_v6, %v12339_v22  ;;  %v3168_v35 = vsub.f32 %v3104_v37, %v3152_v11  ;;  %v3185_v13 = vadd.f32 0.0001, %v3169_v62  ;;  %v3107_v52 = vmul.f32 %v10177_v23, %v6745_v46  ;;  %v3067_v3 = vpop.f32.mrb[123].mxu1  ;;  %v12341_v22 = vld [vmem:[#allocation10_spill] sm:$0xff] }
 0x2ee   :  { %v3195_v5 = vmul.f32 %v7896_v53, %v12338_v39  ;;  %7909 = vrcp.f32 %v3182_v28  ;;  %v11083_v37 = vmul.f32 %v10185_v17, %v3067_v3  ;;  %v12344_v28 = vld [vmem:[#allocation18_spill] sm:$0xff] }
 0x2ef   :  { %v7900_v54 = vpop.eup %7899  ;;  %v3224_v39 = vmul.f32 %v3193_v36, %v10666_v56  ;;  %v3256_v47 = vmul.f32 %v10950_v9, %v3193_v36  ;;  %v12345_v56 = vsub.f32 %v10793_v43, %v10798_v18  ;;  %7911 = vrcp.f32 %v3185_v13 }
 0x2f0   :  { %v3225_v48 = vmul.f32 %v3195_v5, %v12334_v50  ;;  %v3257_v53 = vmul.f32 %v10957_v20, %v3195_v5  ;;  %v7902_v44 = vpop.eup %7901  ;;  %v12343_v50 = vsub.f32 %v12341_v22, %v12342_v31  ;;  %v3184_v5 = vadd.f32 0.0001, %v3168_v35  ;;  %v11091_v31 = vpop.f32.mrb[124].mxu1 }
 0x2f1   :  { %v3240_v11 = vsub.f32 %v12344_v28, %v3224_v39  ;;  %v3197_v36 = vmul.f32 %v7902_v44, %v12345_v56  ;;  %v3171_v62 = vsub.f32 %v3107_v52, %v3155_v26  ;;  %v12346_v26 = vld [vmem:[#allocation22_spill] sm:$0xff]  ;;  %v3170_v13 = vsub.f32 %v11083_v37, %v11052_v55  ;;  %v12364_v55 = vld [vmem:[#allocation37_spill] sm:$0xff] }
 0x2f2   :  { %v3241_v6 = vsub.f32 %v12340_v42, %v3225_v48  ;;  %v3199_v30 = vmul.f32 %v7900_v54, %v12343_v50  ;;  %7913 = vrcp.f32 %v3184_v5  ;;  %v11095_v50 = vpop.f32.mrb[125].mxu1 }
 0x2f3   :  { %v3272_v54 = vadd.f32 %v3256_v47, %v3240_v11  ;;  %v3226_v3 = vmul.f32 %v3197_v36, %v10677_v4  ;;  %v3258_v39 = vmul.f32 %v10964_v51, %v3197_v36  ;;  %v3187_v22 = vadd.f32 0.0001, %v3171_v62  ;;  %v12348_v47 = vld [vmem:[#allocation24_spill] sm:$0xff]  ;;  %v11109_v36 = vpop.f32.mrb[126].mxu1 }
 0x2f4   :  { %v3273_v46 = vadd.f32 %v3257_v53, %v3241_v6  ;;  %v3227_v23 = vmul.f32 %v3199_v30, %v10670_v34  ;;  %v3259_v48 = vmul.f32 %v10971_v25, %v3199_v30  ;;  %v7904_v35 = vpop.eup %7903  ;;  %v12347_v34 = vsub.f32 %v10801_v32, %v10805_v63 }
 0x2f5   :  { %v7906_v43 = vpop.eup %7905  ;;  %v3288_v52 = vmax.f32 %v3272_v54, 0.0  ;;  %v3242_v44 = vsub.f32 %v12348_v47, %v3226_v3  ;;  %v12349_v4 = vsub.f32 %v10808_v45, %v10819_v57  ;;  %7915 = vrcp.f32 %v3187_v22  ;;  %v11113_v54 = vpop.f32.mrb[127].mxu1  ;;  %v12350_v22 = vld [vmem:[#allocation26_spill] sm:$0xff] }
 0x2f6   :  { %v3289_v18 = vmax.f32 %v3273_v46, 0.0  ;;  %v3243_v53 = vsub.f32 %v12346_v26, %v3227_v23  ;;  %v3203_v30 = vmul.f32 %v7904_v35, %v12347_v34  ;;  %v7908_v63 = vpop.eup %7907 }
 0x2f7   :  { %v3201_v6 = vmul.f32 %v7906_v43, %v12349_v4  ;;  %v3304_v32 = vmin.f32 %v3288_v52, 1.0  ;;  %v3274_v62 = vadd.f32 %v3258_v39, %v3242_v44  ;;  %v11124_v4 = vpop.f32.mrb[128].mxu1 }
 0x2f8   :  { %v3305_v5 = vmin.f32 %v3289_v18, 1.0  ;;  %v3275_v11 = vadd.f32 %v3259_v48, %v3243_v53  ;;  %v3229_v56 = vmul.f32 %v3203_v30, %v10684_v2  ;;  %v3261_v23 = vmul.f32 %v10991_v29, %v3203_v30  ;;  %v7910_v45 = vpop.eup %7909 }
 0x2f9   :  { %v3228_v46 = vmul.f32 %v3201_v6, %v10688_v33  ;;  %v3260_v35 = vmul.f32 %v10981_v15, %v3201_v6  ;;  %v12351_v2 = vsub.f32 %v10823_v49, %v10827_v14  ;;  %v3320_v18 = vmax.f32 %v3304_v32, 0.1  ;;  %v7912_v6 = vpop.eup %7911 }
 0x2fa   :  { %v3321_v57 = vmax.f32 %v3305_v5, 0.1  ;;  %v3291_v3 = vmax.f32 %v3275_v11, 0.0  ;;  %v3245_v48 = vsub.f32 %v12350_v22, %v3229_v56  ;;  %v3290_v53 = vmax.f32 %v3274_v62, 0.0  ;;  %v11127_v11 = vpop.f32.mrb[129].mxu1 }
 0x2fb   :  { %v3207_v43 = vmul.f32 %v7908_v63, %v12351_v2  ;;  %v3244_v34 = vsub.f32 %v12228_v0, %v3228_v46  ;;  %v12352_v33 = vsub.f32 %v10832_v60, %v10836_v12  ;;  %v12353_v60 = vld [vmem:[#allocation30_spill] sm:$0xff] }
 0x2fc   :  { %7917 = vrcp.f32 %v3321_v57  ;;  %v3307_v30 = vmin.f32 %v3291_v3, 1.0  ;;  %v3277_v52 = vadd.f32 %v3261_v23, %v3245_v48  ;;  %v3306_v5 = vmin.f32 %v3290_v53, 1.0  ;;  %v7914_v56 = vpop.eup %7913  ;;  %v12355_v57 = vld [vmem:[#allocation39_spill] sm:$0xff]  ;;  %v11136_v53 = vpop.f32.mrb[130].mxu1 }
 0x2fd   :  { %v3205_v39 = vmul.f32 %v7910_v45, %v12352_v33  ;;  %v3231_v44 = vmul.f32 %v3207_v43, %v10695_v38  ;;  %7919 = vrcp.f32 %v3320_v18  ;;  %v3276_v49 = vadd.f32 %v3260_v35, %v3244_v34  ;;  %v12354_v45 = vld [vmem:[#allocation50_spill] sm:$0xff] }
 0x2fe   :  { %v3263_v14 = vmul.f32 %v11005_v16, %v3207_v43  ;;  %v3323_v63 = vmax.f32 %v3307_v30, 0.1  ;;  %v3293_v32 = vmax.f32 %v3277_v52, 0.0  ;;  %v3322_v23 = vmax.f32 %v3306_v5, 0.1  ;;  %v12357_v43 = vld [vmem:[#allocation32_spill] sm:$0xff] }
 0x2ff   :  { %v3247_v12 = vsub.f32 %v12353_v60, %v3231_v44  ;;  %v3230_v62 = vmul.f32 %v3205_v39, %v10703_v1  ;;  %v3292_v46 = vmax.f32 %v3276_v49, 0.0  ;;  %v3262_v38 = vmul.f32 %v10998_v58, %v3205_v39  ;;  %v7916_v34 = vpop.eup %7915  ;;  %v11140_v52 = vpop.f32.mrb[131].mxu1 }
 0x300   :  { %v12356_v3 = vsub.f32 %v12354_v45, %v12355_v57  ;;  %7921 = vrcp.f32 %v3323_v63  ;;  %v3309_v35 = vmin.f32 %v3293_v32, 1.0  ;;  %v12360_v32 = vld [vmem:[#allocation35_spill] sm:$0xff]  ;;  %v12362_v45 = vld [vmem:[#allocation56_spill] sm:$0xff] }
 0x301   :  { %v3279_v2 = vadd.f32 %v3263_v14, %v3247_v12  ;;  %v3246_v18 = vsub.f32 %v12357_v43, %v3230_v62  ;;  %7923 = vrcp.f32 %v3322_v23  ;;  %v3308_v33 = vmin.f32 %v3292_v46, 1.0  ;;  %v12361_v62 = vld [vmem:[#allocation15_spill] sm:$0xff] }
 0x302   :  { %v3211_v48 = vmul.f32 %v7912_v6, %v12356_v3  ;;  %v3325_v39 = vmax.f32 %v3309_v35, 0.1  ;;  %v12358_v6 = vld [vmem:[#allocation6_spill] sm:$0xff]  ;;  %v12363_v23 = vsub.f32 %v12361_v62, %v12362_v45 }
 0x303   :  { %v3295_v44 = vmax.f32 %v3279_v2, 0.0  ;;  %v3278_v5 = vadd.f32 %v3262_v38, %v3246_v18  ;;  %v12359_v49 = vsub.f32 %v10850_v10, %v12358_v6  ;;  %v3324_v63 = vmax.f32 %v3308_v33, 0.1 }
 0x304   :  { %v3233_v1 = vmul.f32 %v3211_v48, %v10707_v19  ;;  %v3265_v30 = vmul.f32 %v11019_v24, %v3211_v48  ;;  %v3215_v46 = vmul.f32 %v7916_v34, %v12363_v23  ;;  %v3186_v19 = vadd.f32 0.0001, %v3170_v13  ;;  %v11153_v48 = vpop.f32.mrb[132].mxu1 }
 0x305   :  { %v3209_v14 = vmul.f32 %v7914_v56, %v12359_v49  ;;  %7925 = vrcp.f32 %v3325_v39  ;;  %v3311_v57 = vmin.f32 %v3295_v44, 1.0  ;;  %v3294_v3 = vmax.f32 %v3278_v5, 0.0  ;;  %v11157_v2 = vpop.f32.mrb[133].mxu1 }
 0x306   :  { %v3249_v12 = vsub.f32 %v12360_v32, %v3233_v1  ;;  %7927 = vrcp.f32 %v3324_v63  ;;  %v3235_v35 = vmul.f32 %v3215_v46, %v10720_v40  ;;  %v7918_v18 = vpop.eup %7917  ;;  %v3267_v13 = vmul.f32 %v11039_v8, %v3215_v46  ;;  %v11168_v63 = vpop.f32.mrb[134].mxu1 }
 0x307   :  { %v3232_v38 = vmul.f32 %v3209_v14, %v10716_v41  ;;  %v3264_v56 = vmul.f32 %v11012_v7, %v3209_v14  ;;  %v3327_v34 = vmax.f32 %v3311_v57, 0.1  ;;  %v3310_v33 = vmin.f32 %v3294_v3, 1.0  ;;  %v7920_v1 = vpop.eup %7919  ;;  %v11173_v46 = vpop.f32.mrb[135].mxu1  ;;  %v12369_v3 = vld [vmem:[#allocation44_spill] sm:$0xff] }
 0x308   :  { %v3281_v10 = vadd.f32 %v3265_v30, %v3249_v12  ;;  %v12365_v41 = vsub.f32 %v10957_v20, %v12243_v61  ;;  %v12366_v30 = vld [vmem:[#allocation41_spill] sm:$0xff]  ;;  %7929 = vrcp.f32 %v3186_v19  ;;  %v12367_v40 = vsub.f32 %v10950_v9, %v12243_v61  ;;  %v12368_v20 = vld [vmem:[#allocation42_spill] sm:$0xff] }
 0x309   :  { %v3248_v37 = vsub.f32 %v12364_v55, %v3232_v38  ;;  %v3251_v5 = vsub.f32 %v12366_v30, %v3235_v35  ;;  %7931 = vrcp.f32 %v3327_v34  ;;  %v3326_v49 = vmax.f32 %v3310_v33, 0.1 }
 0x30a   :  { %v3355_v39 = vmul.f32 %v7918_v18, %v12365_v41  ;;  %v3297_v44 = vmax.f32 %v3281_v10, 0.0  ;;  %v3353_v6 = vmul.f32 %v7920_v1, %v12367_v40  ;;  %v3109_v23 = vmul.f32 %v12368_v20, %v11091_v31  ;;  %v7922_v57 = vpop.eup %7921 }
 0x30b   :  { %v3280_v14 = vadd.f32 %v3264_v56, %v3248_v37  ;;  %v3283_v45 = vadd.f32 %v3267_v13, %v3251_v5  ;;  %7933 = vrcp.f32 %v3326_v49  ;;  %v3108_v38 = vmul.f32 %v12369_v3, %v11095_v50  ;;  %v7924_v10 = vpop.eup %7923 }
 0x30c   :  { %v3385_v12 = vadd.f32 %v3355_v39, %v12243_v61  ;;  %v3313_v62 = vmin.f32 %v3297_v44, 1.0  ;;  %v3384_v19 = vadd.f32 %v3353_v6, %v12243_v61  ;;  %v12370_v35 = vsub.f32 %v10971_v25, %v12243_v61  ;;  %v11185_v39 = vpop.f32.mrb[136].mxu1 }
 0x30d   :  { %v3296_v9 = vmax.f32 %v3280_v14, 0.0  ;;  %v3299_v33 = vmax.f32 %v3283_v45, 0.0  ;;  %v12371_v31 = vsub.f32 %v10964_v51, %v12243_v61  ;;  %v3173_v41 = vsub.f32 %v3109_v23, %v11056_v27  ;;  %v11188_v40 = vpop.f32.mrb[137].mxu1 }
 0x30e   :  { %v3401_v56 = vmax.f32 %v3385_v12, 0.0  ;;  %v3359_v18 = vmul.f32 %v7922_v57, %v12370_v35  ;;  %v3329_v34 = vmax.f32 %v3313_v62, 0.1  ;;  %v3400_v37 = vmax.f32 %v3384_v19, 0.0 }
 0x30f   :  { %v3357_v13 = vmul.f32 %v7924_v10, %v12371_v31  ;;  %v3312_v1 = vmin.f32 %v3296_v9, 1.0  ;;  %v3315_v5 = vmin.f32 %v3299_v33, 1.0  ;;  %v7926_v25 = vpop.eup %7925  ;;  %v3189_v12 = vadd.f32 0.0001, %v3173_v41 }
 0x310   :  { %v3417_v44 = vmin.f32 %v3401_v56, 1.0  ;;  %v3387_v50 = vadd.f32 %v3359_v18, %v12243_v61  ;;  %7935 = vrcp.f32 %v3329_v34  ;;  %v3416_v6 = vmin.f32 %v3400_v37, 1.0  ;;  %v7928_v51 = vpop.eup %7927  ;;  %v12374_v56 = vld [vmem:[#allocation52_spill] sm:$0xff]  ;;  %v11200_v18 = vpop.f32.mrb[138].mxu1 }
 0x311   :  { %v3386_v49 = vadd.f32 %v3357_v13, %v12243_v61  ;;  %v3328_v14 = vmax.f32 %v3312_v1, 0.1  ;;  %v12372_v27 = vsub.f32 %v10991_v29, %v12243_v61  ;;  %v3331_v23 = vmax.f32 %v3315_v5, 0.1  ;;  %v11203_v31 = vpop.f32.mrb[139].mxu1  ;;  %v12376_v1 = vld [vmem:[#allocation58_spill] sm:$0xff] }
 0x312   :  { %3434 = vst [vmem:[#allocation3 + $0x88] sm:$0xff] %v3417_v44  ;;  %v3403_v62 = vmax.f32 %v3387_v50, 0.0  ;;  %v3172_v57 = vsub.f32 %v3108_v38, %v11064_v59  ;;  %3433 = vst [vmem:[#allocation3 + $0x80] sm:$0xff] %v3416_v6  ;;  %v12373_v9 = vsub.f32 %v10981_v15, %v12243_v61  ;;  %v3111_v35 = vmul.f32 %v12374_v56, %v11109_v36  ;;  %v7930_v34 = vpop.eup %7929  ;;  %v12375_v15 = vld [vmem:[#allocation57_spill] sm:$0xff] }
 0x313   :  { %v3363_v45 = vmul.f32 %v7926_v25, %v12372_v27  ;;  %v3402_v19 = vmax.f32 %v3386_v49, 0.0  ;;  %7937 = vrcp.f32 %v3328_v14  ;;  %v7932_v59 = vpop.eup %7931  ;;  %v12377_v41 = vsub.f32 %v12375_v15, %v12376_v1  ;;  %v12379_v14 = vld [vmem:[#allocation38_spill] sm:$0xff] }
 0x314   :  { %v3361_v10 = vmul.f32 %v7928_v51, %v12373_v9  ;;  %v3419_v33 = vmin.f32 %v3403_v62, 1.0  ;;  %7939 = vrcp.f32 %v3331_v23  ;;  %v3188_v37 = vadd.f32 0.0001, %v3172_v57  ;;  %v12380_v62 = vld [vmem:[#allocation54_spill] sm:$0xff]  ;;  %v11218_v23 = vpop.f32.mrb[140].mxu1 }
 0x315   :  { %v3389_v29 = vadd.f32 %v3363_v45, %v12243_v61  ;;  %v3418_v38 = vmin.f32 %v3402_v19, 1.0  ;;  %v3213_v44 = vmul.f32 %v7930_v34, %v12377_v41  ;;  %7941 = vrcp.f32 %v3189_v12  ;;  %v7934_v6 = vpop.eup %7933  ;;  %v12381_v45 = vld [vmem:[#allocation12_spill] sm:$0xff]  ;;  %v12383_v34 = vld [vmem:[#allocation43_spill] sm:$0xff] }
 0x316   :  { %v3388_v13 = vadd.f32 %v3361_v10, %v12243_v61  ;;  %3436 = vst [vmem:[#allocation3 + $0x98] sm:$0xff] %v3419_v33  ;;  %v12378_v50 = vsub.f32 %v11005_v16, %v12243_v61  ;;  %7943 = vrcp.f32 %v3188_v37  ;;  %v3175_v25 = vsub.f32 %v3111_v35, %v11071_v21  ;;  %v11224_v10 = vpop.f32.mrb[141].mxu1 }
 0x317   :  { %v3405_v36 = vmax.f32 %v3389_v29, 0.0  ;;  %3435 = vst [vmem:[#allocation3 + $0x90] sm:$0xff] %v3418_v38  ;;  %v3234_v51 = vmul.f32 %v3213_v44, %v12379_v14  ;;  %v3110_v27 = vmul.f32 %v12380_v62, %v11113_v54  ;;  %v3158_v12 = vmul.f32 %v12381_v45, %v12381_v45  ;;  %v12384_v29 = vld [vmem:[#allocation34_spill] sm:$0xff]  ;;  %v11231_v38 = vld [vmem:[%s11839_s1 + $0xe8] sm:$0xff] }
 0x318   :  { %v3367_v5 = vmul.f32 %v7932_v59, %v12378_v50  ;;  %v3404_v49 = vmax.f32 %v3388_v13, 0.0  ;;  %v12382_v19 = vsub.f32 %v10998_v58, %v12243_v61  ;;  %v3191_v9 = vadd.f32 0.0001, %v3175_v25  ;;  %12385 = vst [vmem:[#allocation21_spill] sm:$0xff] %v11231_v38  ;;  %v12387_v50 = vld [vmem:[#allocation13_spill] sm:$0xff]  ;;  %v11243_v25 = vpop.f32.mrb[142].mxu1 }
 0x319   :  { %v3421_v57 = vmin.f32 %v3405_v36, 1.0  ;;  %v3250_v33 = vsub.f32 %v12383_v34, %v3234_v51  ;;  %v3266_v54 = vmul.f32 %v12384_v29, %v3213_v44  ;;  %v3174_v37 = vsub.f32 %v3110_v27, %v3158_v12  ;;  %12389 = vst [vmem:[#allocation9_spill] sm:$0xff] %v11243_v25  ;;  %v12390_v14 = vld [vmem:[#allocation14_spill] sm:$0xff]  ;;  %v12391_v27 = vld [vmem:[#allocation17_spill] sm:$0xff] }
 0x31a   :  { %v3391_v16 = vadd.f32 %v3367_v5, %v12243_v61  ;;  %v3365_v21 = vmul.f32 %v7934_v6, %v12382_v19  ;;  %v3420_v35 = vmin.f32 %v3404_v49, 1.0  ;;  %v7936_v59 = vpop.eup %7935  ;;  %7945 = vrcp.f32 %v3191_v9 }
 0x31b   :  { %3438 = vst [vmem:[#allocation3 + $0xa8] sm:$0xff] %v3421_v57  ;;  %v12386_v1 = vsub.f32 %v11019_v24, %v12243_v61  ;;  %v3282_v44 = vadd.f32 %v3266_v54, %v3250_v33  ;;  %v3190_v36 = vadd.f32 0.0001, %v3174_v37  ;;  %v11241_v5 = vmul.f32 %v12387_v50, %v11124_v4  ;;  %v11253_v24 = vpop.f32.mrb[143].mxu1  ;;  %v12393_v4 = vld [vmem:[#allocation19_spill] sm:$0xff]  ;;  %v12396_v37 = vld [vmem:[#allocation25_spill] sm:$0xff] }
 0x31c   :  { %v3407_v58 = vmax.f32 %v3391_v16, 0.0  ;;  %v3390_v15 = vadd.f32 %v3365_v21, %v12243_v61  ;;  %3437 = vst [vmem:[#allocation3 + $0xa0] sm:$0xff] %v3420_v35  ;;  %v11247_v51 = vmul.f32 %v12390_v14, %v11127_v11  ;;  %v11251_v12 = vmul.f32 %v12391_v27, %v11136_v53  ;;  %12392 = vst [vmem:[#allocation10_spill] sm:$0xff] %v11253_v24  ;;  %v12395_v53 = vld [vmem:[#allocation23_spill] sm:$0xff] }
 0x31d   :  { %v3371_v41 = vmul.f32 %v7936_v59, %v12386_v1  ;;  %12388 = vst [vmem:[#allocation47_spill] sm:$0xff] %v11241_v5  ;;  %v7938_v57 = vpop.eup %7937  ;;  %v3298_v19 = vmax.f32 %v3282_v44, 0.0  ;;  %7947 = vrcp.f32 %v3190_v36  ;;  %v11258_v21 = vmul.f32 %v12393_v4, %v11140_v52  ;;  %v12398_v44 = vld [vmem:[#allocation27_spill] sm:$0xff] }
 0x31e   :  { %v3423_v6 = vmin.f32 %v3407_v58, 1.0  ;;  %v3406_v49 = vmax.f32 %v3390_v15, 0.0  ;;  %v7940_v9 = vpop.eup %7939  ;;  %v12394_v11 = vsub.f32 %v11012_v7, %v12243_v61  ;;  %v11265_v54 = vmul.f32 %v12395_v53, %v11153_v48  ;;  %v6954_v7 = vpop.f32.mrb[144].mxu1  ;;  %v12405_v24 = vld [vmem:[#allocation55_spill] sm:$0xff] }
 0x31f   :  { %v3393_v16 = vadd.f32 %v3371_v41, %v12243_v61  ;;  %v11269_v59 = vmul.f32 %v12396_v37, %v11157_v2  ;;  %v7942_v58 = vpop.eup %7941  ;;  %v12397_v52 = vsub.f32 %v11039_v8, %v12243_v61  ;;  %v3314_v41 = vmin.f32 %v3298_v19, 1.0  ;;  %v12403_v8 = vld [vmem:[#allocation31_spill] sm:$0xff] }
 0x320   :  { %3440 = vst [vmem:[#allocation3 + $0xb8] sm:$0xff] %v3423_v6  ;;  %v3422_v35 = vmin.f32 %v3406_v49, 1.0  ;;  %v3369_v33 = vmul.f32 %v7938_v57, %v12394_v11  ;;  %v11276_v36 = vmul.f32 %v12398_v44, %v11168_v63  ;;  %v7944_v6 = vpop.eup %7943  ;;  %v12399_v49 = vld [vmem:[#allocation45_spill] sm:$0xff]  ;;  %v12400_v57 = vld [vmem:[#allocation48_spill] sm:$0xff]  ;;  %v11288_v19 = vmul.f32 %v12403_v8, %v11185_v39 }
 0x321   :  { %v3409_v15 = vmax.f32 %v3393_v16, 0.0  ;;  %v3375_v1 = vmul.f32 %v7940_v9, %v12397_v52  ;;  %v12401_v2 = vsub.f32 %v12399_v49, %v12400_v57  ;;  %v12402_v16 = vld [vmem:[#allocation29_spill] sm:$0xff]  ;;  %v3982_v9 = vpop.f32.mrb[145].mxu1  ;;  %v3330_v62 = vmax.f32 %v3314_v41, 0.1  ;;  %v12407_v49 = vld [vmem:[#allocation40_spill] sm:$0xff] }
 0x322   :  { %3439 = vst [vmem:[#allocation3 + $0xb0] sm:$0xff] %v3422_v35  ;;  %v3392_v48 = vadd.f32 %v3369_v33, %v12243_v61  ;;  %v11284_v13 = vmul.f32 %v12402_v16, %v11173_v46  ;;  %v12404_v35 = vld [vmem:[#allocation60_spill] sm:$0xff]  ;;  %v12408_v57 = vld [vmem:[#allocation33_spill] sm:$0xff]  ;;  %v12411_v41 = vld [vmem:[#allocation46_spill] sm:$0xff] }
 0x323   :  { %v3219_v11 = vmul.f32 %v7942_v58, %v12401_v2  ;;  %v3425_v63 = vmin.f32 %v3409_v15, 1.0  ;;  %v3395_v52 = vadd.f32 %v3375_v1, %v12243_v61  ;;  %v12406_v33 = vsub.f32 %v12404_v35, %v12405_v24  ;;  %v12409_v2 = vld [vmem:[#allocation36_spill] sm:$0xff]  ;;  %v6957_v24 = vpop.f32.mrb[146].mxu1  ;;  %v12412_v35 = vld [vmem:[#allocation51_spill] sm:$0xff] }
 0x324   :  { %v3408_v25 = vmax.f32 %v3392_v48, 0.0  ;;  %v11297_v46 = vmul.f32 %v12408_v57, %v11188_v40  ;;  %v11301_v39 = vmul.f32 %v12409_v2, %v11200_v18  ;;  %7949 = vrcp.f32 %v3330_v62  ;;  %v11309_v40 = vld [vmem:[%s11839_s1 + $0xe0] sm:$0xff]  ;;  %v3992_v62 = vpop.f32.mrb[147].mxu1 }
 0x325   :  { %v3217_v56 = vmul.f32 %v7944_v6, %v12406_v33  ;;  %v3237_v58 = vmul.f32 %v3219_v11, %v12407_v49  ;;  %3442 = vst [vmem:[#allocation3 + $0xc8] sm:$0xff] %v3425_v63  ;;  %v3411_v15 = vmax.f32 %v3395_v52, 0.0  ;;  %v3269_v1 = vmul.f32 %v11231_v38, %v3219_v11  ;;  %v7946_v6 = vpop.eup %7945  ;;  %v12413_v52 = vld [vmem:[#allocation53_spill] sm:$0xff] }
 0x326   :  { %12410 = vst [vmem:[#allocation49_spill] sm:$0xff] %v11301_v39  ;;  %v3424_v48 = vmin.f32 %v3408_v25, 1.0  ;;  %v11314_v63 = vmul.f32 %v10185_v17, %v11203_v31  ;;  %v12415_v38 = vld [vmem:[#allocation61_spill] sm:$0xff]  ;;  %v11329_v31 = vmul.f32 %v12387_v50, %v6954_v7  ;;  %v6960_v7 = vpop.f32.mrb[148].mxu1  ;;  %v12425_v50 = vld [vmem:[#allocation8_spill] sm:$0xff] }
 0x327   :  { %v3236_v34 = vmul.f32 %v3217_v56, %v12411_v41  ;;  %v3253_v33 = vsub.f32 %v12412_v35, %v3237_v58  ;;  %v3268_v18 = vmul.f32 %v11309_v40, %v3217_v56  ;;  %v3427_v11 = vmin.f32 %v3411_v15, 1.0  ;;  %v12414_v41 = vld [vmem:[#allocation7_spill] sm:$0xff]  ;;  %v7948_v15 = vpop.eup %7947 }
 0x328   :  { %v12416_v25 = vsub.f32 %v12414_v41, %v12415_v38  ;;  %v11322_v58 = vmul.f32 %v12368_v20, %v11218_v23  ;;  %3441 = vst [vmem:[#allocation3 + $0xc0] sm:$0xff] %v3424_v48  ;;  %v11326_v56 = vmul.f32 %v12369_v3, %v11224_v10  ;;  %12419 = vst [vmem:[#allocation6_spill] sm:$0xff] %v11329_v31  ;;  %v11339_v23 = vld [vmem:[%s11839_s1 + $0xf8] sm:$0xff] }
 0x329   :  { %v3252_v49 = vsub.f32 %v12413_v52, %v3236_v34  ;;  %v3285_v35 = vadd.f32 %v3269_v1, %v3253_v33  ;;  %v11333_v34 = vmul.f32 %v11241_v5, %v12340_v42  ;;  %3444 = vst [vmem:[#allocation3 + $0xd8] sm:$0xff] %v3427_v11  ;;  %v11343_v1 = vmul.f32 %v12390_v14, %v3982_v9  ;;  %v12422_v33 = vld [vmem:[#allocation28_spill] sm:$0xff] }
 0x32a   :  { %v3223_v39 = vmul.f32 %v7946_v6, %v12416_v25  ;;  %12417 = vst [vmem:[#allocation50_spill] sm:$0xff] %v11322_v58  ;;  %12418 = vst [vmem:[#allocation39_spill] sm:$0xff] %v11326_v56  ;;  %v12421_v6 = vld [vmem:[#allocation59_spill] sm:$0xff]  ;;  %v12423_v25 = vld [vmem:[#allocation20_spill] sm:$0xff]  ;;  %v11352_v11 = vmul.f32 %v11247_v51, %v12344_v28  ;;  %v11356_v9 = vmul.f32 %v12391_v27, %v6957_v24 }
 0x32b   :  { %12420 = vst [vmem:[#allocation15_spill] sm:$0xff] %v11333_v34  ;;  %v3284_v38 = vadd.f32 %v3268_v18, %v3252_v49  ;;  %v3301_v48 = vmax.f32 %v3285_v35, 0.0  ;;  %v12424_v42 = vsub.f32 %v12422_v33, %v12423_v25  ;;  %v4002_v49 = vpop.f32.mrb[149].mxu1  ;;  %v11360_v35 = vmul.f32 %v11251_v12, %v12346_v26  ;;  %v12428_v28 = vld [vmem:[#allocation11_spill] sm:$0xff] }
 0x32c   :  { %v3239_v41 = vmul.f32 %v3223_v39, %v12421_v6  ;;  %v3271_v10 = vmul.f32 %v11339_v23, %v3223_v39  ;;  %12426 = vst [vmem:[#allocation56_spill] sm:$0xff] %v11356_v9  ;;  %v11374_v26 = vmul.f32 %v12393_v4, %v3992_v62  ;;  %v11379_v31 = vmul.f32 %v11258_v21, %v12348_v47 }
 0x32d   :  { %v3221_v5 = vmul.f32 %v7948_v15, %v12424_v42  ;;  %v3300_v6 = vmax.f32 %v3284_v38, 0.0  ;;  %12427 = vst [vmem:[#allocation44_spill] sm:$0xff] %v11360_v35  ;;  %v3317_v33 = vmin.f32 %v3301_v48, 1.0  ;;  %v11366_v15 = vld [vmem:[%s11839_s1 + $0xf0] sm:$0xff]  ;;  %v6963_v48 = vpop.f32.mrb[150].mxu1  ;;  %v11386_v18 = vmul.f32 %v11265_v54, %v12350_v22 }
 0x32e   :  { %v3255_v39 = vsub.f32 %v12425_v50, %v3239_v41  ;;  %v4012_v38 = vpop.f32.mrb[151].mxu1  ;;  %v11389_v62 = vmul.f32 %v12396_v37, %v4002_v49 }
 0x32f   :  { %v3238_v42 = vmul.f32 %v3221_v5, %v12381_v45  ;;  %v3270_v25 = vmul.f32 %v11366_v15, %v3221_v5  ;;  %v3316_v41 = vmin.f32 %v3300_v6, 1.0  ;;  %v3333_v45 = vmax.f32 %v3317_v33, 0.1  ;;  %v7950_v6 = vpop.eup %7949  ;;  %v6966_v49 = vpop.f32.mrb[152].mxu1 }
 0x330   :  { %v3287_v24 = vadd.f32 %v3271_v10, %v3255_v39  ;;  %v11382_v5 = vmul.f32 %v12395_v53, %v6960_v7  ;;  %v12429_v33 = vsub.f32 %v12384_v29, %v12243_v61  ;;  %v11404_v29 = vmul.f32 %v12398_v44, %v6963_v48  ;;  %v12434_v7 = vld [vmem:[#allocation49_spill] sm:$0xff] }
 0x331   :  { %v3254_v34 = vsub.f32 %v12428_v28, %v3238_v42  ;;  %v3332_v10 = vmax.f32 %v3316_v41, 0.1  ;;  %7951 = vrcp.f32 %v3333_v45  ;;  %v11435_v48 = vmul.f32 %v11297_v46, %v12364_v55 }
 0x332   :  { %v3303_v39 = vmax.f32 %v3287_v24, 0.0  ;;  %v3373_v42 = vmul.f32 %v7950_v6, %v12429_v33  ;;  %v11400_v24 = vmul.f32 %v11269_v59, %v12228_v0  ;;  %v3348_v55 = vsub.f32 %v11309_v40, %v12243_v61  ;;  %v12443_v40 = vld [vmem:[#allocation51_spill] sm:$0xff] }
 0x333   :  { %v3286_v47 = vadd.f32 %v3270_v25, %v3254_v34  ;;  %7953 = vrcp.f32 %v3332_v10  ;;  %v11408_v34 = vmul.f32 %v11276_v36, %v12353_v60  ;;  %v4022_v25 = vpop.f32.mrb[153].mxu1  ;;  %v11413_v10 = vmul.f32 %v12402_v16, %v4012_v38  ;;  %12432 = vst [vmem:[#allocation38_spill] sm:$0xff] %v11435_v48  ;;  %v12445_v48 = vld [vmem:[#allocation21_spill] sm:$0xff] }
 0x334   :  { %v3319_v35 = vmin.f32 %v3303_v39, 1.0  ;;  %v3394_v22 = vadd.f32 %v3373_v42, %v12243_v61  ;;  %v11417_v39 = vmul.f32 %v11284_v13, %v12357_v43  ;;  %v11422_v42 = vmul.f32 %v12403_v8, %v6966_v49  ;;  %v6969_v41 = vpop.f32.mrb[154].mxu1 }
 0x335   :  { %v3302_v9 = vmax.f32 %v3286_v47, 0.0  ;;  %v11428_v38 = vmul.f32 %v11288_v19, %v12360_v32  ;;  %v11431_v6 = vmul.f32 %v12408_v57, %v4022_v25  ;;  %v11438_v49 = vmul.f32 %v12409_v2, %v6969_v41 }
 0x336   :  { %v3335_v45 = vmax.f32 %v3319_v35, 0.1  ;;  %v3410_v47 = vmax.f32 %v3394_v22, 0.0  ;;  %12430 = vst [vmem:[#allocation57_spill] sm:$0xff] %v11422_v42  ;;  %v11444_v32 = vmul.f32 %v12434_v7, %v12366_v30  ;;  %v12440_v42 = vld [vmem:[#allocation52_spill] sm:$0xff]  ;;  %v12446_v35 = vsub.f32 %v12445_v48, %v12243_v61  ;;  %v12447_v30 = vld [vmem:[#allocation10_spill] sm:$0xff] }
 0x337   :  { %v3318_v33 = vmin.f32 %v3302_v9, 1.0  ;;  %12431 = vst [vmem:[#allocation58_spill] sm:$0xff] %v11428_v38  ;;  %12433 = vst [vmem:[#allocation12_spill] sm:$0xff] %v11438_v49  ;;  %v12439_v38 = vld [vmem:[#allocation9_spill] sm:$0xff] }
 0x338   :  { %7955 = vrcp.f32 %v3335_v45  ;;  %v3426_v22 = vmin.f32 %v3410_v47, 1.0  ;;  %v4032_v45 = vpop.f32.mrb[155].mxu1  ;;  %12435 = vst [vmem:[#allocation34_spill] sm:$0xff] %v11444_v32  ;;  %v12437_v47 = vld [vmem:[#allocation43_spill] sm:$0xff] }
 0x339   :  { %v3334_v9 = vmax.f32 %v3318_v33, 0.1  ;;  %v11447_v25 = vmul.f32 %v10185_v17, %v4032_v45  ;;  %v11451_v33 = vmul.f32 %v11314_v63, %v12437_v47  ;;  %v6972_v45 = vpop.f32.mrb[156].mxu1  ;;  %v11463_v47 = vmul.f32 %v12440_v42, %v12439_v38 }
 0x33a   :  { %3443 = vst [vmem:[#allocation3 + $0xd0] sm:$0xff] %v3426_v22  ;;  %v11466_v60 = vmul.f32 %v12368_v20, %v6972_v45  ;;  %v11470_v22 = vmul.f32 %v11322_v58, %v12443_v40  ;;  %v11484_v45 = vmul.f32 %v11326_v56, %v12413_v52  ;;  %v3351_v40 = vsub.f32 %v11339_v23, %v12243_v61 }
 0x33b   :  { %12436 = vst [vmem:[#allocation14_spill] sm:$0xff] %v11447_v25  ;;  %12438 = vst [vmem:[#allocation17_spill] sm:$0xff] %v11451_v33  ;;  %7957 = vrcp.f32 %v3334_v9  ;;  %v7952_v43 = vpop.eup %7951  ;;  %v4042_v9 = vpop.f32.mrb[157].mxu1  ;;  %v12448_v33 = vld [vmem:[#allocation54_spill] sm:$0xff]  ;;  %v11499_v52 = vmul.f32 %v11463_v47, %v12425_v50 }
 0x33c   :  { %12441 = vst [vmem:[#allocation19_spill] sm:$0xff] %v11463_v47  ;;  %12442 = vst [vmem:[#allocation23_spill] sm:$0xff] %v11466_v60  ;;  %v3379_v32 = vmul.f32 %v7952_v43, %v12446_v35  ;;  %v11477_v25 = vmul.f32 %v12448_v33, %v12447_v30  ;;  %v11480_v38 = vmul.f32 %v12369_v3, %v4042_v9  ;;  %v6975_v48 = vpop.f32.mrb[158].mxu1 }
 0x33d   :  { %12444 = vst [vmem:[#allocation25_spill] sm:$0xff] %v11470_v22  ;;  %v7954_v41 = vpop.eup %7953  ;;  %12451 = vst [vmem:[#allocation48_spill] sm:$0xff] %v11484_v45  ;;  %v11495_v9 = vmul.f32 %v12440_v42, %v6975_v48  ;;  %v4052_v23 = vpop.f32.mrb[159].mxu1  ;;  %v12457_v42 = vld [vmem:[#allocation47_spill] sm:$0xff] }
 0x33e   :  { %12449 = vst [vmem:[#allocation27_spill] sm:$0xff] %v11477_v25  ;;  %12450 = vst [vmem:[#allocation45_spill] sm:$0xff] %v11480_v38  ;;  %v3377_v20 = vmul.f32 %v7954_v41, %v3348_v55  ;;  %v3397_v43 = vadd.f32 %v3379_v32, %v12243_v61  ;;  %v3350_v41 = vsub.f32 %v11366_v15, %v12243_v61  ;;  %v7066_v22 = vpop.f32.mrb[160].mxu1 }
 0x33f   :  { %12452 = vst [vmem:[#allocation29_spill] sm:$0xff] %v11495_v9  ;;  %12453 = vst [vmem:[#allocation31_spill] sm:$0xff] %v11499_v52  ;;  %v11504_v32 = vmul.f32 %v12448_v33, %v4052_v23  ;;  %v11508_v30 = vmul.f32 %v11477_v25, %v12428_v28  ;;  %v12456_v23 = vld [vmem:[#allocation13_spill] sm:$0xff]  ;;  %v4432_v28 = vmul.f32 %v12457_v42, %v12457_v42  ;;  %v4304_v25 = vpop.f32.mrb[161].mxu1 }
 0x340   :  { %v3396_v35 = vadd.f32 %v3377_v20, %v12243_v61  ;;  %v3413_v49 = vmax.f32 %v3397_v43, 0.0  ;;  %v4384_v33 = vmul.f32 %v12456_v23, %v7066_v22 }
 0x341   :  { %12454 = vst [vmem:[#allocation60_spill] sm:$0xff] %v11504_v32  ;;  %12455 = vst [vmem:[#allocation55_spill] sm:$0xff] %v11508_v30 }
 0x342   :  { %v7956_v55 = vpop.eup %7955  ;;  %v3412_v20 = vmax.f32 %v3396_v35, 0.0  ;;  %v3429_v50 = vmin.f32 %v3413_v49, 1.0  ;;  %v4383_v35 = vmul.f32 %v12390_v14, %v4304_v25  ;;  %v4431_v49 = vmul.f32 %v11247_v51, %v11247_v51 }
 0x343   :  { %v3383_v48 = vmul.f32 %v7956_v55, %v3351_v40  ;;  %v4448_v38 = vsub.f32 %v4384_v33, %v4432_v28 }
 0x344   :  { %v3428_v15 = vmin.f32 %v3412_v20, 1.0  ;;  %3446 = vst [vmem:[#allocation3 + $0xe8] sm:$0xff] %v3429_v50  ;;  %v4447_v45 = vsub.f32 %v4383_v35, %v4431_v49  ;;  %v4434_v50 = vmul.f32 %v11251_v12, %v11251_v12  ;;  %v11541_v49 = vld [vmem:[%s11839_s1 + $0x108] sm:$0xff] }
 0x345   :  { %v7958_v60 = vpop.eup %7957  ;;  %v3399_v43 = vadd.f32 %v3383_v48, %v12243_v61  ;;  %v7069_v48 = vpop.f32.mrb[162].mxu1  ;;  %v4464_v22 = vadd.f32 0.0001, %v4448_v38 }
 0x346   :  { %v3381_v40 = vmul.f32 %v7958_v60, %v3350_v41  ;;  %3445 = vst [vmem:[#allocation3 + $0xe0] sm:$0xff] %v3428_v15  ;;  %v4386_v23 = vmul.f32 %v12391_v27, %v7069_v48  ;;  %v4314_v60 = vpop.f32.mrb[163].mxu1  ;;  %v4463_v14 = vadd.f32 0.0001, %v4447_v45  ;;  %v4433_v15 = vmul.f32 %v11258_v21, %v11258_v21  ;;  %v11531_v27 = vld [vmem:[%s11839_s1 + $0x100] sm:$0xff] }
 0x347   :  { %v3415_v55 = vmax.f32 %v3399_v43, 0.0  ;;  %v4385_v25 = vmul.f32 %v12393_v4, %v4314_v60  ;;  %7959 = vrcp.f32 %v4464_v22  ;;  %v7072_v38 = vpop.f32.mrb[164].mxu1  ;;  %v4435_v22 = vmul.f32 %v11269_v59, %v11269_v59 }
 0x348   :  { %v3398_v20 = vadd.f32 %v3381_v40, %v12243_v61  ;;  %v4450_v28 = vsub.f32 %v4386_v23, %v4434_v50  ;;  %7961 = vrcp.f32 %v4463_v14  ;;  %v4388_v4 = vmul.f32 %v12395_v53, %v7072_v38  ;;  %v4324_v35 = vpop.f32.mrb[165].mxu1  ;;  %v11551_v53 = vld [vmem:[%s11839_s1 + $0x110] sm:$0xff]  ;;  %v11558_v50 = vld [vmem:[%s11839_s1 + $0x118] sm:$0xff] }
 0x349   :  { %v3431_v30 = vmin.f32 %v3415_v55, 1.0  ;;  %v4449_v43 = vsub.f32 %v4385_v25, %v4433_v15  ;;  %v4387_v48 = vmul.f32 %v12396_v37, %v4324_v35  ;;  %v11572_v25 = vld [vmem:[%s11839_s1 + $0x128] sm:$0xff]  ;;  %v4440_v15 = vmul.f32 %v11288_v19, %v11288_v19 }
 0x34a   :  { %v3414_v41 = vmax.f32 %v3398_v20, 0.0  ;;  %v4466_v40 = vadd.f32 0.0001, %v4450_v28 }
 0x34b   :  { %3448 = vst [vmem:[#allocation3 + $0xf8] sm:$0xff] %v3431_v30  ;;  %v4436_v30 = vmul.f32 %v11265_v54, %v11265_v54  ;;  %v4465_v20 = vadd.f32 0.0001, %v4449_v43  ;;  %v4451_v28 = vsub.f32 %v4387_v48, %v4435_v22  ;;  %v11579_v43 = vld [vmem:[%s11839_s1 + $0x130] sm:$0xff] }
 0x34c   :  { %v3430_v33 = vmin.f32 %v3414_v41, 1.0  ;;  %7963 = vrcp.f32 %v4466_v40  ;;  %v11565_v41 = vld [vmem:[%s11839_s1 + $0x120] sm:$0xff] }
 0x34d   :  { %v4452_v37 = vsub.f32 %v4388_v4, %v4436_v30  ;;  %7965 = vrcp.f32 %v4465_v20  ;;  %v4438_v30 = vmul.f32 %v11276_v36, %v11276_v36  ;;  %v11589_v20 = vld [vmem:[%s11839_s1 + $0x138] sm:$0xff]  ;;  %v4467_v22 = vadd.f32 0.0001, %v4451_v28 }
 0x34e   :  { %3447 = vst [vmem:[#allocation3 + $0xf0] sm:$0xff] %v3430_v33  ;;  %v7075_v33 = vpop.f32.mrb[166].mxu1 }
 0x34f   :  { %v4468_v40 = vadd.f32 0.0001, %v4452_v37  ;;  %v4390_v4 = vmul.f32 %v12398_v44, %v7075_v33  ;;  %v4334_v35 = vpop.f32.mrb[167].mxu1  ;;  %v4437_v37 = vmul.f32 %v11284_v13, %v11284_v13  ;;  %v11599_v44 = vld [vmem:[%s11839_s1 + $0x148] sm:$0xff] }
 0x350   :  { %v4389_v14 = vmul.f32 %v12402_v16, %v4334_v35  ;;  %v7078_v48 = vpop.f32.mrb[168].mxu1  ;;  %v4439_v16 = vmul.f32 %v11297_v46, %v11297_v46  ;;  %v4442_v35 = vmul.f32 %v12434_v7, %v12434_v7 }
 0x351   :  { %7967 = vrcp.f32 %v4468_v40  ;;  %v4454_v38 = vsub.f32 %v4390_v4, %v4438_v30  ;;  %v7960_v23 = vpop.eup %7959  ;;  %v4392_v45 = vmul.f32 %v12403_v8, %v7078_v48  ;;  %v4344_v55 = vpop.f32.mrb[169].mxu1  ;;  %v11612_v40 = vmul.f32 %v11314_v63, %v11314_v63  ;;  %v12458_v30 = vld [vmem:[#allocation6_spill] sm:$0xff] }
 0x352   :  { %7969 = vrcp.f32 %v4467_v22  ;;  %v4453_v28 = vsub.f32 %v4389_v14, %v4437_v37  ;;  %v11616_v4 = vmul.f32 %v11322_v58, %v11322_v58  ;;  %v7962_v14 = vpop.eup %7961  ;;  %v12459_v22 = vld [vmem:[#allocation15_spill] sm:$0xff]  ;;  %v4391_v52 = vmul.f32 %v12408_v57, %v4344_v55  ;;  %v7081_v55 = vpop.f32.mrb[170].mxu1 }
 0x353   :  { %v4470_v60 = vadd.f32 0.0001, %v4454_v38  ;;  %v12460_v37 = vsub.f32 %v12458_v30, %v12459_v22  ;;  %v11624_v8 = vmul.f32 %v11326_v56, %v11326_v56  ;;  %v12461_v38 = vsub.f32 %v11343_v1, %v11352_v11 }
 0x354   :  { %v4469_v32 = vadd.f32 0.0001, %v4453_v28  ;;  %v4456_v9 = vsub.f32 %v4392_v45, %v4440_v15  ;;  %v11631_v58 = vmul.f32 %v11463_v47, %v11463_v47  ;;  %v4455_v57 = vsub.f32 %v4391_v52, %v4439_v16  ;;  %v4354_v45 = vpop.f32.mrb[171].mxu1  ;;  %v12462_v15 = vld [vmem:[#allocation16_spill] sm:$0xff] }
 0x355   :  { %v4482_v33 = vmul.f32 %v7960_v23, %v12460_v37  ;;  %v4480_v48 = vmul.f32 %v7962_v14, %v12461_v38  ;;  %7971 = vrcp.f32 %v4470_v60  ;;  %v4394_v11 = vmul.f32 %v12409_v2, %v7081_v55  ;;  %v12463_v38 = vld [vmem:[#allocation56_spill] sm:$0xff] }
 0x356   :  { %7973 = vrcp.f32 %v4469_v32  ;;  %v7964_v28 = vpop.eup %7963  ;;  %v4472_v1 = vadd.f32 0.0001, %v4456_v9  ;;  %v12464_v47 = vld [vmem:[#allocation44_spill] sm:$0xff]  ;;  %v11643_v52 = vmul.f32 %v10185_v17, %v4354_v45  ;;  %v12466_v32 = vld [vmem:[#allocation18_spill] sm:$0xff] }
 0x357   :  { %v4512_v30 = vmul.f32 %v4482_v33, %v12457_v42  ;;  %v4544_v23 = vmul.f32 %v11541_v49, %v4482_v33  ;;  %v4511_v22 = vmul.f32 %v4480_v48, %v11247_v51  ;;  %v4543_v37 = vmul.f32 %v11531_v27, %v4480_v48  ;;  %v7966_v60 = vpop.eup %7965 }
 0x358   :  { %v12465_v42 = vsub.f32 %v12463_v38, %v12464_v47  ;;  %v4471_v33 = vadd.f32 0.0001, %v4455_v57  ;;  %v12467_v51 = vsub.f32 %v11374_v26, %v11379_v31  ;;  %7975 = vrcp.f32 %v4472_v1  ;;  %v11651_v47 = vpop.f32.mrb[172].mxu1 }
 0x359   :  { %v4528_v14 = vsub.f32 %v12462_v15, %v4512_v30  ;;  %v4527_v16 = vsub.f32 %v12466_v32, %v4511_v22  ;;  %v4458_v2 = vsub.f32 %v4394_v11, %v4442_v35  ;;  %v11655_v15 = vpop.f32.mrb[173].mxu1  ;;  %v12468_v35 = vld [vmem:[#allocation22_spill] sm:$0xff]  ;;  %v4457_v1 = vsub.f32 %v11643_v52, %v11612_v40 }
 0x35a   :  { %v4486_v56 = vmul.f32 %v7964_v28, %v12465_v42  ;;  %v4484_v9 = vmul.f32 %v7966_v60, %v12467_v51  ;;  %7977 = vrcp.f32 %v4471_v33 }
 0x35b   :  { %v4560_v48 = vadd.f32 %v4544_v23, %v4528_v14  ;;  %v7968_v57 = vpop.eup %7967  ;;  %v4559_v28 = vadd.f32 %v4543_v37, %v4527_v16  ;;  %v4474_v45 = vadd.f32 0.0001, %v4458_v2  ;;  %v12470_v37 = vld [vmem:[#allocation24_spill] sm:$0xff]  ;;  %v11669_v16 = vpop.f32.mrb[174].mxu1 }
 0x35c   :  { %v4514_v55 = vmul.f32 %v4486_v56, %v11251_v12  ;;  %v4546_v30 = vmul.f32 %v11558_v50, %v4486_v56  ;;  %v4513_v17 = vmul.f32 %v4484_v9, %v11258_v21  ;;  %v4545_v22 = vmul.f32 %v11551_v53, %v4484_v9  ;;  %v7970_v26 = vpop.eup %7969  ;;  %v11673_v9 = vpop.f32.mrb[175].mxu1 }
 0x35d   :  { %v4576_v31 = vmax.f32 %v4560_v48, 0.0  ;;  %v12469_v12 = vsub.f32 %v11382_v5, %v11386_v18  ;;  %v4575_v11 = vmax.f32 %v4559_v28, 0.0  ;;  %v12471_v21 = vsub.f32 %v11389_v62, %v11400_v24  ;;  %v12472_v48 = vld [vmem:[#allocation26_spill] sm:$0xff] }
 0x35e   :  { %v4530_v23 = vsub.f32 %v12468_v35, %v4514_v55  ;;  %v4529_v60 = vsub.f32 %v12470_v37, %v4513_v17  ;;  %7979 = vrcp.f32 %v4474_v45  ;;  %v12475_v37 = vld [vmem:[#allocation30_spill] sm:$0xff] }
 0x35f   :  { %v4490_v56 = vmul.f32 %v7968_v57, %v12469_v12  ;;  %v4488_v14 = vmul.f32 %v7970_v26, %v12471_v21  ;;  %v4592_v38 = vmin.f32 %v4576_v31, 1.0  ;;  %v7972_v18 = vpop.eup %7971  ;;  %v4591_v5 = vmin.f32 %v4575_v11, 1.0 }
 0x360   :  { %v4562_v42 = vadd.f32 %v4546_v30, %v4530_v23  ;;  %v4561_v51 = vadd.f32 %v4545_v22, %v4529_v60  ;;  %v7974_v62 = vpop.eup %7973 }
 0x361   :  { %v4516_v33 = vmul.f32 %v4490_v56, %v11265_v54  ;;  %v4548_v32 = vmul.f32 %v11572_v25, %v4490_v56  ;;  %v4515_v40 = vmul.f32 %v4488_v14, %v11269_v59  ;;  %v4547_v52 = vmul.f32 %v11565_v41, %v4488_v14  ;;  %v12476_v14 = vld [vmem:[#allocation57_spill] sm:$0xff] }
 0x362   :  { %v4608_v24 = vmax.f32 %v4592_v38, 0.1  ;;  %v4578_v2 = vmax.f32 %v4562_v42, 0.0  ;;  %v12473_v54 = vsub.f32 %v11404_v29, %v11408_v34  ;;  %v4607_v57 = vmax.f32 %v4591_v5, 0.1  ;;  %v7976_v35 = vpop.eup %7975  ;;  %v12477_v38 = vld [vmem:[#allocation58_spill] sm:$0xff] }
 0x363   :  { %v4532_v55 = vsub.f32 %v12472_v48, %v4516_v33  ;;  %v4577_v28 = vmax.f32 %v4561_v51, 0.0  ;;  %v4531_v17 = vsub.f32 %v12228_v0, %v4515_v40  ;;  %v12474_v59 = vsub.f32 %v11413_v10, %v11417_v39  ;;  %v12480_v48 = vld [vmem:[#allocation38_spill] sm:$0xff] }
 0x364   :  { %v4494_v30 = vmul.f32 %v7972_v18, %v12473_v54  ;;  %7981 = vrcp.f32 %v4608_v24  ;;  %v4594_v45 = vmin.f32 %v4578_v2, 1.0  ;;  %v7978_v34 = vpop.eup %7977  ;;  %v12479_v18 = vld [vmem:[#allocation32_spill] sm:$0xff] }
 0x365   :  { %v4492_v22 = vmul.f32 %v7974_v62, %v12474_v59  ;;  %v4564_v26 = vadd.f32 %v4548_v32, %v4532_v55  ;;  %7983 = vrcp.f32 %v4607_v57  ;;  %v4593_v23 = vmin.f32 %v4577_v28, 1.0  ;;  %v12482_v57 = vld [vmem:[#allocation35_spill] sm:$0xff]  ;;  %v12484_v59 = vld [vmem:[#allocation34_spill] sm:$0xff] }
 0x366   :  { %v4518_v31 = vmul.f32 %v4494_v30, %v11276_v36  ;;  %v4563_v12 = vadd.f32 %v4547_v52, %v4531_v17  ;;  %v4550_v29 = vmul.f32 %v11589_v20, %v4494_v30  ;;  %v4610_v56 = vmax.f32 %v4594_v45, 0.1  ;;  %v12483_v17 = vld [vmem:[#allocation12_spill] sm:$0xff] }
 0x367   :  { %v4580_v11 = vmax.f32 %v4564_v26, 0.0  ;;  %v4517_v60 = vmul.f32 %v4492_v22, %v11284_v13  ;;  %v4609_v10 = vmax.f32 %v4593_v23, 0.1  ;;  %v4549_v21 = vmul.f32 %v11579_v43, %v4492_v22 }
 0x368   :  { %v4534_v0 = vsub.f32 %v12475_v37, %v4518_v31  ;;  %v4579_v39 = vmax.f32 %v4563_v12, 0.0  ;;  %v12478_v36 = vsub.f32 %v12476_v14, %v12477_v38  ;;  %7985 = vrcp.f32 %v4610_v56  ;;  %v7980_v51 = vpop.eup %7979  ;;  %v12488_v14 = vld [vmem:[#allocation41_spill] sm:$0xff] }
 0x369   :  { %v4596_v33 = vmin.f32 %v4580_v11, 1.0  ;;  %v4533_v5 = vsub.f32 %v12479_v18, %v4517_v60  ;;  %7987 = vrcp.f32 %v4609_v10  ;;  %v12481_v55 = vsub.f32 %v11431_v6, %v12480_v48  ;;  %v11705_v6 = vld [vmem:[%s11839_s1 + $0x140] sm:$0xff] }
 0x36a   :  { %v4498_v42 = vmul.f32 %v7976_v35, %v12478_v36  ;;  %v4566_v32 = vadd.f32 %v4550_v29, %v4534_v0  ;;  %v4595_v40 = vmin.f32 %v4579_v39, 1.0  ;;  %v12485_v22 = vsub.f32 %v12483_v17, %v12484_v59 }
 0x36b   :  { %v4612_v62 = vmax.f32 %v4596_v33, 0.1  ;;  %v4565_v2 = vadd.f32 %v4549_v21, %v4533_v5  ;;  %v4496_v54 = vmul.f32 %v7978_v34, %v12481_v55  ;;  %v4473_v26 = vadd.f32 0.0001, %v4457_v1  ;;  %v12486_v1 = vld [vmem:[#allocation37_spill] sm:$0xff] }
 0x36c   :  { %v4520_v52 = vmul.f32 %v4498_v42, %v11288_v19  ;;  %v4552_v13 = vmul.f32 %v11599_v44, %v4498_v42  ;;  %v4582_v24 = vmax.f32 %v4566_v32, 0.0  ;;  %v4611_v30 = vmax.f32 %v4595_v40, 0.1 }
 0x36d   :  { %v4502_v45 = vmul.f32 %v7980_v51, %v12485_v22  ;;  %7989 = vrcp.f32 %v4612_v62  ;;  %v4581_v19 = vmax.f32 %v4565_v2, 0.0  ;;  %v4519_v35 = vmul.f32 %v4496_v54, %v11297_v46  ;;  %v11713_v46 = vld [vmem:[%s11839_s1 + $0x158] sm:$0xff]  ;;  %v12490_v51 = vld [vmem:[#allocation42_spill] sm:$0xff] }
 0x36e   :  { %v4536_v28 = vsub.f32 %v12482_v57, %v4520_v52  ;;  %v4598_v31 = vmin.f32 %v4582_v24, 1.0  ;;  %7991 = vrcp.f32 %v4611_v30  ;;  %v4551_v12 = vmul.f32 %v11705_v6, %v4496_v54  ;;  %v7982_v34 = vpop.eup %7981 }
 0x36f   :  { %v4522_v29 = vmul.f32 %v4502_v45, %v12434_v7  ;;  %v4597_v11 = vmin.f32 %v4581_v19, 1.0  ;;  %v4535_v37 = vsub.f32 %v12486_v1, %v4519_v35  ;;  %v4554_v0 = vmul.f32 %v11713_v46, %v4502_v45  ;;  %v7984_v60 = vpop.eup %7983 }
 0x370   :  { %v4568_v23 = vadd.f32 %v4552_v13, %v4536_v28  ;;  %v4614_v56 = vmax.f32 %v4598_v31, 0.1  ;;  %v12487_v10 = vsub.f32 %v11541_v49, %v12243_v61  ;;  %7993 = vrcp.f32 %v4473_v26 }
 0x371   :  { %v4538_v7 = vsub.f32 %v12488_v14, %v4522_v29  ;;  %v12489_v38 = vsub.f32 %v11531_v27, %v12243_v61  ;;  %v4613_v42 = vmax.f32 %v4597_v11, 0.1  ;;  %v4567_v33 = vadd.f32 %v4551_v12, %v4535_v37  ;;  %v12495_v11 = vld [vmem:[#allocation52_spill] sm:$0xff]  ;;  %v12497_v14 = vld [vmem:[#allocation17_spill] sm:$0xff] }
 0x372   :  { %v4642_v39 = vmul.f32 %v7982_v34, %v12487_v10  ;;  %v4584_v21 = vmax.f32 %v4568_v23, 0.0  ;;  %7995 = vrcp.f32 %v4614_v56  ;;  %v4396_v40 = vmul.f32 %v12490_v51, %v11651_v47  ;;  %v7986_v49 = vpop.eup %7985 }
 0x373   :  { %v4640_v36 = vmul.f32 %v7984_v60, %v12489_v38  ;;  %v4570_v5 = vadd.f32 %v4554_v0, %v4538_v7  ;;  %7997 = vrcp.f32 %v4613_v42  ;;  %v4583_v13 = vmax.f32 %v4567_v33, 0.0  ;;  %v7988_v27 = vpop.eup %7987 }
 0x374   :  { %v4672_v32 = vadd.f32 %v4642_v39, %v12243_v61  ;;  %v4600_v18 = vmin.f32 %v4584_v21, 1.0  ;;  %v4395_v62 = vmul.f32 %v12369_v3, %v11655_v15  ;;  %v12491_v2 = vsub.f32 %v11558_v50, %v12243_v61  ;;  %v12496_v21 = vld [vmem:[#allocation14_spill] sm:$0xff] }
 0x375   :  { %v4671_v52 = vadd.f32 %v4640_v36, %v12243_v61  ;;  %v4586_v54 = vmax.f32 %v4570_v5, 0.0  ;;  %v12492_v47 = vsub.f32 %v11551_v53, %v12243_v61  ;;  %v4599_v28 = vmin.f32 %v4583_v13, 1.0  ;;  %v12500_v5 = vld [vmem:[#allocation54_spill] sm:$0xff] }
 0x376   :  { %v4688_v24 = vmax.f32 %v4672_v32, 0.0  ;;  %v4646_v48 = vmul.f32 %v7986_v49, %v12491_v2  ;;  %v4616_v55 = vmax.f32 %v4600_v18, 0.1  ;;  %v4460_v17 = vsub.f32 %v4396_v40, %v11616_v4  ;;  %v12501_v40 = vld [vmem:[#allocation27_spill] sm:$0xff] }
 0x377   :  { %v4687_v30 = vmax.f32 %v4671_v52, 0.0  ;;  %v4644_v57 = vmul.f32 %v7988_v27, %v12492_v47  ;;  %v4602_v3 = vmin.f32 %v4586_v54, 1.0  ;;  %v7990_v15 = vpop.eup %7989  ;;  %v4615_v26 = vmax.f32 %v4599_v28, 0.1 }
 0x378   :  { %v4704_v59 = vmin.f32 %v4688_v24, 1.0  ;;  %v4674_v22 = vadd.f32 %v4646_v48, %v12243_v61  ;;  %7999 = vrcp.f32 %v4616_v55  ;;  %v4476_v31 = vadd.f32 0.0001, %v4460_v17  ;;  %v7992_v19 = vpop.eup %7991  ;;  %v12503_v24 = vld [vmem:[#allocation43_spill] sm:$0xff] }
 0x379   :  { %v4703_v45 = vmin.f32 %v4687_v30, 1.0  ;;  %v4673_v50 = vadd.f32 %v4644_v57, %v12243_v61  ;;  %v12493_v53 = vsub.f32 %v11572_v25, %v12243_v61  ;;  %v4618_v12 = vmax.f32 %v4602_v3, 0.1 }
 0x37a   :  { %4721 = vst [vmem:[#allocation3 + $0x108] sm:$0xff] %v4704_v59  ;;  %v4690_v35 = vmax.f32 %v4674_v22, 0.0  ;;  %v4459_v4 = vsub.f32 %v4395_v62, %v11624_v8  ;;  %v12494_v34 = vsub.f32 %v11565_v41, %v12243_v61  ;;  %8001 = vrcp.f32 %v4615_v26  ;;  %v7994_v37 = vpop.eup %7993 }
 0x37b   :  { %v4650_v23 = vmul.f32 %v7990_v15, %v12493_v53  ;;  %4720 = vst [vmem:[#allocation3 + $0x100] sm:$0xff] %v4703_v45  ;;  %v4689_v29 = vmax.f32 %v4673_v50, 0.0  ;;  %v4398_v1 = vmul.f32 %v12495_v11, %v11669_v16  ;;  %8003 = vrcp.f32 %v4618_v12  ;;  %v12505_v12 = vld [vmem:[#allocation23_spill] sm:$0xff] }
 0x37c   :  { %v4648_v56 = vmul.f32 %v7992_v19, %v12494_v34  ;;  %v4706_v0 = vmin.f32 %v4690_v35, 1.0  ;;  %v4475_v25 = vadd.f32 0.0001, %v4459_v4  ;;  %v7996_v10 = vpop.eup %7995  ;;  %v12498_v7 = vsub.f32 %v12496_v21, %v12497_v14  ;;  %v12506_v4 = vld [vmem:[#allocation25_spill] sm:$0xff]  ;;  %v12512_v14 = vld [vmem:[#allocation39_spill] sm:$0xff] }
 0x37d   :  { %v4676_v60 = vadd.f32 %v4650_v23, %v12243_v61  ;;  %v4705_v39 = vmin.f32 %v4689_v29, 1.0  ;;  %8005 = vrcp.f32 %v4476_v31  ;;  %v12499_v16 = vsub.f32 %v11589_v20, %v12243_v61  ;;  %v7998_v33 = vpop.eup %7997 }
 0x37e   :  { %v4675_v8 = vadd.f32 %v4648_v56, %v12243_v61  ;;  %v4500_v38 = vmul.f32 %v7994_v37, %v12498_v7  ;;  %4723 = vst [vmem:[#allocation3 + $0x118] sm:$0xff] %v4706_v0  ;;  %8007 = vrcp.f32 %v4475_v25  ;;  %v4462_v42 = vsub.f32 %v4398_v1, %v11631_v58  ;;  %v12508_v37 = vld [vmem:[#allocation45_spill] sm:$0xff]  ;;  %v12509_v0 = vld [vmem:[#allocation48_spill] sm:$0xff] }
 0x37f   :  { %v4692_v41 = vmax.f32 %v4676_v60, 0.0  ;;  %v4654_v36 = vmul.f32 %v7996_v10, %v12499_v16  ;;  %4722 = vst [vmem:[#allocation3 + $0x110] sm:$0xff] %v4705_v39  ;;  %v4397_v51 = vmul.f32 %v12500_v5, %v11673_v9  ;;  %v4445_v49 = vmul.f32 %v12501_v40, %v12501_v40  ;;  %v12511_v39 = vld [vmem:[#allocation50_spill] sm:$0xff]  ;;  %v12513_v16 = vld [vmem:[#allocation51_spill] sm:$0xff] }
 0x380   :  { %v4691_v32 = vmax.f32 %v4675_v8, 0.0  ;;  %v4521_v18 = vmul.f32 %v4500_v38, %v11314_v63  ;;  %v12502_v20 = vsub.f32 %v11579_v43, %v12243_v61  ;;  %v4478_v27 = vadd.f32 0.0001, %v4462_v42  ;;  %v11769_v63 = vld [vmem:[%s11839_s1 + $0x150] sm:$0xff]  ;;  %v8067_v42 = vld [vmem:[%s11839_s1 + $0x168] sm:$0xff] }
 0x381   :  { %v4708_v52 = vmin.f32 %v4692_v41, 1.0  ;;  %v4678_v13 = vadd.f32 %v4654_v36, %v12243_v61  ;;  %v4553_v9 = vmul.f32 %v11769_v63, %v4500_v38  ;;  %v4461_v48 = vsub.f32 %v4397_v51, %v4445_v49  ;;  %v8068_v51 = vld [vmem:[%s11839_s1 + $0x160] sm:$0xff] }
 0x382   :  { %v4652_v62 = vmul.f32 %v7998_v33, %v12502_v20  ;;  %v4707_v58 = vmin.f32 %v4691_v32, 1.0  ;;  %v4537_v2 = vsub.f32 %v12503_v24, %v4521_v18  ;;  %v8000_v55 = vpop.eup %7999  ;;  %v4631_v54 = vsub.f32 %v11705_v6, %v12243_v61  ;;  %v12514_v18 = vld [vmem:[#allocation53_spill] sm:$0xff] }
 0x383   :  { %4725 = vst [vmem:[#allocation3 + $0x128] sm:$0xff] %v4708_v52  ;;  %v4694_v30 = vmax.f32 %v4678_v13, 0.0  ;;  %8009 = vrcp.f32 %v4478_v27  ;;  %v4634_v47 = vsub.f32 %v11713_v46, %v12243_v61  ;;  %v12504_v57 = vsub.f32 %v11599_v44, %v12243_v61  ;;  %v12515_v52 = vld [vmem:[#allocation29_spill] sm:$0xff]  ;;  %v12516_v13 = vld [vmem:[#allocation31_spill] sm:$0xff] }
 0x384   :  { %v4677_v43 = vadd.f32 %v4652_v62, %v12243_v61  ;;  %4724 = vst [vmem:[#allocation3 + $0x120] sm:$0xff] %v4707_v58  ;;  %v4569_v17 = vadd.f32 %v4553_v9, %v4537_v2  ;;  %v4477_v59 = vadd.f32 0.0001, %v4461_v48  ;;  %v8002_v15 = vpop.eup %8001  ;;  %v12507_v29 = vsub.f32 %v12505_v12, %v12506_v4  ;;  %v12518_v2 = vld [vmem:[#allocation19_spill] sm:$0xff] }
 0x385   :  { %v4658_v28 = vmul.f32 %v8000_v55, %v12504_v57  ;;  %v4710_v22 = vmin.f32 %v4694_v30, 1.0  ;;  %v8004_v50 = vpop.eup %8003  ;;  %v4656_v31 = vmul.f32 %v8002_v15, %v4631_v54  ;;  %v12510_v60 = vsub.f32 %v12508_v37, %v12509_v0  ;;  %v12519_v55 = vld [vmem:[#allocation60_spill] sm:$0xff]  ;;  %v12520_v54 = vld [vmem:[#allocation55_spill] sm:$0xff] }
 0x386   :  { %v4693_v3 = vmax.f32 %v4677_v43, 0.0  ;;  %v4585_v45 = vmax.f32 %v4569_v17, 0.0  ;;  %8011 = vrcp.f32 %v4477_v59  ;;  %v4662_v35 = vmul.f32 %v8004_v50, %v4634_v47  ;;  %v12522_v57 = vld [vmem:[#allocation8_spill] sm:$0xff]  ;;  %v8069_v17 = vld [vmem:[%s11839_s1 + $0x178] sm:$0xff] }
 0x387   :  { %v4680_v6 = vadd.f32 %v4658_v28, %v12243_v61  ;;  %4727 = vst [vmem:[#allocation3 + $0x138] sm:$0xff] %v4710_v22  ;;  %v8006_v19 = vpop.eup %8005  ;;  %v4679_v44 = vadd.f32 %v4656_v31, %v12243_v61  ;;  %v12517_v20 = vsub.f32 %v12515_v52, %v12516_v13  ;;  %v12521_v30 = vsub.f32 %v12519_v55, %v12520_v54 }
 0x388   :  { %v4709_v26 = vmin.f32 %v4693_v3, 1.0  ;;  %v4601_v53 = vmin.f32 %v4585_v45, 1.0  ;;  %v8008_v23 = vpop.eup %8007  ;;  %v4506_v34 = vmul.f32 %v8006_v19, %v12507_v29  ;;  %v4682_v11 = vadd.f32 %v4662_v35, %v12243_v61  ;;  %v8070_v19 = vld [vmem:[%s11839_s1 + $0x170] sm:$0xff]  ;;  %s8097_s1 = smov [#allocation3]  }
 0x389   :  { %v4696_v46 = vmax.f32 %v4680_v6, 0.0  ;;  %v4504_v25 = vmul.f32 %v8008_v23, %v12510_v60  ;;  %v4695_v10 = vmax.f32 %v4679_v44, 0.0  ;;  %v4633_v22 = vsub.f32 %v11769_v63, %v12243_v61  ;;  %s4741_s7 = sshll.u32 %s8097_s1, 4  ;;  %s4742_s7 = int_to_ptr.vmem [resolvable:$true] %s4741_s7 }
 0x38a   :  { %4726 = vst [vmem:[#allocation3 + $0x130] sm:$0xff] %v4709_v26  ;;  %v4617_v1 = vmax.f32 %v4601_v53, 0.1  ;;  %v4524_v8 = vmul.f32 %v4506_v34, %v12511_v39  ;;  %v4698_v21 = vmax.f32 %v4682_v11, 0.0  ;;  %v4556_v33 = vmul.f32 %v8067_v42, %v4506_v34  ;;  %v12523_v26 = vld [vmem:[#allocation11_spill] sm:$0xff]  ;;  %s8071_s8 = scalar_lea.vmem %s4742_s7, 6144  ;;  %p8076_p1 = scmp.lt.s32.totalorder %s4742_s7, %s4742_s7 }
 0x38b   :  { %v4712_v56 = vmin.f32 %v4696_v46, 1.0  ;;  %v4523_v7 = vmul.f32 %v4504_v25, %v12512_v14  ;;  %v4711_v41 = vmin.f32 %v4695_v10, 1.0  ;;  %v4555_v49 = vmul.f32 %v8068_v51, %v4504_v25  ;;  %p8072_p0 = scmp.ne.s32.totalorder %s4742_s7, %s8071_s8  ;;  %p8077_p2 = scmp.lt.s32.totalorder %s8071_s8, %s8071_s8 }
 0x38c   :  { %8013 = vrcp.f32 %v4617_v1  ;;  %v4540_v36 = vsub.f32 %v12513_v16, %v4524_v8  ;;  %v4714_v32 = vmin.f32 %v4698_v21, 1.0  ;;  %v4636_v37 = vsub.f32 %v8067_v42, %v12243_v61 }
 0x38d   :  { %4729 = vst [vmem:[#allocation3 + $0x148] sm:$0xff] %v4712_v56  ;;  %v8010_v38 = vpop.eup %8009  ;;  %v4539_v5 = vsub.f32 %v12514_v18, %v4523_v7  ;;  %4728 = vst [vmem:[#allocation3 + $0x140] sm:$0xff] %v4711_v41  ;;  %v4635_v0 = vsub.f32 %v8068_v51, %v12243_v61  ;;  %v4638_v39 = vsub.f32 %v8069_v17, %v12243_v61  ;;  %p8078_p3 = por %p8077_p2, %p8076_p1 }
 0x38e   :  { %v4510_v62 = vmul.f32 %v8010_v38, %v12517_v20  ;;  %v4572_v27 = vadd.f32 %v4556_v33, %v4540_v36  ;;  %4731 = vst [vmem:[#allocation3 + $0x158] sm:$0xff] %v4714_v32  ;;  %v4637_v38 = vsub.f32 %v8070_v19, %v12243_v61 }
 0x38f   :  { %v4571_v24 = vadd.f32 %v4555_v49, %v4539_v5  ;;  %p8079_p4 = pnand %p8078_p3, %p8072_p0 }
 0x390   :  { %v8012_v58 = vpop.eup %8011  ;;  %v4526_v9 = vmul.f32 %v4510_v62, %v12518_v2  ;;  %v4588_v48 = vmax.f32 %v4572_v27, 0.0  ;;  %v4558_v59 = vmul.f32 %v8069_v17, %v4510_v62 }
 0x391   :  { %v4508_v43 = vmul.f32 %v8012_v58, %v12521_v30  ;;  %v4587_v47 = vmax.f32 %v4571_v24, 0.0 }
 0x392   :  { %v4542_v28 = vsub.f32 %v12522_v57, %v4526_v9  ;;  %v4604_v3 = vmin.f32 %v4588_v48, 1.0 }
 0x393   :  { %v4525_v15 = vmul.f32 %v4508_v43, %v12501_v40  ;;  %v4603_v6 = vmin.f32 %v4587_v47, 1.0  ;;  %v4557_v46 = vmul.f32 %v8070_v19, %v4508_v43 }
 0x394   :  { %v4574_v45 = vadd.f32 %v4558_v59, %v4542_v28  ;;  %v4620_v50 = vmax.f32 %v4604_v3, 0.1 }
 0x395   :  { %v4541_v31 = vsub.f32 %v12523_v26, %v4525_v15  ;;  %v4619_v53 = vmax.f32 %v4603_v6, 0.1 }
 0x396   :  { %v8014_v35 = vpop.eup %8013  ;;  %v4590_v23 = vmax.f32 %v4574_v45, 0.0  ;;  %8015 = vrcp.f32 %v4620_v50 }
 0x397   :  { %v4660_v44 = vmul.f32 %v8014_v35, %v4633_v22  ;;  %v4573_v12 = vadd.f32 %v4557_v46, %v4541_v31  ;;  %8017 = vrcp.f32 %v4619_v53 }
 0x398   :  { %v4606_v63 = vmin.f32 %v4590_v23, 1.0 }
 0x399   :  { %v4681_v40 = vadd.f32 %v4660_v44, %v12243_v61  ;;  %v4589_v4 = vmax.f32 %v4573_v12, 0.0 }
 0x39a   :  { %v4622_v29 = vmax.f32 %v4606_v63, 0.1 }
 0x39b   :  { %v4697_v34 = vmax.f32 %v4681_v40, 0.0  ;;  %v4605_v56 = vmin.f32 %v4589_v4, 1.0 }
 0x39c   :  { %8019 = vrcp.f32 %v4622_v29 }
 0x39d   :  { %v4713_v11 = vmin.f32 %v4697_v34, 1.0  ;;  %v4621_v1 = vmax.f32 %v4605_v56, 0.1 }
 0x39f   :  { %4730 = vst [vmem:[#allocation3 + $0x150] sm:$0xff] %v4713_v11  ;;  %8021 = vrcp.f32 %v4621_v1 }
 0x3a0   :  { %v8016_v60 = vpop.eup %8015 }
 0x3a1   :  { %v8018_v25 = vpop.eup %8017  ;;  %v4666_v10 = vmul.f32 %v8016_v60, %v4636_v37 }
 0x3a2   :  { %v4664_v8 = vmul.f32 %v8018_v25, %v4635_v0 }
 0x3a3   :  { %v4684_v21 = vadd.f32 %v4666_v10, %v12243_v61 }
 0x3a4   :  { %v4683_v14 = vadd.f32 %v4664_v8, %v12243_v61 }
 0x3a5   :  { %v4700_v41 = vmax.f32 %v4684_v21, 0.0 }
 0x3a6   :  { %v8020_v7 = vpop.eup %8019  ;;  %v4699_v16 = vmax.f32 %v4683_v14, 0.0 }
 0x3a7   :  { %v4670_v36 = vmul.f32 %v8020_v7, %v4638_v39  ;;  %v4716_v42 = vmin.f32 %v4700_v41, 1.0 }
 0x3a8   :  { %v4715_v32 = vmin.f32 %v4699_v16, 1.0 }
 0x3a9   :  { %v8022_v33 = vpop.eup %8021  ;;  %v4686_v18 = vadd.f32 %v4670_v36, %v12243_v61  ;;  %4733 = vst [vmem:[#allocation3 + $0x168] sm:$0xff] %v4716_v42 }
 0x3aa   :  { %v4668_v5 = vmul.f32 %v8022_v33, %v4637_v38  ;;  %4732 = vst [vmem:[#allocation3 + $0x160] sm:$0xff] %v4715_v32 }
 0x3ab   :  { %v4702_v51 = vmax.f32 %v4686_v18, 0.0 }
 0x3ac   :  { %v4685_v49 = vadd.f32 %v4668_v5, %v12243_v61 }
 0x3ad   :  { %v4718_v52 = vmin.f32 %v4702_v51, 1.0 }
 0x3ae   :  { %v4701_v13 = vmax.f32 %v4685_v49, 0.0 }
 0x3af   :  { %4735 = vst [vmem:[#allocation3 + $0x178] sm:$0xff] %v4718_v52 }
 0x3b0   :  { %v4717_v20 = vmin.f32 %v4701_v13, 1.0 }
 0x3b2   :  { %4734 = vst [vmem:[#allocation3 + $0x170] sm:$0xff] %v4717_v20 }
 0x3b3   :  { %8082 = shalt.err (!%p8079_p4)
}
 0x3b4   :  { %s8083_s11 = scalar_lea.hbm %s11841_s3, 6144 }
 0x3b5   :  { %p8084_p5 = scmp.ne.s32.totalorder %s11841_s3, %s8083_s11  ;;  %p8087_p6 = scmp.lt.u32.totalorder %s8083_s11, %s11841_s3 }
 0x3b7   :  { %p8089_p7 = pnand %p8087_p6, %p8084_p5 }
 0x3b9   :  { %8092 = shalt.err (!%p8089_p7)
}
 0x3ba   :  { %s8098_s15 = smov 128   ;;  %s8099_s16 = smov 8  }
 0x3bb   :  { %4747 = dma.vmem_to_hbm [thread:$0]  %s4742_s7, 6144, %s11841_s3, [#allocation4], %s8098_s15, %s8098_s15, %s8099_s16  }
 0x3bc   :  { %8093 = dma.done.wait [#allocation4], 6144  }
 0x3bd   :  { %8094 = vsyncadd [#allocation4], 4294961152 }
 0x3be   :  { %4751 = vsyncpa [#allocation4], 1 }

</bundles_post_ra>
